<compile_context>
chip_gen: v7x
topology: tpu7x:2x2x1
jax: 0.10.0
libtpu: 0.0.40
codegen_flags: <defaults>
</compile_context>

<pallas_src>
import functools
import math

import jax
import jax.numpy as jnp
from jax.experimental import pallas as pl
from jax.experimental.pallas import tpu as pltpu

# ----------------------------- model hyper-parameters -----------------------------
DX = 2            # input (location) dim
DY = 1            # observation dim
DZ = 32           # token embedding dim
NUM_HEADS = 4
HEAD_DIM = 8
INNER = NUM_HEADS * HEAD_DIM
PHI_HIDDEN = 16   # hidden dim of the pairwise-difference MLP
FF_DIM = 64
NUM_LAYERS = 2

# One precision setting shared by the Pallas kernels AND the reference, so both paths run
# full-f32 contract precision on the MXU and agree to float32 rounding.
_HI = jax.lax.Precision.HIGHEST


# ================================ shared math helpers ==============================
def _ln(x, g, b):
    mu = jnp.mean(x, axis=-1, keepdims=True)
    var = jnp.mean((x - mu) ** 2, axis=-1, keepdims=True)
    return (x - mu) * jax.lax.rsqrt(var + 1e-5) * g + b


def _small_k_proj(x, w_ref):
    """x @ w for a tiny static contraction dim: VPU broadcast multiply-adds, no MXU matmul."""
    k = x.shape[-1]
    acc = x[:, 0:1] * w_ref[0:1, :]
    for d in range(1, k):
        acc = acc + x[:, d:d + 1] * w_ref[d:d + 1, :]
    return acc


# ================================ Pallas kernels ==================================
def _mlp2_kernel(y_ref, w1_ref, b1_ref, w2_ref, b2_ref, o_ref):
    """2-layer MLP (Linear -> ReLU -> Linear) on a row tile.  First layer has K = dy+1 = 2."""
    h = _small_k_proj(y_ref[...], w1_ref) + b1_ref[...]
    h = jnp.maximum(h, 0.0)
    z = jnp.dot(h, w2_ref[...], precision=_HI, preferred_element_type=jnp.float32) + b2_ref[...]
    o_ref[...] = z.astype(o_ref.dtype)


def _pick_row_tile(rows, target=512):
    """Largest row tile <= target that is a multiple of 8 and divides rows (else full)."""
    if rows <= target or rows % 8 != 0:
        return rows
    best = rows
    for t in range(8, target + 1, 8):
        if rows % t == 0:
            best = t
    return best


def y_encoder_pallas(p, y):
    """y: (R, dy+1) -> (R, DZ); one call for all (context + target) tokens."""
    R, din = y.shape
    dz = p["w2"].shape[1]
    tile = _pick_row_tile(R)
    grid = (R // tile,)
    return pl.pallas_call(
        _mlp2_kernel,
        out_shape=jax.ShapeDtypeStruct((R, dz), jnp.float32),
        grid=grid,
        in_specs=[
            pl.BlockSpec((tile, din), lambda i: (i, 0)),
            pl.BlockSpec(p["w1"].shape, lambda i: (0, 0)),
            pl.BlockSpec(p["b1"].shape, lambda i: (0, 0)),
            pl.BlockSpec(p["w2"].shape, lambda i: (0, 0)),
            pl.BlockSpec(p["b2"].shape, lambda i: (0, 0)),
        ],
        out_specs=pl.BlockSpec((tile, dz), lambda i: (i, 0)),
        compiler_params=pltpu.CompilerParams(dimension_semantics=("parallel",)),
    )(y, p["w1"], p["b1"], p["w2"], p["b2"])


def _te_block_kernel(zq_ref, zkv_ref, xq_ref, xkv_ref,
                     ln1_g_ref, ln1_b_ref, wq_ref, bq_ref, wkv_ref, bkv_ref,
                     pw1_ref, pb1_ref, pw2_ref, pb2_ref,
                     wo_ref, bo_ref, ln2_g_ref, ln2_b_ref,
                     ffw1_ref, ffb1_ref, ffw2_ref, ffb2_ref,
                     o_ref, *, num_heads, head_dim, scale, self_attn):
    """One pre-norm TE attention layer for a single batch element, fully fused."""
    inner = num_heads * head_dim
    zq = zq_ref[0]                                   # (nq, dz)  residual stream (query side)
    nq = zq.shape[0]

    # --- pre-norm + fused projections (lane-dense (n, H*hd) layout) ---
    zn = _ln(zq, ln1_g_ref[...], ln1_b_ref[...])
    kv_src = zn if self_attn else zkv_ref[0]         # MHSA: kv from normed z; MHCA: raw context
    nk = kv_src.shape[0]
    q = jnp.dot(zn, wq_ref[...], precision=_HI,
                preferred_element_type=jnp.float32) + bq_ref[...]            # (nq, inner)
    kv = jnp.dot(kv_src, wkv_ref[...], precision=_HI,
                 preferred_element_type=jnp.float32) + bkv_ref[...]          # (nk, 2*inner)
    k = kv[:, :inner]
    v = kv[:, inner:]

    # --- translation-equivariant bias: phi(x_q - x_k) = relu(a_q - b_k + b1) @ W2 + b2 ---
    xq = xq_ref[0]                                   # (nq, dx)
    xk = xkv_ref[0]                                  # (nk, dx)
    a = _small_k_proj(xq, pw1_ref)                   # (nq, ph)  VPU broadcast mul-adds (dx=2)
    b = _small_k_proj(xk, pw1_ref)                   # (nk, ph)
    pb1 = pb1_ref[...]                               # (1, ph)
    h1 = jnp.maximum(a[:, None, :] - b[None, :, :] + pb1[None, :, :], 0.0)   # (nq, nk, ph)
    ph = h1.shape[-1]
    te_flat = jnp.dot(h1.reshape(nq * nk, ph), pw2_ref[...], precision=_HI,
                      preferred_element_type=jnp.float32) + pb2_ref[...]     # (nq*nk, H)
    te = te_flat.reshape(nq, nk, num_heads)

    # --- attention (static unrolled head loop; single lane-dense output slab) ---
    outs = []
    for h in range(num_heads):
        sl = slice(h * head_dim, (h + 1) * head_dim)
        qh, kh, vh = q[:, sl], k[:, sl], v[:, sl]
        dots = jax.lax.dot_general(qh, kh, (((1,), (1,)), ((), ())),
                                   precision=_HI,
                                   preferred_element_type=jnp.float32) * scale
        dots = dots + te[:, :, h]
        dots = dots - jnp.max(dots, axis=-1, keepdims=True)
        e = jnp.exp(dots)
        attn = e / jnp.sum(e, axis=-1, keepdims=True)                        # exact softmax
        outs.append(jnp.dot(attn, vh, precision=_HI,
                            preferred_element_type=jnp.float32))             # (nq, hd)
    o_attn = jnp.concatenate(outs, axis=-1)                                  # (nq, inner)

    # --- output projection + residual + FF block, all in VMEM ---
    z1 = zq + jnp.dot(o_attn, wo_ref[...], precision=_HI,
                      preferred_element_type=jnp.float32) + bo_ref[...]
    zn2 = _ln(z1, ln2_g_ref[...], ln2_b_ref[...])
    hmid = jnp.dot(zn2, ffw1_ref[...], precision=_HI,
                   preferred_element_type=jnp.float32) + ffb1_ref[...]
    hmid = jnp.maximum(hmid, 0.0)
    ff = jnp.dot(hmid, ffw2_ref[...], precision=_HI,
                 preferred_element_type=jnp.float32) + ffb2_ref[...]
    o_ref[0] = (z1 + ff).astype(o_ref.dtype)


def te_block_pallas(p, zq, zkv, xq, xkv, *, self_attn):
    """Fused pre-norm TE attention layer.  MHSA: zkv/xkv == zq/xq.  Grid over batch m."""
    m, nq, dz = zq.shape
    nk = zkv.shape[1]
    dx = xq.shape[-1]
    scale = 1.0 / math.sqrt(HEAD_DIM)

    def bcast(arr):
        return pl.BlockSpec(arr.shape, lambda i: (0, 0))

    weights = (p["ln1_g"], p["ln1_b"], p["wq"], p["bq"], p["wkv"], p["bkv"],
               p["phi_w1"], p["phi_b1"], p["phi_w2"], p["phi_b2"],
               p["wo"], p["bo"], p["ln2_g"], p["ln2_b"],
               p["ff_w1"], p["ff_b1"], p["ff_w2"], p["ff_b2"])

    in_specs = [
        pl.BlockSpec((1, nq, dz), lambda i: (i, 0, 0)),
        pl.BlockSpec((1, nk, dz), lambda i: (i, 0, 0)),
        pl.BlockSpec((1, nq, dx), lambda i: (i, 0, 0)),
        pl.BlockSpec((1, nk, dx), lambda i: (i, 0, 0)),
    ] + [bcast(w) for w in weights]

    return pl.pallas_call(
        functools.partial(_te_block_kernel, num_heads=NUM_HEADS, head_dim=HEAD_DIM,
                          scale=scale, self_attn=self_attn),
        out_shape=jax.ShapeDtypeStruct((m, nq, dz), jnp.float32),
        grid=(m,),
        in_specs=in_specs,
        out_specs=pl.BlockSpec((1, nq, dz), lambda i: (i, 0, 0)),
        compiler_params=pltpu.CompilerParams(dimension_semantics=("parallel",)),
    )(zq, zkv, xq, xkv, *weights)


# ================================ model forward ===================================
def preprocess_observations(xt, yc):
    m, nt, _ = xt.shape
    dy = yc.shape[-1]
    yc2 = jnp.concatenate([yc, jnp.zeros(yc.shape[:-1] + (1,), yc.dtype)], axis=-1)
    yt2 = jnp.concatenate(
        [jnp.zeros((m, nt, dy), yc.dtype), jnp.ones((m, nt, 1), yc.dtype)], axis=-1)
    return yc2, yt2


def tetnp_encoder_forward_pallas(params, xc, yc, xt, pos_enc_c=None, pos_enc_t=None):
    m, nc, _ = xc.shape
    nt = xt.shape[1]
    yc2, yt2 = preprocess_observations(xt, yc)
    din = yc2.shape[-1]
    # one fused y-encoder call over all context + target tokens
    y_all = jnp.concatenate([yc2.reshape(m * nc, din), yt2.reshape(m * nt, din)], axis=0)
    z_all = y_encoder_pallas(params["y_encoder"], y_all)
    dz = z_all.shape[-1]
    zc = z_all[: m * nc].reshape(m, nc, dz)
    zt = z_all[m * nc:].reshape(m, nt, dz)
    if pos_enc_c is not None:
        zc = zc + pos_enc_c
        zt = zt + pos_enc_t
    for lyr in params["layers"]:
        zc = te_block_pallas(lyr["mhsa"], zc, zc, xc, xc, self_attn=True)
        zt = te_block_pallas(lyr["mhca"], zt, zc, xt, xc, self_attn=False)
    return zt


# ======================== pure-JAX reference implementation =======================
def _mm(x, w):
    return jnp.matmul(x, w, precision=_HI)


def _y_encoder_ref(p, y):
    h = jnp.maximum(_mm(y, p["w1"]) + p["b1"], 0.0)
    return _mm(h, p["w2"]) + p["b2"]


def _te_block_ref(p, zq, zkv, xq, xkv, self_attn):
    m, nq, _ = zq.shape
    H, hd = NUM_HEADS, HEAD_DIM
    zn = _ln(zq, p["ln1_g"], p["ln1_b"])
    kv_src = zn if self_attn else zkv
    xk = xq if self_attn else xkv
    nk = kv_src.shape[1]
    q = _mm(zn, p["wq"]) + p["bq"]
    kv = _mm(kv_src, p["wkv"]) + p["bkv"]
    k, v = kv[..., :INNER], kv[..., INNER:]
    a = _mm(xq, p["phi_w1"])                                               # (m, nq, ph)
    b = _mm(xk, p["phi_w1"])                                               # (m, nk, ph)
    h1 = jnp.maximum(a[:, :, None, :] - b[:, None, :, :] + p["phi_b1"][0], 0.0)
    te = (jnp.einsum("mqkp,ph->mhqk", h1, p["phi_w2"], precision=_HI)
          + p["phi_b2"][0][None, :, None, None])
    qh = q.reshape(m, nq, H, hd)
    kh = k.reshape(m, nk, H, hd)
    vh = v.reshape(m, nk, H, hd)
    dots = jnp.einsum("mqhd,mkhd->mhqk", qh, kh, precision=_HI) / math.sqrt(hd) + te
    attn = jax.nn.softmax(dots, axis=-1)
    o = jnp.einsum("mhqk,mkhd->mqhd", attn, vh, precision=_HI).reshape(m, nq, INNER)
    z1 = zq + _mm(o, p["wo"]) + p["bo"]
    zn2 = _ln(z1, p["ln2_g"], p["ln2_b"])
    ff = _mm(jnp.maximum(_mm(zn2, p["ff_w1"]) + p["ff_b1"], 0.0), p["ff_w2"]) + p["ff_b2"]
    return z1 + ff


def tetnp_encoder_forward_ref(params, xc, yc, xt, pos_enc_c=None, pos_enc_t=None):
    yc2, yt2 = preprocess_observations(xt, yc)
    zc = _y_encoder_ref(params["y_encoder"], yc2)
    zt = _y_encoder_ref(params["y_encoder"], yt2)
    if pos_enc_c is not None:
        zc = zc + pos_enc_c
        zt = zt + pos_enc_t
    for lyr in params["layers"]:
        zc = _te_block_ref(lyr["mhsa"], zc, zc, xc, xc, True)
        zt = _te_block_ref(lyr["mhca"], zt, zc, xt, xc, False)
    return zt


# =============================== parameter init ====================================
def _dense(key, din, dout):
    return jax.random.normal(key, (din, dout), jnp.float32) / math.sqrt(din)


def _init_block(key):
    ks = jax.random.split(key, 9)
    return {
        "ln1_g": jnp.ones((1, DZ), jnp.float32), "ln1_b": jnp.zeros((1, DZ), jnp.float32),
        "ln2_g": jnp.ones((1, DZ), jnp.float32), "ln2_b": jnp.zeros((1, DZ), jnp.float32),
        "wq": _dense(ks[0], DZ, INNER), "bq": jnp.zeros((1, INNER), jnp.float32),
        "wkv": _dense(ks[1], DZ, 2 * INNER), "bkv": jnp.zeros((1, 2 * INNER), jnp.float32),
        "phi_w1": _dense(ks[2], DX, PHI_HIDDEN),
        "phi_b1": 0.1 * jax.random.normal(ks[3], (1, PHI_HIDDEN), jnp.float32),
        "phi_w2": jax.random.normal(ks[4], (PHI_HIDDEN, NUM_HEADS), jnp.float32) / math.sqrt(PHI_HIDDEN),
        "phi_b2": 0.1 * jax.random.normal(ks[5], (1, NUM_HEADS), jnp.float32),
        "wo": _dense(ks[6], INNER, DZ), "bo": jnp.zeros((1, DZ), jnp.float32),
        "ff_w1": _dense(ks[7], DZ, FF_DIM), "ff_b1": jnp.zeros((1, FF_DIM), jnp.float32),
        "ff_w2": _dense(ks[8], FF_DIM, DZ), "ff_b2": jnp.zeros((1, DZ), jnp.float32),
    }


def init_params(key):
    ky, *kl = jax.random.split(key, 1 + 2 * NUM_LAYERS)
    ky1, ky2 = jax.random.split(ky)
    return {
        "y_encoder": {
            "w1": _dense(ky1, DY + 1, DZ), "b1": jnp.zeros((1, DZ), jnp.float32),
            "w2": _dense(ky2, DZ, DZ), "b2": jnp.zeros((1, DZ), jnp.float32),
        },
        "layers": [
            {"mhsa": _init_block(kl[2 * i]), "mhca": _init_block(kl[2 * i + 1])}
            for i in range(NUM_LAYERS)
        ],
    }


# ===================================== main ========================================
if __name__ == "__main__":
    key = jax.random.PRNGKey(0)
    kp, kx1, kx2, ky = jax.random.split(key, 4)

    M, NC, NT = 2, 8, 8
    xc = jax.random.normal(kx1, (M, NC, DX), jnp.float32)
    xt = jax.random.normal(kx2, (M, NT, DX), jnp.float32)
    yc = jax.random.normal(ky, (M, NC, DY), jnp.float32)

    params = init_params(kp)

    forward_pallas = jax.jit(tetnp_encoder_forward_pallas)
    out = forward_pallas(params, xc, yc, xt)
    out = jax.block_until_ready(out)

    ref = jax.jit(tetnp_encoder_forward_ref)(params, xc, yc, xt)
    ref = jax.block_until_ready(ref)

    assert out.shape == (M, NT, DZ), out.shape
    assert bool(jnp.all(jnp.isfinite(out)))
    max_diff = float(jnp.max(jnp.abs(out - ref)))
    assert bool(jnp.allclose(out, ref, atol=5e-3, rtol=5e-3)), f"max abs diff {max_diff}"

    print("KERNEL_OK")
</pallas_src>

<mosaic_0001>
module attributes {stable_mosaic.version = 11 : i64} {
  func.func @_mlp2_kernel(%arg0: i32, %arg1: memref<32x2xf32, #tpu.memory_space<vmem>>, %arg2: memref<2x32xf32, #tpu.memory_space<vmem>>, %arg3: memref<1x32xf32, #tpu.memory_space<vmem>>, %arg4: memref<32x32xf32, #tpu.memory_space<vmem>>, %arg5: memref<1x32xf32, #tpu.memory_space<vmem>>, %arg6: memref<32x32xf32, #tpu.memory_space<vmem>>) attributes {dimension_semantics = [#tpu.dimension_semantics<parallel>], iteration_bounds = array<i64: 1>, scalar_prefetch = 0 : i64, scratch_operands = 0 : i64, tpu.core_type = #tpu.core_type<tc>, window_params = [{transform_indices = @transform_0, window_bounds = array<i64: 32, 2>}, {pipeline_mode = #tpu.pipeline_mode<synchronous>, transform_indices = @transform_1, window_bounds = array<i64: 2, 32>}, {pipeline_mode = #tpu.pipeline_mode<synchronous>, transform_indices = @transform_2, window_bounds = array<i64: 1, 32>}, {pipeline_mode = #tpu.pipeline_mode<synchronous>, transform_indices = @transform_3, window_bounds = array<i64: 32, 32>}, {pipeline_mode = #tpu.pipeline_mode<synchronous>, transform_indices = @transform_4, window_bounds = array<i64: 1, 32>}, {transform_indices = @transform_5, window_bounds = array<i64: 32, 32>}]} {
    %c0 = arith.constant 0 : index
    %c0_0 = arith.constant 0 : index
    %0 = vector.load %arg1[%c0, %c0_0] : memref<32x2xf32, #tpu.memory_space<vmem>>, vector<32x2xf32>
    %1 = vector.extract_strided_slice %0 {offsets = [0, 0], sizes = [32, 1], strides = [1, 1]} : vector<32x2xf32> to vector<32x1xf32>
    %c0_1 = arith.constant 0 : index
    %c0_2 = arith.constant 0 : index
    %2 = vector.load %arg2[%c0_1, %c0_2] : memref<2x32xf32, #tpu.memory_space<vmem>>, vector<1x32xf32>
    %3 = vector.broadcast %1 : vector<32x1xf32> to vector<32x32xf32>
    %4 = vector.broadcast %2 : vector<1x32xf32> to vector<32x32xf32>
    %5 = arith.mulf %3, %4 : vector<32x32xf32>
    %6 = vector.extract_strided_slice %0 {offsets = [0, 1], sizes = [32, 1], strides = [1, 1]} : vector<32x2xf32> to vector<32x1xf32>
    %c1 = arith.constant 1 : index
    %c0_3 = arith.constant 0 : index
    %7 = vector.load %arg2[%c1, %c0_3] : memref<2x32xf32, #tpu.memory_space<vmem>>, vector<1x32xf32>
    %8 = vector.broadcast %6 : vector<32x1xf32> to vector<32x32xf32>
    %9 = vector.broadcast %7 : vector<1x32xf32> to vector<32x32xf32>
    %10 = arith.mulf %8, %9 : vector<32x32xf32>
    %11 = arith.addf %5, %10 : vector<32x32xf32>
    %c0_4 = arith.constant 0 : index
    %c0_5 = arith.constant 0 : index
    %12 = vector.load %arg3[%c0_4, %c0_5] : memref<1x32xf32, #tpu.memory_space<vmem>>, vector<1x32xf32>
    %13 = vector.broadcast %12 : vector<1x32xf32> to vector<32x32xf32>
    %14 = arith.addf %11, %13 : vector<32x32xf32>
    %cst = arith.constant 0.000000e+00 : f32
    %15 = vector.broadcast %cst : f32 to vector<32x32xf32>
    %16 = arith.maximumf %14, %15 : vector<32x32xf32>
    %c0_6 = arith.constant 0 : index
    %c0_7 = arith.constant 0 : index
    %17 = vector.load %arg4[%c0_6, %c0_7] : memref<32x32xf32, #tpu.memory_space<vmem>>, vector<32x32xf32>
    %cst_8 = arith.constant dense<0.000000e+00> : vector<32x32xf32>
    %18 = tpu.matmul %16, %17, %cst_8 {dimension_numbers = #tpu.dot_dimension_numbers<[1], [0], [0], [1], [0, 0, 1, 1], [], []>, precision = #tpu.contract_precision<fp32>} : vector<32x32xf32>, vector<32x32xf32>, vector<32x32xf32> -> vector<32x32xf32>
    %c0_9 = arith.constant 0 : index
    %c0_10 = arith.constant 0 : index
    %19 = vector.load %arg5[%c0_9, %c0_10] : memref<1x32xf32, #tpu.memory_space<vmem>>, vector<1x32xf32>
    %20 = vector.broadcast %19 : vector<1x32xf32> to vector<32x32xf32>
    %21 = arith.addf %18, %20 : vector<32x32xf32>
    %c0_11 = arith.constant 0 : index
    %c0_12 = arith.constant 0 : index
    %22 = vector.load %arg6[%c0_11, %c0_12] : memref<32x32xf32, #tpu.memory_space<vmem>>, vector<32x32xf32>
    tpu.vector_store %arg6[%c0_11, %c0_12], %21 {strides = array<i32>} : memref<32x32xf32, #tpu.memory_space<vmem>>, vector<32x32xf32>,
    return
  }
  func.func @transform_0(%arg0: i32) -> (i32, i32) {
    %c0_i32 = arith.constant 0 : i32
    %c0_i32_0 = arith.constant 0 : i32
    return %arg0, %c0_i32 : i32, i32
  }
  func.func @transform_1(%arg0: i32) -> (i32, i32) {
    %c0_i32 = arith.constant 0 : i32
    %c0_i32_0 = arith.constant 0 : i32
    %c0_i32_1 = arith.constant 0 : i32
    return %c0_i32, %c0_i32_0 : i32, i32
  }
  func.func @transform_2(%arg0: i32) -> (i32, i32) {
    %c0_i32 = arith.constant 0 : i32
    %c0_i32_0 = arith.constant 0 : i32
    %c0_i32_1 = arith.constant 0 : i32
    return %c0_i32, %c0_i32_0 : i32, i32
  }
  func.func @transform_3(%arg0: i32) -> (i32, i32) {
    %c0_i32 = arith.constant 0 : i32
    %c0_i32_0 = arith.constant 0 : i32
    %c0_i32_1 = arith.constant 0 : i32
    return %c0_i32, %c0_i32_0 : i32, i32
  }
  func.func @transform_4(%arg0: i32) -> (i32, i32) {
    %c0_i32 = arith.constant 0 : i32
    %c0_i32_0 = arith.constant 0 : i32
    %c0_i32_1 = arith.constant 0 : i32
    return %c0_i32, %c0_i32_0 : i32, i32
  }
  func.func @transform_5(%arg0: i32) -> (i32, i32) {
    %c0_i32 = arith.constant 0 : i32
    %c0_i32_0 = arith.constant 0 : i32
    return %arg0, %c0_i32 : i32, i32
  }
}

module attributes {stable_mosaic.version = 11 : i64} {
  func.func @_te_block_kernel(%arg0: i32, %arg1: memref<1x8x32xf32, #tpu.memory_space<vmem>>, %arg2: memref<1x8x32xf32, #tpu.memory_space<vmem>>, %arg3: memref<1x8x2xf32, #tpu.memory_space<vmem>>, %arg4: memref<1x8x2xf32, #tpu.memory_space<vmem>>, %arg5: memref<1x32xf32, #tpu.memory_space<vmem>>, %arg6: memref<1x32xf32, #tpu.memory_space<vmem>>, %arg7: memref<32x32xf32, #tpu.memory_space<vmem>>, %arg8: memref<1x32xf32, #tpu.memory_space<vmem>>, %arg9: memref<32x64xf32, #tpu.memory_space<vmem>>, %arg10: memref<1x64xf32, #tpu.memory_space<vmem>>, %arg11: memref<2x16xf32, #tpu.memory_space<vmem>>, %arg12: memref<1x16xf32, #tpu.memory_space<vmem>>, %arg13: memref<16x4xf32, #tpu.memory_space<vmem>>, %arg14: memref<1x4xf32, #tpu.memory_space<vmem>>, %arg15: memref<32x32xf32, #tpu.memory_space<vmem>>, %arg16: memref<1x32xf32, #tpu.memory_space<vmem>>, %arg17: memref<1x32xf32, #tpu.memory_space<vmem>>, %arg18: memref<1x32xf32, #tpu.memory_space<vmem>>, %arg19: memref<32x64xf32, #tpu.memory_space<vmem>>, %arg20: memref<1x64xf32, #tpu.memory_space<vmem>>, %arg21: memref<64x32xf32, #tpu.memory_space<vmem>>, %arg22: memref<1x32xf32, #tpu.memory_space<vmem>>, %arg23: memref<1x8x32xf32, #tpu.memory_space<vmem>>) attributes {dimension_semantics = [#tpu.dimension_semantics<parallel>], iteration_bounds = array<i64: 2>, scalar_prefetch = 0 : i64, scratch_operands = 0 : i64, tpu.core_type = #tpu.core_type<tc>, window_params = [{transform_indices = @transform_0, window_bounds = array<i64: 1, 8, 32>}, {transform_indices = @transform_1, window_bounds = array<i64: 1, 8, 32>}, {transform_indices = @transform_2, window_bounds = array<i64: 1, 8, 2>}, {transform_indices = @transform_3, window_bounds = array<i64: 1, 8, 2>}, {pipeline_mode = #tpu.pipeline_mode<synchronous>, transform_indices = @transform_4, window_bounds = array<i64: 1, 32>}, {pipeline_mode = #tpu.pipeline_mode<synchronous>, transform_indices = @transform_5, window_bounds = array<i64: 1, 32>}, {pipeline_mode = #tpu.pipeline_mode<synchronous>, transform_indices = @transform_6, window_bounds = array<i64: 32, 32>}, {pipeline_mode = #tpu.pipeline_mode<synchronous>, transform_indices = @transform_7, window_bounds = array<i64: 1, 32>}, {pipeline_mode = #tpu.pipeline_mode<synchronous>, transform_indices = @transform_8, window_bounds = array<i64: 32, 64>}, {pipeline_mode = #tpu.pipeline_mode<synchronous>, transform_indices = @transform_9, window_bounds = array<i64: 1, 64>}, {pipeline_mode = #tpu.pipeline_mode<synchronous>, transform_indices = @transform_10, window_bounds = array<i64: 2, 16>}, {pipeline_mode = #tpu.pipeline_mode<synchronous>, transform_indices = @transform_11, window_bounds = array<i64: 1, 16>}, {pipeline_mode = #tpu.pipeline_mode<synchronous>, transform_indices = @transform_12, window_bounds = array<i64: 16, 4>}, {pipeline_mode = #tpu.pipeline_mode<synchronous>, transform_indices = @transform_13, window_bounds = array<i64: 1, 4>}, {pipeline_mode = #tpu.pipeline_mode<synchronous>, transform_indices = @transform_14, window_bounds = array<i64: 32, 32>}, {pipeline_mode = #tpu.pipeline_mode<synchronous>, transform_indices = @transform_15, window_bounds = array<i64: 1, 32>}, {pipeline_mode = #tpu.pipeline_mode<synchronous>, transform_indices = @transform_16, window_bounds = array<i64: 1, 32>}, {pipeline_mode = #tpu.pipeline_mode<synchronous>, transform_indices = @transform_17, window_bounds = array<i64: 1, 32>}, {pipeline_mode = #tpu.pipeline_mode<synchronous>, transform_indices = @transform_18, window_bounds = array<i64: 32, 64>}, {pipeline_mode = #tpu.pipeline_mode<synchronous>, transform_indices = @transform_19, window_bounds = array<i64: 1, 64>}, {pipeline_mode = #tpu.pipeline_mode<synchronous>, transform_indices = @transform_20, window_bounds = array<i64: 64, 32>}, {pipeline_mode = #tpu.pipeline_mode<synchronous>, transform_indices = @transform_21, window_bounds = array<i64: 1, 32>}, {transform_indices = @transform_22, window_bounds = array<i64: 1, 8, 32>}]} {
    %c0 = arith.constant 0 : index
    %c0_0 = arith.constant 0 : index
    %c0_1 = arith.constant 0 : index
    %0 = vector.load %arg1[%c0, %c0_0, %c0_1] : memref<1x8x32xf32, #tpu.memory_space<vmem>>, vector<1x8x32xf32>
    %1 = vector.shape_cast %0 : vector<1x8x32xf32> to vector<8x32xf32>
    %c0_2 = arith.constant 0 : index
    %c0_3 = arith.constant 0 : index
    %2 = vector.load %arg5[%c0_2, %c0_3] : memref<1x32xf32, #tpu.memory_space<vmem>>, vector<1x32xf32>
    %c0_4 = arith.constant 0 : index
    %c0_5 = arith.constant 0 : index
    %3 = vector.load %arg6[%c0_4, %c0_5] : memref<1x32xf32, #tpu.memory_space<vmem>>, vector<1x32xf32>
    %cst = arith.constant dense<0.000000e+00> : vector<8xf32>
    %4 = vector.multi_reduction <add>, %1, %cst [1] : vector<8x32xf32> to vector<8xf32>
    %5 = vector.shape_cast %4 : vector<8xf32> to vector<8x1xf32>
    %cst_6 = arith.constant 3.200000e+01 : f32
    %6 = vector.broadcast %cst_6 : f32 to vector<8x1xf32>
    %7 = arith.divf %5, %6 : vector<8x1xf32>
    %8 = vector.broadcast %7 : vector<8x1xf32> to vector<8x32xf32>
    %9 = arith.subf %1, %8 : vector<8x32xf32>
    %10 = arith.mulf %9, %9 : vector<8x32xf32>
    %cst_7 = arith.constant dense<0.000000e+00> : vector<8xf32>
    %11 = vector.multi_reduction <add>, %10, %cst_7 [1] : vector<8x32xf32> to vector<8xf32>
    %12 = vector.shape_cast %11 : vector<8xf32> to vector<8x1xf32>
    %cst_8 = arith.constant 3.200000e+01 : f32
    %13 = vector.broadcast %cst_8 : f32 to vector<8x1xf32>
    %14 = arith.divf %12, %13 : vector<8x1xf32>
    %15 = vector.broadcast %7 : vector<8x1xf32> to vector<8x32xf32>
    %16 = arith.subf %1, %15 : vector<8x32xf32>
    %cst_9 = arith.constant 9.99999974E-6 : f32
    %17 = vector.broadcast %cst_9 : f32 to vector<8x1xf32>
    %18 = arith.addf %14, %17 : vector<8x1xf32>
    %19 = math.rsqrt %18 : vector<8x1xf32>
    %20 = vector.broadcast %19 : vector<8x1xf32> to vector<8x32xf32>
    %21 = arith.mulf %16, %20 : vector<8x32xf32>
    %22 = vector.broadcast %2 : vector<1x32xf32> to vector<8x32xf32>
    %23 = arith.mulf %21, %22 : vector<8x32xf32>
    %24 = vector.broadcast %3 : vector<1x32xf32> to vector<8x32xf32>
    %25 = arith.addf %23, %24 : vector<8x32xf32>
    %c0_10 = arith.constant 0 : index
    %c0_11 = arith.constant 0 : index
    %26 = vector.load %arg7[%c0_10, %c0_11] : memref<32x32xf32, #tpu.memory_space<vmem>>, vector<32x32xf32>
    %cst_12 = arith.constant dense<0.000000e+00> : vector<8x32xf32>
    %27 = tpu.matmul %25, %26, %cst_12 {dimension_numbers = #tpu.dot_dimension_numbers<[1], [0], [0], [1], [0, 0, 1, 1], [], []>, precision = #tpu.contract_precision<fp32>} : vector<8x32xf32>, vector<32x32xf32>, vector<8x32xf32> -> vector<8x32xf32>
    %c0_13 = arith.constant 0 : index
    %c0_14 = arith.constant 0 : index
    %28 = vector.load %arg8[%c0_13, %c0_14] : memref<1x32xf32, #tpu.memory_space<vmem>>, vector<1x32xf32>
    %29 = vector.broadcast %28 : vector<1x32xf32> to vector<8x32xf32>
    %30 = arith.addf %27, %29 : vector<8x32xf32>
    %c0_15 = arith.constant 0 : index
    %c0_16 = arith.constant 0 : index
    %31 = vector.load %arg9[%c0_15, %c0_16] : memref<32x64xf32, #tpu.memory_space<vmem>>, vector<32x64xf32>
    %cst_17 = arith.constant dense<0.000000e+00> : vector<8x64xf32>
    %32 = tpu.matmul %25, %31, %cst_17 {dimension_numbers = #tpu.dot_dimension_numbers<[1], [0], [0], [1], [0, 0, 1, 1], [], []>, precision = #tpu.contract_precision<fp32>} : vector<8x32xf32>, vector<32x64xf32>, vector<8x64xf32> -> vector<8x64xf32>
    %c0_18 = arith.constant 0 : index
    %c0_19 = arith.constant 0 : index
    %33 = vector.load %arg10[%c0_18, %c0_19] : memref<1x64xf32, #tpu.memory_space<vmem>>, vector<1x64xf32>
    %34 = vector.broadcast %33 : vector<1x64xf32> to vector<8x64xf32>
    %35 = arith.addf %32, %34 : vector<8x64xf32>
    %36 = vector.extract_strided_slice %35 {offsets = [0, 0], sizes = [8, 32], strides = [1, 1]} : vector<8x64xf32> to vector<8x32xf32>
    %37 = vector.extract_strided_slice %35 {offsets = [0, 32], sizes = [8, 32], strides = [1, 1]} : vector<8x64xf32> to vector<8x32xf32>
    %c0_20 = arith.constant 0 : index
    %c0_21 = arith.constant 0 : index
    %c0_22 = arith.constant 0 : index
    %38 = vector.load %arg3[%c0_20, %c0_21, %c0_22] : memref<1x8x2xf32, #tpu.memory_space<vmem>>, vector<1x8x2xf32>
    %39 = vector.shape_cast %38 : vector<1x8x2xf32> to vector<8x2xf32>
    %c0_23 = arith.constant 0 : index
    %c0_24 = arith.constant 0 : index
    %c0_25 = arith.constant 0 : index
    %40 = vector.load %arg4[%c0_23, %c0_24, %c0_25] : memref<1x8x2xf32, #tpu.memory_space<vmem>>, vector<1x8x2xf32>
    %41 = vector.shape_cast %40 : vector<1x8x2xf32> to vector<8x2xf32>
    %42 = vector.extract_strided_slice %39 {offsets = [0, 0], sizes = [8, 1], strides = [1, 1]} : vector<8x2xf32> to vector<8x1xf32>
    %c0_26 = arith.constant 0 : index
    %c0_27 = arith.constant 0 : index
    %43 = vector.load %arg11[%c0_26, %c0_27] : memref<2x16xf32, #tpu.memory_space<vmem>>, vector<1x16xf32>
    %44 = vector.broadcast %42 : vector<8x1xf32> to vector<8x16xf32>
    %45 = vector.broadcast %43 : vector<1x16xf32> to vector<8x16xf32>
    %46 = arith.mulf %44, %45 : vector<8x16xf32>
    %47 = vector.extract_strided_slice %39 {offsets = [0, 1], sizes = [8, 1], strides = [1, 1]} : vector<8x2xf32> to vector<8x1xf32>
    %c1 = arith.constant 1 : index
    %c0_28 = arith.constant 0 : index
    %48 = vector.load %arg11[%c1, %c0_28] : memref<2x16xf32, #tpu.memory_space<vmem>>, vector<1x16xf32>
    %49 = vector.broadcast %47 : vector<8x1xf32> to vector<8x16xf32>
    %50 = vector.broadcast %48 : vector<1x16xf32> to vector<8x16xf32>
    %51 = arith.mulf %49, %50 : vector<8x16xf32>
    %52 = arith.addf %46, %51 : vector<8x16xf32>
    %53 = vector.extract_strided_slice %41 {offsets = [0, 0], sizes = [8, 1], strides = [1, 1]} : vector<8x2xf32> to vector<8x1xf32>
    %c0_29 = arith.constant 0 : index
    %c0_30 = arith.constant 0 : index
    %54 = vector.load %arg11[%c0_29, %c0_30] : memref<2x16xf32, #tpu.memory_space<vmem>>, vector<1x16xf32>
    %55 = vector.broadcast %53 : vector<8x1xf32> to vector<8x16xf32>
    %56 = vector.broadcast %54 : vector<1x16xf32> to vector<8x16xf32>
    %57 = arith.mulf %55, %56 : vector<8x16xf32>
    %58 = vector.extract_strided_slice %41 {offsets = [0, 1], sizes = [8, 1], strides = [1, 1]} : vector<8x2xf32> to vector<8x1xf32>
    %c1_31 = arith.constant 1 : index
    %c0_32 = arith.constant 0 : index
    %59 = vector.load %arg11[%c1_31, %c0_32] : memref<2x16xf32, #tpu.memory_space<vmem>>, vector<1x16xf32>
    %60 = vector.broadcast %58 : vector<8x1xf32> to vector<8x16xf32>
    %61 = vector.broadcast %59 : vector<1x16xf32> to vector<8x16xf32>
    %62 = arith.mulf %60, %61 : vector<8x16xf32>
    %63 = arith.addf %57, %62 : vector<8x16xf32>
    %c0_33 = arith.constant 0 : index
    %c0_34 = arith.constant 0 : index
    %64 = vector.load %arg12[%c0_33, %c0_34] : memref<1x16xf32, #tpu.memory_space<vmem>>, vector<1x16xf32>
    %65 = vector.shape_cast %52 : vector<8x16xf32> to vector<8x1x16xf32>
    %66 = vector.shape_cast %63 : vector<8x16xf32> to vector<1x8x16xf32>
    %67 = vector.broadcast %65 : vector<8x1x16xf32> to vector<8x8x16xf32>
    %68 = vector.broadcast %66 : vector<1x8x16xf32> to vector<8x8x16xf32>
    %69 = arith.subf %67, %68 : vector<8x8x16xf32>
    %70 = vector.shape_cast %64 : vector<1x16xf32> to vector<1x1x16xf32>
    %71 = vector.broadcast %70 : vector<1x1x16xf32> to vector<8x8x16xf32>
    %72 = arith.addf %69, %71 : vector<8x8x16xf32>
    %cst_35 = arith.constant 0.000000e+00 : f32
    %73 = vector.broadcast %cst_35 : f32 to vector<8x8x16xf32>
    %74 = arith.maximumf %72, %73 : vector<8x8x16xf32>
    %75 = vector.shape_cast %74 : vector<8x8x16xf32> to vector<64x16xf32>
    %c0_36 = arith.constant 0 : index
    %c0_37 = arith.constant 0 : index
    %76 = vector.load %arg13[%c0_36, %c0_37] : memref<16x4xf32, #tpu.memory_space<vmem>>, vector<16x4xf32>
    %cst_38 = arith.constant dense<0.000000e+00> : vector<64x4xf32>
    %77 = tpu.matmul %75, %76, %cst_38 {dimension_numbers = #tpu.dot_dimension_numbers<[1], [0], [0], [1], [0, 0, 1, 1], [], []>, precision = #tpu.contract_precision<fp32>} : vector<64x16xf32>, vector<16x4xf32>, vector<64x4xf32> -> vector<64x4xf32>
    %c0_39 = arith.constant 0 : index
    %c0_40 = arith.constant 0 : index
    %78 = vector.load %arg14[%c0_39, %c0_40] : memref<1x4xf32, #tpu.memory_space<vmem>>, vector<1x4xf32>
    %79 = vector.broadcast %78 : vector<1x4xf32> to vector<64x4xf32>
    %80 = arith.addf %77, %79 : vector<64x4xf32>
    %81 = vector.shape_cast %80 : vector<64x4xf32> to vector<8x8x4xf32>
    %82 = vector.extract_strided_slice %30 {offsets = [0, 0], sizes = [8, 8], strides = [1, 1]} : vector<8x32xf32> to vector<8x8xf32>
    %83 = vector.extract_strided_slice %36 {offsets = [0, 0], sizes = [8, 8], strides = [1, 1]} : vector<8x32xf32> to vector<8x8xf32>
    %84 = vector.extract_strided_slice %37 {offsets = [0, 0], sizes = [8, 8], strides = [1, 1]} : vector<8x32xf32> to vector<8x8xf32>
    %cst_41 = arith.constant dense<0.000000e+00> : vector<8x8xf32>
    %85 = tpu.matmul %82, %83, %cst_41 {dimension_numbers = #tpu.dot_dimension_numbers<[1], [1], [0], [0], [0, 0, 1, 0], [], []>, precision = #tpu.contract_precision<fp32>} : vector<8x8xf32>, vector<8x8xf32>, vector<8x8xf32> -> vector<8x8xf32>
    %cst_42 = arith.constant 0.353553385 : f32
    %86 = vector.broadcast %cst_42 : f32 to vector<8x8xf32>
    %87 = arith.mulf %85, %86 : vector<8x8xf32>
    %88 = vector.extract_strided_slice %81 {offsets = [0, 0, 0], sizes = [8, 8, 1], strides = [1, 1, 1]} : vector<8x8x4xf32> to vector<8x8x1xf32>
    %89 = vector.shape_cast %88 : vector<8x8x1xf32> to vector<8x8xf32>
    %90 = arith.addf %87, %89 : vector<8x8xf32>
    %cst_43 = arith.constant dense<0xFF800000> : vector<8xf32>
    %91 = vector.multi_reduction <maximumf>, %90, %cst_43 [1] : vector<8x8xf32> to vector<8xf32>
    %92 = vector.shape_cast %91 : vector<8xf32> to vector<8x1xf32>
    %93 = vector.broadcast %92 : vector<8x1xf32> to vector<8x8xf32>
    %94 = arith.subf %90, %93 : vector<8x8xf32>
    %95 = math.exp %94 : vector<8x8xf32>
    %cst_44 = arith.constant dense<0.000000e+00> : vector<8xf32>
    %96 = vector.multi_reduction <add>, %95, %cst_44 [1] : vector<8x8xf32> to vector<8xf32>
    %97 = vector.shape_cast %96 : vector<8xf32> to vector<8x1xf32>
    %98 = vector.broadcast %97 : vector<8x1xf32> to vector<8x8xf32>
    %99 = arith.divf %95, %98 : vector<8x8xf32>
    %cst_45 = arith.constant dense<0.000000e+00> : vector<8x8xf32>
    %100 = tpu.matmul %99, %84, %cst_45 {dimension_numbers = #tpu.dot_dimension_numbers<[1], [0], [0], [1], [0, 0, 1, 1], [], []>, precision = #tpu.contract_precision<fp32>} : vector<8x8xf32>, vector<8x8xf32>, vector<8x8xf32> -> vector<8x8xf32>
    %101 = vector.extract_strided_slice %30 {offsets = [0, 8], sizes = [8, 8], strides = [1, 1]} : vector<8x32xf32> to vector<8x8xf32>
    %102 = vector.extract_strided_slice %36 {offsets = [0, 8], sizes = [8, 8], strides = [1, 1]} : vector<8x32xf32> to vector<8x8xf32>
    %103 = vector.extract_strided_slice %37 {offsets = [0, 8], sizes = [8, 8], strides = [1, 1]} : vector<8x32xf32> to vector<8x8xf32>
    %cst_46 = arith.constant dense<0.000000e+00> : vector<8x8xf32>
    %104 = tpu.matmul %101, %102, %cst_46 {dimension_numbers = #tpu.dot_dimension_numbers<[1], [1], [0], [0], [0, 0, 1, 0], [], []>, precision = #tpu.contract_precision<fp32>} : vector<8x8xf32>, vector<8x8xf32>, vector<8x8xf32> -> vector<8x8xf32>
    %cst_47 = arith.constant 0.353553385 : f32
    %105 = vector.broadcast %cst_47 : f32 to vector<8x8xf32>
    %106 = arith.mulf %104, %105 : vector<8x8xf32>
    %107 = vector.extract_strided_slice %81 {offsets = [0, 0, 1], sizes = [8, 8, 1], strides = [1, 1, 1]} : vector<8x8x4xf32> to vector<8x8x1xf32>
    %108 = vector.shape_cast %107 : vector<8x8x1xf32> to vector<8x8xf32>
    %109 = arith.addf %106, %108 : vector<8x8xf32>
    %cst_48 = arith.constant dense<0xFF800000> : vector<8xf32>
    %110 = vector.multi_reduction <maximumf>, %109, %cst_48 [1] : vector<8x8xf32> to vector<8xf32>
    %111 = vector.shape_cast %110 : vector<8xf32> to vector<8x1xf32>
    %112 = vector.broadcast %111 : vector<8x1xf32> to vector<8x8xf32>
    %113 = arith.subf %109, %112 : vector<8x8xf32>
    %114 = math.exp %113 : vector<8x8xf32>
    %cst_49 = arith.constant dense<0.000000e+00> : vector<8xf32>
    %115 = vector.multi_reduction <add>, %114, %cst_49 [1] : vector<8x8xf32> to vector<8xf32>
    %116 = vector.shape_cast %115 : vector<8xf32> to vector<8x1xf32>
    %117 = vector.broadcast %116 : vector<8x1xf32> to vector<8x8xf32>
    %118 = arith.divf %114, %117 : vector<8x8xf32>
    %cst_50 = arith.constant dense<0.000000e+00> : vector<8x8xf32>
    %119 = tpu.matmul %118, %103, %cst_50 {dimension_numbers = #tpu.dot_dimension_numbers<[1], [0], [0], [1], [0, 0, 1, 1], [], []>, precision = #tpu.contract_precision<fp32>} : vector<8x8xf32>, vector<8x8xf32>, vector<8x8xf32> -> vector<8x8xf32>
    %120 = vector.extract_strided_slice %30 {offsets = [0, 16], sizes = [8, 8], strides = [1, 1]} : vector<8x32xf32> to vector<8x8xf32>
    %121 = vector.extract_strided_slice %36 {offsets = [0, 16], sizes = [8, 8], strides = [1, 1]} : vector<8x32xf32> to vector<8x8xf32>
    %122 = vector.extract_strided_slice %37 {offsets = [0, 16], sizes = [8, 8], strides = [1, 1]} : vector<8x32xf32> to vector<8x8xf32>
    %cst_51 = arith.constant dense<0.000000e+00> : vector<8x8xf32>
    %123 = tpu.matmul %120, %121, %cst_51 {dimension_numbers = #tpu.dot_dimension_numbers<[1], [1], [0], [0], [0, 0, 1, 0], [], []>, precision = #tpu.contract_precision<fp32>} : vector<8x8xf32>, vector<8x8xf32>, vector<8x8xf32> -> vector<8x8xf32>
    %cst_52 = arith.constant 0.353553385 : f32
    %124 = vector.broadcast %cst_52 : f32 to vector<8x8xf32>
    %125 = arith.mulf %123, %124 : vector<8x8xf32>
    %126 = vector.extract_strided_slice %81 {offsets = [0, 0, 2], sizes = [8, 8, 1], strides = [1, 1, 1]} : vector<8x8x4xf32> to vector<8x8x1xf32>
    %127 = vector.shape_cast %126 : vector<8x8x1xf32> to vector<8x8xf32>
    %128 = arith.addf %125, %127 : vector<8x8xf32>
    %cst_53 = arith.constant dense<0xFF800000> : vector<8xf32>
    %129 = vector.multi_reduction <maximumf>, %128, %cst_53 [1] : vector<8x8xf32> to vector<8xf32>
    %130 = vector.shape_cast %129 : vector<8xf32> to vector<8x1xf32>
    %131 = vector.broadcast %130 : vector<8x1xf32> to vector<8x8xf32>
    %132 = arith.subf %128, %131 : vector<8x8xf32>
    %133 = math.exp %132 : vector<8x8xf32>
    %cst_54 = arith.constant dense<0.000000e+00> : vector<8xf32>
    %134 = vector.multi_reduction <add>, %133, %cst_54 [1] : vector<8x8xf32> to vector<8xf32>
    %135 = vector.shape_cast %134 : vector<8xf32> to vector<8x1xf32>
    %136 = vector.broadcast %135 : vector<8x1xf32> to vector<8x8xf32>
    %137 = arith.divf %133, %136 : vector<8x8xf32>
    %cst_55 = arith.constant dense<0.000000e+00> : vector<8x8xf32>
    %138 = tpu.matmul %137, %122, %cst_55 {dimension_numbers = #tpu.dot_dimension_numbers<[1], [0], [0], [1], [0, 0, 1, 1], [], []>, precision = #tpu.contract_precision<fp32>} : vector<8x8xf32>, vector<8x8xf32>, vector<8x8xf32> -> vector<8x8xf32>
    %139 = vector.extract_strided_slice %30 {offsets = [0, 24], sizes = [8, 8], strides = [1, 1]} : vector<8x32xf32> to vector<8x8xf32>
    %140 = vector.extract_strided_slice %36 {offsets = [0, 24], sizes = [8, 8], strides = [1, 1]} : vector<8x32xf32> to vector<8x8xf32>
    %141 = vector.extract_strided_slice %37 {offsets = [0, 24], sizes = [8, 8], strides = [1, 1]} : vector<8x32xf32> to vector<8x8xf32>
    %cst_56 = arith.constant dense<0.000000e+00> : vector<8x8xf32>
    %142 = tpu.matmul %139, %140, %cst_56 {dimension_numbers = #tpu.dot_dimension_numbers<[1], [1], [0], [0], [0, 0, 1, 0], [], []>, precision = #tpu.contract_precision<fp32>} : vector<8x8xf32>, vector<8x8xf32>, vector<8x8xf32> -> vector<8x8xf32>
    %cst_57 = arith.constant 0.353553385 : f32
    %143 = vector.broadcast %cst_57 : f32 to vector<8x8xf32>
    %144 = arith.mulf %142, %143 : vector<8x8xf32>
    %145 = vector.extract_strided_slice %81 {offsets = [0, 0, 3], sizes = [8, 8, 1], strides = [1, 1, 1]} : vector<8x8x4xf32> to vector<8x8x1xf32>
    %146 = vector.shape_cast %145 : vector<8x8x1xf32> to vector<8x8xf32>
    %147 = arith.addf %144, %146 : vector<8x8xf32>
    %cst_58 = arith.constant dense<0xFF800000> : vector<8xf32>
    %148 = vector.multi_reduction <maximumf>, %147, %cst_58 [1] : vector<8x8xf32> to vector<8xf32>
    %149 = vector.shape_cast %148 : vector<8xf32> to vector<8x1xf32>
    %150 = vector.broadcast %149 : vector<8x1xf32> to vector<8x8xf32>
    %151 = arith.subf %147, %150 : vector<8x8xf32>
    %152 = math.exp %151 : vector<8x8xf32>
    %cst_59 = arith.constant dense<0.000000e+00> : vector<8xf32>
    %153 = vector.multi_reduction <add>, %152, %cst_59 [1] : vector<8x8xf32> to vector<8xf32>
    %154 = vector.shape_cast %153 : vector<8xf32> to vector<8x1xf32>
    %155 = vector.broadcast %154 : vector<8x1xf32> to vector<8x8xf32>
    %156 = arith.divf %152, %155 : vector<8x8xf32>
    %cst_60 = arith.constant dense<0.000000e+00> : vector<8x8xf32>
    %157 = tpu.matmul %156, %141, %cst_60 {dimension_numbers = #tpu.dot_dimension_numbers<[1], [0], [0], [1], [0, 0, 1, 1], [], []>, precision = #tpu.contract_precision<fp32>} : vector<8x8xf32>, vector<8x8xf32>, vector<8x8xf32> -> vector<8x8xf32>
    %158 = tpu.concatenate %100, %119, %138, %157 in 1 : vector<8x8xf32>, vector<8x8xf32>, vector<8x8xf32>, vector<8x8xf32> -> vector<8x32xf32>
    %c0_61 = arith.constant 0 : index
    %c0_62 = arith.constant 0 : index
    %159 = vector.load %arg15[%c0_61, %c0_62] : memref<32x32xf32, #tpu.memory_space<vmem>>, vector<32x32xf32>
    %cst_63 = arith.constant dense<0.000000e+00> : vector<8x32xf32>
    %160 = tpu.matmul %158, %159, %cst_63 {dimension_numbers = #tpu.dot_dimension_numbers<[1], [0], [0], [1], [0, 0, 1, 1], [], []>, precision = #tpu.contract_precision<fp32>} : vector<8x32xf32>, vector<32x32xf32>, vector<8x32xf32> -> vector<8x32xf32>
    %161 = arith.addf %1, %160 : vector<8x32xf32>
    %c0_64 = arith.constant 0 : index
    %c0_65 = arith.constant 0 : index
    %162 = vector.load %arg16[%c0_64, %c0_65] : memref<1x32xf32, #tpu.memory_space<vmem>>, vector<1x32xf32>
    %163 = vector.broadcast %162 : vector<1x32xf32> to vector<8x32xf32>
    %164 = arith.addf %161, %163 : vector<8x32xf32>
    %c0_66 = arith.constant 0 : index
    %c0_67 = arith.constant 0 : index
    %165 = vector.load %arg17[%c0_66, %c0_67] : memref<1x32xf32, #tpu.memory_space<vmem>>, vector<1x32xf32>
    %c0_68 = arith.constant 0 : index
    %c0_69 = arith.constant 0 : index
    %166 = vector.load %arg18[%c0_68, %c0_69] : memref<1x32xf32, #tpu.memory_space<vmem>>, vector<1x32xf32>
    %cst_70 = arith.constant dense<0.000000e+00> : vector<8xf32>
    %167 = vector.multi_reduction <add>, %164, %cst_70 [1] : vector<8x32xf32> to vector<8xf32>
    %168 = vector.shape_cast %167 : vector<8xf32> to vector<8x1xf32>
    %cst_71 = arith.constant 3.200000e+01 : f32
    %169 = vector.broadcast %cst_71 : f32 to vector<8x1xf32>
    %170 = arith.divf %168, %169 : vector<8x1xf32>
    %171 = vector.broadcast %170 : vector<8x1xf32> to vector<8x32xf32>
    %172 = arith.subf %164, %171 : vector<8x32xf32>
    %173 = arith.mulf %172, %172 : vector<8x32xf32>
    %cst_72 = arith.constant dense<0.000000e+00> : vector<8xf32>
    %174 = vector.multi_reduction <add>, %173, %cst_72 [1] : vector<8x32xf32> to vector<8xf32>
    %175 = vector.shape_cast %174 : vector<8xf32> to vector<8x1xf32>
    %cst_73 = arith.constant 3.200000e+01 : f32
    %176 = vector.broadcast %cst_73 : f32 to vector<8x1xf32>
    %177 = arith.divf %175, %176 : vector<8x1xf32>
    %178 = vector.broadcast %170 : vector<8x1xf32> to vector<8x32xf32>
    %179 = arith.subf %164, %178 : vector<8x32xf32>
    %cst_74 = arith.constant 9.99999974E-6 : f32
    %180 = vector.broadcast %cst_74 : f32 to vector<8x1xf32>
    %181 = arith.addf %177, %180 : vector<8x1xf32>
    %182 = math.rsqrt %181 : vector<8x1xf32>
    %183 = vector.broadcast %182 : vector<8x1xf32> to vector<8x32xf32>
    %184 = arith.mulf %179, %183 : vector<8x32xf32>
    %185 = vector.broadcast %165 : vector<1x32xf32> to vector<8x32xf32>
    %186 = arith.mulf %184, %185 : vector<8x32xf32>
    %187 = vector.broadcast %166 : vector<1x32xf32> to vector<8x32xf32>
    %188 = arith.addf %186, %187 : vector<8x32xf32>
    %c0_75 = arith.constant 0 : index
    %c0_76 = arith.constant 0 : index
    %189 = vector.load %arg19[%c0_75, %c0_76] : memref<32x64xf32, #tpu.memory_space<vmem>>, vector<32x64xf32>
    %cst_77 = arith.constant dense<0.000000e+00> : vector<8x64xf32>
    %190 = tpu.matmul %188, %189, %cst_77 {dimension_numbers = #tpu.dot_dimension_numbers<[1], [0], [0], [1], [0, 0, 1, 1], [], []>, precision = #tpu.contract_precision<fp32>} : vector<8x32xf32>, vector<32x64xf32>, vector<8x64xf32> -> vector<8x64xf32>
    %c0_78 = arith.constant 0 : index
    %c0_79 = arith.constant 0 : index
    %191 = vector.load %arg20[%c0_78, %c0_79] : memref<1x64xf32, #tpu.memory_space<vmem>>, vector<1x64xf32>
    %192 = vector.broadcast %191 : vector<1x64xf32> to vector<8x64xf32>
    %193 = arith.addf %190, %192 : vector<8x64xf32>
    %cst_80 = arith.constant 0.000000e+00 : f32
    %194 = vector.broadcast %cst_80 : f32 to vector<8x64xf32>
    %195 = arith.maximumf %193, %194 : vector<8x64xf32>
    %c0_81 = arith.constant 0 : index
    %c0_82 = arith.constant 0 : index
    %196 = vector.load %arg21[%c0_81, %c0_82] : memref<64x32xf32, #tpu.memory_space<vmem>>, vector<64x32xf32>
    %cst_83 = arith.constant dense<0.000000e+00> : vector<8x32xf32>
    %197 = tpu.matmul %195, %196, %cst_83 {dimension_numbers = #tpu.dot_dimension_numbers<[1], [0], [0], [1], [0, 0, 1, 1], [], []>, precision = #tpu.contract_precision<fp32>} : vector<8x64xf32>, vector<64x32xf32>, vector<8x32xf32> -> vector<8x32xf32>
    %c0_84 = arith.constant 0 : index
    %c0_85 = arith.constant 0 : index
    %198 = vector.load %arg22[%c0_84, %c0_85] : memref<1x32xf32, #tpu.memory_space<vmem>>, vector<1x32xf32>
    %199 = vector.broadcast %198 : vector<1x32xf32> to vector<8x32xf32>
    %200 = arith.addf %197, %199 : vector<8x32xf32>
    %201 = arith.addf %164, %200 : vector<8x32xf32>
    %c0_86 = arith.constant 0 : index
    %c0_87 = arith.constant 0 : index
    %c0_88 = arith.constant 0 : index
    %202 = vector.load %arg23[%c0_86, %c0_87, %c0_88] : memref<1x8x32xf32, #tpu.memory_space<vmem>>, vector<1x8x32xf32>
    %203 = vector.shape_cast %202 : vector<1x8x32xf32> to vector<8x32xf32>
    %204 = vector.shape_cast %201 : vector<8x32xf32> to vector<1x8x32xf32>
    tpu.vector_store %arg23[%c0_86, %c0_87, %c0_88], %204 {strides = array<i32>} : memref<1x8x32xf32, #tpu.memory_space<vmem>>, vector<1x8x32xf32>,
    return
  }
  func.func @transform_0(%arg0: i32) -> (i32, i32, i32) {
    %c0_i32 = arith.constant 0 : i32
    %c0_i32_0 = arith.constant 0 : i32
    %c0_i32_1 = arith.constant 0 : i32
    return %arg0, %c0_i32, %c0_i32_0 : i32, i32, i32
  }
  func.func @transform_1(%arg0: i32) -> (i32, i32, i32) {
    %c0_i32 = arith.constant 0 : i32
    %c0_i32_0 = arith.constant 0 : i32
    %c0_i32_1 = arith.constant 0 : i32
    return %arg0, %c0_i32, %c0_i32_0 : i32, i32, i32
  }
  func.func @transform_2(%arg0: i32) -> (i32, i32, i32) {
    %c0_i32 = arith.constant 0 : i32
    %c0_i32_0 = arith.constant 0 : i32
    %c0_i32_1 = arith.constant 0 : i32
    return %arg0, %c0_i32, %c0_i32_0 : i32, i32, i32
  }
  func.func @transform_3(%arg0: i32) -> (i32, i32, i32) {
    %c0_i32 = arith.constant 0 : i32
    %c0_i32_0 = arith.constant 0 : i32
    %c0_i32_1 = arith.constant 0 : i32
    return %arg0, %c0_i32, %c0_i32_0 : i32, i32, i32
  }
  func.func @transform_4(%arg0: i32) -> (i32, i32) {
    %c0_i32 = arith.constant 0 : i32
    %c0_i32_0 = arith.constant 0 : i32
    %c0_i32_1 = arith.constant 0 : i32
    return %c0_i32, %c0_i32_0 : i32, i32
  }
  func.func @transform_5(%arg0: i32) -> (i32, i32) {
    %c0_i32 = arith.constant 0 : i32
    %c0_i32_0 = arith.constant 0 : i32
    %c0_i32_1 = arith.constant 0 : i32
    return %c0_i32, %c0_i32_0 : i32, i32
  }
  func.func @transform_6(%arg0: i32) -> (i32, i32) {
    %c0_i32 = arith.constant 0 : i32
    %c0_i32_0 = arith.constant 0 : i32
    %c0_i32_1 = arith.constant 0 : i32
    return %c0_i32, %c0_i32_0 : i32, i32
  }
  func.func @transform_7(%arg0: i32) -> (i32, i32) {
    %c0_i32 = arith.constant 0 : i32
    %c0_i32_0 = arith.constant 0 : i32
    %c0_i32_1 = arith.constant 0 : i32
    return %c0_i32, %c0_i32_0 : i32, i32
  }
  func.func @transform_8(%arg0: i32) -> (i32, i32) {
    %c0_i32 = arith.constant 0 : i32
    %c0_i32_0 = arith.constant 0 : i32
    %c0_i32_1 = arith.constant 0 : i32
    return %c0_i32, %c0_i32_0 : i32, i32
  }
  func.func @transform_9(%arg0: i32) -> (i32, i32) {
    %c0_i32 = arith.constant 0 : i32
    %c0_i32_0 = arith.constant 0 : i32
    %c0_i32_1 = arith.constant 0 : i32
    return %c0_i32, %c0_i32_0 : i32, i32
  }
  func.func @transform_10(%arg0: i32) -> (i32, i32) {
    %c0_i32 = arith.constant 0 : i32
    %c0_i32_0 = arith.constant 0 : i32
    %c0_i32_1 = arith.constant 0 : i32
    return %c0_i32, %c0_i32_0 : i32, i32
  }
  func.func @transform_11(%arg0: i32) -> (i32, i32) {
    %c0_i32 = arith.constant 0 : i32
    %c0_i32_0 = arith.constant 0 : i32
    %c0_i32_1 = arith.constant 0 : i32
    return %c0_i32, %c0_i32_0 : i32, i32
  }
  func.func @transform_12(%arg0: i32) -> (i32, i32) {
    %c0_i32 = arith.constant 0 : i32
    %c0_i32_0 = arith.constant 0 : i32
    %c0_i32_1 = arith.constant 0 : i32
    return %c0_i32, %c0_i32_0 : i32, i32
  }
  func.func @transform_13(%arg0: i32) -> (i32, i32) {
    %c0_i32 = arith.constant 0 : i32
    %c0_i32_0 = arith.constant 0 : i32
    %c0_i32_1 = arith.constant 0 : i32
    return %c0_i32, %c0_i32_0 : i32, i32
  }
  func.func @transform_14(%arg0: i32) -> (i32, i32) {
    %c0_i32 = arith.constant 0 : i32
    %c0_i32_0 = arith.constant 0 : i32
    %c0_i32_1 = arith.constant 0 : i32
    return %c0_i32, %c0_i32_0 : i32, i32
  }
  func.func @transform_15(%arg0: i32) -> (i32, i32) {
    %c0_i32 = arith.constant 0 : i32
    %c0_i32_0 = arith.constant 0 : i32
    %c0_i32_1 = arith.constant 0 : i32
    return %c0_i32, %c0_i32_0 : i32, i32
  }
  func.func @transform_16(%arg0: i32) -> (i32, i32) {
    %c0_i32 = arith.constant 0 : i32
    %c0_i32_0 = arith.constant 0 : i32
    %c0_i32_1 = arith.constant 0 : i32
    return %c0_i32, %c0_i32_0 : i32, i32
  }
  func.func @transform_17(%arg0: i32) -> (i32, i32) {
    %c0_i32 = arith.constant 0 : i32
    %c0_i32_0 = arith.constant 0 : i32
    %c0_i32_1 = arith.constant 0 : i32
    return %c0_i32, %c0_i32_0 : i32, i32
  }
  func.func @transform_18(%arg0: i32) -> (i32, i32) {
    %c0_i32 = arith.constant 0 : i32
    %c0_i32_0 = arith.constant 0 : i32
    %c0_i32_1 = arith.constant 0 : i32
    return %c0_i32, %c0_i32_0 : i32, i32
  }
  func.func @transform_19(%arg0: i32) -> (i32, i32) {
    %c0_i32 = arith.constant 0 : i32
    %c0_i32_0 = arith.constant 0 : i32
    %c0_i32_1 = arith.constant 0 : i32
    return %c0_i32, %c0_i32_0 : i32, i32
  }
  func.func @transform_20(%arg0: i32) -> (i32, i32) {
    %c0_i32 = arith.constant 0 : i32
    %c0_i32_0 = arith.constant 0 : i32
    %c0_i32_1 = arith.constant 0 : i32
    return %c0_i32, %c0_i32_0 : i32, i32
  }
  func.func @transform_21(%arg0: i32) -> (i32, i32) {
    %c0_i32 = arith.constant 0 : i32
    %c0_i32_0 = arith.constant 0 : i32
    %c0_i32_1 = arith.constant 0 : i32
    return %c0_i32, %c0_i32_0 : i32, i32
  }
  func.func @transform_22(%arg0: i32) -> (i32, i32, i32) {
    %c0_i32 = arith.constant 0 : i32
    %c0_i32_0 = arith.constant 0 : i32
    %c0_i32_1 = arith.constant 0 : i32
    return %arg0, %c0_i32, %c0_i32_0 : i32, i32, i32
  }
}

module attributes {stable_mosaic.version = 11 : i64} {
  func.func @_te_block_kernel(%arg0: i32, %arg1: memref<1x8x32xf32, #tpu.memory_space<vmem>>, %arg2: memref<1x8x32xf32, #tpu.memory_space<vmem>>, %arg3: memref<1x8x2xf32, #tpu.memory_space<vmem>>, %arg4: memref<1x8x2xf32, #tpu.memory_space<vmem>>, %arg5: memref<1x32xf32, #tpu.memory_space<vmem>>, %arg6: memref<1x32xf32, #tpu.memory_space<vmem>>, %arg7: memref<32x32xf32, #tpu.memory_space<vmem>>, %arg8: memref<1x32xf32, #tpu.memory_space<vmem>>, %arg9: memref<32x64xf32, #tpu.memory_space<vmem>>, %arg10: memref<1x64xf32, #tpu.memory_space<vmem>>, %arg11: memref<2x16xf32, #tpu.memory_space<vmem>>, %arg12: memref<1x16xf32, #tpu.memory_space<vmem>>, %arg13: memref<16x4xf32, #tpu.memory_space<vmem>>, %arg14: memref<1x4xf32, #tpu.memory_space<vmem>>, %arg15: memref<32x32xf32, #tpu.memory_space<vmem>>, %arg16: memref<1x32xf32, #tpu.memory_space<vmem>>, %arg17: memref<1x32xf32, #tpu.memory_space<vmem>>, %arg18: memref<1x32xf32, #tpu.memory_space<vmem>>, %arg19: memref<32x64xf32, #tpu.memory_space<vmem>>, %arg20: memref<1x64xf32, #tpu.memory_space<vmem>>, %arg21: memref<64x32xf32, #tpu.memory_space<vmem>>, %arg22: memref<1x32xf32, #tpu.memory_space<vmem>>, %arg23: memref<1x8x32xf32, #tpu.memory_space<vmem>>) attributes {dimension_semantics = [#tpu.dimension_semantics<parallel>], iteration_bounds = array<i64: 2>, scalar_prefetch = 0 : i64, scratch_operands = 0 : i64, tpu.core_type = #tpu.core_type<tc>, window_params = [{transform_indices = @transform_0, window_bounds = array<i64: 1, 8, 32>}, {transform_indices = @transform_1, window_bounds = array<i64: 1, 8, 32>}, {transform_indices = @transform_2, window_bounds = array<i64: 1, 8, 2>}, {transform_indices = @transform_3, window_bounds = array<i64: 1, 8, 2>}, {pipeline_mode = #tpu.pipeline_mode<synchronous>, transform_indices = @transform_4, window_bounds = array<i64: 1, 32>}, {pipeline_mode = #tpu.pipeline_mode<synchronous>, transform_indices = @transform_5, window_bounds = array<i64: 1, 32>}, {pipeline_mode = #tpu.pipeline_mode<synchronous>, transform_indices = @transform_6, window_bounds = array<i64: 32, 32>}, {pipeline_mode = #tpu.pipeline_mode<synchronous>, transform_indices = @transform_7, window_bounds = array<i64: 1, 32>}, {pipeline_mode = #tpu.pipeline_mode<synchronous>, transform_indices = @transform_8, window_bounds = array<i64: 32, 64>}, {pipeline_mode = #tpu.pipeline_mode<synchronous>, transform_indices = @transform_9, window_bounds = array<i64: 1, 64>}, {pipeline_mode = #tpu.pipeline_mode<synchronous>, transform_indices = @transform_10, window_bounds = array<i64: 2, 16>}, {pipeline_mode = #tpu.pipeline_mode<synchronous>, transform_indices = @transform_11, window_bounds = array<i64: 1, 16>}, {pipeline_mode = #tpu.pipeline_mode<synchronous>, transform_indices = @transform_12, window_bounds = array<i64: 16, 4>}, {pipeline_mode = #tpu.pipeline_mode<synchronous>, transform_indices = @transform_13, window_bounds = array<i64: 1, 4>}, {pipeline_mode = #tpu.pipeline_mode<synchronous>, transform_indices = @transform_14, window_bounds = array<i64: 32, 32>}, {pipeline_mode = #tpu.pipeline_mode<synchronous>, transform_indices = @transform_15, window_bounds = array<i64: 1, 32>}, {pipeline_mode = #tpu.pipeline_mode<synchronous>, transform_indices = @transform_16, window_bounds = array<i64: 1, 32>}, {pipeline_mode = #tpu.pipeline_mode<synchronous>, transform_indices = @transform_17, window_bounds = array<i64: 1, 32>}, {pipeline_mode = #tpu.pipeline_mode<synchronous>, transform_indices = @transform_18, window_bounds = array<i64: 32, 64>}, {pipeline_mode = #tpu.pipeline_mode<synchronous>, transform_indices = @transform_19, window_bounds = array<i64: 1, 64>}, {pipeline_mode = #tpu.pipeline_mode<synchronous>, transform_indices = @transform_20, window_bounds = array<i64: 64, 32>}, {pipeline_mode = #tpu.pipeline_mode<synchronous>, transform_indices = @transform_21, window_bounds = array<i64: 1, 32>}, {transform_indices = @transform_22, window_bounds = array<i64: 1, 8, 32>}]} {
    %c0 = arith.constant 0 : index
    %c0_0 = arith.constant 0 : index
    %c0_1 = arith.constant 0 : index
    %0 = vector.load %arg1[%c0, %c0_0, %c0_1] : memref<1x8x32xf32, #tpu.memory_space<vmem>>, vector<1x8x32xf32>
    %1 = vector.shape_cast %0 : vector<1x8x32xf32> to vector<8x32xf32>
    %c0_2 = arith.constant 0 : index
    %c0_3 = arith.constant 0 : index
    %2 = vector.load %arg5[%c0_2, %c0_3] : memref<1x32xf32, #tpu.memory_space<vmem>>, vector<1x32xf32>
    %c0_4 = arith.constant 0 : index
    %c0_5 = arith.constant 0 : index
    %3 = vector.load %arg6[%c0_4, %c0_5] : memref<1x32xf32, #tpu.memory_space<vmem>>, vector<1x32xf32>
    %cst = arith.constant dense<0.000000e+00> : vector<8xf32>
    %4 = vector.multi_reduction <add>, %1, %cst [1] : vector<8x32xf32> to vector<8xf32>
    %5 = vector.shape_cast %4 : vector<8xf32> to vector<8x1xf32>
    %cst_6 = arith.constant 3.200000e+01 : f32
    %6 = vector.broadcast %cst_6 : f32 to vector<8x1xf32>
    %7 = arith.divf %5, %6 : vector<8x1xf32>
    %8 = vector.broadcast %7 : vector<8x1xf32> to vector<8x32xf32>
    %9 = arith.subf %1, %8 : vector<8x32xf32>
    %10 = arith.mulf %9, %9 : vector<8x32xf32>
    %cst_7 = arith.constant dense<0.000000e+00> : vector<8xf32>
    %11 = vector.multi_reduction <add>, %10, %cst_7 [1] : vector<8x32xf32> to vector<8xf32>
    %12 = vector.shape_cast %11 : vector<8xf32> to vector<8x1xf32>
    %cst_8 = arith.constant 3.200000e+01 : f32
    %13 = vector.broadcast %cst_8 : f32 to vector<8x1xf32>
    %14 = arith.divf %12, %13 : vector<8x1xf32>
    %15 = vector.broadcast %7 : vector<8x1xf32> to vector<8x32xf32>
    %16 = arith.subf %1, %15 : vector<8x32xf32>
    %cst_9 = arith.constant 9.99999974E-6 : f32
    %17 = vector.broadcast %cst_9 : f32 to vector<8x1xf32>
    %18 = arith.addf %14, %17 : vector<8x1xf32>
    %19 = math.rsqrt %18 : vector<8x1xf32>
    %20 = vector.broadcast %19 : vector<8x1xf32> to vector<8x32xf32>
    %21 = arith.mulf %16, %20 : vector<8x32xf32>
    %22 = vector.broadcast %2 : vector<1x32xf32> to vector<8x32xf32>
    %23 = arith.mulf %21, %22 : vector<8x32xf32>
    %24 = vector.broadcast %3 : vector<1x32xf32> to vector<8x32xf32>
    %25 = arith.addf %23, %24 : vector<8x32xf32>
    %c0_10 = arith.constant 0 : index
    %c0_11 = arith.constant 0 : index
    %c0_12 = arith.constant 0 : index
    %26 = vector.load %arg2[%c0_10, %c0_11, %c0_12] : memref<1x8x32xf32, #tpu.memory_space<vmem>>, vector<1x8x32xf32>
    %27 = vector.shape_cast %26 : vector<1x8x32xf32> to vector<8x32xf32>
    %c0_13 = arith.constant 0 : index
    %c0_14 = arith.constant 0 : index
    %28 = vector.load %arg7[%c0_13, %c0_14] : memref<32x32xf32, #tpu.memory_space<vmem>>, vector<32x32xf32>
    %cst_15 = arith.constant dense<0.000000e+00> : vector<8x32xf32>
    %29 = tpu.matmul %25, %28, %cst_15 {dimension_numbers = #tpu.dot_dimension_numbers<[1], [0], [0], [1], [0, 0, 1, 1], [], []>, precision = #tpu.contract_precision<fp32>} : vector<8x32xf32>, vector<32x32xf32>, vector<8x32xf32> -> vector<8x32xf32>
    %c0_16 = arith.constant 0 : index
    %c0_17 = arith.constant 0 : index
    %30 = vector.load %arg8[%c0_16, %c0_17] : memref<1x32xf32, #tpu.memory_space<vmem>>, vector<1x32xf32>
    %31 = vector.broadcast %30 : vector<1x32xf32> to vector<8x32xf32>
    %32 = arith.addf %29, %31 : vector<8x32xf32>
    %c0_18 = arith.constant 0 : index
    %c0_19 = arith.constant 0 : index
    %33 = vector.load %arg9[%c0_18, %c0_19] : memref<32x64xf32, #tpu.memory_space<vmem>>, vector<32x64xf32>
    %cst_20 = arith.constant dense<0.000000e+00> : vector<8x64xf32>
    %34 = tpu.matmul %27, %33, %cst_20 {dimension_numbers = #tpu.dot_dimension_numbers<[1], [0], [0], [1], [0, 0, 1, 1], [], []>, precision = #tpu.contract_precision<fp32>} : vector<8x32xf32>, vector<32x64xf32>, vector<8x64xf32> -> vector<8x64xf32>
    %c0_21 = arith.constant 0 : index
    %c0_22 = arith.constant 0 : index
    %35 = vector.load %arg10[%c0_21, %c0_22] : memref<1x64xf32, #tpu.memory_space<vmem>>, vector<1x64xf32>
    %36 = vector.broadcast %35 : vector<1x64xf32> to vector<8x64xf32>
    %37 = arith.addf %34, %36 : vector<8x64xf32>
    %38 = vector.extract_strided_slice %37 {offsets = [0, 0], sizes = [8, 32], strides = [1, 1]} : vector<8x64xf32> to vector<8x32xf32>
    %39 = vector.extract_strided_slice %37 {offsets = [0, 32], sizes = [8, 32], strides = [1, 1]} : vector<8x64xf32> to vector<8x32xf32>
    %c0_23 = arith.constant 0 : index
    %c0_24 = arith.constant 0 : index
    %c0_25 = arith.constant 0 : index
    %40 = vector.load %arg3[%c0_23, %c0_24, %c0_25] : memref<1x8x2xf32, #tpu.memory_space<vmem>>, vector<1x8x2xf32>
    %41 = vector.shape_cast %40 : vector<1x8x2xf32> to vector<8x2xf32>
    %c0_26 = arith.constant 0 : index
    %c0_27 = arith.constant 0 : index
    %c0_28 = arith.constant 0 : index
    %42 = vector.load %arg4[%c0_26, %c0_27, %c0_28] : memref<1x8x2xf32, #tpu.memory_space<vmem>>, vector<1x8x2xf32>
    %43 = vector.shape_cast %42 : vector<1x8x2xf32> to vector<8x2xf32>
    %44 = vector.extract_strided_slice %41 {offsets = [0, 0], sizes = [8, 1], strides = [1, 1]} : vector<8x2xf32> to vector<8x1xf32>
    %c0_29 = arith.constant 0 : index
    %c0_30 = arith.constant 0 : index
    %45 = vector.load %arg11[%c0_29, %c0_30] : memref<2x16xf32, #tpu.memory_space<vmem>>, vector<1x16xf32>
    %46 = vector.broadcast %44 : vector<8x1xf32> to vector<8x16xf32>
    %47 = vector.broadcast %45 : vector<1x16xf32> to vector<8x16xf32>
    %48 = arith.mulf %46, %47 : vector<8x16xf32>
    %49 = vector.extract_strided_slice %41 {offsets = [0, 1], sizes = [8, 1], strides = [1, 1]} : vector<8x2xf32> to vector<8x1xf32>
    %c1 = arith.constant 1 : index
    %c0_31 = arith.constant 0 : index
    %50 = vector.load %arg11[%c1, %c0_31] : memref<2x16xf32, #tpu.memory_space<vmem>>, vector<1x16xf32>
    %51 = vector.broadcast %49 : vector<8x1xf32> to vector<8x16xf32>
    %52 = vector.broadcast %50 : vector<1x16xf32> to vector<8x16xf32>
    %53 = arith.mulf %51, %52 : vector<8x16xf32>
    %54 = arith.addf %48, %53 : vector<8x16xf32>
    %55 = vector.extract_strided_slice %43 {offsets = [0, 0], sizes = [8, 1], strides = [1, 1]} : vector<8x2xf32> to vector<8x1xf32>
    %c0_32 = arith.constant 0 : index
    %c0_33 = arith.constant 0 : index
    %56 = vector.load %arg11[%c0_32, %c0_33] : memref<2x16xf32, #tpu.memory_space<vmem>>, vector<1x16xf32>
    %57 = vector.broadcast %55 : vector<8x1xf32> to vector<8x16xf32>
    %58 = vector.broadcast %56 : vector<1x16xf32> to vector<8x16xf32>
    %59 = arith.mulf %57, %58 : vector<8x16xf32>
    %60 = vector.extract_strided_slice %43 {offsets = [0, 1], sizes = [8, 1], strides = [1, 1]} : vector<8x2xf32> to vector<8x1xf32>
    %c1_34 = arith.constant 1 : index
    %c0_35 = arith.constant 0 : index
    %61 = vector.load %arg11[%c1_34, %c0_35] : memref<2x16xf32, #tpu.memory_space<vmem>>, vector<1x16xf32>
    %62 = vector.broadcast %60 : vector<8x1xf32> to vector<8x16xf32>
    %63 = vector.broadcast %61 : vector<1x16xf32> to vector<8x16xf32>
    %64 = arith.mulf %62, %63 : vector<8x16xf32>
    %65 = arith.addf %59, %64 : vector<8x16xf32>
    %c0_36 = arith.constant 0 : index
    %c0_37 = arith.constant 0 : index
    %66 = vector.load %arg12[%c0_36, %c0_37] : memref<1x16xf32, #tpu.memory_space<vmem>>, vector<1x16xf32>
    %67 = vector.shape_cast %54 : vector<8x16xf32> to vector<8x1x16xf32>
    %68 = vector.shape_cast %65 : vector<8x16xf32> to vector<1x8x16xf32>
    %69 = vector.broadcast %67 : vector<8x1x16xf32> to vector<8x8x16xf32>
    %70 = vector.broadcast %68 : vector<1x8x16xf32> to vector<8x8x16xf32>
    %71 = arith.subf %69, %70 : vector<8x8x16xf32>
    %72 = vector.shape_cast %66 : vector<1x16xf32> to vector<1x1x16xf32>
    %73 = vector.broadcast %72 : vector<1x1x16xf32> to vector<8x8x16xf32>
    %74 = arith.addf %71, %73 : vector<8x8x16xf32>
    %cst_38 = arith.constant 0.000000e+00 : f32
    %75 = vector.broadcast %cst_38 : f32 to vector<8x8x16xf32>
    %76 = arith.maximumf %74, %75 : vector<8x8x16xf32>
    %77 = vector.shape_cast %76 : vector<8x8x16xf32> to vector<64x16xf32>
    %c0_39 = arith.constant 0 : index
    %c0_40 = arith.constant 0 : index
    %78 = vector.load %arg13[%c0_39, %c0_40] : memref<16x4xf32, #tpu.memory_space<vmem>>, vector<16x4xf32>
    %cst_41 = arith.constant dense<0.000000e+00> : vector<64x4xf32>
    %79 = tpu.matmul %77, %78, %cst_41 {dimension_numbers = #tpu.dot_dimension_numbers<[1], [0], [0], [1], [0, 0, 1, 1], [], []>, precision = #tpu.contract_precision<fp32>} : vector<64x16xf32>, vector<16x4xf32>, vector<64x4xf32> -> vector<64x4xf32>
    %c0_42 = arith.constant 0 : index
    %c0_43 = arith.constant 0 : index
    %80 = vector.load %arg14[%c0_42, %c0_43] : memref<1x4xf32, #tpu.memory_space<vmem>>, vector<1x4xf32>
    %81 = vector.broadcast %80 : vector<1x4xf32> to vector<64x4xf32>
    %82 = arith.addf %79, %81 : vector<64x4xf32>
    %83 = vector.shape_cast %82 : vector<64x4xf32> to vector<8x8x4xf32>
    %84 = vector.extract_strided_slice %32 {offsets = [0, 0], sizes = [8, 8], strides = [1, 1]} : vector<8x32xf32> to vector<8x8xf32>
    %85 = vector.extract_strided_slice %38 {offsets = [0, 0], sizes = [8, 8], strides = [1, 1]} : vector<8x32xf32> to vector<8x8xf32>
    %86 = vector.extract_strided_slice %39 {offsets = [0, 0], sizes = [8, 8], strides = [1, 1]} : vector<8x32xf32> to vector<8x8xf32>
    %cst_44 = arith.constant dense<0.000000e+00> : vector<8x8xf32>
    %87 = tpu.matmul %84, %85, %cst_44 {dimension_numbers = #tpu.dot_dimension_numbers<[1], [1], [0], [0], [0, 0, 1, 0], [], []>, precision = #tpu.contract_precision<fp32>} : vector<8x8xf32>, vector<8x8xf32>, vector<8x8xf32> -> vector<8x8xf32>
    %cst_45 = arith.constant 0.353553385 : f32
    %88 = vector.broadcast %cst_45 : f32 to vector<8x8xf32>
    %89 = arith.mulf %87, %88 : vector<8x8xf32>
    %90 = vector.extract_strided_slice %83 {offsets = [0, 0, 0], sizes = [8, 8, 1], strides = [1, 1, 1]} : vector<8x8x4xf32> to vector<8x8x1xf32>
    %91 = vector.shape_cast %90 : vector<8x8x1xf32> to vector<8x8xf32>
    %92 = arith.addf %89, %91 : vector<8x8xf32>
    %cst_46 = arith.constant dense<0xFF800000> : vector<8xf32>
    %93 = vector.multi_reduction <maximumf>, %92, %cst_46 [1] : vector<8x8xf32> to vector<8xf32>
    %94 = vector.shape_cast %93 : vector<8xf32> to vector<8x1xf32>
    %95 = vector.broadcast %94 : vector<8x1xf32> to vector<8x8xf32>
    %96 = arith.subf %92, %95 : vector<8x8xf32>
    %97 = math.exp %96 : vector<8x8xf32>
    %cst_47 = arith.constant dense<0.000000e+00> : vector<8xf32>
    %98 = vector.multi_reduction <add>, %97, %cst_47 [1] : vector<8x8xf32> to vector<8xf32>
    %99 = vector.shape_cast %98 : vector<8xf32> to vector<8x1xf32>
    %100 = vector.broadcast %99 : vector<8x1xf32> to vector<8x8xf32>
    %101 = arith.divf %97, %100 : vector<8x8xf32>
    %cst_48 = arith.constant dense<0.000000e+00> : vector<8x8xf32>
    %102 = tpu.matmul %101, %86, %cst_48 {dimension_numbers = #tpu.dot_dimension_numbers<[1], [0], [0], [1], [0, 0, 1, 1], [], []>, precision = #tpu.contract_precision<fp32>} : vector<8x8xf32>, vector<8x8xf32>, vector<8x8xf32> -> vector<8x8xf32>
    %103 = vector.extract_strided_slice %32 {offsets = [0, 8], sizes = [8, 8], strides = [1, 1]} : vector<8x32xf32> to vector<8x8xf32>
    %104 = vector.extract_strided_slice %38 {offsets = [0, 8], sizes = [8, 8], strides = [1, 1]} : vector<8x32xf32> to vector<8x8xf32>
    %105 = vector.extract_strided_slice %39 {offsets = [0, 8], sizes = [8, 8], strides = [1, 1]} : vector<8x32xf32> to vector<8x8xf32>
    %cst_49 = arith.constant dense<0.000000e+00> : vector<8x8xf32>
    %106 = tpu.matmul %103, %104, %cst_49 {dimension_numbers = #tpu.dot_dimension_numbers<[1], [1], [0], [0], [0, 0, 1, 0], [], []>, precision = #tpu.contract_precision<fp32>} : vector<8x8xf32>, vector<8x8xf32>, vector<8x8xf32> -> vector<8x8xf32>
    %cst_50 = arith.constant 0.353553385 : f32
    %107 = vector.broadcast %cst_50 : f32 to vector<8x8xf32>
    %108 = arith.mulf %106, %107 : vector<8x8xf32>
    %109 = vector.extract_strided_slice %83 {offsets = [0, 0, 1], sizes = [8, 8, 1], strides = [1, 1, 1]} : vector<8x8x4xf32> to vector<8x8x1xf32>
    %110 = vector.shape_cast %109 : vector<8x8x1xf32> to vector<8x8xf32>
    %111 = arith.addf %108, %110 : vector<8x8xf32>
    %cst_51 = arith.constant dense<0xFF800000> : vector<8xf32>
    %112 = vector.multi_reduction <maximumf>, %111, %cst_51 [1] : vector<8x8xf32> to vector<8xf32>
    %113 = vector.shape_cast %112 : vector<8xf32> to vector<8x1xf32>
    %114 = vector.broadcast %113 : vector<8x1xf32> to vector<8x8xf32>
    %115 = arith.subf %111, %114 : vector<8x8xf32>
    %116 = math.exp %115 : vector<8x8xf32>
    %cst_52 = arith.constant dense<0.000000e+00> : vector<8xf32>
    %117 = vector.multi_reduction <add>, %116, %cst_52 [1] : vector<8x8xf32> to vector<8xf32>
    %118 = vector.shape_cast %117 : vector<8xf32> to vector<8x1xf32>
    %119 = vector.broadcast %118 : vector<8x1xf32> to vector<8x8xf32>
    %120 = arith.divf %116, %119 : vector<8x8xf32>
    %cst_53 = arith.constant dense<0.000000e+00> : vector<8x8xf32>
    %121 = tpu.matmul %120, %105, %cst_53 {dimension_numbers = #tpu.dot_dimension_numbers<[1], [0], [0], [1], [0, 0, 1, 1], [], []>, precision = #tpu.contract_precision<fp32>} : vector<8x8xf32>, vector<8x8xf32>, vector<8x8xf32> -> vector<8x8xf32>
    %122 = vector.extract_strided_slice %32 {offsets = [0, 16], sizes = [8, 8], strides = [1, 1]} : vector<8x32xf32> to vector<8x8xf32>
    %123 = vector.extract_strided_slice %38 {offsets = [0, 16], sizes = [8, 8], strides = [1, 1]} : vector<8x32xf32> to vector<8x8xf32>
    %124 = vector.extract_strided_slice %39 {offsets = [0, 16], sizes = [8, 8], strides = [1, 1]} : vector<8x32xf32> to vector<8x8xf32>
    %cst_54 = arith.constant dense<0.000000e+00> : vector<8x8xf32>
    %125 = tpu.matmul %122, %123, %cst_54 {dimension_numbers = #tpu.dot_dimension_numbers<[1], [1], [0], [0], [0, 0, 1, 0], [], []>, precision = #tpu.contract_precision<fp32>} : vector<8x8xf32>, vector<8x8xf32>, vector<8x8xf32> -> vector<8x8xf32>
    %cst_55 = arith.constant 0.353553385 : f32
    %126 = vector.broadcast %cst_55 : f32 to vector<8x8xf32>
    %127 = arith.mulf %125, %126 : vector<8x8xf32>
    %128 = vector.extract_strided_slice %83 {offsets = [0, 0, 2], sizes = [8, 8, 1], strides = [1, 1, 1]} : vector<8x8x4xf32> to vector<8x8x1xf32>
    %129 = vector.shape_cast %128 : vector<8x8x1xf32> to vector<8x8xf32>
    %130 = arith.addf %127, %129 : vector<8x8xf32>
    %cst_56 = arith.constant dense<0xFF800000> : vector<8xf32>
    %131 = vector.multi_reduction <maximumf>, %130, %cst_56 [1] : vector<8x8xf32> to vector<8xf32>
    %132 = vector.shape_cast %131 : vector<8xf32> to vector<8x1xf32>
    %133 = vector.broadcast %132 : vector<8x1xf32> to vector<8x8xf32>
    %134 = arith.subf %130, %133 : vector<8x8xf32>
    %135 = math.exp %134 : vector<8x8xf32>
    %cst_57 = arith.constant dense<0.000000e+00> : vector<8xf32>
    %136 = vector.multi_reduction <add>, %135, %cst_57 [1] : vector<8x8xf32> to vector<8xf32>
    %137 = vector.shape_cast %136 : vector<8xf32> to vector<8x1xf32>
    %138 = vector.broadcast %137 : vector<8x1xf32> to vector<8x8xf32>
    %139 = arith.divf %135, %138 : vector<8x8xf32>
    %cst_58 = arith.constant dense<0.000000e+00> : vector<8x8xf32>
    %140 = tpu.matmul %139, %124, %cst_58 {dimension_numbers = #tpu.dot_dimension_numbers<[1], [0], [0], [1], [0, 0, 1, 1], [], []>, precision = #tpu.contract_precision<fp32>} : vector<8x8xf32>, vector<8x8xf32>, vector<8x8xf32> -> vector<8x8xf32>
    %141 = vector.extract_strided_slice %32 {offsets = [0, 24], sizes = [8, 8], strides = [1, 1]} : vector<8x32xf32> to vector<8x8xf32>
    %142 = vector.extract_strided_slice %38 {offsets = [0, 24], sizes = [8, 8], strides = [1, 1]} : vector<8x32xf32> to vector<8x8xf32>
    %143 = vector.extract_strided_slice %39 {offsets = [0, 24], sizes = [8, 8], strides = [1, 1]} : vector<8x32xf32> to vector<8x8xf32>
    %cst_59 = arith.constant dense<0.000000e+00> : vector<8x8xf32>
    %144 = tpu.matmul %141, %142, %cst_59 {dimension_numbers = #tpu.dot_dimension_numbers<[1], [1], [0], [0], [0, 0, 1, 0], [], []>, precision = #tpu.contract_precision<fp32>} : vector<8x8xf32>, vector<8x8xf32>, vector<8x8xf32> -> vector<8x8xf32>
    %cst_60 = arith.constant 0.353553385 : f32
    %145 = vector.broadcast %cst_60 : f32 to vector<8x8xf32>
    %146 = arith.mulf %144, %145 : vector<8x8xf32>
    %147 = vector.extract_strided_slice %83 {offsets = [0, 0, 3], sizes = [8, 8, 1], strides = [1, 1, 1]} : vector<8x8x4xf32> to vector<8x8x1xf32>
    %148 = vector.shape_cast %147 : vector<8x8x1xf32> to vector<8x8xf32>
    %149 = arith.addf %146, %148 : vector<8x8xf32>
    %cst_61 = arith.constant dense<0xFF800000> : vector<8xf32>
    %150 = vector.multi_reduction <maximumf>, %149, %cst_61 [1] : vector<8x8xf32> to vector<8xf32>
    %151 = vector.shape_cast %150 : vector<8xf32> to vector<8x1xf32>
    %152 = vector.broadcast %151 : vector<8x1xf32> to vector<8x8xf32>
    %153 = arith.subf %149, %152 : vector<8x8xf32>
    %154 = math.exp %153 : vector<8x8xf32>
    %cst_62 = arith.constant dense<0.000000e+00> : vector<8xf32>
    %155 = vector.multi_reduction <add>, %154, %cst_62 [1] : vector<8x8xf32> to vector<8xf32>
    %156 = vector.shape_cast %155 : vector<8xf32> to vector<8x1xf32>
    %157 = vector.broadcast %156 : vector<8x1xf32> to vector<8x8xf32>
    %158 = arith.divf %154, %157 : vector<8x8xf32>
    %cst_63 = arith.constant dense<0.000000e+00> : vector<8x8xf32>
    %159 = tpu.matmul %158, %143, %cst_63 {dimension_numbers = #tpu.dot_dimension_numbers<[1], [0], [0], [1], [0, 0, 1, 1], [], []>, precision = #tpu.contract_precision<fp32>} : vector<8x8xf32>, vector<8x8xf32>, vector<8x8xf32> -> vector<8x8xf32>
    %160 = tpu.concatenate %102, %121, %140, %159 in 1 : vector<8x8xf32>, vector<8x8xf32>, vector<8x8xf32>, vector<8x8xf32> -> vector<8x32xf32>
    %c0_64 = arith.constant 0 : index
    %c0_65 = arith.constant 0 : index
    %161 = vector.load %arg15[%c0_64, %c0_65] : memref<32x32xf32, #tpu.memory_space<vmem>>, vector<32x32xf32>
    %cst_66 = arith.constant dense<0.000000e+00> : vector<8x32xf32>
    %162 = tpu.matmul %160, %161, %cst_66 {dimension_numbers = #tpu.dot_dimension_numbers<[1], [0], [0], [1], [0, 0, 1, 1], [], []>, precision = #tpu.contract_precision<fp32>} : vector<8x32xf32>, vector<32x32xf32>, vector<8x32xf32> -> vector<8x32xf32>
    %163 = arith.addf %1, %162 : vector<8x32xf32>
    %c0_67 = arith.constant 0 : index
    %c0_68 = arith.constant 0 : index
    %164 = vector.load %arg16[%c0_67, %c0_68] : memref<1x32xf32, #tpu.memory_space<vmem>>, vector<1x32xf32>
    %165 = vector.broadcast %164 : vector<1x32xf32> to vector<8x32xf32>
    %166 = arith.addf %163, %165 : vector<8x32xf32>
    %c0_69 = arith.constant 0 : index
    %c0_70 = arith.constant 0 : index
    %167 = vector.load %arg17[%c0_69, %c0_70] : memref<1x32xf32, #tpu.memory_space<vmem>>, vector<1x32xf32>
    %c0_71 = arith.constant 0 : index
    %c0_72 = arith.constant 0 : index
    %168 = vector.load %arg18[%c0_71, %c0_72] : memref<1x32xf32, #tpu.memory_space<vmem>>, vector<1x32xf32>
    %cst_73 = arith.constant dense<0.000000e+00> : vector<8xf32>
    %169 = vector.multi_reduction <add>, %166, %cst_73 [1] : vector<8x32xf32> to vector<8xf32>
    %170 = vector.shape_cast %169 : vector<8xf32> to vector<8x1xf32>
    %cst_74 = arith.constant 3.200000e+01 : f32
    %171 = vector.broadcast %cst_74 : f32 to vector<8x1xf32>
    %172 = arith.divf %170, %171 : vector<8x1xf32>
    %173 = vector.broadcast %172 : vector<8x1xf32> to vector<8x32xf32>
    %174 = arith.subf %166, %173 : vector<8x32xf32>
    %175 = arith.mulf %174, %174 : vector<8x32xf32>
    %cst_75 = arith.constant dense<0.000000e+00> : vector<8xf32>
    %176 = vector.multi_reduction <add>, %175, %cst_75 [1] : vector<8x32xf32> to vector<8xf32>
    %177 = vector.shape_cast %176 : vector<8xf32> to vector<8x1xf32>
    %cst_76 = arith.constant 3.200000e+01 : f32
    %178 = vector.broadcast %cst_76 : f32 to vector<8x1xf32>
    %179 = arith.divf %177, %178 : vector<8x1xf32>
    %180 = vector.broadcast %172 : vector<8x1xf32> to vector<8x32xf32>
    %181 = arith.subf %166, %180 : vector<8x32xf32>
    %cst_77 = arith.constant 9.99999974E-6 : f32
    %182 = vector.broadcast %cst_77 : f32 to vector<8x1xf32>
    %183 = arith.addf %179, %182 : vector<8x1xf32>
    %184 = math.rsqrt %183 : vector<8x1xf32>
    %185 = vector.broadcast %184 : vector<8x1xf32> to vector<8x32xf32>
    %186 = arith.mulf %181, %185 : vector<8x32xf32>
    %187 = vector.broadcast %167 : vector<1x32xf32> to vector<8x32xf32>
    %188 = arith.mulf %186, %187 : vector<8x32xf32>
    %189 = vector.broadcast %168 : vector<1x32xf32> to vector<8x32xf32>
    %190 = arith.addf %188, %189 : vector<8x32xf32>
    %c0_78 = arith.constant 0 : index
    %c0_79 = arith.constant 0 : index
    %191 = vector.load %arg19[%c0_78, %c0_79] : memref<32x64xf32, #tpu.memory_space<vmem>>, vector<32x64xf32>
    %cst_80 = arith.constant dense<0.000000e+00> : vector<8x64xf32>
    %192 = tpu.matmul %190, %191, %cst_80 {dimension_numbers = #tpu.dot_dimension_numbers<[1], [0], [0], [1], [0, 0, 1, 1], [], []>, precision = #tpu.contract_precision<fp32>} : vector<8x32xf32>, vector<32x64xf32>, vector<8x64xf32> -> vector<8x64xf32>
    %c0_81 = arith.constant 0 : index
    %c0_82 = arith.constant 0 : index
    %193 = vector.load %arg20[%c0_81, %c0_82] : memref<1x64xf32, #tpu.memory_space<vmem>>, vector<1x64xf32>
    %194 = vector.broadcast %193 : vector<1x64xf32> to vector<8x64xf32>
    %195 = arith.addf %192, %194 : vector<8x64xf32>
    %cst_83 = arith.constant 0.000000e+00 : f32
    %196 = vector.broadcast %cst_83 : f32 to vector<8x64xf32>
    %197 = arith.maximumf %195, %196 : vector<8x64xf32>
    %c0_84 = arith.constant 0 : index
    %c0_85 = arith.constant 0 : index
    %198 = vector.load %arg21[%c0_84, %c0_85] : memref<64x32xf32, #tpu.memory_space<vmem>>, vector<64x32xf32>
    %cst_86 = arith.constant dense<0.000000e+00> : vector<8x32xf32>
    %199 = tpu.matmul %197, %198, %cst_86 {dimension_numbers = #tpu.dot_dimension_numbers<[1], [0], [0], [1], [0, 0, 1, 1], [], []>, precision = #tpu.contract_precision<fp32>} : vector<8x64xf32>, vector<64x32xf32>, vector<8x32xf32> -> vector<8x32xf32>
    %c0_87 = arith.constant 0 : index
    %c0_88 = arith.constant 0 : index
    %200 = vector.load %arg22[%c0_87, %c0_88] : memref<1x32xf32, #tpu.memory_space<vmem>>, vector<1x32xf32>
    %201 = vector.broadcast %200 : vector<1x32xf32> to vector<8x32xf32>
    %202 = arith.addf %199, %201 : vector<8x32xf32>
    %203 = arith.addf %166, %202 : vector<8x32xf32>
    %c0_89 = arith.constant 0 : index
    %c0_90 = arith.constant 0 : index
    %c0_91 = arith.constant 0 : index
    %204 = vector.load %arg23[%c0_89, %c0_90, %c0_91] : memref<1x8x32xf32, #tpu.memory_space<vmem>>, vector<1x8x32xf32>
    %205 = vector.shape_cast %204 : vector<1x8x32xf32> to vector<8x32xf32>
    %206 = vector.shape_cast %203 : vector<8x32xf32> to vector<1x8x32xf32>
    tpu.vector_store %arg23[%c0_89, %c0_90, %c0_91], %206 {strides = array<i32>} : memref<1x8x32xf32, #tpu.memory_space<vmem>>, vector<1x8x32xf32>,
    return
  }
  func.func @transform_0(%arg0: i32) -> (i32, i32, i32) {
    %c0_i32 = arith.constant 0 : i32
    %c0_i32_0 = arith.constant 0 : i32
    %c0_i32_1 = arith.constant 0 : i32
    return %arg0, %c0_i32, %c0_i32_0 : i32, i32, i32
  }
  func.func @transform_1(%arg0: i32) -> (i32, i32, i32) {
    %c0_i32 = arith.constant 0 : i32
    %c0_i32_0 = arith.constant 0 : i32
    %c0_i32_1 = arith.constant 0 : i32
    return %arg0, %c0_i32, %c0_i32_0 : i32, i32, i32
  }
  func.func @transform_2(%arg0: i32) -> (i32, i32, i32) {
    %c0_i32 = arith.constant 0 : i32
    %c0_i32_0 = arith.constant 0 : i32
    %c0_i32_1 = arith.constant 0 : i32
    return %arg0, %c0_i32, %c0_i32_0 : i32, i32, i32
  }
  func.func @transform_3(%arg0: i32) -> (i32, i32, i32) {
    %c0_i32 = arith.constant 0 : i32
    %c0_i32_0 = arith.constant 0 : i32
    %c0_i32_1 = arith.constant 0 : i32
    return %arg0, %c0_i32, %c0_i32_0 : i32, i32, i32
  }
  func.func @transform_4(%arg0: i32) -> (i32, i32) {
    %c0_i32 = arith.constant 0 : i32
    %c0_i32_0 = arith.constant 0 : i32
    %c0_i32_1 = arith.constant 0 : i32
    return %c0_i32, %c0_i32_0 : i32, i32
  }
  func.func @transform_5(%arg0: i32) -> (i32, i32) {
    %c0_i32 = arith.constant 0 : i32
    %c0_i32_0 = arith.constant 0 : i32
    %c0_i32_1 = arith.constant 0 : i32
    return %c0_i32, %c0_i32_0 : i32, i32
  }
  func.func @transform_6(%arg0: i32) -> (i32, i32) {
    %c0_i32 = arith.constant 0 : i32
    %c0_i32_0 = arith.constant 0 : i32
    %c0_i32_1 = arith.constant 0 : i32
    return %c0_i32, %c0_i32_0 : i32, i32
  }
  func.func @transform_7(%arg0: i32) -> (i32, i32) {
    %c0_i32 = arith.constant 0 : i32
    %c0_i32_0 = arith.constant 0 : i32
    %c0_i32_1 = arith.constant 0 : i32
    return %c0_i32, %c0_i32_0 : i32, i32
  }
  func.func @transform_8(%arg0: i32) -> (i32, i32) {
    %c0_i32 = arith.constant 0 : i32
    %c0_i32_0 = arith.constant 0 : i32
    %c0_i32_1 = arith.constant 0 : i32
    return %c0_i32, %c0_i32_0 : i32, i32
  }
  func.func @transform_9(%arg0: i32) -> (i32, i32) {
    %c0_i32 = arith.constant 0 : i32
    %c0_i32_0 = arith.constant 0 : i32
    %c0_i32_1 = arith.constant 0 : i32
    return %c0_i32, %c0_i32_0 : i32, i32
  }
  func.func @transform_10(%arg0: i32) -> (i32, i32) {
    %c0_i32 = arith.constant 0 : i32
    %c0_i32_0 = arith.constant 0 : i32
    %c0_i32_1 = arith.constant 0 : i32
    return %c0_i32, %c0_i32_0 : i32, i32
  }
  func.func @transform_11(%arg0: i32) -> (i32, i32) {
    %c0_i32 = arith.constant 0 : i32
    %c0_i32_0 = arith.constant 0 : i32
    %c0_i32_1 = arith.constant 0 : i32
    return %c0_i32, %c0_i32_0 : i32, i32
  }
  func.func @transform_12(%arg0: i32) -> (i32, i32) {
    %c0_i32 = arith.constant 0 : i32
    %c0_i32_0 = arith.constant 0 : i32
    %c0_i32_1 = arith.constant 0 : i32
    return %c0_i32, %c0_i32_0 : i32, i32
  }
  func.func @transform_13(%arg0: i32) -> (i32, i32) {
    %c0_i32 = arith.constant 0 : i32
    %c0_i32_0 = arith.constant 0 : i32
    %c0_i32_1 = arith.constant 0 : i32
    return %c0_i32, %c0_i32_0 : i32, i32
  }
  func.func @transform_14(%arg0: i32) -> (i32, i32) {
    %c0_i32 = arith.constant 0 : i32
    %c0_i32_0 = arith.constant 0 : i32
    %c0_i32_1 = arith.constant 0 : i32
    return %c0_i32, %c0_i32_0 : i32, i32
  }
  func.func @transform_15(%arg0: i32) -> (i32, i32) {
    %c0_i32 = arith.constant 0 : i32
    %c0_i32_0 = arith.constant 0 : i32
    %c0_i32_1 = arith.constant 0 : i32
    return %c0_i32, %c0_i32_0 : i32, i32
  }
  func.func @transform_16(%arg0: i32) -> (i32, i32) {
    %c0_i32 = arith.constant 0 : i32
    %c0_i32_0 = arith.constant 0 : i32
    %c0_i32_1 = arith.constant 0 : i32
    return %c0_i32, %c0_i32_0 : i32, i32
  }
  func.func @transform_17(%arg0: i32) -> (i32, i32) {
    %c0_i32 = arith.constant 0 : i32
    %c0_i32_0 = arith.constant 0 : i32
    %c0_i32_1 = arith.constant 0 : i32
    return %c0_i32, %c0_i32_0 : i32, i32
  }
  func.func @transform_18(%arg0: i32) -> (i32, i32) {
    %c0_i32 = arith.constant 0 : i32
    %c0_i32_0 = arith.constant 0 : i32
    %c0_i32_1 = arith.constant 0 : i32
    return %c0_i32, %c0_i32_0 : i32, i32
  }
  func.func @transform_19(%arg0: i32) -> (i32, i32) {
    %c0_i32 = arith.constant 0 : i32
    %c0_i32_0 = arith.constant 0 : i32
    %c0_i32_1 = arith.constant 0 : i32
    return %c0_i32, %c0_i32_0 : i32, i32
  }
  func.func @transform_20(%arg0: i32) -> (i32, i32) {
    %c0_i32 = arith.constant 0 : i32
    %c0_i32_0 = arith.constant 0 : i32
    %c0_i32_1 = arith.constant 0 : i32
    return %c0_i32, %c0_i32_0 : i32, i32
  }
  func.func @transform_21(%arg0: i32) -> (i32, i32) {
    %c0_i32 = arith.constant 0 : i32
    %c0_i32_0 = arith.constant 0 : i32
    %c0_i32_1 = arith.constant 0 : i32
    return %c0_i32, %c0_i32_0 : i32, i32
  }
  func.func @transform_22(%arg0: i32) -> (i32, i32, i32) {
    %c0_i32 = arith.constant 0 : i32
    %c0_i32_0 = arith.constant 0 : i32
    %c0_i32_1 = arith.constant 0 : i32
    return %arg0, %c0_i32, %c0_i32_0 : i32, i32, i32
  }
}

module attributes {stable_mosaic.version = 11 : i64} {
  func.func @_te_block_kernel(%arg0: i32, %arg1: memref<1x8x32xf32, #tpu.memory_space<vmem>>, %arg2: memref<1x8x32xf32, #tpu.memory_space<vmem>>, %arg3: memref<1x8x2xf32, #tpu.memory_space<vmem>>, %arg4: memref<1x8x2xf32, #tpu.memory_space<vmem>>, %arg5: memref<1x32xf32, #tpu.memory_space<vmem>>, %arg6: memref<1x32xf32, #tpu.memory_space<vmem>>, %arg7: memref<32x32xf32, #tpu.memory_space<vmem>>, %arg8: memref<1x32xf32, #tpu.memory_space<vmem>>, %arg9: memref<32x64xf32, #tpu.memory_space<vmem>>, %arg10: memref<1x64xf32, #tpu.memory_space<vmem>>, %arg11: memref<2x16xf32, #tpu.memory_space<vmem>>, %arg12: memref<1x16xf32, #tpu.memory_space<vmem>>, %arg13: memref<16x4xf32, #tpu.memory_space<vmem>>, %arg14: memref<1x4xf32, #tpu.memory_space<vmem>>, %arg15: memref<32x32xf32, #tpu.memory_space<vmem>>, %arg16: memref<1x32xf32, #tpu.memory_space<vmem>>, %arg17: memref<1x32xf32, #tpu.memory_space<vmem>>, %arg18: memref<1x32xf32, #tpu.memory_space<vmem>>, %arg19: memref<32x64xf32, #tpu.memory_space<vmem>>, %arg20: memref<1x64xf32, #tpu.memory_space<vmem>>, %arg21: memref<64x32xf32, #tpu.memory_space<vmem>>, %arg22: memref<1x32xf32, #tpu.memory_space<vmem>>, %arg23: memref<1x8x32xf32, #tpu.memory_space<vmem>>) attributes {dimension_semantics = [#tpu.dimension_semantics<parallel>], iteration_bounds = array<i64: 2>, scalar_prefetch = 0 : i64, scratch_operands = 0 : i64, tpu.core_type = #tpu.core_type<tc>, window_params = [{transform_indices = @transform_0, window_bounds = array<i64: 1, 8, 32>}, {transform_indices = @transform_1, window_bounds = array<i64: 1, 8, 32>}, {transform_indices = @transform_2, window_bounds = array<i64: 1, 8, 2>}, {transform_indices = @transform_3, window_bounds = array<i64: 1, 8, 2>}, {pipeline_mode = #tpu.pipeline_mode<synchronous>, transform_indices = @transform_4, window_bounds = array<i64: 1, 32>}, {pipeline_mode = #tpu.pipeline_mode<synchronous>, transform_indices = @transform_5, window_bounds = array<i64: 1, 32>}, {pipeline_mode = #tpu.pipeline_mode<synchronous>, transform_indices = @transform_6, window_bounds = array<i64: 32, 32>}, {pipeline_mode = #tpu.pipeline_mode<synchronous>, transform_indices = @transform_7, window_bounds = array<i64: 1, 32>}, {pipeline_mode = #tpu.pipeline_mode<synchronous>, transform_indices = @transform_8, window_bounds = array<i64: 32, 64>}, {pipeline_mode = #tpu.pipeline_mode<synchronous>, transform_indices = @transform_9, window_bounds = array<i64: 1, 64>}, {pipeline_mode = #tpu.pipeline_mode<synchronous>, transform_indices = @transform_10, window_bounds = array<i64: 2, 16>}, {pipeline_mode = #tpu.pipeline_mode<synchronous>, transform_indices = @transform_11, window_bounds = array<i64: 1, 16>}, {pipeline_mode = #tpu.pipeline_mode<synchronous>, transform_indices = @transform_12, window_bounds = array<i64: 16, 4>}, {pipeline_mode = #tpu.pipeline_mode<synchronous>, transform_indices = @transform_13, window_bounds = array<i64: 1, 4>}, {pipeline_mode = #tpu.pipeline_mode<synchronous>, transform_indices = @transform_14, window_bounds = array<i64: 32, 32>}, {pipeline_mode = #tpu.pipeline_mode<synchronous>, transform_indices = @transform_15, window_bounds = array<i64: 1, 32>}, {pipeline_mode = #tpu.pipeline_mode<synchronous>, transform_indices = @transform_16, window_bounds = array<i64: 1, 32>}, {pipeline_mode = #tpu.pipeline_mode<synchronous>, transform_indices = @transform_17, window_bounds = array<i64: 1, 32>}, {pipeline_mode = #tpu.pipeline_mode<synchronous>, transform_indices = @transform_18, window_bounds = array<i64: 32, 64>}, {pipeline_mode = #tpu.pipeline_mode<synchronous>, transform_indices = @transform_19, window_bounds = array<i64: 1, 64>}, {pipeline_mode = #tpu.pipeline_mode<synchronous>, transform_indices = @transform_20, window_bounds = array<i64: 64, 32>}, {pipeline_mode = #tpu.pipeline_mode<synchronous>, transform_indices = @transform_21, window_bounds = array<i64: 1, 32>}, {transform_indices = @transform_22, window_bounds = array<i64: 1, 8, 32>}]} {
    %c0 = arith.constant 0 : index
    %c0_0 = arith.constant 0 : index
    %c0_1 = arith.constant 0 : index
    %0 = vector.load %arg1[%c0, %c0_0, %c0_1] : memref<1x8x32xf32, #tpu.memory_space<vmem>>, vector<1x8x32xf32>
    %1 = vector.shape_cast %0 : vector<1x8x32xf32> to vector<8x32xf32>
    %c0_2 = arith.constant 0 : index
    %c0_3 = arith.constant 0 : index
    %2 = vector.load %arg5[%c0_2, %c0_3] : memref<1x32xf32, #tpu.memory_space<vmem>>, vector<1x32xf32>
    %c0_4 = arith.constant 0 : index
    %c0_5 = arith.constant 0 : index
    %3 = vector.load %arg6[%c0_4, %c0_5] : memref<1x32xf32, #tpu.memory_space<vmem>>, vector<1x32xf32>
    %cst = arith.constant dense<0.000000e+00> : vector<8xf32>
    %4 = vector.multi_reduction <add>, %1, %cst [1] : vector<8x32xf32> to vector<8xf32>
    %5 = vector.shape_cast %4 : vector<8xf32> to vector<8x1xf32>
    %cst_6 = arith.constant 3.200000e+01 : f32
    %6 = vector.broadcast %cst_6 : f32 to vector<8x1xf32>
    %7 = arith.divf %5, %6 : vector<8x1xf32>
    %8 = vector.broadcast %7 : vector<8x1xf32> to vector<8x32xf32>
    %9 = arith.subf %1, %8 : vector<8x32xf32>
    %10 = arith.mulf %9, %9 : vector<8x32xf32>
    %cst_7 = arith.constant dense<0.000000e+00> : vector<8xf32>
    %11 = vector.multi_reduction <add>, %10, %cst_7 [1] : vector<8x32xf32> to vector<8xf32>
    %12 = vector.shape_cast %11 : vector<8xf32> to vector<8x1xf32>
    %cst_8 = arith.constant 3.200000e+01 : f32
    %13 = vector.broadcast %cst_8 : f32 to vector<8x1xf32>
    %14 = arith.divf %12, %13 : vector<8x1xf32>
    %15 = vector.broadcast %7 : vector<8x1xf32> to vector<8x32xf32>
    %16 = arith.subf %1, %15 : vector<8x32xf32>
    %cst_9 = arith.constant 9.99999974E-6 : f32
    %17 = vector.broadcast %cst_9 : f32 to vector<8x1xf32>
    %18 = arith.addf %14, %17 : vector<8x1xf32>
    %19 = math.rsqrt %18 : vector<8x1xf32>
    %20 = vector.broadcast %19 : vector<8x1xf32> to vector<8x32xf32>
    %21 = arith.mulf %16, %20 : vector<8x32xf32>
    %22 = vector.broadcast %2 : vector<1x32xf32> to vector<8x32xf32>
    %23 = arith.mulf %21, %22 : vector<8x32xf32>
    %24 = vector.broadcast %3 : vector<1x32xf32> to vector<8x32xf32>
    %25 = arith.addf %23, %24 : vector<8x32xf32>
    %c0_10 = arith.constant 0 : index
    %c0_11 = arith.constant 0 : index
    %c0_12 = arith.constant 0 : index
    %26 = vector.load %arg2[%c0_10, %c0_11, %c0_12] : memref<1x8x32xf32, #tpu.memory_space<vmem>>, vector<1x8x32xf32>
    %27 = vector.shape_cast %26 : vector<1x8x32xf32> to vector<8x32xf32>
    %c0_13 = arith.constant 0 : index
    %c0_14 = arith.constant 0 : index
    %28 = vector.load %arg7[%c0_13, %c0_14] : memref<32x32xf32, #tpu.memory_space<vmem>>, vector<32x32xf32>
    %cst_15 = arith.constant dense<0.000000e+00> : vector<8x32xf32>
    %29 = tpu.matmul %25, %28, %cst_15 {dimension_numbers = #tpu.dot_dimension_numbers<[1], [0], [0], [1], [0, 0, 1, 1], [], []>, precision = #tpu.contract_precision<fp32>} : vector<8x32xf32>, vector<32x32xf32>, vector<8x32xf32> -> vector<8x32xf32>
    %c0_16 = arith.constant 0 : index
    %c0_17 = arith.constant 0 : index
    %30 = vector.load %arg8[%c0_16, %c0_17] : memref<1x32xf32, #tpu.memory_space<vmem>>, vector<1x32xf32>
    %31 = vector.broadcast %30 : vector<1x32xf32> to vector<8x32xf32>
    %32 = arith.addf %29, %31 : vector<8x32xf32>
    %c0_18 = arith.constant 0 : index
    %c0_19 = arith.constant 0 : index
    %33 = vector.load %arg9[%c0_18, %c0_19] : memref<32x64xf32, #tpu.memory_space<vmem>>, vector<32x64xf32>
    %cst_20 = arith.constant dense<0.000000e+00> : vector<8x64xf32>
    %34 = tpu.matmul %27, %33, %cst_20 {dimension_numbers = #tpu.dot_dimension_numbers<[1], [0], [0], [1], [0, 0, 1, 1], [], []>, precision = #tpu.contract_precision<fp32>} : vector<8x32xf32>, vector<32x64xf32>, vector<8x64xf32> -> vector<8x64xf32>
    %c0_21 = arith.constant 0 : index
    %c0_22 = arith.constant 0 : index
    %35 = vector.load %arg10[%c0_21, %c0_22] : memref<1x64xf32, #tpu.memory_space<vmem>>, vector<1x64xf32>
    %36 = vector.broadcast %35 : vector<1x64xf32> to vector<8x64xf32>
    %37 = arith.addf %34, %36 : vector<8x64xf32>
    %38 = vector.extract_strided_slice %37 {offsets = [0, 0], sizes = [8, 32], strides = [1, 1]} : vector<8x64xf32> to vector<8x32xf32>
    %39 = vector.extract_strided_slice %37 {offsets = [0, 32], sizes = [8, 32], strides = [1, 1]} : vector<8x64xf32> to vector<8x32xf32>
    %c0_23 = arith.constant 0 : index
    %c0_24 = arith.constant 0 : index
    %c0_25 = arith.constant 0 : index
    %40 = vector.load %arg3[%c0_23, %c0_24, %c0_25] : memref<1x8x2xf32, #tpu.memory_space<vmem>>, vector<1x8x2xf32>
    %41 = vector.shape_cast %40 : vector<1x8x2xf32> to vector<8x2xf32>
    %c0_26 = arith.constant 0 : index
    %c0_27 = arith.constant 0 : index
    %c0_28 = arith.constant 0 : index
    %42 = vector.load %arg4[%c0_26, %c0_27, %c0_28] : memref<1x8x2xf32, #tpu.memory_space<vmem>>, vector<1x8x2xf32>
    %43 = vector.shape_cast %42 : vector<1x8x2xf32> to vector<8x2xf32>
    %44 = vector.extract_strided_slice %41 {offsets = [0, 0], sizes = [8, 1], strides = [1, 1]} : vector<8x2xf32> to vector<8x1xf32>
    %c0_29 = arith.constant 0 : index
    %c0_30 = arith.constant 0 : index
    %45 = vector.load %arg11[%c0_29, %c0_30] : memref<2x16xf32, #tpu.memory_space<vmem>>, vector<1x16xf32>
    %46 = vector.broadcast %44 : vector<8x1xf32> to vector<8x16xf32>
    %47 = vector.broadcast %45 : vector<1x16xf32> to vector<8x16xf32>
    %48 = arith.mulf %46, %47 : vector<8x16xf32>
    %49 = vector.extract_strided_slice %41 {offsets = [0, 1], sizes = [8, 1], strides = [1, 1]} : vector<8x2xf32> to vector<8x1xf32>
    %c1 = arith.constant 1 : index
    %c0_31 = arith.constant 0 : index
    %50 = vector.load %arg11[%c1, %c0_31] : memref<2x16xf32, #tpu.memory_space<vmem>>, vector<1x16xf32>
    %51 = vector.broadcast %49 : vector<8x1xf32> to vector<8x16xf32>
    %52 = vector.broadcast %50 : vector<1x16xf32> to vector<8x16xf32>
    %53 = arith.mulf %51, %52 : vector<8x16xf32>
    %54 = arith.addf %48, %53 : vector<8x16xf32>
    %55 = vector.extract_strided_slice %43 {offsets = [0, 0], sizes = [8, 1], strides = [1, 1]} : vector<8x2xf32> to vector<8x1xf32>
    %c0_32 = arith.constant 0 : index
    %c0_33 = arith.constant 0 : index
    %56 = vector.load %arg11[%c0_32, %c0_33] : memref<2x16xf32, #tpu.memory_space<vmem>>, vector<1x16xf32>
    %57 = vector.broadcast %55 : vector<8x1xf32> to vector<8x16xf32>
    %58 = vector.broadcast %56 : vector<1x16xf32> to vector<8x16xf32>
    %59 = arith.mulf %57, %58 : vector<8x16xf32>
    %60 = vector.extract_strided_slice %43 {offsets = [0, 1], sizes = [8, 1], strides = [1, 1]} : vector<8x2xf32> to vector<8x1xf32>
    %c1_34 = arith.constant 1 : index
    %c0_35 = arith.constant 0 : index
    %61 = vector.load %arg11[%c1_34, %c0_35] : memref<2x16xf32, #tpu.memory_space<vmem>>, vector<1x16xf32>
    %62 = vector.broadcast %60 : vector<8x1xf32> to vector<8x16xf32>
    %63 = vector.broadcast %61 : vector<1x16xf32> to vector<8x16xf32>
    %64 = arith.mulf %62, %63 : vector<8x16xf32>
    %65 = arith.addf %59, %64 : vector<8x16xf32>
    %c0_36 = arith.constant 0 : index
    %c0_37 = arith.constant 0 : index
    %66 = vector.load %arg12[%c0_36, %c0_37] : memref<1x16xf32, #tpu.memory_space<vmem>>, vector<1x16xf32>
    %67 = vector.shape_cast %54 : vector<8x16xf32> to vector<8x1x16xf32>
    %68 = vector.shape_cast %65 : vector<8x16xf32> to vector<1x8x16xf32>
    %69 = vector.broadcast %67 : vector<8x1x16xf32> to vector<8x8x16xf32>
    %70 = vector.broadcast %68 : vector<1x8x16xf32> to vector<8x8x16xf32>
    %71 = arith.subf %69, %70 : vector<8x8x16xf32>
    %72 = vector.shape_cast %66 : vector<1x16xf32> to vector<1x1x16xf32>
    %73 = vector.broadcast %72 : vector<1x1x16xf32> to vector<8x8x16xf32>
    %74 = arith.addf %71, %73 : vector<8x8x16xf32>
    %cst_38 = arith.constant 0.000000e+00 : f32
    %75 = vector.broadcast %cst_38 : f32 to vector<8x8x16xf32>
    %76 = arith.maximumf %74, %75 : vector<8x8x16xf32>
    %77 = vector.shape_cast %76 : vector<8x8x16xf32> to vector<64x16xf32>
    %c0_39 = arith.constant 0 : index
    %c0_40 = arith.constant 0 : index
    %78 = vector.load %arg13[%c0_39, %c0_40] : memref<16x4xf32, #tpu.memory_space<vmem>>, vector<16x4xf32>
    %cst_41 = arith.constant dense<0.000000e+00> : vector<64x4xf32>
    %79 = tpu.matmul %77, %78, %cst_41 {dimension_numbers = #tpu.dot_dimension_numbers<[1], [0], [0], [1], [0, 0, 1, 1], [], []>, precision = #tpu.contract_precision<fp32>} : vector<64x16xf32>, vector<16x4xf32>, vector<64x4xf32> -> vector<64x4xf32>
    %c0_42 = arith.constant 0 : index
    %c0_43 = arith.constant 0 : index
    %80 = vector.load %arg14[%c0_42, %c0_43] : memref<1x4xf32, #tpu.memory_space<vmem>>, vector<1x4xf32>
    %81 = vector.broadcast %80 : vector<1x4xf32> to vector<64x4xf32>
    %82 = arith.addf %79, %81 : vector<64x4xf32>
    %83 = vector.shape_cast %82 : vector<64x4xf32> to vector<8x8x4xf32>
    %84 = vector.extract_strided_slice %32 {offsets = [0, 0], sizes = [8, 8], strides = [1, 1]} : vector<8x32xf32> to vector<8x8xf32>
    %85 = vector.extract_strided_slice %38 {offsets = [0, 0], sizes = [8, 8], strides = [1, 1]} : vector<8x32xf32> to vector<8x8xf32>
    %86 = vector.extract_strided_slice %39 {offsets = [0, 0], sizes = [8, 8], strides = [1, 1]} : vector<8x32xf32> to vector<8x8xf32>
    %cst_44 = arith.constant dense<0.000000e+00> : vector<8x8xf32>
    %87 = tpu.matmul %84, %85, %cst_44 {dimension_numbers = #tpu.dot_dimension_numbers<[1], [1], [0], [0], [0, 0, 1, 0], [], []>, precision = #tpu.contract_precision<fp32>} : vector<8x8xf32>, vector<8x8xf32>, vector<8x8xf32> -> vector<8x8xf32>
    %cst_45 = arith.constant 0.353553385 : f32
    %88 = vector.broadcast %cst_45 : f32 to vector<8x8xf32>
    %89 = arith.mulf %87, %88 : vector<8x8xf32>
    %90 = vector.extract_strided_slice %83 {offsets = [0, 0, 0], sizes = [8, 8, 1], strides = [1, 1, 1]} : vector<8x8x4xf32> to vector<8x8x1xf32>
    %91 = vector.shape_cast %90 : vector<8x8x1xf32> to vector<8x8xf32>
    %92 = arith.addf %89, %91 : vector<8x8xf32>
    %cst_46 = arith.constant dense<0xFF800000> : vector<8xf32>
    %93 = vector.multi_reduction <maximumf>, %92, %cst_46 [1] : vector<8x8xf32> to vector<8xf32>
    %94 = vector.shape_cast %93 : vector<8xf32> to vector<8x1xf32>
    %95 = vector.broadcast %94 : vector<8x1xf32> to vector<8x8xf32>
    %96 = arith.subf %92, %95 : vector<8x8xf32>
    %97 = math.exp %96 : vector<8x8xf32>
    %cst_47 = arith.constant dense<0.000000e+00> : vector<8xf32>
    %98 = vector.multi_reduction <add>, %97, %cst_47 [1] : vector<8x8xf32> to vector<8xf32>
    %99 = vector.shape_cast %98 : vector<8xf32> to vector<8x1xf32>
    %100 = vector.broadcast %99 : vector<8x1xf32> to vector<8x8xf32>
    %101 = arith.divf %97, %100 : vector<8x8xf32>
    %cst_48 = arith.constant dense<0.000000e+00> : vector<8x8xf32>
    %102 = tpu.matmul %101, %86, %cst_48 {dimension_numbers = #tpu.dot_dimension_numbers<[1], [0], [0], [1], [0, 0, 1, 1], [], []>, precision = #tpu.contract_precision<fp32>} : vector<8x8xf32>, vector<8x8xf32>, vector<8x8xf32> -> vector<8x8xf32>
    %103 = vector.extract_strided_slice %32 {offsets = [0, 8], sizes = [8, 8], strides = [1, 1]} : vector<8x32xf32> to vector<8x8xf32>
    %104 = vector.extract_strided_slice %38 {offsets = [0, 8], sizes = [8, 8], strides = [1, 1]} : vector<8x32xf32> to vector<8x8xf32>
    %105 = vector.extract_strided_slice %39 {offsets = [0, 8], sizes = [8, 8], strides = [1, 1]} : vector<8x32xf32> to vector<8x8xf32>
    %cst_49 = arith.constant dense<0.000000e+00> : vector<8x8xf32>
    %106 = tpu.matmul %103, %104, %cst_49 {dimension_numbers = #tpu.dot_dimension_numbers<[1], [1], [0], [0], [0, 0, 1, 0], [], []>, precision = #tpu.contract_precision<fp32>} : vector<8x8xf32>, vector<8x8xf32>, vector<8x8xf32> -> vector<8x8xf32>
    %cst_50 = arith.constant 0.353553385 : f32
    %107 = vector.broadcast %cst_50 : f32 to vector<8x8xf32>
    %108 = arith.mulf %106, %107 : vector<8x8xf32>
    %109 = vector.extract_strided_slice %83 {offsets = [0, 0, 1], sizes = [8, 8, 1], strides = [1, 1, 1]} : vector<8x8x4xf32> to vector<8x8x1xf32>
    %110 = vector.shape_cast %109 : vector<8x8x1xf32> to vector<8x8xf32>
    %111 = arith.addf %108, %110 : vector<8x8xf32>
    %cst_51 = arith.constant dense<0xFF800000> : vector<8xf32>
    %112 = vector.multi_reduction <maximumf>, %111, %cst_51 [1] : vector<8x8xf32> to vector<8xf32>
    %113 = vector.shape_cast %112 : vector<8xf32> to vector<8x1xf32>
    %114 = vector.broadcast %113 : vector<8x1xf32> to vector<8x8xf32>
    %115 = arith.subf %111, %114 : vector<8x8xf32>
    %116 = math.exp %115 : vector<8x8xf32>
    %cst_52 = arith.constant dense<0.000000e+00> : vector<8xf32>
    %117 = vector.multi_reduction <add>, %116, %cst_52 [1] : vector<8x8xf32> to vector<8xf32>
    %118 = vector.shape_cast %117 : vector<8xf32> to vector<8x1xf32>
    %119 = vector.broadcast %118 : vector<8x1xf32> to vector<8x8xf32>
    %120 = arith.divf %116, %119 : vector<8x8xf32>
    %cst_53 = arith.constant dense<0.000000e+00> : vector<8x8xf32>
    %121 = tpu.matmul %120, %105, %cst_53 {dimension_numbers = #tpu.dot_dimension_numbers<[1], [0], [0], [1], [0, 0, 1, 1], [], []>, precision = #tpu.contract_precision<fp32>} : vector<8x8xf32>, vector<8x8xf32>, vector<8x8xf32> -> vector<8x8xf32>
    %122 = vector.extract_strided_slice %32 {offsets = [0, 16], sizes = [8, 8], strides = [1, 1]} : vector<8x32xf32> to vector<8x8xf32>
    %123 = vector.extract_strided_slice %38 {offsets = [0, 16], sizes = [8, 8], strides = [1, 1]} : vector<8x32xf32> to vector<8x8xf32>
    %124 = vector.extract_strided_slice %39 {offsets = [0, 16], sizes = [8, 8], strides = [1, 1]} : vector<8x32xf32> to vector<8x8xf32>
    %cst_54 = arith.constant dense<0.000000e+00> : vector<8x8xf32>
    %125 = tpu.matmul %122, %123, %cst_54 {dimension_numbers = #tpu.dot_dimension_numbers<[1], [1], [0], [0], [0, 0, 1, 0], [], []>, precision = #tpu.contract_precision<fp32>} : vector<8x8xf32>, vector<8x8xf32>, vector<8x8xf32> -> vector<8x8xf32>
    %cst_55 = arith.constant 0.353553385 : f32
    %126 = vector.broadcast %cst_55 : f32 to vector<8x8xf32>
    %127 = arith.mulf %125, %126 : vector<8x8xf32>
    %128 = vector.extract_strided_slice %83 {offsets = [0, 0, 2], sizes = [8, 8, 1], strides = [1, 1, 1]} : vector<8x8x4xf32> to vector<8x8x1xf32>
    %129 = vector.shape_cast %128 : vector<8x8x1xf32> to vector<8x8xf32>
    %130 = arith.addf %127, %129 : vector<8x8xf32>
    %cst_56 = arith.constant dense<0xFF800000> : vector<8xf32>
    %131 = vector.multi_reduction <maximumf>, %130, %cst_56 [1] : vector<8x8xf32> to vector<8xf32>
    %132 = vector.shape_cast %131 : vector<8xf32> to vector<8x1xf32>
    %133 = vector.broadcast %132 : vector<8x1xf32> to vector<8x8xf32>
    %134 = arith.subf %130, %133 : vector<8x8xf32>
    %135 = math.exp %134 : vector<8x8xf32>
    %cst_57 = arith.constant dense<0.000000e+00> : vector<8xf32>
    %136 = vector.multi_reduction <add>, %135, %cst_57 [1] : vector<8x8xf32> to vector<8xf32>
    %137 = vector.shape_cast %136 : vector<8xf32> to vector<8x1xf32>
    %138 = vector.broadcast %137 : vector<8x1xf32> to vector<8x8xf32>
    %139 = arith.divf %135, %138 : vector<8x8xf32>
    %cst_58 = arith.constant dense<0.000000e+00> : vector<8x8xf32>
    %140 = tpu.matmul %139, %124, %cst_58 {dimension_numbers = #tpu.dot_dimension_numbers<[1], [0], [0], [1], [0, 0, 1, 1], [], []>, precision = #tpu.contract_precision<fp32>} : vector<8x8xf32>, vector<8x8xf32>, vector<8x8xf32> -> vector<8x8xf32>
    %141 = vector.extract_strided_slice %32 {offsets = [0, 24], sizes = [8, 8], strides = [1, 1]} : vector<8x32xf32> to vector<8x8xf32>
    %142 = vector.extract_strided_slice %38 {offsets = [0, 24], sizes = [8, 8], strides = [1, 1]} : vector<8x32xf32> to vector<8x8xf32>
    %143 = vector.extract_strided_slice %39 {offsets = [0, 24], sizes = [8, 8], strides = [1, 1]} : vector<8x32xf32> to vector<8x8xf32>
    %cst_59 = arith.constant dense<0.000000e+00> : vector<8x8xf32>
    %144 = tpu.matmul %141, %142, %cst_59 {dimension_numbers = #tpu.dot_dimension_numbers<[1], [1], [0], [0], [0, 0, 1, 0], [], []>, precision = #tpu.contract_precision<fp32>} : vector<8x8xf32>, vector<8x8xf32>, vector<8x8xf32> -> vector<8x8xf32>
    %cst_60 = arith.constant 0.353553385 : f32
    %145 = vector.broadcast %cst_60 : f32 to vector<8x8xf32>
    %146 = arith.mulf %144, %145 : vector<8x8xf32>
    %147 = vector.extract_strided_slice %83 {offsets = [0, 0, 3], sizes = [8, 8, 1], strides = [1, 1, 1]} : vector<8x8x4xf32> to vector<8x8x1xf32>
    %148 = vector.shape_cast %147 : vector<8x8x1xf32> to vector<8x8xf32>
    %149 = arith.addf %146, %148 : vector<8x8xf32>
    %cst_61 = arith.constant dense<0xFF800000> : vector<8xf32>
    %150 = vector.multi_reduction <maximumf>, %149, %cst_61 [1] : vector<8x8xf32> to vector<8xf32>
    %151 = vector.shape_cast %150 : vector<8xf32> to vector<8x1xf32>
    %152 = vector.broadcast %151 : vector<8x1xf32> to vector<8x8xf32>
    %153 = arith.subf %149, %152 : vector<8x8xf32>
    %154 = math.exp %153 : vector<8x8xf32>
    %cst_62 = arith.constant dense<0.000000e+00> : vector<8xf32>
    %155 = vector.multi_reduction <add>, %154, %cst_62 [1] : vector<8x8xf32> to vector<8xf32>
    %156 = vector.shape_cast %155 : vector<8xf32> to vector<8x1xf32>
    %157 = vector.broadcast %156 : vector<8x1xf32> to vector<8x8xf32>
    %158 = arith.divf %154, %157 : vector<8x8xf32>
    %cst_63 = arith.constant dense<0.000000e+00> : vector<8x8xf32>
    %159 = tpu.matmul %158, %143, %cst_63 {dimension_numbers = #tpu.dot_dimension_numbers<[1], [0], [0], [1], [0, 0, 1, 1], [], []>, precision = #tpu.contract_precision<fp32>} : vector<8x8xf32>, vector<8x8xf32>, vector<8x8xf32> -> vector<8x8xf32>
    %160 = tpu.concatenate %102, %121, %140, %159 in 1 : vector<8x8xf32>, vector<8x8xf32>, vector<8x8xf32>, vector<8x8xf32> -> vector<8x32xf32>
    %c0_64 = arith.constant 0 : index
    %c0_65 = arith.constant 0 : index
    %161 = vector.load %arg15[%c0_64, %c0_65] : memref<32x32xf32, #tpu.memory_space<vmem>>, vector<32x32xf32>
    %cst_66 = arith.constant dense<0.000000e+00> : vector<8x32xf32>
    %162 = tpu.matmul %160, %161, %cst_66 {dimension_numbers = #tpu.dot_dimension_numbers<[1], [0], [0], [1], [0, 0, 1, 1], [], []>, precision = #tpu.contract_precision<fp32>} : vector<8x32xf32>, vector<32x32xf32>, vector<8x32xf32> -> vector<8x32xf32>
    %163 = arith.addf %1, %162 : vector<8x32xf32>
    %c0_67 = arith.constant 0 : index
    %c0_68 = arith.constant 0 : index
    %164 = vector.load %arg16[%c0_67, %c0_68] : memref<1x32xf32, #tpu.memory_space<vmem>>, vector<1x32xf32>
    %165 = vector.broadcast %164 : vector<1x32xf32> to vector<8x32xf32>
    %166 = arith.addf %163, %165 : vector<8x32xf32>
    %c0_69 = arith.constant 0 : index
    %c0_70 = arith.constant 0 : index
    %167 = vector.load %arg17[%c0_69, %c0_70] : memref<1x32xf32, #tpu.memory_space<vmem>>, vector<1x32xf32>
    %c0_71 = arith.constant 0 : index
    %c0_72 = arith.constant 0 : index
    %168 = vector.load %arg18[%c0_71, %c0_72] : memref<1x32xf32, #tpu.memory_space<vmem>>, vector<1x32xf32>
    %cst_73 = arith.constant dense<0.000000e+00> : vector<8xf32>
    %169 = vector.multi_reduction <add>, %166, %cst_73 [1] : vector<8x32xf32> to vector<8xf32>
    %170 = vector.shape_cast %169 : vector<8xf32> to vector<8x1xf32>
    %cst_74 = arith.constant 3.200000e+01 : f32
    %171 = vector.broadcast %cst_74 : f32 to vector<8x1xf32>
    %172 = arith.divf %170, %171 : vector<8x1xf32>
    %173 = vector.broadcast %172 : vector<8x1xf32> to vector<8x32xf32>
    %174 = arith.subf %166, %173 : vector<8x32xf32>
    %175 = arith.mulf %174, %174 : vector<8x32xf32>
    %cst_75 = arith.constant dense<0.000000e+00> : vector<8xf32>
    %176 = vector.multi_reduction <add>, %175, %cst_75 [1] : vector<8x32xf32> to vector<8xf32>
    %177 = vector.shape_cast %176 : vector<8xf32> to vector<8x1xf32>
    %cst_76 = arith.constant 3.200000e+01 : f32
    %178 = vector.broadcast %cst_76 : f32 to vector<8x1xf32>
    %179 = arith.divf %177, %178 : vector<8x1xf32>
    %180 = vector.broadcast %172 : vector<8x1xf32> to vector<8x32xf32>
    %181 = arith.subf %166, %180 : vector<8x32xf32>
    %cst_77 = arith.constant 9.99999974E-6 : f32
    %182 = vector.broadcast %cst_77 : f32 to vector<8x1xf32>
    %183 = arith.addf %179, %182 : vector<8x1xf32>
    %184 = math.rsqrt %183 : vector<8x1xf32>
    %185 = vector.broadcast %184 : vector<8x1xf32> to vector<8x32xf32>
    %186 = arith.mulf %181, %185 : vector<8x32xf32>
    %187 = vector.broadcast %167 : vector<1x32xf32> to vector<8x32xf32>
    %188 = arith.mulf %186, %187 : vector<8x32xf32>
    %189 = vector.broadcast %168 : vector<1x32xf32> to vector<8x32xf32>
    %190 = arith.addf %188, %189 : vector<8x32xf32>
    %c0_78 = arith.constant 0 : index
    %c0_79 = arith.constant 0 : index
    %191 = vector.load %arg19[%c0_78, %c0_79] : memref<32x64xf32, #tpu.memory_space<vmem>>, vector<32x64xf32>
    %cst_80 = arith.constant dense<0.000000e+00> : vector<8x64xf32>
    %192 = tpu.matmul %190, %191, %cst_80 {dimension_numbers = #tpu.dot_dimension_numbers<[1], [0], [0], [1], [0, 0, 1, 1], [], []>, precision = #tpu.contract_precision<fp32>} : vector<8x32xf32>, vector<32x64xf32>, vector<8x64xf32> -> vector<8x64xf32>
    %c0_81 = arith.constant 0 : index
    %c0_82 = arith.constant 0 : index
    %193 = vector.load %arg20[%c0_81, %c0_82] : memref<1x64xf32, #tpu.memory_space<vmem>>, vector<1x64xf32>
    %194 = vector.broadcast %193 : vector<1x64xf32> to vector<8x64xf32>
    %195 = arith.addf %192, %194 : vector<8x64xf32>
    %cst_83 = arith.constant 0.000000e+00 : f32
    %196 = vector.broadcast %cst_83 : f32 to vector<8x64xf32>
    %197 = arith.maximumf %195, %196 : vector<8x64xf32>
    %c0_84 = arith.constant 0 : index
    %c0_85 = arith.constant 0 : index
    %198 = vector.load %arg21[%c0_84, %c0_85] : memref<64x32xf32, #tpu.memory_space<vmem>>, vector<64x32xf32>
    %cst_86 = arith.constant dense<0.000000e+00> : vector<8x32xf32>
    %199 = tpu.matmul %197, %198, %cst_86 {dimension_numbers = #tpu.dot_dimension_numbers<[1], [0], [0], [1], [0, 0, 1, 1], [], []>, precision = #tpu.contract_precision<fp32>} : vector<8x64xf32>, vector<64x32xf32>, vector<8x32xf32> -> vector<8x32xf32>
    %c0_87 = arith.constant 0 : index
    %c0_88 = arith.constant 0 : index
    %200 = vector.load %arg22[%c0_87, %c0_88] : memref<1x32xf32, #tpu.memory_space<vmem>>, vector<1x32xf32>
    %201 = vector.broadcast %200 : vector<1x32xf32> to vector<8x32xf32>
    %202 = arith.addf %199, %201 : vector<8x32xf32>
    %203 = arith.addf %166, %202 : vector<8x32xf32>
    %c0_89 = arith.constant 0 : index
    %c0_90 = arith.constant 0 : index
    %c0_91 = arith.constant 0 : index
    %204 = vector.load %arg23[%c0_89, %c0_90, %c0_91] : memref<1x8x32xf32, #tpu.memory_space<vmem>>, vector<1x8x32xf32>
    %205 = vector.shape_cast %204 : vector<1x8x32xf32> to vector<8x32xf32>
    %206 = vector.shape_cast %203 : vector<8x32xf32> to vector<1x8x32xf32>
    tpu.vector_store %arg23[%c0_89, %c0_90, %c0_91], %206 {strides = array<i32>} : memref<1x8x32xf32, #tpu.memory_space<vmem>>, vector<1x8x32xf32>,
    return
  }
  func.func @transform_0(%arg0: i32) -> (i32, i32, i32) {
    %c0_i32 = arith.constant 0 : i32
    %c0_i32_0 = arith.constant 0 : i32
    %c0_i32_1 = arith.constant 0 : i32
    return %arg0, %c0_i32, %c0_i32_0 : i32, i32, i32
  }
  func.func @transform_1(%arg0: i32) -> (i32, i32, i32) {
    %c0_i32 = arith.constant 0 : i32
    %c0_i32_0 = arith.constant 0 : i32
    %c0_i32_1 = arith.constant 0 : i32
    return %arg0, %c0_i32, %c0_i32_0 : i32, i32, i32
  }
  func.func @transform_2(%arg0: i32) -> (i32, i32, i32) {
    %c0_i32 = arith.constant 0 : i32
    %c0_i32_0 = arith.constant 0 : i32
    %c0_i32_1 = arith.constant 0 : i32
    return %arg0, %c0_i32, %c0_i32_0 : i32, i32, i32
  }
  func.func @transform_3(%arg0: i32) -> (i32, i32, i32) {
    %c0_i32 = arith.constant 0 : i32
    %c0_i32_0 = arith.constant 0 : i32
    %c0_i32_1 = arith.constant 0 : i32
    return %arg0, %c0_i32, %c0_i32_0 : i32, i32, i32
  }
  func.func @transform_4(%arg0: i32) -> (i32, i32) {
    %c0_i32 = arith.constant 0 : i32
    %c0_i32_0 = arith.constant 0 : i32
    %c0_i32_1 = arith.constant 0 : i32
    return %c0_i32, %c0_i32_0 : i32, i32
  }
  func.func @transform_5(%arg0: i32) -> (i32, i32) {
    %c0_i32 = arith.constant 0 : i32
    %c0_i32_0 = arith.constant 0 : i32
    %c0_i32_1 = arith.constant 0 : i32
    return %c0_i32, %c0_i32_0 : i32, i32
  }
  func.func @transform_6(%arg0: i32) -> (i32, i32) {
    %c0_i32 = arith.constant 0 : i32
    %c0_i32_0 = arith.constant 0 : i32
    %c0_i32_1 = arith.constant 0 : i32
    return %c0_i32, %c0_i32_0 : i32, i32
  }
  func.func @transform_7(%arg0: i32) -> (i32, i32) {
    %c0_i32 = arith.constant 0 : i32
    %c0_i32_0 = arith.constant 0 : i32
    %c0_i32_1 = arith.constant 0 : i32
    return %c0_i32, %c0_i32_0 : i32, i32
  }
  func.func @transform_8(%arg0: i32) -> (i32, i32) {
    %c0_i32 = arith.constant 0 : i32
    %c0_i32_0 = arith.constant 0 : i32
    %c0_i32_1 = arith.constant 0 : i32
    return %c0_i32, %c0_i32_0 : i32, i32
  }
  func.func @transform_9(%arg0: i32) -> (i32, i32) {
    %c0_i32 = arith.constant 0 : i32
    %c0_i32_0 = arith.constant 0 : i32
    %c0_i32_1 = arith.constant 0 : i32
    return %c0_i32, %c0_i32_0 : i32, i32
  }
  func.func @transform_10(%arg0: i32) -> (i32, i32) {
    %c0_i32 = arith.constant 0 : i32
    %c0_i32_0 = arith.constant 0 : i32
    %c0_i32_1 = arith.constant 0 : i32
    return %c0_i32, %c0_i32_0 : i32, i32
  }
  func.func @transform_11(%arg0: i32) -> (i32, i32) {
    %c0_i32 = arith.constant 0 : i32
    %c0_i32_0 = arith.constant 0 : i32
    %c0_i32_1 = arith.constant 0 : i32
    return %c0_i32, %c0_i32_0 : i32, i32
  }
  func.func @transform_12(%arg0: i32) -> (i32, i32) {
    %c0_i32 = arith.constant 0 : i32
    %c0_i32_0 = arith.constant 0 : i32
    %c0_i32_1 = arith.constant 0 : i32
    return %c0_i32, %c0_i32_0 : i32, i32
  }
  func.func @transform_13(%arg0: i32) -> (i32, i32) {
    %c0_i32 = arith.constant 0 : i32
    %c0_i32_0 = arith.constant 0 : i32
    %c0_i32_1 = arith.constant 0 : i32
    return %c0_i32, %c0_i32_0 : i32, i32
  }
  func.func @transform_14(%arg0: i32) -> (i32, i32) {
    %c0_i32 = arith.constant 0 : i32
    %c0_i32_0 = arith.constant 0 : i32
    %c0_i32_1 = arith.constant 0 : i32
    return %c0_i32, %c0_i32_0 : i32, i32
  }
  func.func @transform_15(%arg0: i32) -> (i32, i32) {
    %c0_i32 = arith.constant 0 : i32
    %c0_i32_0 = arith.constant 0 : i32
    %c0_i32_1 = arith.constant 0 : i32
    return %c0_i32, %c0_i32_0 : i32, i32
  }
  func.func @transform_16(%arg0: i32) -> (i32, i32) {
    %c0_i32 = arith.constant 0 : i32
    %c0_i32_0 = arith.constant 0 : i32
    %c0_i32_1 = arith.constant 0 : i32
    return %c0_i32, %c0_i32_0 : i32, i32
  }
  func.func @transform_17(%arg0: i32) -> (i32, i32) {
    %c0_i32 = arith.constant 0 : i32
    %c0_i32_0 = arith.constant 0 : i32
    %c0_i32_1 = arith.constant 0 : i32
    return %c0_i32, %c0_i32_0 : i32, i32
  }
  func.func @transform_18(%arg0: i32) -> (i32, i32) {
    %c0_i32 = arith.constant 0 : i32
    %c0_i32_0 = arith.constant 0 : i32
    %c0_i32_1 = arith.constant 0 : i32
    return %c0_i32, %c0_i32_0 : i32, i32
  }
  func.func @transform_19(%arg0: i32) -> (i32, i32) {
    %c0_i32 = arith.constant 0 : i32
    %c0_i32_0 = arith.constant 0 : i32
    %c0_i32_1 = arith.constant 0 : i32
    return %c0_i32, %c0_i32_0 : i32, i32
  }
  func.func @transform_20(%arg0: i32) -> (i32, i32) {
    %c0_i32 = arith.constant 0 : i32
    %c0_i32_0 = arith.constant 0 : i32
    %c0_i32_1 = arith.constant 0 : i32
    return %c0_i32, %c0_i32_0 : i32, i32
  }
  func.func @transform_21(%arg0: i32) -> (i32, i32) {
    %c0_i32 = arith.constant 0 : i32
    %c0_i32_0 = arith.constant 0 : i32
    %c0_i32_1 = arith.constant 0 : i32
    return %c0_i32, %c0_i32_0 : i32, i32
  }
  func.func @transform_22(%arg0: i32) -> (i32, i32, i32) {
    %c0_i32 = arith.constant 0 : i32
    %c0_i32_0 = arith.constant 0 : i32
    %c0_i32_1 = arith.constant 0 : i32
    return %arg0, %c0_i32, %c0_i32_0 : i32, i32, i32
  }
}

</mosaic_0001>

<bundles_post_ra>
// kernel: tetnp_encoder_forward_pallas.5
= control target key start
LH: loop header
LB: loop body
LE: loop exit
PB: predicated region body
PF: predicated region fallthrough
CT: control target
= control target key end

     0   :  { %v958_v0 = vmov 0   ;;  %v959_v3 = vmov 1   ;;  %vm108_vm0 = vcmask 261120   ;;  %s1086_s0 = inlined_call_operand.vmem [shape: f32[32,2], index: 0, kind: input, shape index: {}]   ;;  %s1087_s3 = inlined_call_operand.vmem [shape: f32[32,32], index: 3, kind: input, shape index: {}]   ;;  %s1088_s1 = inlined_call_operand.vmem [shape: f32[2,32], index: 1, kind: input, shape index: {}]   ;;  %s1089_s2 = inlined_call_operand.vmem [shape: f32[1,32], index: 2, kind: input, shape index: {}]   ;;  %s1090_s4 = inlined_call_operand.vmem [shape: f32[1,32], index: 4, kind: input, shape index: {}]   ;;  %s1091_s5 = inlined_call_operand.vmem [shape: f32[32,32], index: 5, kind: output, shape index: {}]  }
   0x1   :  { %955 = vset.pattern.permute.xlu1 %v958_v0  ;;  %953 = vset.pattern.permute.xlu0 %v958_v0  ;;  %v21_v1 = vld [vmem:[%s1086_s0 + $0x8] sm:$0xff]  ;;  %v20_v2 = vld [vmem:[%s1086_s0] sm:$0xff]  ;;  %v22_v4 = vld [vmem:[%s1086_s0 + $0x10] sm:$0xff] }
   0x2   :  { %32 = vperm.xlu1 %955, %v21_v1   ;;  %27 = vperm.xlu0 %953, %v20_v2   ;;  %v97_v5 = vld [vmem:[%s1087_s3] sm:$0xff]  ;;  %v98_v6 = vld [vmem:[%s1087_s3 + $0x8] sm:$0xff]  ;;  %v23_v9 = vld [vmem:[%s1086_s0 + $0x18] sm:$0xff] }
   0x3   :  { %v122_v7 = vand.u32 4294901760, %v97_v5  ;;  %v125_v8 = vand.u32 4294901760, %v98_v6  ;;  %v99_v11 = vld [vmem:[%s1087_s3 + $0x10] sm:$0xff]  ;;  %v100_v12 = vld [vmem:[%s1087_s3 + $0x18] sm:$0xff]  ;;  %v743_v40 = vld [vmem:[%s1088_s1] ss:$0 sm:$0xff] }
   0x4   :  { %v128_v13 = vand.u32 4294901760, %v99_v11  ;;  %v131_v14 = vand.u32 4294901760, %v100_v12  ;;  %v744_v41 = vld [vmem:[%s1088_s1 + $0x1] ss:$0 sm:$0xff]  ;;  %v745_v48 = vld [vmem:[%s1089_s2] ss:$0 sm:$0xff] }
   0x5   :  { %v1008_v10 = vpack.c.bf16 %v125_v8, %v122_v7  ;;  %v232_v16 = vsub.f32 %v97_v5, %v122_v7  ;;  %v239_v17 = vsub.f32 %v98_v6, %v125_v8 }
   0x6   :  { %956 = vset.pattern.permute.xlu1 %v959_v3  ;;  %954 = vset.pattern.permute.xlu0 %v959_v3  ;;  %v1019_v15 = vpack.c.bf16 %v131_v14, %v128_v13  ;;  %v246_v23 = vsub.f32 %v99_v11, %v128_v13  ;;  %v253_v24 = vsub.f32 %v100_v12, %v131_v14 }
   0x7   :  { %59 = vperm.xlu1 %956, %v21_v1   ;;  %55 = vperm.xlu0 %954, %v20_v2   ;;  %v233_v18 = vand.u32 4294901760, %v232_v16  ;;  %v240_v19 = vand.u32 4294901760, %v239_v17  ;;  %v1036_v36 = vpack.c.bf16 %v239_v17, %v232_v16 }
   0x8   :  { %904 = vmatprep.subr.bf16.mxu0 %v1008_v10  ;;  %880 = vmatprep.subr.bf16.mxu1 %v1008_v10  ;;  %v247_v27 = vand.u32 4294901760, %v246_v23  ;;  %v254_v28 = vand.u32 4294901760, %v253_v24  ;;  %v1038_v37 = vpack.c.bf16 %v253_v24, %v246_v23 }
   0x9   :  { %906 = vmatpush3.bf16.msra.mxu0 %v1008_v10  ;;  %882 = vmatpush3.bf16.msra.mxu1 %v1008_v10  ;;  %v1026_v20 = vpack.c.bf16 %v240_v19, %v233_v18  ;;  %v234_v21 = vsub.f32 %v232_v16, %v233_v18  ;;  %v241_v22 = vsub.f32 %v239_v17, %v240_v19 }
   0xa   :  { %908 = vmatprep.subr.bf16.mxu0 %v1019_v15  ;;  %884 = vmatprep.subr.bf16.mxu1 %v1019_v15  ;;  %v248_v30 = vsub.f32 %v246_v23, %v247_v27  ;;  %v1031_v31 = vpack.c.bf16 %v254_v28, %v247_v27  ;;  %v255_v32 = vsub.f32 %v253_v24, %v254_v28 }
   0xb   :  { %957 = vset.pattern.permute.xlu1 %v958_v0  ;;  %63 = vperm.xlu0 %954, %v22_v4   ;;  %v235_v25 = vand.u32 4294901760, %v234_v21  ;;  %v242_v26 = vand.u32 4294901760, %v241_v22 }
   0xc   :  { %37 = vperm.xlu1 %957, %v22_v4   ;;  %v249_v33 = vand.u32 4294901760, %v248_v30  ;;  %v256_v34 = vand.u32 4294901760, %v255_v32 }
   0xd   :  { %910 = vmatpush3.bf16.msra.mxu0 %v1019_v15  ;;  %886 = vmatpush3.bf16.msra.mxu1 %v1019_v15  ;;  %v1029_v29 = vpack.c.bf16 %v242_v26, %v235_v25 }
   0xe   :  { %912 = vmatprep.subr.bf16.mxu0 %v1026_v20  ;;  %v1034_v35 = vpack.c.bf16 %v256_v34, %v249_v33 }
   0xf   :  { %67 = vperm.xlu0 %954, %v23_v9   ;;  %888 = vmatprep.subr.bf16.mxu1 %v1029_v29 }
  0x10   :  { %42 = vperm.xlu1 %957, %v23_v9  }
  0x81   :  { %v33_v38 = vpop.permute.xlu1 %32  ;;  %v28_v39 = vpop.permute.xlu0 %27 }
  0x82   :  { %v50_v44 = vmul.f32 %v743_v40, %v33_v38  ;;  %v49_v45 = vmul.f32 %v743_v40, %v28_v39 }
  0x86   :  { %v60_v42 = vpop.permute.xlu1 %59  ;;  %v56_v43 = vpop.permute.xlu0 %55 }
  0x87   :  { %v75_v46 = vmul.f32 %v744_v41, %v60_v42  ;;  %v74_v47 = vmul.f32 %v744_v41, %v56_v43 }
  0x89   :  { %v79_v49 = vadd.f32 %v75_v46, %v50_v44  ;;  %v78_v50 = vadd.f32 %v74_v47, %v49_v45 }
  0x8a   :  { %v64_v51 = vpop.permute.xlu0 %63 }
  0x8b   :  { %v90_v52 = vadd.f32 %v745_v48, %v79_v49  ;;  %v89_v53 = vadd.f32 %v745_v48, %v78_v50  ;;  %v76_v54 = vmul.f32 %v744_v41, %v64_v51  ;;  %v38_v55 = vpop.permute.xlu1 %37 }
  0x8c   :  { %v51_v56 = vmul.f32 %v743_v40, %v38_v55 }
  0x8d   :  { %v94_v57 = vmax.f32 %v90_v52, 0.0  ;;  %v93_v58 = vmax.f32 %v89_v53, 0.0 }
  0x8e   :  { %v80_v59 = vadd.f32 %v76_v54, %v51_v56  ;;  %v68_v60 = vpop.permute.xlu0 %67 }
  0x8f   :  { %v113_v61 = vsel %vm108_vm0, %v94_v57, 0  ;;  %v77_v62 = vmul.f32 %v744_v41, %v68_v60  ;;  %v43_v63 = vpop.permute.xlu1 %42  ;;  %v110_v0 = vsel %vm108_vm0, %v93_v58, 0 }
  0x90   :  { %v200_v1 = vand.u32 4294901760, %v113_v61  ;;  %v91_v2 = vadd.f32 %v745_v48, %v80_v59  ;;  %v52_v3 = vmul.f32 %v743_v40, %v43_v63  ;;  %v190_v4 = vand.u32 4294901760, %v110_v0 }
  0x92   :  { %v201_v5 = vsub.f32 %v113_v61, %v200_v1  ;;  %v95_v6 = vmax.f32 %v91_v2, 0.0  ;;  %v81_v7 = vadd.f32 %v77_v62, %v52_v3  ;;  %v191_v8 = vsub.f32 %v110_v0, %v190_v4 }
  0x94   :  { %v116_v9 = vsel %vm108_vm0, %v95_v6, 0  ;;  %v92_v11 = vadd.f32 %v745_v48, %v81_v7  ;;  %v192_v12 = vand.u32 4294901760, %v191_v8  ;;  %v202_v13 = vand.u32 4294901760, %v201_v5 }
  0x95   :  { %v210_v14 = vand.u32 4294901760, %v116_v9 }
  0x96   :  { %v96_v16 = vmax.f32 %v92_v11, 0.0  ;;  %845 = vmatprep.mubr.f32.mxu0 %v192_v12  ;;  %v193_v17 = vsub.f32 %v191_v8, %v192_v12  ;;  %v203_v18 = vsub.f32 %v201_v5, %v202_v13 }
  0x97   :  { %v211_v19 = vsub.f32 %v116_v9, %v210_v14  ;;  %846 = vmatmul.mubr.f32.vlgmr.msra.gmra.mrb[0].mxu0 %v202_v13 }
  0x98   :  { %v119_v21 = vsel %vm108_vm0, %v96_v16, 0  ;;  %v194_v22 = vand.u32 4294901760, %v193_v17  ;;  %v204_v23 = vand.u32 4294901760, %v203_v18  ;;  %914 = vmatpush3.bf16.msra.mxu0 %v1026_v20 }
  0x99   :  { %v220_v24 = vand.u32 4294901760, %v119_v21  ;;  %v212_v25 = vand.u32 4294901760, %v211_v19  ;;  %916 = vmatprep.subr.bf16.mxu0 %v1031_v31 }
  0x9a   :  { %803 = vmatprep.mubr.f32.mxu1 %v194_v22 }
  0x9b   :  { %v221_v26 = vsub.f32 %v119_v21, %v220_v24  ;;  %804 = vmatmul.mubr.f32.vlgmr.msra.gmra.mrb[0].mxu1 %v204_v23  ;;  %848 = vmatprep.mubr.f32.mxu0 %v212_v25  ;;  %v213_v27 = vsub.f32 %v211_v19, %v212_v25 }
  0x9c   :  { %890 = vmatpush3.bf16.msra.mxu1 %v1029_v29  ;;  %918 = vmatpush3.bf16.msra.mxu0 %v1031_v31  ;;  %v746_v31 = vld [vmem:[%s1090_s4] ss:$0 sm:$0xff] }
  0x9d   :  { %v214_v28 = vand.u32 4294901760, %v213_v27  ;;  %v222_v30 = vand.u32 4294901760, %v221_v26  ;;  %892 = vmatprep.subr.bf16.mxu1 %v1034_v35  ;;  %920 = vmatprep.subr.bf16.mxu0 %v1008_v10 }
  0x9f   :  { %806 = vmatprep.mubr.f32.mxu1 %v214_v28  ;;  %849 = vmatmul.mubr.f32.gmra.mrb[2].mxu0 %v222_v30  ;;  %v223_v20 = vsub.f32 %v221_v26, %v222_v30 }
  0xa0   :  { %859 = vmatprep.mubr.f32.mxu0 %v190_v4  ;;  %894 = vmatpush3.bf16.msra.mxu1 %v1034_v35 }
  0xa1   :  { %v224_v32 = vand.u32 4294901760, %v223_v20  ;;  %896 = vmatprep.subr.bf16.mxu1 %v1036_v36 }
  0xa3   :  { %807 = vmatmul.mubr.f32.gmra.mrb[2].mxu1 %v224_v32  ;;  %860 = vmatmul.mubr.f32.vlgmr.msra.gmra.mrb[0].mxu0 %v200_v1 }
  0xa4   :  { %817 = vmatprep.mubr.f32.mxu1 %v190_v4  ;;  %862 = vmatprep.mubr.f32.mxu0 %v210_v14 }
  0xa5   :  { %922 = vmatpush3.bf16.msra.mxu0 %v1008_v10 }
  0xa6   :  { %924 = vmatprep.subr.bf16.mxu0 %v1019_v15 }
  0xa7   :  { %818 = vmatmul.mubr.f32.vlgmr.msra.gmra.mrb[0].mxu1 %v200_v1  ;;  %863 = vmatmul.mubr.f32.gmra.mrb[2].mxu0 %v220_v24 }
  0xa8   :  { %898 = vmatpush3.bf16.msra.mxu1 %v1036_v36  ;;  %820 = vmatprep.mubr.f32.mxu1 %v210_v14 }
  0xa9   :  { %926 = vmatpush3.bf16.msra.mxu0 %v1019_v15  ;;  %873 = vmatprep.mubr.f32.mxu0 %v190_v4 }
  0xaa   :  { %900 = vmatprep.subr.bf16.mxu1 %v1038_v37 }
  0xab   :  { %821 = vmatmul.mubr.f32.gmra.mrb[2].mxu1 %v220_v24 }
  0xac   :  { %902 = vmatpush3.bf16.msra.mxu1 %v1038_v37  ;;  %874 = vmatmul.mubr.f32.vlgmr.msra.gmra.mrb[0].mxu0 %v200_v1 }
  0xad   :  { %831 = vmatprep.mubr.f32.mxu1 %v191_v8  ;;  %876 = vmatprep.mubr.f32.mxu0 %v210_v14 }
  0xaf   :  { %832 = vmatmul.mubr.f32.vlgmr.msra.gmra.mrb[0].mxu1 %v201_v5 }
  0xb0   :  { %877 = vmatmul.mubr.f32.gmra.mrb[2].mxu0 %v220_v24  ;;  %834 = vmatprep.mubr.f32.mxu1 %v211_v19 }
  0xb3   :  { %835 = vmatmul.mubr.f32.gmra.mrb[2].mxu1 %v221_v26 }
 0x17f   :  { %v875_v10 = vpop.f32.mrb[0].mxu0 }
 0x180   :  { %v713_v29 = vpop.f32.mrb[1].mxu0 }
 0x182   :  { %v833_v15 = vpop.f32.mrb[0].mxu1 }
 0x183   :  { %v927_v33 = vadd.f32 %v833_v15, %v746_v31  ;;  %v878_v34 = vpop.f32.mrb[2].mxu0  ;;  %v415_v35 = vpop.f32.mrb[1].mxu1 }
 0x184   :  { %v929_v36 = vadd.f32 %v746_v31, %v415_v35  ;;  %v725_v38 = vpop.f32.mrb[3].mxu0 }
 0x185   :  { %v928_v37 = vadd.f32 %v927_v33, %v875_v10 }
 0x186   :  { %v930_v39 = vadd.f32 %v929_v36, %v713_v29  ;;  %v836_v40 = vpop.f32.mrb[2].mxu1 }
 0x187   :  { %736 = vst.msk [vmem:[%s1091_s5 + $0x8] sm:$0xff] %vm108_vm0, %v928_v37  ;;  %v931_v41 = vadd.f32 %v836_v40, %v746_v31  ;;  %v429_v42 = vpop.f32.mrb[3].mxu1 }
 0x188   :  { %735 = vst.msk [vmem:[%s1091_s5] sm:$0xff] %vm108_vm0, %v930_v39  ;;  %v933_v43 = vadd.f32 %v746_v31, %v429_v42 }
 0x189   :  { %v932_v44 = vadd.f32 %v931_v41, %v878_v34 }
 0x18a   :  { %v934_v45 = vadd.f32 %v933_v43, %v725_v38 }
 0x18b   :  { %738 = vst.msk [vmem:[%s1091_s5 + $0x18] sm:$0xff] %vm108_vm0, %v932_v44 }
 0x18c   :  { %737 = vst.msk [vmem:[%s1091_s5 + $0x10] sm:$0xff] %vm108_vm0, %v934_v45 }

// kernel: tetnp_encoder_forward_pallas.9
= control target key start
LH: loop header
LB: loop body
LE: loop exit
PB: predicated region body
PF: predicated region fallthrough
CT: control target
= control target key end

     0   :  { %s11268_s0 = inlined_call_operand.vmem [shape: f32[2,8,32], index: 0, kind: input, shape index: {}]   ;;  %s11269_s1 = inlined_call_operand.vmem [shape: f32[2,8,32], index: 1, kind: input, shape index: {}]   ;;  %s11270_s2 = inlined_call_operand.vmem [shape: f32[2,8,2], index: 2, kind: input, shape index: {}]   ;;  %s11271_s3 = inlined_call_operand.vmem [shape: f32[2,8,2], index: 3, kind: input, shape index: {}]   ;;  %s11272_s4 = inlined_call_operand.vmem [shape: f32[1,32], index: 4, kind: input, shape index: {}]   ;;  %s11273_s5 = inlined_call_operand.vmem [shape: f32[1,32], index: 5, kind: input, shape index: {}]   ;;  %s11274_s6 = inlined_call_operand.vmem [shape: f32[32,32], index: 6, kind: input, shape index: {}]   ;;  %s11275_s7 = inlined_call_operand.vmem [shape: f32[1,32], index: 7, kind: input, shape index: {}]   ;;  %s11276_s8 = inlined_call_operand.vmem [shape: f32[32,64], index: 8, kind: input, shape index: {}]   ;;  %s11277_s9 = inlined_call_operand.vmem [shape: f32[1,64], index: 9, kind: input, shape index: {}]   ;;  %s11278_s10 = inlined_call_operand.vmem [shape: f32[2,16], index: 10, kind: input, shape index: {}]   ;;  %s11279_s11 = inlined_call_operand.vmem [shape: f32[1,16], index: 11, kind: input, shape index: {}]   ;;  %s11280_s12 = inlined_call_operand.vmem [shape: f32[16,4], index: 12, kind: input, shape index: {}]   ;;  %s11281_s13 = inlined_call_operand.vmem [shape: f32[1,4], index: 13, kind: input, shape index: {}]   ;;  %s11282_s14 = inlined_call_operand.vmem [shape: f32[32,32], index: 14, kind: input, shape index: {}]   ;;  %s11283_s15 = inlined_call_operand.vmem [shape: f32[1,32], index: 15, kind: input, shape index: {}]   ;;  %s11284_s16 = inlined_call_operand.vmem [shape: f32[1,32], index: 16, kind: input, shape index: {}]   ;;  %s11285_s17 = inlined_call_operand.vmem [shape: f32[1,32], index: 17, kind: input, shape index: {}]   ;;  %s11286_s18 = inlined_call_operand.vmem [shape: f32[32,64], index: 18, kind: input, shape index: {}]   ;;  %s11287_s19 = inlined_call_operand.vmem [shape: f32[1,64], index: 19, kind: input, shape index: {}]   ;;  %s11288_s20 = inlined_call_operand.vmem [shape: f32[64,32], index: 20, kind: input, shape index: {}]   ;;  %s11289_s21 = inlined_call_operand.vmem [shape: f32[1,32], index: 21, kind: input, shape index: {}]   ;;  %s11290_s22 = inlined_call_operand.hbm [shape: f32[2,8,32], index: 22, kind: output, shape index: {}]  }
   0x1   :  { %11298 = sst [smem:[#allocation11_spill]] %s11268_s0 }
   0x2   :  { %11299 = sst [smem:[#allocation12_spill]] %s11269_s1 }
   0x3   :  { %11300 = sst [smem:[#allocation13_spill]] %s11270_s2 }
   0x4   :  { %11301 = sst [smem:[#allocation14_spill]] %s11271_s3 }
   0x5   :  { %11302 = sst [smem:[#allocation15_spill]] %s11272_s4 }
   0x6   :  { %11303 = sst [smem:[#allocation16_spill]] %s11273_s5 }
   0x7   :  { %11304 = sst [smem:[#allocation17_spill]] %s11274_s6 }
   0x8   :  { %27 = vsyncpa [#allocation3], 0 }
   0x9   :  { %29 = vsyncpa [#allocation3 + $0x1], 0  ;;  %s10128_s3 = smov 0   ;;  %s10130_s28 = smov 0  }
   0xa   :  { %s10132_s29 = smov 0   ;;  %s10134_s30 = smov 0  }
   0xb LB: > { %11305 = sst [smem:[#allocation5_spill]] %s9980_s3  ;;  %s10149_s4 = sadd.s32 4294967295, %s9992_s30   ;;  %s9992_s30 = sphi %s10134_s30, %s11324_s30   ;;  %s9988_s29 = sphi %s10132_s29, %s11326_s29   ;;  %s9984_s28 = sphi %s10130_s28, %s11328_s28   ;;  %s9980_s3 = sphi %s10128_s3, %s11327_s3  }
   0xc   : > { %11306 = sst [smem:[#allocation6_spill]] %s9988_s29  ;;  %s8373_s0 = sadd.s32 4294967294, %s9992_s30  }
   0xd   : > { %11307 = sst [smem:[#allocation7_spill]] %s9992_s30  ;;  %s10153_s23 = sadd.s32 1, %s9992_s30  }
   0xe   : > { %11308 = sst [smem:[#allocation8_spill]] %s10153_s23  ;;  %s524_s1 = sadd.s32 1, %s9988_s29 }
   0xf   : > { %s521_s5 = ssub.s32 %s9992_s30, %s10153_s23  ;;  %p534_p0 = scmp.ne.s32.totalorder %s9988_s29, %s9984_s28 }
  0x10   : > { %p522_p1 = scmp.eq.s32.totalorder %s521_s5, 0  ;;  %p535_p2 = scmp.eq.s32.totalorder %s10149_s4, 1 }
  0x11   : > { %p540_p3 = scmp.ne.s32.totalorder %s9984_s28, %s9980_s3  ;;  %p541_p4 = scmp.eq.s32.totalorder %s8373_s0, 1 }
  0x12   : > { %s10164_s24 = scalar_select %p522_p1, %s9988_s29, %s524_s1  }
  0x13   : > { %p10166_p5 = por %p535_p2, %p534_p0  ;;  %p10170_p6 = por %p541_p4, %p540_p3 }
  0x14   : > { %11309 = sst [smem:[#allocation9_spill]] %s10164_s24  ;;  %p8376_p7 = scmp.ge.s32.totalorder %s9992_s30, 1 }
  0x15   : > { %s11311_s25 = scalar_select %p10170_p6, 1, 0 }
  0x16   : > { %p641_p8 = scmp.lt.s32.totalorder %s9992_s30, 3 }
  0x17   : > { %11312 = sst [smem:[#allocation10_spill]] %s11311_s25 }
  0x18   : > { %p642_p9 = pnand %p8376_p7, %p641_p8 }
  0x19   : > { %p714_p10 = scmp.lt.s32.totalorder (!%p642_p9), %s10149_s4, 1  ;;  %vm733_vm0 = vcmask (!%p642_p9), 261120   ;;  %s11313_s1 = sld [smem:[#allocation11_spill]] (!%p642_p9)  ;;  %v9994_v2 = vmov (!%p642_p9), 0   ;;  %v9995_v4 = vmov (!%p642_p9), 1   ;;  %v9996_v34 = vmov (!%p642_p9), 0.0|0.0  }
  0x1a   : > { %645 = sbr.rel (%p642_p9) target bundleno = 3410 (0xd52), region = 108  ;;  %s11314_s23 = sld [smem:[#allocation13_spill]] (!%p642_p9)  ;;  %9900 = vset.pattern.permute.xlu1 (!%p642_p9), %v9994_v2  ;;  %9902 = vset.pattern.permute.xlu0 (!%p642_p9), %v9994_v2  ;;  %vm9997_vm1 = vmmov (!%p642_p9), 0   ;;  %v9998_v38 = vmov (!%p642_p9), 0.0   ;;  %v1803_v43 = vlaneseq (!%p642_p9)  ;;  %v9999_v50 = vmov (!%p642_p9), 1966171168  }
  0x1b   : > { %s11315_s30 = sld [smem:[#allocation14_spill]] (!%p642_p9)  ;;  %9449 = vmatprep.subr.bf16.mxu0 (!%p642_p9), %v9996_v34  ;;  %9443 = vmatprep.subr.bf16.mxu1 (!%p642_p9), %v9996_v34  ;;  %v1801_v51 = vunpack.c.l.s4 (!%p642_p9), %v9999_v50  ;;  %v8386_v52 = vld [vmem:[%s11278_s10] ss:$0 sm:$0xff] (!%p642_p9)  ;;  %v8387_v53 = vld [vmem:[%s11278_s10 + $0x1] ss:$0 sm:$0xff] (!%p642_p9)  ;;  %vm1927_vm2 = vcmask (!%p642_p9), 130048  }
  0x1c   : > { %8748 = vmatprep.mubr.msk.f32.mxu0 (!%p642_p9), %vm9997_vm1, %v9998_v38  ;;  %8737 = vmatprep.mubr.msk.f32.mxu1 (!%p642_p9), %vm9997_vm1, %v9998_v38  ;;  %v1804_v44 = vshrl.u32 (!%p642_p9), %v1803_v43, 7  ;;  %v3199_v45 = vand.u32 (!%p642_p9), 127, %v1803_v43  ;;  %vm2712_vm3 = vcmask (!%p642_p9), 64512   ;;  %vm3232_vm4 = vcmask (!%p642_p9), 1041409   ;;  %s10001_s0 = smov (!%p642_p9), 120   ;;  %s10007_s29 = smov (!%p642_p9), 72  }
  0x1d   : > { %v1802_v58 = vunpack.c.0.s8 (!%p642_p9), %v1801_v51  ;;  %vm3234_vm5 = vcmask (!%p642_p9), 1042434   ;;  %vm3236_vm6 = vcmask (!%p642_p9), 1043459   ;;  %vm3238_vm7 = vcmask (!%p642_p9), 1044484   ;;  %s10008_s3 = smov (!%p642_p9), 80  }
  0x1e   : > { %v10251_v46 = vsub.s32 (!%p642_p9), %v3199_v45, %v1804_v44  ;;  %vm3240_vm8 = vcmask (!%p642_p9), 1045509   ;;  %vm3242_vm9 = vcmask (!%p642_p9), 1046534   ;;  %vm3244_vm10 = vcmask (!%p642_p9), 1047559  }
  0x1f   : > { %v1805_v61 = vsub.s32 (!%p642_p9), %v1802_v58, %v1804_v44  ;;  %vm6674_vm11 = vcmask (!%p642_p9), 195584   ;;  %vm7721_vm12 = vcmask (!%p642_p9), 523264  }
  0x21   : > { %s715_s26 = scalar_select %p714_p10, %s10149_s4, 1 }
  0x23   : > { %s10178_s2 = sshll.u32 %s715_s26, 3 }
  0x24   : > { %s10184_s5 = scalar_lea.vmem %s11313_s1, %s10178_s2  ;;  %s725_s25 = scalar_lea.vmem %s11314_s23, %s10178_s2 }
  0x25   : > { %v730_v0 = vld [vmem:[%s10184_s5] sm:$0xff]  ;;  %s729_s27 = scalar_lea.vmem %s11315_s30, %s10178_s2  ;;  %s11316_s30 = sld [smem:[#allocation17_spill]] }
  0x26   : > { %v734_v1 = vsel %vm733_vm0, %v730_v0, 0.0  ;;  %v1761_v3 = vld [vmem:[%s725_s25] sm:$0xff]  ;;  %s11318_s1 = sld [smem:[#allocation12_spill]]  ;;  %s11319_s25 = sld [smem:[#allocation15_spill]] }
  0x27   : > { %735 = vadd.xlane.f32.xlu0 %v734_v1  ;;  %1766 = vperm.xlu1 %9900, %v1761_v3   ;;  %v1762_v5 = vld [vmem:[%s729_s27] sm:$0xff]  ;;  %s10006_s27 = smov 88  }
  0x28   : > { %v10270_v1 = vld [vmem:[%s11276_s8] sm:$0xff] }
  0x2b   : > { %9901 = vset.pattern.permute.xlu1 %v9995_v4  ;;  %s11317_s23 = smov %s11316_s30  ;;  %v763_v11 = vld [vmem:[%s11316_s30] sm:$0xff]  ;;  %s10009_s30 = smov 8  }
  0x2c   : > { %1776 = vperm.xlu1 %9901, %v1761_v3   ;;  %v764_v12 = vld [vmem:[%s11317_s23 + $0x8] sm:$0xff]  ;;  %v778_v13 = vand.u32 4294901760, %v763_v11  ;;  %v765_v17 = vld [vmem:[%s11317_s23 + $0x10] sm:$0xff]  ;;  %v766_v18 = vld [vmem:[%s11317_s23 + $0x18] sm:$0xff]  ;;  %s721_s26 = scalar_lea.vmem %s11318_s1, %s10178_s2  ;;  %s10002_s1 = smov 112  }
  0x2d   : > { %v781_v14 = vand.u32 4294901760, %v764_v12  ;;  %v784_v21 = vand.u32 4294901760, %v765_v17  ;;  %v787_v22 = vand.u32 4294901760, %v766_v18  ;;  %s711_s2 = sand.u32 1, %s9984_s28  }
  0x2e   : > { %v10208_v15 = vsub.f32 %v763_v11, %v778_v13  ;;  %v8382_v11 = vld [vmem:[%s11319_s25] ss:$0 sm:$0xff]  ;;  %s10000_s25 = smov 96  }
  0x2f   : > { %v10210_v16 = vsub.f32 %v764_v12, %v781_v14  ;;  %v10222_v25 = vsub.f32 %v765_v17, %v784_v21  ;;  %v10224_v26 = vsub.f32 %v766_v18, %v787_v22  ;;  %v10233_v35 = vpack.c.bf16 %v781_v14, %v778_v13 }
  0x30   : > { %1792 = vperm.xlu1 %9901, %v1762_v5   ;;  %v859_v19 = vand.u32 4294901760, %v10208_v15  ;;  %v10245_v41 = vpack.c.bf16 %v787_v22, %v784_v21  ;;  %v10279_v12 = vsub.s32 0, %v1804_v44  ;;  %v1277_v13 = vand.u32 4294901760, %v10270_v1 }
  0x31   : > { %v866_v20 = vand.u32 4294901760, %v10210_v16  ;;  %v873_v29 = vand.u32 4294901760, %v10222_v25  ;;  %v880_v30 = vand.u32 4294901760, %v10224_v26  ;;  %9445 = vmatpush3.bf16.msra.mxu1 %v10233_v35  ;;  %v9456_v40 = vpack.c.bf16 %v10210_v16, %v10208_v15 }
  0x32   : > { %v860_v23 = vsub.f32 %v10208_v15, %v859_v19  ;;  %9446 = vmatprep.subr.bf16.mxu1 %v9996_v34  ;;  %v9459_v42 = vpack.c.bf16 %v10224_v26, %v10222_v25 }
  0x33   : > { %v867_v24 = vsub.f32 %v10210_v16, %v866_v20  ;;  %v874_v32 = vsub.f32 %v10222_v25, %v873_v29  ;;  %v881_v33 = vsub.f32 %v10224_v26, %v880_v30  ;;  %v10253_v47 = vpack.c.bf16 %v866_v20, %v859_v19 }
  0x34   : > { %9903 = vset.pattern.permute.xlu1 %v9994_v2  ;;  %v861_v27 = vand.u32 4294901760, %v860_v23  ;;  %v10255_v48 = vpack.c.bf16 %v880_v30, %v873_v29  ;;  %v1263_v2 = vld [vmem:[%s11276_s8 + $0x8] sm:$0xff]  ;;  %v10295_v30 = vsub.f32 %v10270_v1, %v1277_v13 }
  0x35   : > { %v868_v28 = vand.u32 4294901760, %v867_v24  ;;  %v875_v36 = vand.u32 4294901760, %v874_v32  ;;  %v882_v37 = vand.u32 4294901760, %v881_v33  ;;  %9448 = vmatpush3.bf16.msra.mxu1 %v10245_v41  ;;  %v1280_v14 = vand.u32 4294901760, %v1263_v2 }
  0x36   : > { %9479 = vmatprep.subr.bf16.mxu1 %v9996_v34 }
  0x37   : > { %v9450_v31 = vpack.c.bf16 %v868_v28, %v861_v27  ;;  %v9453_v39 = vpack.c.bf16 %v882_v37, %v875_v36  ;;  %v1264_v27 = vld [vmem:[%s11276_s8 + $0x10] sm:$0xff]  ;;  %v1265_v28 = vld [vmem:[%s11276_s8 + $0x18] sm:$0xff]  ;;  %v10298_v33 = vsub.f32 %v1263_v2, %v1280_v14 }
  0x38   : > { %v1283_v37 = vand.u32 4294901760, %v1264_v27 }
  0x39   : > { %9451 = vmatpush3.bf16.msra.mxu0 %v9450_v31 }
  0x3a   : > { %9452 = vmatprep.subr.bf16.mxu0 %v9996_v34  ;;  %v10317_v58 = vsub.f32 %v1264_v27, %v1283_v37 }
  0x3d   : > { %9454 = vmatpush3.bf16.msra.mxu0 %v9453_v39  ;;  %v1286_v39 = vand.u32 4294901760, %v1265_v28 }
  0x3e   : > { %9455 = vmatprep.subr.bf16.mxu0 %v9996_v34 }
  0xa6   : > { %v1767_v49 = vpop.permute.xlu1 %1766 }
  0xa7   : > { %v1773_v57 = vmul.f32 %v8386_v52, %v1767_v49 }
  0xab   : > { %v1777_v54 = vpop.permute.xlu1 %1776 }
  0xac   : > { %v1783_v59 = vmul.f32 %v8387_v53, %v1777_v54  ;;  %v1358_v54 = vand.u32 4294901760, %v10295_v30 }
  0xae   : > { %v1784_v62 = vadd.f32 %v1783_v59, %v1773_v57  ;;  %v10319_v59 = vsub.f32 %v1265_v28, %v1286_v39  ;;  %v1359_v16 = vsub.f32 %v10295_v30, %v1358_v54 }
  0xaf   : > { %v1793_v3 = vpop.permute.xlu1 %1792 }
  0xb0   : > { %v1806_v63 = vrot.slane %v1784_v62, %v1805_v61  ;;  %v1795_v19 = vmul.f32 %v8387_v53, %v1793_v3  ;;  %v1360_v26 = vand.u32 4294901760, %v1359_v16 }
  0xb2   : > { %v1822_v18 = vrot.slane %v1806_v63, %v1805_v61 }
  0xb4   : > { %v736_v6 = vpop.xlane.xlu0 %735  ;;  %v1851_v32 = vrot.slane %v1822_v18, %v10279_v12 }
  0xb5   : > { %v738_v7 = vmul.f32 0.03125, %v736_v6  ;;  %v1799_v6 = vcombine.high %v1784_v62, %v1784_v62 }
  0xb7   : > { %v10197_v8 = vsub.f32 %v730_v0, %v738_v7  ;;  %v762_v0 = vld [vmem:[%s721_s26] sm:$0xff]  ;;  %v1814_v7 = vcombine.high %v1806_v63, %v1806_v63  ;;  %s11320_s26 = sld [smem:[#allocation16_spill]]  ;;  %v1813_v23 = vrot.slane %v1799_v6, %v1805_v61 }
  0xb9   : > { %v740_v9 = vmul.f32 %v10197_v8, %v10197_v8  ;;  %v1836_v24 = vrot.slane %v1814_v7, %v1805_v61  ;;  %v1815_v44 = vcombine.high %v1813_v23, %v1813_v23  ;;  %v1829_v51 = vrot.slane %v1813_v23, %v1805_v61 }
  0xba   : > { %v10348_v7 = vpack.c.bf16 %v1280_v14, %v1277_v13  ;;  %v10366_v23 = vpack.c.bf16 %v1286_v39, %v1283_v37 }
  0xbb   : > { %v741_v10 = vsel %vm733_vm0, %v740_v9, 0.0  ;;  %v1846_v45 = vcombine.high %v1836_v24, %v1836_v24  ;;  %v1855_v49 = vrot.slane %v1836_v24, %v10279_v12  ;;  %v1843_v62 = vrot.slane %v1815_v44, %v1805_v61 }
  0xbc   : > { %742 = vadd.xlane.f32.xlu0 %v741_v10  ;;  %v1274_v10 = vsel %vm733_vm0, %v762_v0, 0  ;;  %v1845_v1 = vcombine.high %v1829_v51, %v1829_v51  ;;  %v1867_v2 = vrot.slane %v1829_v51, %v10279_v12 }
  0xbd   : > { %v8383_v21 = vld [vmem:[%s11320_s26] ss:$0 sm:$0xff]  ;;  %v10292_v29 = vand.u32 4294901760, %v1274_v10  ;;  %v1863_v63 = vrot.slane %v1846_v45, %v10279_v12  ;;  %s10003_s26 = smov 104  }
  0xbf   : > { %v10308_v53 = vsub.f32 %v1274_v10, %v10292_v29  ;;  %v1379_v10 = vand.u32 4294901760, %v10319_v59 }
  0xc1   : > { %v1347_v15 = vand.u32 4294901760, %v10308_v53  ;;  %v1380_v27 = vsub.f32 %v10319_v59, %v1379_v10 }
  0xc3   : > { %v1348_v25 = vsub.f32 %v10308_v53, %v1347_v15 }
  0xc5   : > { %v1349_v45 = vand.u32 4294901760, %v1348_v25  ;;  %v9492_v25 = vpack.c.bf16 %v10298_v33, %v10295_v30 }
  0xd2   : > { %1787 = vperm.xlu0 %9902, %v1762_v5  }
  0xd6   : > { %9905 = vset.pattern.permute.xlu0 %v9995_v4 }
 0x149   : > { %v743_v55 = vpop.xlane.xlu0 %742 }
 0x14a   : > { %v744_v56 = vmul.f32 0.03125, %v743_v55  ;;  %v1365_v55 = vand.u32 4294901760, %v10298_v33 }
 0x14c   : > { %v745_v60 = vadd.f32 1e-05, %v744_v56 }
 0x14e   : > { %9909 = vrsqrt.f32 %v745_v60  ;;  %v10324_v60 = vld [vmem:[%s11279_s11] ss:$0 sm:$0xff] }
 0x151   : > { %v1788_v5 = vpop.permute.xlu0 %1787 }
 0x152   : > { %v1790_v20 = vmul.f32 %v8386_v52, %v1788_v5 }
 0x154   : > { %v10300_v36 = vadd.f32 %v1795_v19, %v1790_v20  ;;  %v1875_v20 = vrot.slane %v1845_v1, %v10279_v12 }
 0x156   : > { %v1888_v56 = vsub.f32 %v1851_v32, %v10300_v36  ;;  %v1889_v0 = vsub.f32 %v1855_v49, %v10300_v36  ;;  %v1891_v19 = vsub.f32 %v1863_v63, %v10300_v36  ;;  %v1892_v14 = vsub.f32 %v1867_v2, %v10300_v36 }
 0x157   : > { %v1894_v44 = vsub.f32 %v1875_v20, %v10300_v36 }
 0x158   : > { %v9910_v9 = vpop.eup %9909  ;;  %v1902_v61 = vadd.f32 %v10324_v60, %v1888_v56  ;;  %v1905_v37 = vadd.f32 %v10324_v60, %v1891_v19  ;;  %v1381_v56 = vand.u32 4294901760, %v1380_v27 }
 0x159   : > { %v747_v17 = vmul.f32 %v9910_v9, %v10197_v8  ;;  %v1844_v8 = vcombine.high %v1822_v18, %v1822_v18  ;;  %v1372_v9 = vand.u32 4294901760, %v10317_v58  ;;  %v1903_v18 = vadd.f32 %v10324_v60, %v1889_v0 }
 0x15a   : > { %v1913_v1 = vmax.f32 %v1905_v37, 0.0 }
 0x15b   : > { %v754_v22 = vmul.f32 %v8382_v11, %v747_v17  ;;  %v1859_v52 = vrot.slane %v1844_v8, %v10279_v12  ;;  %v1847_v11 = vcombine.high %v1843_v62, %v1843_v62  ;;  %v1871_v17 = vrot.slane %v1843_v62, %v10279_v12  ;;  %v10380_v8 = vld [vmem:[%s11280_s12] sm:$0xff] }
 0x15c   : > { %v1373_v24 = vsub.f32 %v10317_v58, %v1372_v9  ;;  %v1911_v32 = vmax.f32 %v1903_v18, 0.0  ;;  %v1953_v62 = vand.u32 4294901760, %v10380_v8  ;;  %v1938_v20 = vsel %vm1927_vm2, %v1913_v1, 0 }
 0x15d   : > { %v761_v31 = vadd.f32 %v8383_v21, %v754_v22  ;;  %v1890_v5 = vsub.f32 %v1859_v52, %v10300_v36  ;;  %v1910_v22 = vmax.f32 %v1902_v61, 0.0  ;;  %v1879_v28 = vrot.slane %v1847_v11, %v10279_v12 }
 0x15e   : > { %v1893_v39 = vsub.f32 %v1871_v17, %v10300_v36  ;;  %v1374_v52 = vand.u32 4294901760, %v1373_v24  ;;  %v1932_v0 = vsel %vm1927_vm2, %v1911_v32, 0  ;;  %v10414_v11 = vsub.f32 %v10380_v8, %v1953_v62 }
 0x15f   : > { %v775_v43 = vsel %vm733_vm0, %v761_v31, 0  ;;  %v1904_v13 = vadd.f32 %v10324_v60, %v1890_v5  ;;  %v10385_v31 = vld [vmem:[%s11280_s12 + $0x8] sm:$0xff]  ;;  %v1929_v51 = vsel %vm1927_vm2, %v1910_v22, 0  ;;  %v1895_v5 = vsub.f32 %v1879_v28, %v10300_v36 }
 0x160   : > { %v10304_v50 = vand.u32 4294901760, %v775_v43  ;;  %v1956_v63 = vand.u32 4294901760, %v10385_v31  ;;  %v1907_v2 = vadd.f32 %v10324_v60, %v1893_v39  ;;  %v10407_v16 = vand.u32 4294901760, %v1929_v51 }
 0x161   : > { %v1912_v12 = vmax.f32 %v1904_v13, 0.0  ;;  %v9489_v17 = vpack.c.bf16 %v1381_v56, %v1374_v52  ;;  %v10423_v18 = vand.u32 4294901760, %v1932_v0  ;;  %v1909_v13 = vadd.f32 %v10324_v60, %v1895_v5 }
 0x162   : > { %8749 = vmatmul.mubr.f32.vlgmr.msra.gmra.mrb[0].mxu0 %v10304_v50  ;;  %v10315_v57 = vsub.f32 %v775_v43, %v10304_v50  ;;  %v1906_v43 = vadd.f32 %v10324_v60, %v1892_v14  ;;  %v10419_v36 = vsub.f32 %v10385_v31, %v1956_v63  ;;  %v9507_v30 = vpack.c.bf16 %v1379_v10, %v1372_v9 }
 0x163   : > { %9457 = vmatpush3.bf16.msra.mxu0 %v9456_v40  ;;  %8759 = vmatprep.mubr.msk.f32.mxu0 %vm9997_vm1, %v9998_v38  ;;  %v1366_v40 = vsub.f32 %v10298_v33, %v1365_v55  ;;  %v1917_v28 = vmax.f32 %v1909_v13, 0.0 }
 0x164   : > { %9458 = vmatprep.subr.bf16.mxu0 %v9996_v34  ;;  %v848_v3 = vand.u32 4294901760, %v10315_v57  ;;  %v1914_v61 = vmax.f32 %v1906_v43, 0.0 }
 0x165   : > { %v1950_v56 = vsel %vm1927_vm2, %v1917_v28, 0 }
 0x166   : > { %v849_v6 = vsub.f32 %v10315_v57, %v848_v3 }
 0x167   : > { %9460 = vmatpush3.bf16.msra.mxu0 %v9459_v42  ;;  %v1367_v42 = vand.u32 4294901760, %v1366_v40  ;;  %v1935_v40 = vsel %vm1927_vm2, %v1912_v12, 0  ;;  %v9495_v12 = vpack.c.bf16 %v10319_v59, %v10317_v58  ;;  %v8384_v58 = vld [vmem:[%s11275_s7] ss:$0 sm:$0xff] }
 0x168   : > { %v850_v21 = vand.u32 4294901760, %v849_v6  ;;  %9461 = vmatprep.subr.bf16.mxu0 %v9996_v34  ;;  %v1908_v6 = vadd.f32 %v10324_v60, %v1894_v44  ;;  %v10426_v19 = vand.u32 4294901760, %v1935_v40  ;;  %v2109_v60 = vand.u32 4294901760, %v10419_v36 }
 0x169   : > { %v9486_v49 = vpack.c.bf16 %v1367_v42, %v1360_v26  ;;  %v10445_v26 = vsub.f32 %v1932_v0, %v10423_v18  ;;  %v10447_v42 = vand.u32 4294901760, %v1938_v20  ;;  %v10490_v0 = vpack.c.bf16 %v1956_v63, %v1953_v62 }
 0x16a   : > { %8738 = vmatmul.mubr.f32.vlgmr.msra.gmra.mrb[0].mxu1 %v850_v21  ;;  %8760 = vmatmul.mubr.f32.vlgmr.msra.gmra.mrb[0].mxu0 %v10315_v57  ;;  %v1915_v21 = vmax.f32 %v1907_v2, 0.0  ;;  %v10433_v57 = vsub.f32 %v1929_v51, %v10407_v16  ;;  %v1916_v14 = vmax.f32 %v1908_v6, 0.0  ;;  %v10451_v22 = vsub.f32 %v1935_v40, %v10426_v19 }
 0x16b   : > { %9481 = vmatpush3.bf16.msra.mxu1 %v10348_v7  ;;  %9463 = vmatpush3.bf16.msra.mxu0 %v10233_v35  ;;  %v2110_v39 = vsub.f32 %v10419_v36, %v2109_v60  ;;  %v2031_v43 = vand.u32 4294901760, %v10445_v26  ;;  %v10472_v44 = vsub.f32 %v1938_v20, %v10447_v42  ;;  %v10506_v63 = vand.u32 4294901760, %v1950_v56 }
 0x16c   : > { %9482 = vmatprep.subr.bf16.mxu1 %v9996_v34  ;;  %9464 = vmatprep.subr.bf16.mxu0 %v9996_v34  ;;  %v1944_v27 = vsel %vm1927_vm2, %v1915_v21, 0  ;;  %v2021_v32 = vand.u32 4294901760, %v10433_v57  ;;  %v1947_v37 = vsel %vm1927_vm2, %v1916_v14, 0 }
 0x16d   : > { %8803 = vmatprep.mubr.msk.f32.mxu1 %vm9997_vm1, %v9998_v38  ;;  %8770 = vmatprep.mubr.msk.f32.mxu0 %vm9997_vm1, %v9998_v38  ;;  %v10481_v52 = vand.u32 4294901760, %v1947_v37  ;;  %v2111_v2 = vand.u32 4294901760, %v2110_v39  ;;  %v2032_v8 = vsub.f32 %v10445_v26, %v2031_v43  ;;  %v2051_v31 = vand.u32 4294901760, %v10472_v44 }
 0x16e   : > { %v10525_v13 = vsub.f32 %v1950_v56, %v10506_v63 }
 0x16f   : > { %9484 = vmatpush3.bf16.msra.mxu1 %v10366_v23  ;;  %9466 = vmatpush3.bf16.msra.mxu0 %v10245_v41  ;;  %v2052_v20 = vsub.f32 %v10472_v44, %v2051_v31 }
 0x170   : > { %9485 = vmatprep.subr.bf16.mxu1 %v9996_v34  ;;  %9467 = vmatprep.subr.bf16.mxu0 %v9996_v34 }
 0x172   : > { %8804 = vmatmul.mubr.f32.vlgmr.msra.gmra.mrb[2].mxu1 %v1349_v45  ;;  %8771 = vmatmul.mubr.f32.vlgmr.msra.gmra.mrb[0].mxu0 %v848_v3  ;;  %v1941_v3 = vsel %vm1927_vm2, %v1914_v61, 0  ;;  %v10474_v45 = vand.u32 4294901760, %v1944_v27  ;;  %v10514_v61 = vsub.f32 %v1947_v37, %v10481_v52  ;;  %v2091_v37 = vand.u32 4294901760, %v10525_v13 }
 0x173   : > { %9487 = vmatpush3.bf16.msra.mxu1 %v9486_v49  ;;  %9469 = vmatpush3.bf16.msra.mxu0 %v10253_v47  ;;  %v2102_v47 = vand.u32 4294901760, %v10414_v11  ;;  %v10453_v24 = vand.u32 4294901760, %v1941_v3  ;;  %v2041_v49 = vand.u32 4294901760, %v10451_v22 }
 0x174   : > { %9488 = vmatprep.subr.bf16.mxu1 %v9996_v34  ;;  %9470 = vmatprep.subr.bf16.mxu0 %v9996_v34  ;;  %v10504_v62 = vsub.f32 %v1944_v27, %v10474_v45  ;;  %v2053_v27 = vand.u32 4294901760, %v2052_v20 }
 0x175   : > { %8814 = vmatprep.mubr.msk.f32.mxu1 %vm9997_vm1, %v9998_v38  ;;  %8781 = vmatprep.mubr.msk.f32.mxu0 %vm9997_vm1, %v9998_v38  ;;  %v10479_v51 = vsub.f32 %v1941_v3, %v10453_v24  ;;  %v2042_v5 = vsub.f32 %v10451_v22, %v2041_v49 }
 0x176   : > { %v2071_v21 = vand.u32 4294901760, %v10504_v62 }
 0x177   : > { %9490 = vmatpush3.bf16.msra.mxu1 %v9489_v17  ;;  %9472 = vmatpush3.bf16.msra.mxu0 %v10255_v48  ;;  %v2103_v48 = vsub.f32 %v10414_v11, %v2102_v47  ;;  %v2061_v40 = vand.u32 4294901760, %v10479_v51  ;;  %v2043_v3 = vand.u32 4294901760, %v2042_v5 }
 0x178   : > { %9491 = vmatprep.subr.bf16.mxu1 %v9996_v34  ;;  %9473 = vmatprep.subr.bf16.mxu0 %v9996_v34  ;;  %v2072_v28 = vsub.f32 %v10504_v62, %v2071_v21 }
 0x179   : > { %v2104_v1 = vand.u32 4294901760, %v2103_v48  ;;  %v2062_v14 = vsub.f32 %v10479_v51, %v2061_v40  ;;  %v9504_v48 = vpack.c.bf16 %v1365_v55, %v1358_v54 }
 0x17a   : > { %8815 = vmatmul.mubr.f32.vlgmr.msra.gmra.mrb[2].mxu1 %v10292_v29  ;;  %8782 = vmatmul.mubr.f32.vlgmr.msra.gmra.mrb[0].mxu0 %v10304_v50  ;;  %v2073_v56 = vand.u32 4294901760, %v2072_v28 }
 0x17b   : > { %9493 = vmatpush3.bf16.msra.mxu1 %v9492_v25  ;;  %9475 = vmatpush3.bf16.msra.mxu0 %v10233_v35  ;;  %v2022_v35 = vsub.f32 %v10433_v57, %v2021_v32  ;;  %v9519_v17 = vpack.c.bf16 %v2111_v2, %v2104_v1  ;;  %v9523_v25 = vpack.c.bf16 %v10419_v36, %v10414_v11  ;;  %v2063_v39 = vand.u32 4294901760, %v2062_v14  ;;  %v8385_v11 = vld [vmem:[%s11277_s9] ss:$0 sm:$0xff] }
 0x17c   : > { %9494 = vmatprep.subr.bf16.mxu1 %v9996_v34  ;;  %9476 = vmatprep.subr.bf16.mxu0 %v9996_v34 }
 0x17d   : > { %8825 = vmatprep.mubr.msk.f32.mxu1 %vm9997_vm1, %v9998_v38  ;;  %8792 = vmatprep.mubr.msk.f32.mxu0 %vm9997_vm1, %v9998_v38  ;;  %v2023_v6 = vand.u32 4294901760, %v2022_v35  ;;  %v2092_v35 = vsub.f32 %v10525_v13, %v2091_v37 }
 0x17f   : > { %9496 = vmatpush3.bf16.msra.mxu1 %v9495_v12  ;;  %9478 = vmatpush3.bf16.msra.mxu0 %v10245_v41  ;;  %v2033_v41 = vand.u32 4294901760, %v2032_v8 }
 0x180   : > { %9497 = vmatprep.subr.bf16.mxu1 %v9996_v34  ;;  %9516 = vmatprep.subr.bf16.mxu0 %v10490_v0 }
 0x182   : > { %8826 = vmatmul.mubr.f32.vlgmr.msra.gmra.mrb[2].mxu1 %v10308_v53  ;;  %8793 = vmatmul.mubr.f32.vlgmr.msra.gmra.mrb[0].mxu0 %v10304_v50  ;;  %v2081_v50 = vand.u32 4294901760, %v10514_v61  ;;  %v2093_v53 = vand.u32 4294901760, %v2092_v35 }
 0x183   : > { %9499 = vmatpush3.bf16.msra.mxu1 %v10348_v7  ;;  %9518 = vmatpush3.bf16.msra.mxu0 %v10490_v0 }
 0x184   : > { %9500 = vmatprep.subr.bf16.mxu1 %v9996_v34  ;;  %8865 = vmatprep.mubr.f32.mxu0 %v2023_v6  ;;  %v2082_v12 = vsub.f32 %v10514_v61, %v2081_v50 }
 0x185   : > { %8836 = vmatprep.mubr.msk.f32.mxu1 %vm9997_vm1, %v9998_v38  ;;  %9520 = vmatprep.subr.bf16.mxu0 %v9519_v17 }
 0x186   : > { %8866 = vmatmul.mubr.f32.vlgmr.msra.gmra.mrb[2].mxu0 %v2033_v41  ;;  %v2083_v33 = vand.u32 4294901760, %v2082_v12 }
 0x187   : > { %9502 = vmatpush3.bf16.msra.mxu1 %v10366_v23  ;;  %8868 = vmatprep.mubr.f32.mxu0 %v2043_v3 }
 0x188   : > { %9503 = vmatprep.subr.bf16.mxu1 %v9996_v34  ;;  %9522 = vmatpush3.bf16.msra.mxu0 %v9519_v17 }
 0x189   : > { %9524 = vmatprep.subr.bf16.mxu0 %v9523_v25 }
 0x18a   : > { %8837 = vmatmul.mubr.f32.vlgmr.msra.gmra.mrb[2].mxu1 %v1347_v15  ;;  %8869 = vmatmul.mubr.f32.gmra.mrb[4].mxu0 %v2053_v27 }
 0x18b   : > { %9505 = vmatpush3.bf16.msra.mxu1 %v9504_v48  ;;  %8871 = vmatprep.mubr.f32.mxu0 %v2063_v39 }
 0x18c   : > { %9506 = vmatprep.subr.bf16.mxu1 %v9996_v34  ;;  %8847 = vmatprep.mubr.msk.f32.mxu1 %vm9997_vm1, %v9998_v38 }
 0x18e   : > { %8872 = vmatmul.mubr.f32.gmra.mrb[6].mxu0 %v2073_v56 }
 0x18f   : > { %9508 = vmatpush3.bf16.msra.mxu1 %v9507_v30  ;;  %8874 = vmatprep.mubr.f32.mxu0 %v2083_v33 }
 0x190   : > { %9509 = vmatprep.subr.bf16.mxu1 %v9996_v34 }
 0x192   : > { %8848 = vmatmul.mubr.f32.vlgmr.msra.gmra.mrb[2].mxu1 %v10292_v29  ;;  %8875 = vmatmul.mubr.f32.gmra.mrb[8].mxu0 %v2093_v53 }
 0x193   : > { %9511 = vmatpush3.bf16.msra.mxu1 %v10348_v7  ;;  %8881 = vmatprep.mubr.f32.mxu0 %v10407_v16 }
 0x194   : > { %9512 = vmatprep.subr.bf16.mxu1 %v9996_v34  ;;  %8858 = vmatprep.mubr.msk.f32.mxu1 %vm9997_vm1, %v9998_v38 }
 0x196   : > { %8882 = vmatmul.mubr.f32.vlgmr.msra.gmra.mrb[2].mxu0 %v10423_v18 }
 0x197   : > { %9514 = vmatpush3.bf16.msra.mxu1 %v10366_v23  ;;  %8884 = vmatprep.mubr.f32.mxu0 %v10426_v19 }
 0x198   : > { %9526 = vmatpush3.bf16.msra.mxu0 %v9523_v25  ;;  %8957 = vmatprep.subr.mxu1 %v9998_v38 }
 0x199   : > { %9528 = vmatprep.subr.bf16.mxu0 %v10490_v0 }
 0x19a   : > { %8859 = vmatmul.mubr.f32.vlgmr.msra.gmra.mrb[2].mxu1 %v10292_v29  ;;  %8885 = vmatmul.mubr.f32.gmra.mrb[4].mxu0 %v10447_v42  ;;  %v9531_v29 = vpack.c.bf16 %v2109_v60, %v2102_v47 }
 0x19b   : > { %8887 = vmatprep.mubr.f32.mxu0 %v10453_v24  ;;  %8959 = vmatprep.mubr.msk.f32.mxu1 %vm9997_vm1, %v9998_v38 }
 0x19e   : > { %8888 = vmatmul.mubr.f32.gmra.mrb[6].mxu0 %v10474_v45 }
 0x19f   : > { %8890 = vmatprep.mubr.f32.mxu0 %v10481_v52 }
 0x1a2   : > { %8891 = vmatmul.mubr.f32.gmra.mrb[8].mxu0 %v10506_v63 }
 0x1a3   : > { %8897 = vmatprep.mubr.f32.mxu0 %v10433_v57 }
 0x1a6   : > { %8898 = vmatmul.mubr.f32.vlgmr.msra.gmra.mrb[2].mxu0 %v10445_v26 }
 0x1a7   : > { %8900 = vmatprep.mubr.f32.mxu0 %v10451_v22  ;;  %9530 = vmatpush3.bf16.msra.mxu0 %v10490_v0 }
 0x1a8   : > { %9532 = vmatprep.subr.bf16.mxu0 %v9531_v29 }
 0x1aa   : > { %8901 = vmatmul.mubr.f32.gmra.mrb[4].mxu0 %v10472_v44  ;;  %v8389_v44 = vld [vmem:[%s11281_s13] ss:$0 sm:$0xff] }
 0x1ab   : > { %8903 = vmatprep.mubr.f32.mxu0 %v10479_v51 }
 0x1ae   : > { %8904 = vmatmul.mubr.f32.gmra.mrb[6].mxu0 %v10504_v62 }
 0x1af   : > { %8906 = vmatprep.mubr.f32.mxu0 %v10514_v61 }
 0x1b2   : > { %8907 = vmatmul.mubr.f32.gmra.mrb[8].mxu0 %v10525_v13 }
 0x1b3   : > { %8913 = vmatprep.mubr.f32.mxu0 %v2021_v32 }
 0x1b6   : > { %8914 = vmatmul.mubr.f32.vlgmr.msra.gmra.mrb[2].mxu0 %v2031_v43 }
 0x1b7   : > { %8916 = vmatprep.mubr.f32.mxu0 %v2041_v49  ;;  %9534 = vmatpush3.bf16.msra.mxu0 %v9531_v29 }
 0x1b8   : > { %9536 = vmatprep.subr.bf16.mxu0 %v10490_v0 }
 0x1ba   : > { %8917 = vmatmul.mubr.f32.gmra.mrb[4].mxu0 %v2051_v31 }
 0x1bb   : > { %8919 = vmatprep.mubr.f32.mxu0 %v2061_v40 }
 0x1be   : > { %8920 = vmatmul.mubr.f32.gmra.mrb[6].mxu0 %v2071_v21 }
 0x1bf   : > { %8922 = vmatprep.mubr.f32.mxu0 %v2081_v50 }
 0x1c2   : > { %8923 = vmatmul.mubr.f32.gmra.mrb[8].mxu0 %v2091_v37 }
 0x1c3   : > { %8929 = vmatprep.mubr.f32.mxu0 %v10407_v16 }
 0x1c6   : > { %8930 = vmatmul.mubr.f32.vlgmr.msra.gmra.mrb[2].mxu0 %v10423_v18 }
 0x1c7   : > { %8932 = vmatprep.mubr.f32.mxu0 %v10426_v19  ;;  %9538 = vmatpush3.bf16.msra.mxu0 %v10490_v0 }
 0x1c8   : > { %9077 = vmatprep.subr.mxu0 %v9998_v38 }
 0x1ca   : > { %8933 = vmatmul.mubr.f32.gmra.mrb[4].mxu0 %v10447_v42 }
 0x1cb   : > { %8935 = vmatprep.mubr.f32.mxu0 %v10453_v24 }
 0x1ce   : > { %8936 = vmatmul.mubr.f32.gmra.mrb[6].mxu0 %v10474_v45 }
 0x1cf   : > { %8938 = vmatprep.mubr.f32.mxu0 %v10481_v52 }
 0x1d2   : > { %8939 = vmatmul.mubr.f32.gmra.mrb[8].mxu0 %v10506_v63 }
 0x1d3   : > { %8945 = vmatprep.mubr.f32.mxu0 %v10407_v16 }
 0x1d6   : > { %8946 = vmatmul.mubr.f32.vlgmr.msra.gmra.mrb[2].mxu0 %v10423_v18 }
 0x1d7   : > { %8948 = vmatprep.mubr.f32.mxu0 %v10426_v19 }
 0x1da   : > { %8949 = vmatmul.mubr.f32.gmra.mrb[4].mxu0 %v10447_v42 }
 0x1db   : > { %8951 = vmatprep.mubr.f32.mxu0 %v10453_v24 }
 0x1de   : > { %8952 = vmatmul.mubr.f32.gmra.mrb[6].mxu0 %v10474_v45 }
 0x1df   : > { %8954 = vmatprep.mubr.f32.mxu0 %v10481_v52 }
 0x1e2   : > { %8955 = vmatmul.mubr.f32.gmra.mrb[8].mxu0 %v10506_v63 }
 0x1e3   : > { %9079 = vmatprep.mubr.msk.f32.mxu0 %vm9997_vm1, %v9998_v38 }
 0x23d   : > { %v852_v54 = vpop.f32.mrb[0].mxu1 }
 0x23e   : > { %v8739_v55 = vpop.f32.mrb[1].mxu1  ;;  %v853_v59 = vadd.f32 %v8384_v58, %v852_v54 }
 0x255   : > { %v1258_v15 = vpop.f32.mrb[0].mxu0 }
 0x256   : > { %v10632_v7 = vadd.f32 %v1258_v15, %v853_v59  ;;  %v8794_v9 = vpop.f32.mrb[1].mxu0 }
 0x258   : > { %v2714_v10 = vsel %vm2712_vm3, %v10632_v7, 0 }
 0x259   : > { %v2785_v23 = vand.u32 4294901760, %v2714_v10 }
 0x25b   : > { %v2786_v16 = vsub.f32 %v2714_v10, %v2785_v23 }
 0x25d   : > { %v2787_v36 = vand.u32 4294901760, %v2786_v16 }
 0x25f   : > { %v2788_v60 = vsub.f32 %v2786_v16, %v2787_v36 }
 0x261   : > { %v2789_v22 = vand.u32 4294901760, %v2788_v60 }
 0x26d   : > { %v1757_v18 = vpop.f32.mrb[2].mxu1 }
 0x26e   : > { %v10639_v19 = vadd.f32 %v8385_v11, %v1757_v18  ;;  %v8860_v57 = vpop.f32.mrb[3].mxu1 }
 0x270   : > { %v2717_v47 = vsel %vm2712_vm3, %v10639_v19, 0 }
 0x271   : > { %v2720_v26 = vand.u32 4294901760, %v2717_v47 }
 0x273   : > { %8958 = vmatpush3.xpose.msra.mxu1 %v2720_v26  ;;  %v2797_v42 = vsub.f32 %v2717_v47, %v2720_v26 }
 0x274   : > { %8962 = vmatprep.subr.mxu1 %v9998_v38 }
 0x275   : > { %v2798_v24 = vand.u32 4294901760, %v2797_v42 }
 0x276   : > { %8960 = vmatmul.mubr.f32.vlgmr.msra.gmra.mrb[4].mxu1 %v2789_v22 }
 0x277   : > { %v2799_v32 = vsub.f32 %v2797_v42, %v2798_v24  ;;  %8964 = vmatprep.mubr.msk.f32.mxu1 %vm9997_vm1, %v9998_v38 }
 0x279   : > { %v2800_v43 = vand.u32 4294901760, %v2799_v32 }
 0x27b   : > { %8963 = vmatpush3.xpose.msra.mxu1 %v2800_v43 }
 0x27c   : > { %8967 = vmatprep.subr.mxu1 %v9998_v38 }
 0x27e   : > { %8965 = vmatmul.mubr.f32.vlgmr.msra.gmra.mrb[4].mxu1 %v2785_v23 }
 0x27f   : > { %8968 = vmatpush3.xpose.msra.mxu1 %v2797_v42  ;;  %8969 = vmatprep.mubr.msk.f32.mxu1 %vm9997_vm1, %v9998_v38 }
 0x280   : > { %8972 = vmatprep.subr.mxu1 %v9998_v38 }
 0x286   : > { %8970 = vmatmul.mubr.f32.vlgmr.msra.gmra.mrb[4].mxu1 %v2786_v16 }
 0x287   : > { %8973 = vmatpush3.xpose.msra.mxu1 %v2720_v26  ;;  %8974 = vmatprep.mubr.msk.f32.mxu1 %vm9997_vm1, %v9998_v38 }
 0x288   : > { %8977 = vmatprep.subr.mxu1 %v9998_v38 }
 0x28e   : > { %8975 = vmatmul.mubr.f32.vlgmr.msra.gmra.mrb[4].mxu1 %v2787_v36 }
 0x28f   : > { %8978 = vmatpush3.xpose.msra.mxu1 %v2798_v24  ;;  %8979 = vmatprep.mubr.msk.f32.mxu1 %vm9997_vm1, %v9998_v38 }
 0x290   : > { %8982 = vmatprep.subr.mxu1 %v9998_v38 }
 0x296   : > { %8980 = vmatmul.mubr.f32.vlgmr.msra.gmra.mrb[4].mxu1 %v2785_v23 }
 0x297   : > { %8983 = vmatpush3.xpose.msra.mxu1 %v2720_v26  ;;  %8984 = vmatprep.mubr.msk.f32.mxu1 %vm9997_vm1, %v9998_v38 }
 0x298   : > { %8987 = vmatprep.subr.mxu1 %v9998_v38 }
 0x29e   : > { %8985 = vmatmul.mubr.f32.vlgmr.msra.gmra.mrb[4].mxu1 %v2785_v23  ;;  %v10004_v23 = vmov 2  }
 0x29f   : > { %8989 = vmatprep.mubr.msk.f32.mxu1 %vm9997_vm1, %v9998_v38 }
 0x2a9   : > { %v8947_v45 = vpop.f32.mrb[2].mxu0 }
 0x2aa   : > { %v10664_v49 = vadd.f32 %v8947_v45, %v8389_v44  ;;  %v2666_v51 = vpop.f32.mrb[3].mxu0 }
 0x2ab   : > { %v10667_v0 = vadd.f32 %v8389_v44, %v2666_v51 }
 0x2ac   : > { %3178 = vperm.xlu1 %9903, %v10664_v49  }
 0x2ad   : > { %v8950_v52 = vpop.f32.mrb[4].mxu0 }
 0x2ae   : > { %v2678_v1 = vpop.f32.mrb[5].mxu0  ;;  %v10670_v8 = vadd.f32 %v8950_v52, %v8389_v44 }
 0x2af   : > { %v10673_v63 = vadd.f32 %v8389_v44, %v2678_v1 }
 0x2b0   : > { %3175 = vperm.xlu1 %9903, %v10667_v0  }
 0x2b1   : > { %v8953_v2 = vpop.f32.mrb[6].mxu0 }
 0x2b2   : > { %v2690_v31 = vpop.f32.mrb[7].mxu0  ;;  %v10676_v40 = vadd.f32 %v8953_v2, %v8389_v44 }
 0x2b3   : > { %v10679_v61 = vadd.f32 %v8389_v44, %v2690_v31 }
 0x2b4   : > { %3184 = vperm.xlu1 %9903, %v10670_v8  }
 0x2b5   : > { %v8956_v62 = vpop.f32.mrb[8].mxu0 }
 0x2b6   : > { %v2702_v5 = vpop.f32.mrb[9].mxu0  ;;  %v10685_v17 = vadd.f32 %v8956_v62, %v8389_v44 }
 0x2b7   : > { %v10682_v6 = vadd.f32 %v8389_v44, %v2702_v5 }
 0x2b8   : > { %3181 = vperm.xlu1 %9903, %v10673_v63  }
 0x2bc   : > { %3190 = vperm.xlu1 %9903, %v10676_v40  }
 0x2c0   : > { %3187 = vperm.xlu1 %9903, %v10679_v61  }
 0x2c4   : > { %3193 = vperm.xlu1 %9903, %v10682_v6  }
 0x2c8   : > { %3196 = vperm.xlu1 %9903, %v10685_v17  }
 0x2cc   : > { %9904 = vset.pattern.permute.xlu1 %v9995_v4 }
 0x32b   : > { %v3179_v41 = vpop.permute.xlu1 %3178 }
 0x32c   : > { %v3207_v28 = vrot.slane %v3179_v41, %v10251_v46 }
 0x32f   : > { %v3176_v20 = vpop.permute.xlu1 %3175 }
 0x330   : > { %v3203_v50 = vrot.slane %v3176_v20, %v10251_v46 }
 0x332   : > { %v3233_v37 = vsel %vm3232_vm4, %v3207_v28, %v3203_v50 }
 0x333   : > { %v3185_v21 = vpop.permute.xlu1 %3184 }
 0x334   : > { %v3215_v39 = vrot.slane %v3185_v21, %v10251_v46 }
 0x337   : > { %v3182_v13 = vpop.permute.xlu1 %3181 }
 0x338   : > { %v3211_v25 = vrot.slane %v3182_v13, %v10251_v46 }
 0x33a   : > { %v3235_v48 = vsel %vm3234_vm5, %v3211_v25, %v3233_v37 }
 0x33b   : > { %v3191_v3 = vpop.permute.xlu1 %3190  ;;  %v3237_v56 = vsel %vm3236_vm6, %v3215_v39, %v3235_v48 }
 0x33c   : > { %v3223_v33 = vrot.slane %v3191_v3, %v10251_v46 }
 0x33f   : > { %v3188_v14 = vpop.permute.xlu1 %3187 }
 0x340   : > { %v3219_v4 = vrot.slane %v3188_v14, %v10251_v46 }
 0x342   : > { %v3239_v35 = vsel %vm3238_vm7, %v3219_v4, %v3237_v56 }
 0x343   : > { %v3194_v27 = vpop.permute.xlu1 %3193  ;;  %v3241_v29 = vsel %vm3240_vm8, %v3223_v33, %v3239_v35 }
 0x344   : > { %v3227_v30 = vrot.slane %v3194_v27, %v10251_v46 }
 0x346   : > { %v3243_v55 = vsel %vm3242_vm9, %v3227_v30, %v3241_v29 }
 0x347   : > { %v3197_v12 = vpop.permute.xlu1 %3196 }
 0x348   : > { %v3231_v53 = vrot.slane %v3197_v12, %v10251_v46 }
 0x34a   : > { %v3245_v15 = vsel %vm3244_vm10, %v3231_v53, %v3243_v55 }
 0x371   : > { %v3161_v54 = vpop.f32.mrb[4].mxu1 }
 0x372   : > { %v3165_v58 = vmul.f32 0.35355338, %v3161_v54  ;;  %v8986_v59 = vpop.f32.mrb[5].mxu1 }
 0x374   : > { %v3247_v9 = vadd.f32 %v3245_v15, %v3165_v58 }
 0x376   : > { %v3248_v10 = vsel %vm2712_vm3, %v3247_v9, -inf }
 0x377   : > { %3249 = vmax.xlane.f32.xlu1 %v3248_v10 }
 0x388   : > { %3259 = vrot.lane.b32.xlu1 %v10639_v19, %s10000_s25  ;;  %s8377_s25 = sshll.u32 %s711_s2, 3 }
 0x38c   : > { %3713 = vrot.lane.b32.xlu1 %v10639_v19, %s10001_s0 }
 0x390   : > { %4694 = vrot.lane.b32.xlu1 %v10632_v7, %s10002_s1 }
 0x394   : > { %5677 = vrot.lane.b32.xlu1 %v10632_v7, %s10003_s26 }
 0x398   : > { %4167 = vperm.xlu1 %9904, %v10667_v0  }
 0x39c   : > { %4173 = vperm.xlu1 %9904, %v10673_v63  }
 0x3a0   : > { %4176 = vperm.xlu1 %9904, %v10670_v8  }
 0x3a4   : > { %4182 = vperm.xlu1 %9904, %v10676_v40  }
 0x3a8   : > { %4188 = vperm.xlu1 %9904, %v10685_v17  }
 0x3ac   : > { %9907 = vset.pattern.permute.xlu1 %v10004_v23 }
 0x3ad   : > { %5153 = vperm.xlu1 %9907, %v10664_v49  }
 0x3b1   : > { %5156 = vperm.xlu1 %9907, %v10673_v63  }
 0x3b5   : > { %5162 = vperm.xlu1 %9907, %v10679_v61  }
 0x3b9   : > { %5168 = vperm.xlu1 %9907, %v10682_v6  }
 0x404   : > { %v3250_v16 = vpop.xlane.xlu1 %3249 }
 0x405   : > { %v3251_v11 = vsub.f32 %v3247_v9, %v3250_v16 }
 0x407   : > { %v3252_v36 = vmul.f32 1.442695, %v3251_v11 }
 0x408   : > { %v3260_v18 = vpop.permute.xlu1 %3259 }
 0x409   : > { %9911 = vpow2.f32 %v3252_v36  ;;  %v10718_v57 = vand.u32 4294901760, %v3260_v18 }
 0x40b   : > { %8988 = vmatpush3.msra.mxu1 %v10718_v57  ;;  %v10749_v2 = vsub.f32 %v3260_v18, %v10718_v57 }
 0x40c   : > { %8992 = vmatprep.subr.mxu1 %v9998_v38  ;;  %v10741_v26 = vpop.permute.xlu1 %3713 }
 0x40d   : > { %v3717_v56 = vsel %vm2712_vm3, %v10741_v26, 0 }
 0x40e   : > { %v10803_v53 = vand.u32 4294901760, %v3717_v56 }
 0x410   : > { %v4695_v42 = vpop.permute.xlu1 %4694  ;;  %v3797_v58 = vsub.f32 %v3717_v56, %v10803_v53 }
 0x411   : > { %v4698_v22 = vsel %vm2712_vm3, %v4695_v42, 0 }
 0x412   : > { %v10744_v24 = vand.u32 4294901760, %v4698_v22  ;;  %v3798_v10 = vand.u32 4294901760, %v3797_v58 }
 0x413   : > { %v9912_v47 = vpop.eup %9911 }
 0x414   : > { %v3254_v60 = vsel %vm2712_vm3, %v9912_v47, 0.0  ;;  %v4769_v43 = vsub.f32 %v4698_v22, %v10744_v24  ;;  %v5678_v50 = vpop.permute.xlu1 %5677  ;;  %v3799_v16 = vsub.f32 %v3797_v58, %v3798_v10 }
 0x415   : > { %3255 = vadd.xlane.f32.xlu0 %v3254_v60  ;;  %v5681_v27 = vsel %vm2712_vm3, %v5678_v50, 0 }
 0x416   : > { %v4770_v45 = vand.u32 4294901760, %v4769_v43  ;;  %v10780_v37 = vand.u32 4294901760, %v5681_v27  ;;  %v3800_v36 = vand.u32 4294901760, %v3799_v16 }
 0x418   : > { %v4771_v51 = vsub.f32 %v4769_v43, %v4770_v45  ;;  %v5752_v4 = vsub.f32 %v5681_v27, %v10780_v37 }
 0x41a   : > { %v4772_v62 = vand.u32 4294901760, %v4771_v51  ;;  %v5753_v35 = vand.u32 4294901760, %v5752_v4 }
 0x41c   : > { %v5754_v29 = vsub.f32 %v5752_v4, %v5753_v35 }
 0x41e   : > { %v5755_v59 = vand.u32 4294901760, %v5754_v29 }
 0x42b   : > { %3711 = vrot.lane.b32.xlu0 %v10632_v7, %s10001_s0  ;;  %v10005_v7 = vmov 3   ;;  %s8396_s0 = sshll.u32 %s10149_s4, 7  ;;  %s10012_s4 = smov [#allocation2]  }
 0x42c   : > { %s9934_s24 = sshll.u32 %s10012_s4, 4  ;;  %s9935_s24 = int_to_ptr.vmem [resolvable:$false] %s9934_s24 }
 0x42f   : > { %4696 = vrot.lane.b32.xlu0 %v10639_v19, %s10002_s1  ;;  %s10010_s1 = smov 16  }
 0x433   : > { %5679 = vrot.lane.b32.xlu0 %v10639_v19, %s10003_s26 }
 0x437   : > { %4170 = vperm.xlu0 %9905, %v10664_v49  }
 0x43b   : > { %4179 = vperm.xlu0 %9905, %v10679_v61  }
 0x43f   : > { %4185 = vperm.xlu0 %9905, %v10682_v6  }
 0x443   : > { %9906 = vset.pattern.permute.xlu0 %v10004_v23 }
 0x444   : > { %5150 = vperm.xlu0 %9906, %v10667_v0  }
 0x448   : > { %5159 = vperm.xlu0 %9906, %v10670_v8  }
 0x44c   : > { %5165 = vperm.xlu0 %9906, %v10676_v40  }
 0x450   : > { %5171 = vperm.xlu0 %9906, %v10685_v17  }
 0x454   : > { %9908 = vset.pattern.permute.xlu0 %v10005_v7 }
 0x455   : > { %6133 = vperm.xlu0 %9908, %v10667_v0  }
 0x459   : > { %6136 = vperm.xlu0 %9908, %v10664_v49  }
 0x45d   : > { %6139 = vperm.xlu0 %9908, %v10673_v63  }
 0x461   : > { %6142 = vperm.xlu0 %9908, %v10670_v8  }
 0x465   : > { %6145 = vperm.xlu0 %9908, %v10679_v61   ;;  %v3344_v61 = vand.u32 4294901760, %v10749_v2 }
 0x467   : > { %v3345_v21 = vsub.f32 %v10749_v2, %v3344_v61 }
 0x469   : > { %6148 = vperm.xlu0 %9908, %v10676_v40   ;;  %v3346_v14 = vand.u32 4294901760, %v3345_v21 }
 0x46d   : > { %6151 = vperm.xlu0 %9908, %v10682_v6  }
 0x471   : > { %6154 = vperm.xlu0 %9908, %v10685_v17  }
 0x4a2   : > { %v3256_v32 = vpop.xlane.xlu0 %3255 }
 0x4a3   : > { %9913 = vrcp.f32 %v3256_v32 }
 0x4a6   : > { %v3712_v44 = vpop.permute.xlu0 %3711 }
 0x4a7   : > { %v3715_v12 = vsel %vm2712_vm3, %v3712_v44, 0 }
 0x4a8   : > { %v10800_v33 = vand.u32 4294901760, %v3715_v12 }
 0x4aa   : > { %v4697_v49 = vpop.permute.xlu0 %4696  ;;  %v3786_v55 = vsub.f32 %v3715_v12, %v10800_v33 }
 0x4ab   : > { %v4700_v52 = vsel %vm2712_vm3, %v4697_v49, 0 }
 0x4ac   : > { %v4703_v0 = vand.u32 4294901760, %v4700_v52  ;;  %v3787_v9 = vand.u32 4294901760, %v3786_v55 }
 0x4ad   : > { %v9914_v1 = vpop.eup %9913 }
 0x4ae   : > { %v3258_v8 = vmul.f32 %v9914_v1, %v9912_v47  ;;  %v4780_v31 = vsub.f32 %v4700_v52, %v4703_v0  ;;  %9078 = vmatpush3.xpose.msra.mxu0 %v4703_v0  ;;  %v5680_v25 = vpop.permute.xlu0 %5679  ;;  %v3788_v23 = vsub.f32 %v3786_v55, %v3787_v9 }
 0x4af   : > { %9082 = vmatprep.subr.mxu0 %v9998_v38  ;;  %v5683_v28 = vsel %vm2712_vm3, %v5680_v25, 0 }
 0x4b0   : > { %v4781_v63 = vand.u32 4294901760, %v4780_v31  ;;  %v3263_v5 = vsel %vm2712_vm3, %v3258_v8, 0  ;;  %v10783_v48 = vand.u32 4294901760, %v5683_v28  ;;  %v3789_v11 = vand.u32 4294901760, %v3788_v23 }
 0x4b1   : > { %9080 = vmatmul.mubr.f32.vlgmr.msra.gmra.mrb[10].mxu0 %v4772_v62  ;;  %v10753_v40 = vand.u32 4294901760, %v3263_v5 }
 0x4b2   : > { %v4782_v6 = vsub.f32 %v4780_v31, %v4781_v63  ;;  %9084 = vmatprep.mubr.msk.f32.mxu0 %vm9997_vm1, %v9998_v38  ;;  %v5763_v39 = vsub.f32 %v5683_v28, %v10783_v48 }
 0x4b3   : > { %v3332_v17 = vsub.f32 %v3263_v5, %v10753_v40 }
 0x4b4   : > { %v4783_v41 = vand.u32 4294901760, %v4782_v6  ;;  %v5764_v30 = vand.u32 4294901760, %v5763_v39 }
 0x4b5   : > { %v3333_v20 = vand.u32 4294901760, %v3332_v17 }
 0x4b6   : > { %9083 = vmatpush3.xpose.msra.mxu0 %v4783_v41  ;;  %v5765_v54 = vsub.f32 %v5763_v39, %v5764_v30  ;;  %v4171_v18 = vpop.permute.xlu0 %4170 }
 0x4b7   : > { %9087 = vmatprep.subr.mxu0 %v9998_v38  ;;  %v3334_v13 = vsub.f32 %v3332_v17, %v3333_v20  ;;  %v4197_v62 = vrot.slane %v4171_v18, %v10251_v46 }
 0x4b8   : > { %v5766_v15 = vand.u32 4294901760, %v5765_v54 }
 0x4b9   : > { %9085 = vmatmul.mubr.f32.vlgmr.msra.gmra.mrb[10].mxu0 %v10744_v24  ;;  %v3335_v3 = vand.u32 4294901760, %v3334_v13 }
 0x4ba   : > { %9088 = vmatpush3.xpose.msra.mxu0 %v4780_v31  ;;  %9089 = vmatprep.mubr.msk.f32.mxu0 %vm9997_vm1, %v9998_v38 }
 0x4bb   : > { %8990 = vmatmul.mubr.f32.vlgmr.msra.gmra.mrb[6].mxu1 %v3335_v3  ;;  %9092 = vmatprep.subr.mxu0 %v9998_v38 }
 0x4bc   : > { %8993 = vmatpush3.msra.mxu1 %v3346_v14  ;;  %8994 = vmatprep.mubr.msk.f32.mxu1 %vm9997_vm1, %v9998_v38 }
 0x4bd   : > { %8997 = vmatprep.subr.mxu1 %v9998_v38 }
 0x4c1   : > { %9090 = vmatmul.mubr.f32.vlgmr.msra.gmra.mrb[10].mxu0 %v4769_v43 }
 0x4c2   : > { %9093 = vmatpush3.xpose.msra.mxu0 %v4703_v0  ;;  %9094 = vmatprep.mubr.msk.f32.mxu0 %vm9997_vm1, %v9998_v38 }
 0x4c3   : > { %8995 = vmatmul.mubr.f32.vlgmr.msra.gmra.mrb[6].mxu1 %v10753_v40  ;;  %9097 = vmatprep.subr.mxu0 %v9998_v38 }
 0x4c4   : > { %8998 = vmatpush3.msra.mxu1 %v10749_v2  ;;  %8999 = vmatprep.mubr.msk.f32.mxu1 %vm9997_vm1, %v9998_v38 }
 0x4c5   : > { %9002 = vmatprep.subr.mxu1 %v9998_v38 }
 0x4c9   : > { %9095 = vmatmul.mubr.f32.vlgmr.msra.gmra.mrb[10].mxu0 %v4770_v45 }
 0x4ca   : > { %9098 = vmatpush3.xpose.msra.mxu0 %v4781_v63  ;;  %9099 = vmatprep.mubr.msk.f32.mxu0 %vm9997_vm1, %v9998_v38 }
 0x4cb   : > { %9000 = vmatmul.mubr.f32.vlgmr.msra.gmra.mrb[6].mxu1 %v3332_v17  ;;  %9102 = vmatprep.subr.mxu0 %v9998_v38 }
 0x4cc   : > { %9003 = vmatpush3.msra.mxu1 %v10718_v57  ;;  %9004 = vmatprep.mubr.msk.f32.mxu1 %vm9997_vm1, %v9998_v38 }
 0x4cd   : > { %9007 = vmatprep.subr.mxu1 %v9998_v38 }
 0x4d1   : > { %9100 = vmatmul.mubr.f32.vlgmr.msra.gmra.mrb[10].mxu0 %v10744_v24 }
 0x4d2   : > { %9103 = vmatpush3.xpose.msra.mxu0 %v4703_v0  ;;  %9104 = vmatprep.mubr.msk.f32.mxu0 %vm9997_vm1, %v9998_v38 }
 0x4d3   : > { %9005 = vmatmul.mubr.f32.vlgmr.msra.gmra.mrb[6].mxu1 %v3333_v20  ;;  %9137 = vmatprep.subr.mxu0 %v9998_v38 }
 0x4d4   : > { %9008 = vmatpush3.msra.mxu1 %v3344_v61  ;;  %9009 = vmatprep.mubr.msk.f32.mxu1 %vm9997_vm1, %v9998_v38 }
 0x4d5   : > { %9012 = vmatprep.subr.mxu1 %v9998_v38 }
 0x4d9   : > { %9105 = vmatmul.mubr.f32.vlgmr.msra.gmra.mrb[10].mxu0 %v10744_v24  ;;  %v4168_v24 = vpop.permute.xlu1 %4167 }
 0x4da   : > { %9138 = vmatpush3.xpose.msra.mxu0 %v10783_v48  ;;  %9139 = vmatprep.mubr.msk.f32.mxu0 %vm9997_vm1, %v9998_v38  ;;  %v4193_v5 = vrot.slane %v4168_v24, %v10251_v46 }
 0x4db   : > { %9010 = vmatmul.mubr.f32.vlgmr.msra.gmra.mrb[6].mxu1 %v10753_v40  ;;  %9142 = vmatprep.subr.mxu0 %v9998_v38 }
 0x4dc   : > { %9013 = vmatpush3.msra.mxu1 %v10718_v57  ;;  %9014 = vmatprep.mubr.msk.f32.mxu1 %vm9997_vm1, %v9998_v38  ;;  %v4180_v57 = vpop.permute.xlu0 %4179  ;;  %v4222_v61 = vsel %vm3232_vm4, %v4197_v62, %v4193_v5 }
 0x4dd   : > { %9140 = vmatmul.mubr.f32.vlgmr.msra.gmra.mrb[12].mxu0 %v5755_v59  ;;  %9017 = vmatprep.subr.mxu1 %v9998_v38  ;;  %v4174_v43 = vpop.permute.xlu1 %4173  ;;  %v4209_v14 = vrot.slane %v4180_v57, %v10251_v46 }
 0x4de   : > { %9143 = vmatpush3.xpose.msra.mxu0 %v5766_v15  ;;  %9144 = vmatprep.mubr.msk.f32.mxu0 %vm9997_vm1, %v9998_v38  ;;  %v4201_v6 = vrot.slane %v4174_v43, %v10251_v46 }
 0x4df   : > { %9147 = vmatprep.subr.mxu0 %v9998_v38 }
 0x4e0   : > { %v4186_v47 = vpop.permute.xlu0 %4185  ;;  %v4223_v41 = vsel %vm3234_vm5, %v4201_v6, %v4222_v61 }
 0x4e1   : > { %v4177_v51 = vpop.permute.xlu1 %4176 }
 0x4e2   : > { %v4205_v21 = vrot.slane %v4177_v51, %v10251_v46 }
 0x4e3   : > { %9015 = vmatmul.mubr.f32.vlgmr.msra.gmra.mrb[6].mxu1 %v10753_v40 }
 0x4e4   : > { %9018 = vmatpush3.xpose.msra.mxu1 %v10803_v53  ;;  %9019 = vmatprep.mubr.msk.f32.mxu1 %vm9997_vm1, %v9998_v38  ;;  %v5151_v60 = vpop.permute.xlu0 %5150  ;;  %v4224_v27 = vsel %vm3236_vm6, %v4205_v21, %v4223_v41 }
 0x4e5   : > { %9145 = vmatmul.mubr.f32.vlgmr.msra.gmra.mrb[12].mxu0 %v10780_v37  ;;  %9022 = vmatprep.subr.mxu1 %v9998_v38  ;;  %v4183_v0 = vpop.permute.xlu1 %4182  ;;  %v5176_v17 = vrot.slane %v5151_v60, %v10251_v46 }
 0x4e6   : > { %9148 = vmatpush3.xpose.msra.mxu0 %v5763_v39  ;;  %9149 = vmatprep.mubr.msk.f32.mxu0 %vm9997_vm1, %v9998_v38  ;;  %v4217_v39 = vrot.slane %v4186_v47, %v10251_v46 }
 0x4e7   : > { %9020 = vmatmul.mubr.f32.vlgmr.msra.gmra.mrb[8].mxu1 %v3789_v11  ;;  %9152 = vmatprep.subr.mxu0 %v9998_v38 }
 0x4e8   : > { %9023 = vmatpush3.xpose.msra.mxu1 %v3800_v36  ;;  %9024 = vmatprep.mubr.msk.f32.mxu1 %vm9997_vm1, %v9998_v38  ;;  %v5160_v7 = vpop.permute.xlu0 %5159 }
 0x4e9   : > { %9027 = vmatprep.subr.mxu1 %v9998_v38  ;;  %v4189_v2 = vpop.permute.xlu1 %4188 }
 0x4ec   : > { %v5166_v42 = vpop.permute.xlu0 %5165 }
 0x4ed   : > { %9150 = vmatmul.mubr.f32.vlgmr.msra.gmra.mrb[12].mxu0 %v5752_v4  ;;  %v5154_v31 = vpop.permute.xlu1 %5153  ;;  %v4225_v4 = vsel %vm3238_vm7, %v4209_v14, %v4224_v27 }
 0x4ee   : > { %9153 = vmatpush3.xpose.msra.mxu0 %v10783_v48  ;;  %9154 = vmatprep.mubr.msk.f32.mxu0 %vm9997_vm1, %v9998_v38  ;;  %v5180_v13 = vrot.slane %v5154_v31, %v10251_v46 }
 0x4ef   : > { %9025 = vmatmul.mubr.f32.vlgmr.msra.gmra.mrb[8].mxu1 %v10800_v33  ;;  %9157 = vmatprep.subr.mxu0 %v9998_v38 }
 0x4f0   : > { %9028 = vmatpush3.xpose.msra.mxu1 %v3797_v58  ;;  %9029 = vmatprep.mubr.msk.f32.mxu1 %vm9997_vm1, %v9998_v38  ;;  %v10866_v32 = vpop.permute.xlu0 %5171  ;;  %v5205_v28 = vsel %vm3232_vm4, %v5180_v13, %v5176_v17  ;;  %v4221_v58 = vrot.slane %v4189_v2, %v10251_v46 }
 0x4f1   : > { %9032 = vmatprep.subr.mxu1 %v9998_v38  ;;  %v5157_v40 = vpop.permute.xlu1 %5156  ;;  %v5204_v23 = vrot.slane %v10866_v32, %v10251_v46 }
 0x4f4   : > { %v6134_v49 = vpop.permute.xlu0 %6133 }
 0x4f5   : > { %9155 = vmatmul.mubr.f32.vlgmr.msra.gmra.mrb[12].mxu0 %v5753_v35  ;;  %v5163_v25 = vpop.permute.xlu1 %5162  ;;  %v4213_v35 = vrot.slane %v4183_v0, %v10251_v46  ;;  %v6159_v16 = vrot.slane %v6134_v49, %v10251_v46 }
 0x4f6   : > { %9158 = vmatpush3.xpose.msra.mxu0 %v5764_v30  ;;  %9159 = vmatprep.mubr.msk.f32.mxu0 %vm9997_vm1, %v9998_v38 }
 0x4f7   : > { %9030 = vmatmul.mubr.f32.vlgmr.msra.gmra.mrb[8].mxu1 %v3786_v55  ;;  %9162 = vmatprep.subr.mxu0 %v9998_v38  ;;  %v4226_v54 = vsel %vm3240_vm8, %v4213_v35, %v4225_v4 }
 0x4f8   : > { %9033 = vmatpush3.xpose.msra.mxu1 %v10803_v53  ;;  %9034 = vmatprep.mubr.msk.f32.mxu1 %vm9997_vm1, %v9998_v38  ;;  %v6137_v52 = vpop.permute.xlu0 %6136  ;;  %v4227_v59 = vsel %vm3242_vm9, %v4217_v39, %v4226_v54 }
 0x4f9   : > { %9037 = vmatprep.subr.mxu1 %v9998_v38  ;;  %v5169_v29 = vpop.permute.xlu1 %5168  ;;  %v6163_v55 = vrot.slane %v6137_v52, %v10251_v46  ;;  %v4228_v43 = vsel %vm3244_vm10, %v4221_v58, %v4227_v59 }
 0x4fa   : > { %v5200_v18 = vrot.slane %v5169_v29, %v10251_v46 }
 0x4fc   : > { %v6140_v1 = vpop.permute.xlu0 %6139 }
 0x4fd   : > { %9160 = vmatmul.mubr.f32.vlgmr.msra.gmra.mrb[12].mxu0 %v10780_v37 }
 0x4fe   : > { %9163 = vmatpush3.xpose.msra.mxu0 %v10783_v48  ;;  %9164 = vmatprep.mubr.msk.f32.mxu0 %vm9997_vm1, %v9998_v38  ;;  %v5184_v48 = vrot.slane %v5157_v40, %v10251_v46 }
 0x4ff   : > { %9035 = vmatmul.mubr.f32.vlgmr.msra.gmra.mrb[8].mxu1 %v3787_v9  ;;  %9539 = vmatprep.subr.bf16.mxu0 %v9996_v34  ;;  %v6167_v9 = vrot.slane %v6140_v1, %v10251_v46 }
 0x500   : > { %9038 = vmatpush3.xpose.msra.mxu1 %v3798_v10  ;;  %9039 = vmatprep.mubr.msk.f32.mxu1 %vm9997_vm1, %v9998_v38  ;;  %v6143_v8 = vpop.permute.xlu0 %6142  ;;  %v5206_v12 = vsel %vm3234_vm5, %v5184_v48, %v5205_v28 }
 0x501   : > { %9042 = vmatprep.subr.mxu1 %v9998_v38  ;;  %v6171_v11 = vrot.slane %v6143_v8, %v10251_v46 }
 0x504   : > { %v6146_v63 = vpop.permute.xlu0 %6145 }
 0x505   : > { %9165 = vmatmul.mubr.f32.vlgmr.msra.gmra.mrb[12].mxu0 %v10780_v37  ;;  %v5188_v37 = vrot.slane %v5160_v7, %v10251_v46  ;;  %v6175_v57 = vrot.slane %v6146_v63, %v10251_v46 }
 0x506   : > { %9205 = vmatprep.mubr.msk.f32.mxu0 %vm9997_vm1, %v9998_v38 }
 0x507   : > { %9040 = vmatmul.mubr.f32.vlgmr.msra.gmra.mrb[8].mxu1 %v10800_v33  ;;  %v5207_v30 = vsel %vm3236_vm6, %v5188_v37, %v5206_v12 }
 0x508   : > { %9043 = vmatpush3.xpose.msra.mxu1 %v10803_v53  ;;  %9044 = vmatprep.mubr.msk.f32.mxu1 %vm9997_vm1, %v9998_v38  ;;  %v6149_v20 = vpop.permute.xlu0 %6148  ;;  %v5192_v53 = vrot.slane %v5163_v25, %v10251_v46 }
 0x509   : > { %9047 = vmatprep.subr.mxu1 %v9998_v38  ;;  %v6179_v24 = vrot.slane %v6149_v20, %v10251_v46 }
 0x50a   : > { %v5208_v15 = vsel %vm3238_vm7, %v5192_v53, %v5207_v30 }
 0x50c   : > { %v6152_v56 = vpop.permute.xlu0 %6151 }
 0x50f   : > { %9045 = vmatmul.mubr.f32.vlgmr.msra.gmra.mrb[8].mxu1 %v10800_v33  ;;  %v5196_v33 = vrot.slane %v5166_v42, %v10251_v46 }
 0x510   : > { %9049 = vmatprep.mubr.msk.f32.mxu1 %vm9997_vm1, %v9998_v38  ;;  %v6155_v47 = vpop.permute.xlu0 %6154 }
 0x511   : > { %v5209_v10 = vsel %vm3240_vm8, %v5196_v33, %v5208_v15  ;;  %v6187_v0 = vrot.slane %v6155_v47, %v10251_v46 }
 0x512   : > { %v5210_v51 = vsel %vm3242_vm9, %v5200_v18, %v5209_v10 }
 0x5ac   : > { %v5144_v26 = vpop.f32.mrb[10].mxu0 }
 0x5ad   : > { %v9106_v22 = vpop.f32.mrb[11].mxu0  ;;  %v5148_v60 = vmul.f32 0.35355338, %v5144_v26  ;;  %v5211_v26 = vsel %vm3244_vm10, %v5204_v23, %v5210_v51 }
 0x5ae   : > { %v6188_v22 = vsel %vm3232_vm4, %v6163_v55, %v6159_v16 }
 0x5af   : > { %v6189_v32 = vsel %vm3234_vm5, %v6167_v9, %v6188_v22  ;;  %v5213_v31 = vadd.f32 %v5211_v26, %v5148_v60 }
 0x5b0   : > { %v6190_v52 = vsel %vm3236_vm6, %v6171_v11, %v6189_v32 }
 0x5b1   : > { %v6191_v1 = vsel %vm3238_vm7, %v6175_v57, %v6190_v52  ;;  %v5214_v40 = vsel %vm2712_vm3, %v5213_v31, -inf }
 0x5b2   : > { %v6192_v62 = vsel %vm3240_vm8, %v6179_v24, %v6191_v1 }
 0x5b6   : > { %v10868_v44 = vpop.f32.mrb[6].mxu1 }
 0x5b7   : > { %v9016_v45 = vpop.f32.mrb[7].mxu1 }
 0x5b8   : > { %v6183_v45 = vrot.slane %v6152_v56, %v10251_v46 }
 0x5ba   : > { %v6193_v63 = vsel %vm3242_vm9, %v6183_v45, %v6192_v62 }
 0x5bb   : > { %v6194_v5 = vsel %vm3244_vm10, %v6187_v0, %v6193_v63 }
 0x5d8   : > { %v6127_v3 = vpop.f32.mrb[12].mxu0 }
 0x5d9   : > { %v9166_v50 = vpop.f32.mrb[13].mxu0  ;;  %v6131_v2 = vmul.f32 0.35355338, %v6127_v3 }
 0x5db   : > { %v6196_v61 = vadd.f32 %v6194_v5, %v6131_v2 }
 0x5dd   : > { %v6197_v46 = vsel %vm2712_vm3, %v6196_v61, -inf }
 0x5e2   : > { %v4161_v36 = vpop.f32.mrb[8].mxu1 }
 0x5e3   : > { %v4165_v7 = vmul.f32 0.35355338, %v4161_v36  ;;  %v9046_v42 = vpop.f32.mrb[9].mxu1 }
 0x5e5   : > { %v4230_v49 = vadd.f32 %v4228_v43, %v4165_v7 }
 0x5e7   : > { %v4231_v8 = vsel %vm2712_vm3, %v4230_v49, -inf }
 0x5e8   : > { %4232 = vmax.xlane.f32.xlu1 %v4231_v8 }
 0x5ec   : > { %5215 = vmax.xlane.f32.xlu1 %v5214_v40 }
 0x5f0   : > { %6198 = vmax.xlane.f32.xlu1 %v6197_v46 }
 0x601   : > { %4242 = vrot.lane.b32.xlu1 %v10639_v19, %s10006_s27 }
 0x675   : > { %v4233_v6 = vpop.xlane.xlu1 %4232 }
 0x676   : > { %v4234_v17 = vsub.f32 %v4230_v49, %v4233_v6 }
 0x678   : > { %v4235_v41 = vmul.f32 1.442695, %v4234_v17  ;;  %v6676_v17 = vld [vmem:[%s11282_s14] sm:$0xff] }
 0x679   : > { %v5216_v20 = vpop.xlane.xlu1 %5215 }
 0x67a   : > { %9915 = vpow2.f32 %v4235_v41  ;;  %v5217_v21 = vsub.f32 %v5213_v31, %v5216_v20  ;;  %v6677_v41 = vld [vmem:[%s11282_s14 + $0x8] sm:$0xff]  ;;  %v6684_v20 = vand.u32 4294901760, %v6676_v17 }
 0x67c   : > { %v5218_v13 = vmul.f32 1.442695, %v5217_v21  ;;  %v6687_v21 = vand.u32 4294901760, %v6677_v41 }
 0x67d   : > { %v6199_v3 = vpop.xlane.xlu1 %6198 }
 0x67e   : > { %9917 = vpow2.f32 %v5218_v13  ;;  %v6200_v48 = vsub.f32 %v6196_v61, %v6199_v3  ;;  %v10992_v13 = vsub.f32 %v6676_v17, %v6684_v20  ;;  %v10994_v3 = vsub.f32 %v6677_v41, %v6687_v21 }
 0x680   : > { %v6201_v4 = vmul.f32 1.442695, %v6200_v48 }
 0x681   : > { %v4243_v14 = vpop.permute.xlu1 %4242 }
 0x682   : > { %v4249_v50 = vand.u32 4294901760, %v4243_v14  ;;  %9919 = vpow2.f32 %v6201_v4 }
 0x684   : > { %v9916_v25 = vpop.eup %9915  ;;  %9048 = vmatpush3.msra.mxu1 %v4249_v50  ;;  %v4326_v30 = vsub.f32 %v4243_v14, %v4249_v50  ;;  %v6765_v14 = vand.u32 4294901760, %v10992_v13 }
 0x685   : > { %v4237_v27 = vsel %vm2712_vm3, %v9916_v25, 0.0  ;;  %9052 = vmatprep.subr.mxu1 %v9998_v38 }
 0x686   : > { %4238 = vadd.xlane.f32.xlu0 %v4237_v27  ;;  %v4327_v54 = vand.u32 4294901760, %v4326_v30 }
 0x688   : > { %v9918_v28 = vpop.eup %9917  ;;  %v4328_v58 = vsub.f32 %v4326_v30, %v4327_v54 }
 0x689   : > { %v5220_v37 = vsel %vm2712_vm3, %v9918_v28, 0.0 }
 0x68a   : > { %5221 = vadd.xlane.f32.xlu1 %v5220_v37  ;;  %v4329_v9 = vand.u32 4294901760, %v4328_v58 }
 0x68c   : > { %v10925_v39 = vpop.eup %9919 }
 0x68d   : > { %v6203_v12 = vsel %vm2712_vm3, %v10925_v39, 0.0 }
 0x69b   : > { %6208 = vrot.lane.b32.xlu1 %v10639_v19, %s10007_s29  ;;  %s11225_s29 = scalar_lea.hbm %s11290_s22, %s8396_s0 }
 0x69c   : > { %5225 = vrot.lane.b32.xlu0 %v10639_v19, %s10008_s3  ;;  %s8265_s3 = scalar_lea.sflag [#allocation3], %s711_s2 }
 0x6bb   : > { %6204 = vadd.xlane.f32.xlu0 %v6203_v12  ;;  %v6678_v12 = vld [vmem:[%s11282_s14 + $0x10] sm:$0xff] }
 0x713   : > { %v4239_v56 = vpop.xlane.xlu0 %4238 }
 0x714   : > { %9921 = vrcp.f32 %v4239_v56  ;;  %v6679_v56 = vld [vmem:[%s11282_s14 + $0x18] sm:$0xff] }
 0x717   : > { %v5222_v10 = vpop.xlane.xlu1 %5221  ;;  %v5226_v36 = vpop.permute.xlu0 %5225 }
 0x718   : > { %9923 = vrcp.f32 %v5222_v10  ;;  %v5232_v57 = vand.u32 4294901760, %v5226_v36 }
 0x71a   : > { %v5309_v60 = vsub.f32 %v5226_v36, %v5232_v57 }
 0x71b   : > { %v6209_v0 = vpop.permute.xlu1 %6208 }
 0x71c   : > { %v5310_v42 = vand.u32 4294901760, %v5309_v60  ;;  %v6215_v1 = vand.u32 4294901760, %v6209_v0 }
 0x71e   : > { %v9922_v35 = vpop.eup %9921  ;;  %v5311_v24 = vsub.f32 %v5309_v60, %v5310_v42  ;;  %v6292_v8 = vsub.f32 %v6209_v0, %v6215_v1 }
 0x71f   : > { %v4241_v33 = vmul.f32 %v9922_v35, %v9916_v25  ;;  %v6766_v25 = vsub.f32 %v10992_v13, %v6765_v14  ;;  %v6690_v35 = vand.u32 4294901760, %v6678_v12 }
 0x720   : > { %v5312_v32 = vand.u32 4294901760, %v5311_v24  ;;  %v6293_v62 = vand.u32 4294901760, %v6292_v8 }
 0x721   : > { %v4246_v53 = vsel %vm2712_vm3, %v4241_v33, 0  ;;  %v6778_v33 = vsub.f32 %v6678_v12, %v6690_v35  ;;  %v7208_v12 = vld [vmem:[%s11286_s18 + $0x10] sm:$0xff] }
 0x722   : > { %v4314_v29 = vand.u32 4294901760, %v4246_v53  ;;  %v9924_v23 = vpop.eup %9923  ;;  %v6294_v5 = vsub.f32 %v6292_v8, %v6293_v62 }
 0x723   : > { %v5224_v16 = vmul.f32 %v9924_v23, %v9918_v28  ;;  %v6767_v28 = vand.u32 4294901760, %v6766_v25  ;;  %v9552_v23 = vpack.c.bf16 %v10994_v3, %v10992_v13  ;;  %v9929_v13 = vld [vmem:[%s10184_s5] sm:$0xff]  ;;  %s713_s5 = scalar_lea.vmem [#allocation2], %s8377_s25  ;;  %s9936_s25 = scalar_lea.vmem %s9935_s24, 256 }
 0x724   : > { %v4315_v55 = vsub.f32 %v4246_v53, %v4314_v29  ;;  %v6295_v61 = vand.u32 4294901760, %v6294_v5 }
 0x725   : > { %v5229_v11 = vsel %vm2712_vm3, %v5224_v16, 0 }
 0x726   : > { %v4316_v19 = vand.u32 4294901760, %v4315_v55  ;;  %v5297_v18 = vand.u32 4294901760, %v5229_v11 }
 0x728   : > { %v4317_v59 = vsub.f32 %v4315_v55, %v4316_v19  ;;  %v5298_v47 = vsub.f32 %v5229_v11, %v5297_v18 }
 0x72a   : > { %v4318_v15 = vand.u32 4294901760, %v4317_v59  ;;  %v5299_v7 = vand.u32 4294901760, %v5298_v47 }
 0x72c   : > { %9050 = vmatmul.mubr.f32.vlgmr.msra.gmra.mrb[10].mxu1 %v4318_v15  ;;  %v5300_v22 = vsub.f32 %v5298_v47, %v5299_v7 }
 0x72d   : > { %9053 = vmatpush3.msra.mxu1 %v4329_v9  ;;  %9054 = vmatprep.mubr.msk.f32.mxu1 %vm9997_vm1, %v9998_v38  ;;  %v9540_v9 = vpack.c.bf16 %v6687_v21, %v6684_v20  ;;  %v8390_v21 = vld [vmem:[%s11283_s15] ss:$0 sm:$0xff] }
 0x72e   : > { %9057 = vmatprep.subr.mxu1 %v9998_v38  ;;  %v5301_v43 = vand.u32 4294901760, %v5300_v22 }
 0x72f   : > { %9541 = vmatpush3.bf16.msra.mxu0 %v9540_v9 }
 0x730   : > { %9542 = vmatprep.subr.bf16.mxu0 %v9996_v34 }
 0x734   : > { %9055 = vmatmul.mubr.f32.vlgmr.msra.gmra.mrb[10].mxu1 %v4314_v29 }
 0x735   : > { %9058 = vmatpush3.msra.mxu1 %v4326_v30  ;;  %9059 = vmatprep.mubr.msk.f32.mxu1 %vm9997_vm1, %v9998_v38  ;;  %v6693_v30 = vand.u32 4294901760, %v6679_v56 }
 0x736   : > { %9062 = vmatprep.subr.mxu1 %v9998_v38 }
 0x737   : > { %v6785_v53 = vsub.f32 %v6679_v56, %v6693_v30  ;;  %v9543_v10 = vpack.c.bf16 %v6693_v30, %v6690_v35  ;;  %v7209_v30 = vld [vmem:[%s11286_s18 + $0x18] sm:$0xff] }
 0x739   : > { %9544 = vmatpush3.bf16.msra.mxu0 %v9543_v10  ;;  %v9555_v36 = vpack.c.bf16 %v6785_v53, %v6778_v33 }
 0x73a   : > { %9551 = vmatprep.subr.bf16.mxu0 %v9996_v34 }
 0x73c   : > { %9060 = vmatmul.mubr.f32.vlgmr.msra.gmra.mrb[10].mxu1 %v4315_v55 }
 0x73d   : > { %9063 = vmatpush3.msra.mxu1 %v4249_v50  ;;  %9064 = vmatprep.mubr.msk.f32.mxu1 %vm9997_vm1, %v9998_v38 }
 0x73e   : > { %9067 = vmatprep.subr.mxu1 %v9998_v38 }
 0x744   : > { %9065 = vmatmul.mubr.f32.vlgmr.msra.gmra.mrb[10].mxu1 %v4316_v19 }
 0x745   : > { %9068 = vmatpush3.msra.mxu1 %v4327_v54  ;;  %9069 = vmatprep.mubr.msk.f32.mxu1 %vm9997_vm1, %v9998_v38  ;;  %v6786_v54 = vand.u32 4294901760, %v6785_v53 }
 0x746   : > { %9072 = vmatprep.subr.mxu1 %v9998_v38 }
 0x747   : > { %v6787_v19 = vsub.f32 %v6785_v53, %v6786_v54  ;;  %v7230_v53 = vand.u32 4294901760, %v7209_v30 }
 0x748   : > { %v6205_v45 = vpop.xlane.xlu0 %6204 }
 0x749   : > { %9925 = vrcp.f32 %v6205_v45  ;;  %v6788_v59 = vand.u32 4294901760, %v6787_v19 }
 0x74c   : > { %9070 = vmatmul.mubr.f32.vlgmr.msra.gmra.mrb[10].mxu1 %v4314_v29 }
 0x74d   : > { %9073 = vmatpush3.msra.mxu1 %v4249_v50  ;;  %9074 = vmatprep.mubr.msk.f32.mxu1 %vm9997_vm1, %v9998_v38  ;;  %v6772_v50 = vand.u32 4294901760, %v10994_v3 }
 0x74e   : > { %9107 = vmatprep.subr.mxu1 %v9998_v38 }
 0x74f   : > { %v6773_v27 = vsub.f32 %v10994_v3, %v6772_v50 }
 0x751   : > { %v6774_v37 = vand.u32 4294901760, %v6773_v27 }
 0x753   : > { %v9926_v49 = vpop.eup %9925  ;;  %v9546_v48 = vpack.c.bf16 %v6774_v37, %v6767_v28 }
 0x754   : > { %9075 = vmatmul.mubr.f32.vlgmr.msra.gmra.mrb[10].mxu1 %v4314_v29  ;;  %v6207_v51 = vmul.f32 %v9926_v49, %v10925_v39  ;;  %v6779_v29 = vand.u32 4294901760, %v6778_v33 }
 0x755   : > { %9108 = vmatpush3.msra.mxu1 %v5232_v57  ;;  %9109 = vmatprep.mubr.msk.f32.mxu1 %vm9997_vm1, %v9998_v38 }
 0x756   : > { %9112 = vmatprep.subr.mxu1 %v9998_v38  ;;  %v6212_v52 = vsel %vm2712_vm3, %v6207_v51, 0  ;;  %v6780_v55 = vsub.f32 %v6778_v33, %v6779_v29  ;;  %v7227_v33 = vand.u32 4294901760, %v7208_v12 }
 0x757   : > { %v6280_v26 = vand.u32 4294901760, %v6212_v52 }
 0x758   : > { %9110 = vmatmul.mubr.f32.vlgmr.msra.gmra.mrb[12].mxu1 %v5301_v43  ;;  %v6781_v58 = vand.u32 4294901760, %v6780_v55  ;;  %v7315_v19 = vsub.f32 %v7208_v12, %v7227_v33 }
 0x759   : > { %9113 = vmatpush3.msra.mxu1 %v5312_v32  ;;  %9114 = vmatprep.mubr.msk.f32.mxu1 %vm9997_vm1, %v9998_v38  ;;  %v6281_v2 = vsub.f32 %v6212_v52, %v6280_v26 }
 0x75a   : > { %9117 = vmatprep.subr.mxu1 %v9998_v38  ;;  %v9549_v15 = vpack.c.bf16 %v6788_v59, %v6781_v58  ;;  %v7322_v58 = vsub.f32 %v7209_v30, %v7230_v53  ;;  %v11061_v59 = vpack.c.bf16 %v7230_v53, %v7227_v33 }
 0x75b   : > { %v6282_v31 = vand.u32 4294901760, %v6281_v2 }
 0x75d   : > { %v6283_v63 = vsub.f32 %v6281_v2, %v6282_v31 }
 0x75f   : > { %v6284_v40 = vand.u32 4294901760, %v6283_v63 }
 0x760   : > { %9115 = vmatmul.mubr.f32.vlgmr.msra.gmra.mrb[12].mxu1 %v5297_v18 }
 0x761   : > { %9118 = vmatpush3.msra.mxu1 %v5309_v60  ;;  %9119 = vmatprep.mubr.msk.f32.mxu1 %vm9997_vm1, %v9998_v38 }
 0x762   : > { %9122 = vmatprep.subr.mxu1 %v9998_v38 }
 0x768   : > { %9120 = vmatmul.mubr.f32.vlgmr.msra.gmra.mrb[12].mxu1 %v5298_v47 }
 0x769   : > { %9123 = vmatpush3.msra.mxu1 %v5232_v57  ;;  %9124 = vmatprep.mubr.msk.f32.mxu1 %vm9997_vm1, %v9998_v38 }
 0x76a   : > { %9127 = vmatprep.subr.mxu1 %v9998_v38 }
 0x770   : > { %9125 = vmatmul.mubr.f32.vlgmr.msra.gmra.mrb[12].mxu1 %v5299_v7 }
 0x771   : > { %9128 = vmatpush3.msra.mxu1 %v5310_v42  ;;  %9129 = vmatprep.mubr.msk.f32.mxu1 %vm9997_vm1, %v9998_v38 }
 0x772   : > { %9132 = vmatprep.subr.mxu1 %v9998_v38 }
 0x778   : > { %9130 = vmatmul.mubr.f32.vlgmr.msra.gmra.mrb[12].mxu1 %v5297_v18 }
 0x779   : > { %9133 = vmatpush3.msra.mxu1 %v5232_v57  ;;  %9134 = vmatprep.mubr.msk.f32.mxu1 %vm9997_vm1, %v9998_v38  ;;  %v9567_v57 = vpack.c.bf16 %v6786_v54, %v6779_v29 }
 0x77a   : > { %9167 = vmatprep.subr.mxu1 %v9998_v38 }
 0x780   : > { %9135 = vmatmul.mubr.f32.vlgmr.msra.gmra.mrb[12].mxu1 %v5297_v18  ;;  %v9564_v18 = vpack.c.bf16 %v6772_v50, %v6765_v14 }
 0x781   : > { %9168 = vmatpush3.msra.mxu1 %v6215_v1  ;;  %9169 = vmatprep.mubr.msk.f32.mxu1 %vm9997_vm1, %v9998_v38 }
 0x782   : > { %9172 = vmatprep.subr.mxu1 %v9998_v38 }
 0x784   : > { %9170 = vmatmul.mubr.f32.vlgmr.msra.gmra.mrb[14].mxu1 %v6284_v40 }
 0x785   : > { %9173 = vmatpush3.msra.mxu1 %v6295_v61  ;;  %9174 = vmatprep.mubr.msk.f32.mxu1 %vm9997_vm1, %v9998_v38 }
 0x786   : > { %9177 = vmatprep.subr.mxu1 %v9998_v38 }
 0x78c   : > { %9175 = vmatmul.mubr.f32.vlgmr.msra.gmra.mrb[14].mxu1 %v6280_v26 }
 0x78d   : > { %9178 = vmatpush3.msra.mxu1 %v6292_v8  ;;  %9179 = vmatprep.mubr.msk.f32.mxu1 %vm9997_vm1, %v9998_v38 }
 0x78e   : > { %9182 = vmatprep.subr.mxu1 %v9998_v38 }
 0x794   : > { %9180 = vmatmul.mubr.f32.vlgmr.msra.gmra.mrb[14].mxu1 %v6281_v2 }
 0x795   : > { %9183 = vmatpush3.msra.mxu1 %v6215_v1  ;;  %9184 = vmatprep.mubr.msk.f32.mxu1 %vm9997_vm1, %v9998_v38 }
 0x796   : > { %9187 = vmatprep.subr.mxu1 %v9998_v38 }
 0x79c   : > { %9185 = vmatmul.mubr.f32.vlgmr.msra.gmra.mrb[14].mxu1 %v6282_v31 }
 0x79d   : > { %9188 = vmatpush3.msra.mxu1 %v6293_v62  ;;  %9189 = vmatprep.mubr.msk.f32.mxu1 %vm9997_vm1, %v9998_v38 }
 0x79e   : > { %9192 = vmatprep.subr.mxu1 %v9998_v38 }
 0x7a4   : > { %9190 = vmatmul.mubr.f32.vlgmr.msra.gmra.mrb[14].mxu1 %v6280_v26 }
 0x7a5   : > { %9193 = vmatpush3.msra.mxu1 %v6215_v1  ;;  %9194 = vmatprep.mubr.msk.f32.mxu1 %vm9997_vm1, %v9998_v38 }
 0x7a6   : > { %9545 = vmatprep.subr.bf16.mxu1 %v9996_v34 }
 0x7ac   : > { %9195 = vmatmul.mubr.f32.vlgmr.msra.gmra.mrb[14].mxu1 %v6280_v26 }
 0x7ad   : > { %9216 = vmatprep.mubr.msk.f32.mxu1 %vm9997_vm1, %v9998_v38  ;;  %9547 = vmatpush3.bf16.msra.mxu1 %v9546_v48 }
 0x7ae   : > { %9548 = vmatprep.subr.bf16.mxu1 %v9996_v34 }
 0x7b1   : > { %9550 = vmatpush3.bf16.msra.mxu1 %v9549_v15 }
 0x7b2   : > { %9557 = vmatprep.subr.bf16.mxu1 %v9996_v34 }
 0x827   : > { %v4690_v46 = vpop.f32.mrb[10].mxu1 }
 0x828   : > { %6661 = vrot.lane.b32.xlu1 %v4690_v46, %s10009_s30  ;;  %v9076_v6 = vpop.f32.mrb[11].mxu1  ;;  %s10011_s30 = smov 24  }
 0x853   : > { %v5673_v4 = vpop.f32.mrb[12].mxu1 }
 0x854   : > { %6665 = vrot.lane.b32.xlu1 %v5673_v4, %s10010_s1  ;;  %v9136_v39 = vpop.f32.mrb[13].mxu1  ;;  %v7206_v4 = vld [vmem:[%s11286_s18] sm:$0xff]  ;;  %s8278_s1 = sshll.u32 %s713_s5, 4  ;;  %s11227_s1 = int_to_ptr.vmem [resolvable:$true] %s8278_s1 }
 0x855   : > { %v7207_v39 = vld [vmem:[%s11286_s18 + $0x8] sm:$0xff]  ;;  %v7221_v56 = vand.u32 4294901760, %v7206_v4  ;;  %p9937_p0 = scmp.lt.s32.totalorder %s11227_s1, %s9935_s24 }
 0x856   : > { %v7224_v35 = vand.u32 4294901760, %v7207_v39 }
 0x857   : > { %v7301_v54 = vsub.f32 %v7206_v4, %v7221_v56 }
 0x858   : > { %v11058_v29 = vpack.c.bf16 %v7224_v35, %v7221_v56  ;;  %v7308_v55 = vsub.f32 %v7207_v39, %v7224_v35  ;;  %v7712_v56 = vld [vmem:[%s11288_s20 + $0x30] sm:$0xff]  ;;  %v7713_v35 = vld [vmem:[%s11288_s20 + $0x38] sm:$0xff] }
 0x859   : > { %v7302_v15 = vand.u32 4294901760, %v7301_v54  ;;  %v7744_v30 = vand.u32 4294901760, %v7712_v56  ;;  %v7747_v33 = vand.u32 4294901760, %v7713_v35 }
 0x85b   : > { %v11145_v53 = vpack.c.bf16 %v7747_v33, %v7744_v30 }
 0x87f   : > { %v6656_v16 = vpop.f32.mrb[14].mxu1 }
 0x880   : > { %6669 = vrot.lane.b32.xlu1 %v6656_v16, %s10011_s30  ;;  %v9196_v11 = vpop.f32.mrb[15].mxu1  ;;  %s9930_s30 = scalar_lea.vmem %s11227_s1, 128 }
 0x881   : > { %p9931_p11 = scmp.ne.s32.totalorder %s11227_s1, %s9930_s30  ;;  %p9938_p1 = scmp.lt.s32.totalorder %s9936_s25, %s9930_s30 }
 0x883   : > { %p9932_p12 = pnand %p9931_p11, %p10166_p5  ;;  %p9939_p2 = por %p9938_p1, %p9937_p0 }
 0x885   : > { %p9933_p13 = pneg %p9932_p12 }
 0x887   : > { %p9940_p3 = pnand %p9939_p2, %p9933_p13 }
 0x89a   : > { %v6662_v47 = vpop.permute.xlu1 %6661 }
 0x89b   : > { %v6672_v7 = vsel %vm2712_vm3, %v10868_v44, %v6662_v47 }
 0x8c6   : > { %v6666_v60 = vpop.permute.xlu1 %6665 }
 0x8c7   : > { %v6673_v42 = vsel %vm1927_vm2, %v6672_v7, %v6666_v60 }
 0x8f2   : > { %v6670_v22 = vpop.permute.xlu1 %6669 }
 0x8f3   : > { %v6675_v24 = vsel %vm6674_vm11, %v6673_v42, %v6670_v22 }
 0x8f4   : > { %v6681_v43 = vsel %vm733_vm0, %v6675_v24, 0  ;;  %v9588_v24 = vpack.c.bf16 %v7308_v55, %v7301_v54 }
 0x8f5   : > { %v6752_v32 = vand.u32 4294901760, %v6681_v43 }
 0x8f7   : > { %v6753_v45 = vsub.f32 %v6681_v43, %v6752_v32  ;;  %9217 = vmatmul.mubr.f32.vlgmr.msra.gmra.mrb[16].mxu1 %v6752_v32  ;;  %v9591_v43 = vpack.c.bf16 %v7322_v58, %v7315_v19 }
 0x8f8   : > { %9559 = vmatpush3.bf16.msra.mxu1 %v9540_v9  ;;  %9238 = vmatprep.mubr.msk.f32.mxu1 %vm9997_vm1, %v9998_v38 }
 0x8f9   : > { %9560 = vmatprep.subr.bf16.mxu1 %v9996_v34  ;;  %v6754_v49 = vand.u32 4294901760, %v6753_v45 }
 0x8fb   : > { %v6755_v51 = vsub.f32 %v6753_v45, %v6754_v49 }
 0x8fc   : > { %9562 = vmatpush3.bf16.msra.mxu1 %v9543_v10 }
 0x8fd   : > { %9569 = vmatprep.subr.bf16.mxu1 %v9996_v34  ;;  %v6756_v44 = vand.u32 4294901760, %v6755_v51  ;;  %v7707_v51 = vld [vmem:[%s11288_s20 + $0x8] sm:$0xff] }
 0x8ff   : > { %9239 = vmatmul.mubr.f32.vlgmr.msra.gmra.mrb[18].mxu1 %v6754_v49  ;;  %9206 = vmatmul.mubr.f32.vlgmr.msra.gmra.mrb[14].mxu0 %v6756_v44  ;;  %v7706_v49 = vld [vmem:[%s11288_s20] sm:$0xff] }
 0x900   : > { %9553 = vmatpush3.bf16.msra.mxu0 %v9552_v23  ;;  %9571 = vmatpush3.bf16.msra.mxu1 %v9540_v9  ;;  %v7309_v9 = vand.u32 4294901760, %v7308_v55  ;;  %v7726_v44 = vand.u32 4294901760, %v7706_v49 }
 0x901   : > { %9554 = vmatprep.subr.bf16.mxu0 %v9996_v34  ;;  %9572 = vmatprep.subr.bf16.mxu1 %v9996_v34 }
 0x902   : > { %9227 = vmatprep.mubr.msk.f32.mxu0 %vm9997_vm1, %v9998_v38  ;;  %9260 = vmatprep.mubr.msk.f32.mxu1 %vm9997_vm1, %v9998_v38  ;;  %v7310_v23 = vsub.f32 %v7308_v55, %v7309_v9 }
 0x904   : > { %9556 = vmatpush3.bf16.msra.mxu0 %v9555_v36  ;;  %9574 = vmatpush3.bf16.msra.mxu1 %v9543_v10  ;;  %v7303_v10 = vsub.f32 %v7301_v54, %v7302_v15  ;;  %v7311_v11 = vand.u32 4294901760, %v7310_v23  ;;  %v7316_v36 = vand.u32 4294901760, %v7315_v19 }
 0x905   : > { %9563 = vmatprep.subr.bf16.mxu0 %v9996_v34  ;;  %9611 = vmatprep.subr.bf16.mxu1 %v9996_v34 }
 0x906   : > { %v7304_v16 = vand.u32 4294901760, %v7303_v10  ;;  %v7317_v47 = vsub.f32 %v7315_v19, %v7316_v36 }
 0x907   : > { %9228 = vmatmul.mubr.f32.vlgmr.msra.gmra.mrb[16].mxu0 %v6753_v45  ;;  %9261 = vmatmul.mubr.f32.vlgmr.msra.gmra.mrb[20].mxu1 %v6752_v32 }
 0x908   : > { %9565 = vmatpush3.bf16.msra.mxu0 %v9564_v18  ;;  %9249 = vmatprep.mubr.msk.f32.mxu0 %vm9997_vm1, %v9998_v38  ;;  %v7323_v18 = vand.u32 4294901760, %v7322_v58  ;;  %v7318_v7 = vand.u32 4294901760, %v7317_v47 }
 0x909   : > { %9566 = vmatprep.subr.bf16.mxu0 %v9996_v34  ;;  %9345 = vmatprep.mubr.msk.f32.mxu1 %vm9997_vm1, %v9998_v38 }
 0x90a   : > { %v7324_v60 = vsub.f32 %v7322_v58, %v7323_v18  ;;  %v9603_v45 = vpack.c.bf16 %v7323_v18, %v7316_v36  ;;  %v11156_v58 = vsub.f32 %v7712_v56, %v7744_v30 }
 0x90c   : > { %9568 = vmatpush3.bf16.msra.mxu0 %v9567_v57  ;;  %v9582_v57 = vpack.c.bf16 %v7311_v11, %v7304_v16  ;;  %v7325_v42 = vand.u32 4294901760, %v7324_v60 }
 0x90d   : > { %9575 = vmatprep.subr.bf16.mxu0 %v9996_v34 }
 0x90e   : > { %v9585_v22 = vpack.c.bf16 %v7325_v42, %v7318_v7 }
 0x90f   : > { %9250 = vmatmul.mubr.f32.vlgmr.msra.gmra.mrb[18].mxu0 %v6752_v32  ;;  %v9600_v32 = vpack.c.bf16 %v7309_v9, %v7302_v15 }
 0x910   : > { %9271 = vmatprep.mubr.msk.f32.mxu0 %vm9997_vm1, %v9998_v38  ;;  %9577 = vmatpush3.bf16.msra.mxu0 %v11058_v29 }
 0x911   : > { %9578 = vmatprep.subr.bf16.mxu0 %v9996_v34 }
 0x914   : > { %9580 = vmatpush3.bf16.msra.mxu0 %v11061_v59 }
 0x915   : > { %9581 = vmatprep.subr.bf16.mxu0 %v9996_v34 }
 0x9ca   : > { %v6849_v52 = vpop.f32.mrb[16].mxu1 }
 0x9cb   : > { %v9218_v0 = vpop.f32.mrb[17].mxu1 }
 0x9d2   : > { %v7006_v26 = vpop.f32.mrb[18].mxu1  ;;  %v6758_v1 = vpop.f32.mrb[14].mxu0 }
 0x9d3   : > { %v6850_v2 = vadd.f32 %v6849_v52, %v6758_v1  ;;  %v9240_v8 = vpop.f32.mrb[19].mxu1  ;;  %v9207_v31 = vpop.f32.mrb[15].mxu0  ;;  %v7729_v52 = vand.u32 4294901760, %v7707_v51 }
 0x9d5   : > { %v11072_v0 = vpack.c.bf16 %v7729_v52, %v7726_v44  ;;  %v11076_v1 = vsub.f32 %v7707_v51, %v7729_v52 }
 0x9d7   : > { %9613 = vmatpush3.bf16.msra.mxu1 %v11072_v0  ;;  %v7818_v9 = vand.u32 4294901760, %v11076_v1 }
 0x9d8   : > { %9614 = vmatprep.subr.bf16.mxu1 %v9996_v34 }
 0x9d9   : > { %v7819_v23 = vsub.f32 %v11076_v1, %v7818_v9 }
 0x9da   : > { %v6929_v62 = vpop.f32.mrb[16].mxu0  ;;  %v7164_v63 = vpop.f32.mrb[20].mxu1 }
 0x9db   : > { %v6930_v5 = vadd.f32 %v6929_v62, %v6850_v2  ;;  %v9229_v40 = vpop.f32.mrb[17].mxu0  ;;  %v9262_v61 = vpop.f32.mrb[21].mxu1  ;;  %v7820_v11 = vand.u32 4294901760, %v7819_v23 }
 0x9dc   : > { %v8392_v40 = vld [vmem:[%s11285_s17] ss:$0 sm:$0xff] }
 0x9dd   : > { %v7007_v46 = vadd.f32 %v7006_v26, %v6930_v5  ;;  %v11074_v26 = vsub.f32 %v7706_v49, %v7726_v44  ;;  %v7853_v44 = vand.u32 4294901760, %v11156_v58 }
 0x9df   : > { %v7811_v15 = vand.u32 4294901760, %v11074_v26 }
 0x9e1   : > { %v7812_v10 = vsub.f32 %v11074_v26, %v7811_v15 }
 0x9e2   : > { %v7089_v6 = vpop.f32.mrb[18].mxu0 }
 0x9e3   : > { %v7090_v17 = vadd.f32 %v7089_v6, %v7007_v46  ;;  %v9251_v41 = vpop.f32.mrb[19].mxu0  ;;  %v7813_v16 = vand.u32 4294901760, %v7812_v10 }
 0x9e5   : > { %v7165_v20 = vadd.f32 %v7164_v63, %v7090_v17  ;;  %v8391_v63 = vld [vmem:[%s11284_s16] ss:$0 sm:$0xff] }
 0x9e7   : > { %v7168_v3 = vadd.f32 %v9929_v13, %v7165_v20 }
 0x9e9   : > { %v11040_v14 = vadd.f32 %v8390_v21, %v7168_v3  ;;  %v7708_v3 = vld [vmem:[%s11288_s20 + $0x10] sm:$0xff] }
 0x9eb   : > { %v7179_v50 = vsel %vm733_vm0, %v11040_v14, 0.0 }
 0x9ec   : > { %7180 = vadd.xlane.f32.xlu0 %v7179_v50  ;;  %v7709_v50 = vld [vmem:[%s11288_s20 + $0x18] sm:$0xff] }
 0xa79   : > { %v7181_v25 = vpop.xlane.xlu0 %7180 }
 0xa7a   : > { %v7182_v27 = vmul.f32 0.03125, %v7181_v25  ;;  %v7732_v25 = vand.u32 4294901760, %v7708_v3 }
 0xa7c   : > { %v7183_v28 = vsub.f32 %v11040_v14, %v7182_v27  ;;  %v7735_v27 = vand.u32 4294901760, %v7709_v50 }
 0xa7e   : > { %v7184_v37 = vmul.f32 %v7183_v28, %v7183_v28  ;;  %v11149_v54 = vsub.f32 %v7709_v50, %v7735_v27 }
 0xa80   : > { %v7185_v48 = vsel %vm733_vm0, %v7184_v37, 0.0  ;;  %v7710_v37 = vld [vmem:[%s11288_s20 + $0x20] sm:$0xff]  ;;  %v7832_v18 = vand.u32 4294901760, %v11149_v54 }
 0xa81   : > { %7186 = vadd.xlane.f32.xlu1 %v7185_v48  ;;  %v7711_v48 = vld [vmem:[%s11288_s20 + $0x28] sm:$0xff]  ;;  %v7738_v4 = vand.u32 4294901760, %v7710_v37 }
 0xa82   : > { %v7741_v39 = vand.u32 4294901760, %v7711_v48  ;;  %v7833_v60 = vsub.f32 %v11149_v54, %v7832_v18 }
 0xa83   : > { %v11151_v55 = vsub.f32 %v7710_v37, %v7738_v4 }
 0xa84   : > { %v11133_v12 = vpack.c.bf16 %v7741_v39, %v7738_v4  ;;  %v11153_v19 = vsub.f32 %v7711_v48, %v7741_v39  ;;  %v7834_v42 = vand.u32 4294901760, %v7833_v60 }
 0xb0e   : > { %v7187_v2 = vpop.xlane.xlu1 %7186 }
 0xb0f   : > { %v7188_v8 = vmul.f32 0.03125, %v7187_v2 }
 0xb11   : > { %v7189_v31 = vadd.f32 1e-05, %v7188_v8  ;;  %v7854_v8 = vsub.f32 %v11156_v58, %v7853_v44 }
 0xb13   : > { %9927 = vrsqrt.f32 %v7189_v31 }
 0xb1d   : > { %v9928_v62 = vpop.eup %9927 }
 0xb1e   : > { %v7191_v5 = vmul.f32 %v9928_v62, %v7183_v28  ;;  %v11121_v28 = vpack.c.bf16 %v7735_v27, %v7732_v25  ;;  %v7855_v62 = vand.u32 4294901760, %v7854_v8 }
 0xb20   : > { %v7198_v61 = vmul.f32 %v8391_v63, %v7191_v5  ;;  %9616 = vmatpush3.bf16.msra.mxu1 %v11121_v28 }
 0xb21   : > { %9617 = vmatprep.subr.bf16.mxu1 %v9996_v34 }
 0xb22   : > { %v7205_v46 = vadd.f32 %v8392_v40, %v7198_v61  ;;  %v9636_v40 = vpack.c.bf16 %v11076_v1, %v11074_v26 }
 0xb24   : > { %v7218_v6 = vsel %vm733_vm0, %v7205_v46, 0  ;;  %9619 = vmatpush3.bf16.msra.mxu1 %v11133_v12  ;;  %v9642_v46 = vpack.c.bf16 %v11153_v19, %v11151_v55 }
 0xb25   : > { %v7289_v17 = vand.u32 4294901760, %v7218_v6  ;;  %9620 = vmatprep.subr.bf16.mxu1 %v9996_v34 }
 0xb27   : > { %v7290_v41 = vsub.f32 %v7218_v6, %v7289_v17 }
 0xb28   : > { %9622 = vmatpush3.bf16.msra.mxu1 %v11145_v53 }
 0xb29   : > { %v7291_v20 = vand.u32 4294901760, %v7290_v41  ;;  %9623 = vmatprep.subr.bf16.mxu1 %v9996_v34 }
 0xb2b   : > { %v7292_v21 = vsub.f32 %v7290_v41, %v7291_v20 }
 0xb2d   : > { %v7293_v13 = vand.u32 4294901760, %v7292_v21 }
 0xb2f   : > { %9272 = vmatmul.mubr.f32.vlgmr.msra.gmra.mrb[20].mxu0 %v7293_v13  ;;  %v8393_v13 = vld [vmem:[%s11287_s19] ss:$0 sm:$0xff] }
 0xb30   : > { %9583 = vmatpush3.bf16.msra.mxu0 %v9582_v57  ;;  %9282 = vmatprep.mubr.msk.f32.mxu0 %vm9997_vm1, %v9998_v38  ;;  %v9624_v57 = vpack.c.bf16 %v7820_v11, %v7813_v16 }
 0xb31   : > { %9584 = vmatprep.subr.bf16.mxu0 %v9996_v34 }
 0xb34   : > { %9586 = vmatpush3.bf16.msra.mxu0 %v9585_v22  ;;  %v7839_v22 = vand.u32 4294901760, %v11151_v55 }
 0xb35   : > { %9587 = vmatprep.subr.bf16.mxu0 %v9996_v34 }
 0xb37   : > { %9283 = vmatmul.mubr.f32.vlgmr.msra.gmra.mrb[20].mxu0 %v7289_v17 }
 0xb38   : > { %9589 = vmatpush3.bf16.msra.mxu0 %v9588_v24  ;;  %9293 = vmatprep.mubr.msk.f32.mxu0 %vm9997_vm1, %v9998_v38  ;;  %v7846_v24 = vand.u32 4294901760, %v11153_v19 }
 0xb39   : > { %9590 = vmatprep.subr.bf16.mxu0 %v9996_v34 }
 0xb3c   : > { %9592 = vmatpush3.bf16.msra.mxu0 %v9591_v43 }
 0xb3d   : > { %9593 = vmatprep.subr.bf16.mxu0 %v9996_v34 }
 0xb3f   : > { %9294 = vmatmul.mubr.f32.vlgmr.msra.gmra.mrb[20].mxu0 %v7290_v41 }
 0xb40   : > { %9595 = vmatpush3.bf16.msra.mxu0 %v11058_v29  ;;  %9304 = vmatprep.mubr.msk.f32.mxu0 %vm9997_vm1, %v9998_v38 }
 0xb41   : > { %9596 = vmatprep.subr.bf16.mxu0 %v9996_v34 }
 0xb44   : > { %9598 = vmatpush3.bf16.msra.mxu0 %v11061_v59 }
 0xb45   : > { %9599 = vmatprep.subr.bf16.mxu0 %v9996_v34 }
 0xb47   : > { %9305 = vmatmul.mubr.f32.vlgmr.msra.gmra.mrb[20].mxu0 %v7291_v20  ;;  %v9666_v20 = vpack.c.bf16 %v7846_v24, %v7839_v22 }
 0xb48   : > { %9601 = vmatpush3.bf16.msra.mxu0 %v9600_v32  ;;  %9315 = vmatprep.mubr.msk.f32.mxu0 %vm9997_vm1, %v9998_v38  ;;  %v7840_v32 = vsub.f32 %v11151_v55, %v7839_v22 }
 0xb49   : > { %9602 = vmatprep.subr.bf16.mxu0 %v9996_v34 }
 0xb4a   : > { %v7841_v49 = vand.u32 4294901760, %v7840_v32 }
 0xb4c   : > { %9604 = vmatpush3.bf16.msra.mxu0 %v9603_v45  ;;  %v7847_v45 = vsub.f32 %v11153_v19, %v7846_v24 }
 0xb4d   : > { %9605 = vmatprep.subr.bf16.mxu0 %v9996_v34 }
 0xb4e   : > { %v7848_v51 = vand.u32 4294901760, %v7847_v45 }
 0xb4f   : > { %9316 = vmatmul.mubr.f32.vlgmr.msra.gmra.mrb[20].mxu0 %v7289_v17 }
 0xb50   : > { %9607 = vmatpush3.bf16.msra.mxu0 %v11058_v29  ;;  %9326 = vmatprep.mubr.msk.f32.mxu0 %vm9997_vm1, %v9998_v38  ;;  %v11147_v29 = vsub.f32 %v7708_v3, %v7732_v25  ;;  %v9630_v2 = vpack.c.bf16 %v7848_v51, %v7841_v49 }
 0xb51   : > { %9608 = vmatprep.subr.bf16.mxu0 %v9996_v34 }
 0xb52   : > { %v7825_v36 = vand.u32 4294901760, %v11147_v29  ;;  %v9639_v61 = vpack.c.bf16 %v11149_v54, %v11147_v29 }
 0xb54   : > { %9610 = vmatpush3.bf16.msra.mxu0 %v11061_v59  ;;  %v11158_v59 = vsub.f32 %v7713_v35, %v7747_v33  ;;  %v7826_v47 = vsub.f32 %v11147_v29, %v7825_v36  ;;  %v9663_v41 = vpack.c.bf16 %v7832_v18, %v7825_v36  ;;  %v8394_v35 = vld [vmem:[%s11289_s21] ss:$0 sm:$0xff] }
 0xb55   : > { %9647 = vmatprep.subr.bf16.mxu0 %v9996_v34 }
 0xb56   : > { %v7827_v7 = vand.u32 4294901760, %v7826_v47  ;;  %v7860_v52 = vand.u32 4294901760, %v11158_v59  ;;  %v9645_v6 = vpack.c.bf16 %v11158_v59, %v11156_v58 }
 0xb57   : > { %9327 = vmatmul.mubr.f32.vlgmr.msra.gmra.mrb[20].mxu0 %v7289_v17  ;;  %v9660_v17 = vpack.c.bf16 %v7818_v9, %v7811_v15 }
 0xb58   : > { %9649 = vmatpush3.bf16.msra.mxu0 %v11072_v0  ;;  %9402 = vmatprep.mubr.msk.f32.mxu0 %vm9997_vm1, %v9998_v38  ;;  %v9627_v43 = vpack.c.bf16 %v7834_v42, %v7827_v7  ;;  %v7861_v31 = vsub.f32 %v11158_v59, %v7860_v52  ;;  %v9669_v21 = vpack.c.bf16 %v7860_v52, %v7853_v44 }
 0xb59   : > { %9650 = vmatprep.subr.bf16.mxu0 %v9996_v34 }
 0xb5a   : > { %v7862_v63 = vand.u32 4294901760, %v7861_v31 }
 0xb5c   : > { %9652 = vmatpush3.bf16.msra.mxu0 %v11121_v28  ;;  %v9633_v5 = vpack.c.bf16 %v7862_v63, %v7855_v62 }
 0xb5d   : > { %9653 = vmatprep.subr.bf16.mxu0 %v9996_v34 }
 0xb60   : > { %9655 = vmatpush3.bf16.msra.mxu0 %v11133_v12 }
 0xb61   : > { %9656 = vmatprep.subr.bf16.mxu0 %v9996_v34 }
 0xb64   : > { %9658 = vmatpush3.bf16.msra.mxu0 %v11145_v53 }
 0xb65   : > { %9671 = vmatprep.subr.bf16.mxu0 %v9996_v34 }
 0xc2a   : > { %v7701_v3 = vpop.f32.mrb[20].mxu0 }
 0xc2b   : > { %v9694_v50 = vadd.f32 %v8393_v13, %v7701_v3  ;;  %v9328_v26 = vpop.f32.mrb[21].mxu0 }
 0xc2d   : > { %v7705_v1 = vmax.f32 %v9694_v50, 0.0 }
 0xc2f   : > { %v7723_v25 = vsel %vm7721_vm12, %v7705_v1, 0 }
 0xc30   : > { %v7798_v27 = vand.u32 4294901760, %v7723_v25 }
 0xc32   : > { %v7799_v37 = vsub.f32 %v7723_v25, %v7798_v27 }
 0xc34   : > { %v7800_v48 = vand.u32 4294901760, %v7799_v37 }
 0xc36   : > { %9403 = vmatmul.mubr.f32.vlgmr.msra.gmra.mrb[22].mxu0 %v7800_v48  ;;  %v7801_v4 = vsub.f32 %v7799_v37, %v7800_v48 }
 0xc37   : > { %9673 = vmatpush3.bf16.msra.mxu0 %v11072_v0  ;;  %9440 = vmatprep.mubr.msk.f32.mxu0 %vm9997_vm1, %v9998_v38 }
 0xc38   : > { %9674 = vmatprep.subr.bf16.mxu0 %v9996_v34  ;;  %v7802_v39 = vand.u32 4294901760, %v7801_v4 }
 0xc3a   : > { %9346 = vmatmul.mubr.f32.vlgmr.msra.gmra.mrb[22].mxu1 %v7802_v39 }
 0xc3b   : > { %9625 = vmatpush3.bf16.msra.mxu1 %v9624_v57  ;;  %9676 = vmatpush3.bf16.msra.mxu0 %v11121_v28 }
 0xc3c   : > { %9626 = vmatprep.subr.bf16.mxu1 %v9996_v34  ;;  %9677 = vmatprep.subr.bf16.mxu0 %v9996_v34 }
 0xc3d   : > { %9364 = vmatprep.mubr.msk.f32.mxu1 %vm9997_vm1, %v9998_v38 }
 0xc3f   : > { %9628 = vmatpush3.bf16.msra.mxu1 %v9627_v43  ;;  %9679 = vmatpush3.bf16.msra.mxu0 %v11133_v12 }
 0xc40   : > { %9629 = vmatprep.subr.bf16.mxu1 %v9996_v34  ;;  %9680 = vmatprep.subr.bf16.mxu0 %v9996_v34 }
 0xc43   : > { %9631 = vmatpush3.bf16.msra.mxu1 %v9630_v2  ;;  %9682 = vmatpush3.bf16.msra.mxu0 %v11145_v53 }
 0xc44   : > { %9632 = vmatprep.subr.bf16.mxu1 %v9996_v34 }
 0xc46   : > { %9441 = vmatmul.mubr.f32.vlgmr.msra.gmra.mrb[24].mxu0 %v7798_v27 }
 0xc47   : > { %9634 = vmatpush3.bf16.msra.mxu1 %v9633_v5 }
 0xc48   : > { %9635 = vmatprep.subr.bf16.mxu1 %v9996_v34 }
 0xc4a   : > { %9365 = vmatmul.mubr.f32.vlgmr.msra.gmra.mrb[24].mxu1 %v7798_v27 }
 0xc4b   : > { %9637 = vmatpush3.bf16.msra.mxu1 %v9636_v40  ;;  %9383 = vmatprep.mubr.msk.f32.mxu1 %vm9997_vm1, %v9998_v38 }
 0xc4c   : > { %9638 = vmatprep.subr.bf16.mxu1 %v9996_v34 }
 0xc4f   : > { %9640 = vmatpush3.bf16.msra.mxu1 %v9639_v61 }
 0xc50   : > { %9641 = vmatprep.subr.bf16.mxu1 %v9996_v34 }
 0xc53   : > { %9643 = vmatpush3.bf16.msra.mxu1 %v9642_v46 }
 0xc54   : > { %9644 = vmatprep.subr.bf16.mxu1 %v9996_v34 }
 0xc57   : > { %9646 = vmatpush3.bf16.msra.mxu1 %v9645_v6 }
 0xc58   : > { %9659 = vmatprep.subr.bf16.mxu1 %v9996_v34 }
 0xc5a   : > { %9384 = vmatmul.mubr.f32.vlgmr.msra.gmra.mrb[26].mxu1 %v7799_v37 }
 0xc5b   : > { %9661 = vmatpush3.bf16.msra.mxu1 %v9660_v17  ;;  %9421 = vmatprep.mubr.msk.f32.mxu1 %vm9997_vm1, %v9998_v38 }
 0xc5c   : > { %9662 = vmatprep.subr.bf16.mxu1 %v9996_v34 }
 0xc5f   : > { %9664 = vmatpush3.bf16.msra.mxu1 %v9663_v41 }
 0xc60   : > { %9665 = vmatprep.subr.bf16.mxu1 %v9996_v34 }
 0xc63   : > { %9667 = vmatpush3.bf16.msra.mxu1 %v9666_v20 }
 0xc64   : > { %9668 = vmatprep.subr.bf16.mxu1 %v9996_v34 }
 0xc67   : > { %9670 = vmatpush3.bf16.msra.mxu1 %v9669_v21 }
 0xc6a   : > { %9422 = vmatmul.mubr.f32.vlgmr.msra.gmra.mrb[28].mxu1 %v7798_v27 }
 0xd09   : > { %v8084_v0 = vpop.f32.mrb[22].mxu0 }
 0xd0a   : > { %v9404_v28 = vpop.f32.mrb[23].mxu0 }
 0xd0d   : > { %v7804_v12 = vpop.f32.mrb[22].mxu1 }
 0xd0e   : > { %v9347_v56 = vpop.f32.mrb[23].mxu1  ;;  %v7805_v33 = vadd.f32 %v8394_v35, %v7804_v12 }
 0xd19   : > { %v8258_v38 = vpop.f32.mrb[24].mxu0 }
 0xd1a   : > { %v9442_v30 = vpop.f32.mrb[25].mxu0 }
 0xd1d   : > { %v7915_v53 = vpop.f32.mrb[24].mxu1 }
 0xd1e   : > { %v7916_v29 = vadd.f32 %v7915_v53, %v7805_v33  ;;  %v9366_v54 = vpop.f32.mrb[25].mxu1 }
 0xd2d   : > { %v8003_v55 = vpop.f32.mrb[26].mxu1 }
 0xd2e   : > { %v8004_v34 = vadd.f32 %v8003_v55, %v7916_v29  ;;  %v9385_v19 = vpop.f32.mrb[27].mxu1 }
 0xd30   : > { %v8085_v58 = vadd.f32 %v8084_v0, %v8004_v34 }
 0xd3d   : > { %v8179_v59 = vpop.f32.mrb[28].mxu1 }
 0xd3e   : > { %v8180_v15 = vadd.f32 %v8179_v59, %v8085_v58  ;;  %v9423_v9 = vpop.f32.mrb[29].mxu1 }
 0xd40   : > { %v8259_v10 = vadd.f32 %v8258_v38, %v8180_v15 }
 0xd42   : > { %v8262_v23 = vadd.f32 %v8259_v10, %v11040_v14 }
 0xd44   : > { %8263 = vst.msk [vmem:[%s713_s5] sm:$0xff] %vm733_vm0, %v8262_v23 }
 0xd45   : > { %9943 = shalt.err (!%p9940_p3)
}
 0xd46   : > { %s9944_s2 = scalar_lea.hbm %s11225_s29, 128  ;;  %s9948_s26 = scalar_lea.hbm %s11290_s22, 256 }
 0xd47   : > { %p9945_p4 = scmp.ne.s32.totalorder %s11225_s29, %s9944_s2  ;;  %p9949_p9 = scmp.lt.u32.totalorder %s11225_s29, %s11290_s22 }
 0xd48   : > { %p9950_p10 = scmp.lt.u32.totalorder %s9948_s26, %s9944_s2  ;;  %p9952_p12 = scmp.lt.u32.totalorder %s9944_s2, %s11225_s29 }
 0xd49   : > { %p9946_p7 = pnand %p9945_p4, %p10166_p5 }
 0xd4a   : > { %p9951_p11 = por %p9950_p10, %p9949_p9 }
 0xd4b   : > { %p9947_p8 = pneg %p9946_p7 }
 0xd4c   : > { %p9953_p13 = por %p9952_p12, %p9951_p11 }
 0xd4e   : > { %p9954_p0 = pnand %p9953_p13, %p9947_p8 }
 0xd50   : > { %9957 = shalt.err (!%p9954_p0)
}
 0xd51   : > { %9843 = dma.vmem_to_hbm [thread:$0]  (%p10166_p5), %s11227_s1, 128, %s11225_s29, %s8265_s3  }
 0xd52 PF: > { %s11321_s30 = sld [smem:[#allocation7_spill]]  ;;  %s11322_s24 = sld [smem:[#allocation5_spill]] }
 0xd58   : > { %p9849_p1 = scmp.ge.s32.totalorder %s11321_s30, 2  ;;  %s8290_s0 = sand.u32 1, %s11322_s24  }
 0xd59   : > { %s8291_s5 = scalar_lea.sflag [#allocation3], %s8290_s0 }
 0xd5a   : > { %p9846_p2 = pnand %p9849_p1, %p10170_p6 }
 0xd5c   : > { %9975 = dma.done.wait (!%p9846_p2), %s8291_s5, 128  }
 0xd5d   : > { %9977 = vsyncadd (!%p9846_p2), %s8291_s5, 4294967168  ;;  %s11324_s30 = sld [smem:[#allocation8_spill]]  ;;  %s11325_s2 = sld [smem:[#allocation6_spill]] }
 0xd5e   : > { %s11326_s29 = sld [smem:[#allocation9_spill]]  ;;  %s11327_s3 = smov %s9984_s28 }
 0xd63   : > { %p32_p3 = scmp.ge.s32.totalorder %s11324_s30, 4   ;;  %s11328_s28 = smov %s11325_s2 }
 0xd65   :  { %34 = sbr.rel (!%p32_p3) target bundleno = 11 (0xb), region = 152 }
 0xd6c   :  { %8296 = vsyncpa [#allocation3], 1 }
 0xd6d   :  { %8298 = vsyncpa [#allocation3 + $0x1], 1 }

// kernel: tetnp_encoder_forward_pallas.6
= control target key start
LH: loop header
LB: loop body
LE: loop exit
PB: predicated region body
PF: predicated region fallthrough
CT: control target
= control target key end

     0   :  { %s11053_s0 = inlined_call_operand.vmem [shape: f32[2,8,32], index: 0, kind: input, shape index: {}, may-alias: {0,1}]   ;;  %s11054_s1 = inlined_call_operand.vmem [shape: f32[2,8,32], index: 1, kind: input, shape index: {}, may-alias: {0,1}]   ;;  %s11055_s2 = inlined_call_operand.vmem [shape: f32[2,8,2], index: 2, kind: input, shape index: {}, may-alias: {2,3}]   ;;  %s11056_s3 = inlined_call_operand.vmem [shape: f32[2,8,2], index: 3, kind: input, shape index: {}, may-alias: {2,3}]   ;;  %s11057_s4 = inlined_call_operand.vmem [shape: f32[1,32], index: 4, kind: input, shape index: {}]   ;;  %s11058_s5 = inlined_call_operand.vmem [shape: f32[1,32], index: 5, kind: input, shape index: {}]   ;;  %s11059_s6 = inlined_call_operand.vmem [shape: f32[32,32], index: 6, kind: input, shape index: {}]   ;;  %s11060_s7 = inlined_call_operand.vmem [shape: f32[1,32], index: 7, kind: input, shape index: {}]   ;;  %s11061_s8 = inlined_call_operand.vmem [shape: f32[32,64], index: 8, kind: input, shape index: {}]   ;;  %s11062_s9 = inlined_call_operand.vmem [shape: f32[1,64], index: 9, kind: input, shape index: {}]   ;;  %s11063_s10 = inlined_call_operand.vmem [shape: f32[2,16], index: 10, kind: input, shape index: {}]   ;;  %s11064_s11 = inlined_call_operand.vmem [shape: f32[1,16], index: 11, kind: input, shape index: {}]   ;;  %s11065_s12 = inlined_call_operand.vmem [shape: f32[16,4], index: 12, kind: input, shape index: {}]   ;;  %s11066_s13 = inlined_call_operand.vmem [shape: f32[1,4], index: 13, kind: input, shape index: {}]   ;;  %s11067_s14 = inlined_call_operand.vmem [shape: f32[32,32], index: 14, kind: input, shape index: {}]   ;;  %s11068_s15 = inlined_call_operand.vmem [shape: f32[1,32], index: 15, kind: input, shape index: {}]   ;;  %s11069_s16 = inlined_call_operand.vmem [shape: f32[1,32], index: 16, kind: input, shape index: {}]   ;;  %s11070_s17 = inlined_call_operand.vmem [shape: f32[1,32], index: 17, kind: input, shape index: {}]   ;;  %s11071_s18 = inlined_call_operand.vmem [shape: f32[32,64], index: 18, kind: input, shape index: {}]   ;;  %s11072_s19 = inlined_call_operand.vmem [shape: f32[1,64], index: 19, kind: input, shape index: {}]   ;;  %s11073_s20 = inlined_call_operand.vmem [shape: f32[64,32], index: 20, kind: input, shape index: {}]   ;;  %s11074_s21 = inlined_call_operand.vmem [shape: f32[1,32], index: 21, kind: input, shape index: {}]   ;;  %s11075_s22 = inlined_call_operand.vmem [shape: f32[2,8,32], index: 22, kind: output, shape index: {}]  }
   0x1   :  { %11077 = sst [smem:[#allocation2_spill]] %s11053_s0 }
   0x2   :  { %11078 = sst [smem:[#allocation3_spill]] %s11055_s2 }
   0x3   :  { %11079 = sst [smem:[#allocation4_spill]] %s11056_s3  ;;  %s10014_s3 = smov 0  }
   0x4   :  { %11080 = sst [smem:[#allocation5_spill]] %s11057_s4 }
   0x5   :  { %11081 = sst [smem:[#allocation6_spill]] %s11058_s5 }
   0x6   :  { %11082 = sst [smem:[#allocation7_spill]] %s11059_s6 }
   0x7 LB: > { %s8349_s28 = sadd.s32 4294967295, %s9879_s3   ;;  %p8353_p0 = scmp.ge.s32.totalorder %s9879_s3, 1  ;;  %s9879_s3 = sphi %s10014_s3, %s32_s3  }
   0x8   : > { %p638_p1 = scmp.lt.s32.totalorder %s9879_s3, 3 }
   0xa   : > { %p639_p2 = pnand %p8353_p0, %p638_p1 }
   0xb   : > { %p710_p3 = scmp.lt.s32.totalorder (!%p639_p2), %s8349_s28, 1  ;;  %vm733_vm0 = vcmask (!%p639_p2), 261120   ;;  %s11083_s0 = sld [smem:[#allocation2_spill]] (!%p639_p2)  ;;  %v9881_v2 = vmov (!%p639_p2), 0   ;;  %v9882_v4 = vmov (!%p639_p2), 1   ;;  %v9883_v34 = vmov (!%p639_p2), 0.0|0.0  }
   0xc   : > { %642 = sbr.rel (%p639_p2) target bundleno = 3382 (0xd36), region = 108  ;;  %s11084_s24 = sld [smem:[#allocation3_spill]] (!%p639_p2)  ;;  %9843 = vset.pattern.permute.xlu1 (!%p639_p2), %v9881_v2  ;;  %9845 = vset.pattern.permute.xlu0 (!%p639_p2), %v9881_v2  ;;  %vm9884_vm1 = vmmov (!%p639_p2), 0   ;;  %v9885_v39 = vmov (!%p639_p2), 0.0   ;;  %v1799_v43 = vlaneseq (!%p639_p2)  ;;  %v9886_v50 = vmov (!%p639_p2), 1966171168  }
   0xd   : > { %s11085_s2 = sld [smem:[#allocation4_spill]] (!%p639_p2)  ;;  %s11086_s4 = sld [smem:[#allocation7_spill]] (!%p639_p2)  ;;  %9423 = vmatprep.subr.bf16.mxu0 (!%p639_p2), %v9883_v34  ;;  %9417 = vmatprep.subr.bf16.mxu1 (!%p639_p2), %v9883_v34  ;;  %v1797_v51 = vunpack.c.l.s4 (!%p639_p2), %v9886_v50  ;;  %v8362_v52 = vld [vmem:[%s11063_s10] ss:$0 sm:$0xff] (!%p639_p2)  ;;  %v8363_v53 = vld [vmem:[%s11063_s10 + $0x1] ss:$0 sm:$0xff] (!%p639_p2) }
   0xe   : > { %8722 = vmatprep.mubr.msk.f32.mxu0 (!%p639_p2), %vm9884_vm1, %v9885_v39  ;;  %8711 = vmatprep.mubr.msk.f32.mxu1 (!%p639_p2), %vm9884_vm1, %v9885_v39  ;;  %v1800_v44 = vshrl.u32 (!%p639_p2), %v1799_v43, 7  ;;  %v3195_v45 = vand.u32 (!%p639_p2), 127, %v1799_v43  ;;  %s11087_s25 = sld [smem:[#allocation5_spill]] (!%p639_p2)  ;;  %vm1923_vm2 = vcmask (!%p639_p2), 130048   ;;  %vm2708_vm3 = vcmask (!%p639_p2), 64512   ;;  %s9890_s26 = smov (!%p639_p2), 104  }
   0xf   : > { %v1798_v58 = vunpack.c.0.s8 (!%p639_p2), %v1797_v51  ;;  %vm3228_vm4 = vcmask (!%p639_p2), 1041409   ;;  %vm3230_vm5 = vcmask (!%p639_p2), 1042434   ;;  %vm3232_vm6 = vcmask (!%p639_p2), 1043459   ;;  %s9896_s30 = smov (!%p639_p2), 8  }
  0x10   : > { %v10095_v46 = vsub.s32 (!%p639_p2), %v3195_v45, %v1800_v44  ;;  %vm3234_vm7 = vcmask (!%p639_p2), 1044484   ;;  %vm3236_vm8 = vcmask (!%p639_p2), 1045509   ;;  %vm3238_vm9 = vcmask (!%p639_p2), 1046534  }
  0x11   : > { %v1801_v61 = vsub.s32 (!%p639_p2), %v1798_v58, %v1800_v44  ;;  %vm3240_vm10 = vcmask (!%p639_p2), 1047559   ;;  %vm6670_vm11 = vcmask (!%p639_p2), 195584   ;;  %vm7717_vm12 = vcmask (!%p639_p2), 523264  }
  0x13   : > { %s11090_s28 = smov (!%p710_p3, %s8349_s28), 1  ;;  %v762_v11 = vld [vmem:[%s11086_s4] sm:$0xff]  ;;  %v763_v12 = vld [vmem:[%s11086_s4 + $0x8] sm:$0xff]  ;;  %v764_v17 = vld [vmem:[%s11086_s4 + $0x10] sm:$0xff] }
  0x14   : > { %s10022_s29 = sshll.u32 %s11090_s28, 3  ;;  %v777_v13 = vand.u32 4294901760, %v762_v11  ;;  %v780_v14 = vand.u32 4294901760, %v763_v12  ;;  %v765_v18 = vld [vmem:[%s11086_s4 + $0x18] sm:$0xff]  ;;  %v783_v21 = vand.u32 4294901760, %v764_v17  ;;  %s9895_s28 = smov 80  }
  0x15   : > { %s10028_s23 = scalar_lea.vmem %s11083_s0, %s10022_s29  ;;  %s721_s6 = scalar_lea.vmem %s11084_s24, %s10022_s29  ;;  %v786_v22 = vand.u32 4294901760, %v765_v18 }
  0x16   : > { %v730_v0 = vld [vmem:[%s10028_s23] sm:$0xff]  ;;  %s725_s27 = scalar_lea.vmem %s11085_s2, %s10022_s29  ;;  %v10052_v15 = vsub.f32 %v762_v11, %v777_v13  ;;  %v10054_v16 = vsub.f32 %v763_v12, %v780_v14  ;;  %v10066_v25 = vsub.f32 %v764_v17, %v783_v21  ;;  %v10078_v38 = vpack.c.bf16 %v780_v14, %v777_v13  ;;  %s9887_s24 = smov 96  }
  0x17   : > { %v734_v1 = vsel %vm733_vm0, %v730_v0, 0.0  ;;  %v1757_v3 = vld [vmem:[%s721_s6] sm:$0xff]  ;;  %v10068_v26 = vsub.f32 %v765_v18, %v786_v22  ;;  %v10089_v41 = vpack.c.bf16 %v786_v22, %v783_v21  ;;  %s9888_s6 = smov 120   ;;  %s9893_s2 = smov 88  }
  0x18   : > { %735 = vadd.xlane.f32.xlu0 %v734_v1  ;;  %1762 = vperm.xlu1 %9843, %v1757_v3   ;;  %v1758_v5 = vld [vmem:[%s725_s27] sm:$0xff]  ;;  %v858_v19 = vand.u32 4294901760, %v10052_v15  ;;  %v865_v20 = vand.u32 4294901760, %v10054_v16  ;;  %v872_v29 = vand.u32 4294901760, %v10066_v25  ;;  %v9430_v40 = vpack.c.bf16 %v10054_v16, %v10052_v15  ;;  %v1262_v1 = vld [vmem:[%s11061_s8 + $0x8] sm:$0xff]  ;;  %s11088_s27 = sld [smem:[#allocation6_spill]] }
  0x19   : > { %v879_v30 = vand.u32 4294901760, %v10068_v26  ;;  %9419 = vmatpush3.bf16.msra.mxu1 %v10078_v38  ;;  %v9433_v42 = vpack.c.bf16 %v10068_v26, %v10066_v25  ;;  %v1276_v12 = vand.u32 4294901760, %v1262_v1 }
  0x1a   : > { %v859_v23 = vsub.f32 %v10052_v15, %v858_v19  ;;  %v866_v24 = vsub.f32 %v10054_v16, %v865_v20  ;;  %v873_v32 = vsub.f32 %v10066_v25, %v872_v29  ;;  %9420 = vmatprep.subr.bf16.mxu1 %v9883_v34  ;;  %v10097_v47 = vpack.c.bf16 %v865_v20, %v858_v19 }
  0x1b   : > { %v880_v33 = vsub.f32 %v10068_v26, %v879_v30  ;;  %v10099_v48 = vpack.c.bf16 %v879_v30, %v872_v29  ;;  %v10131_v30 = vsub.f32 %v1262_v1, %v1276_v12 }
  0x1c   : > { %9844 = vset.pattern.permute.xlu1 %v9882_v4  ;;  %v860_v27 = vand.u32 4294901760, %v859_v23  ;;  %v867_v28 = vand.u32 4294901760, %v866_v24  ;;  %v874_v35 = vand.u32 4294901760, %v873_v32  ;;  %v1263_v23 = vld [vmem:[%s11061_s8 + $0x10] sm:$0xff]  ;;  %v1264_v24 = vld [vmem:[%s11061_s8 + $0x18] sm:$0xff] }
  0x1d   : > { %1772 = vperm.xlu1 %9844, %v1757_v3   ;;  %v881_v36 = vand.u32 4294901760, %v880_v33  ;;  %9422 = vmatpush3.bf16.msra.mxu1 %v10089_v41  ;;  %v1279_v32 = vand.u32 4294901760, %v1263_v23  ;;  %v1282_v33 = vand.u32 4294901760, %v1264_v24  ;;  %v1361_v51 = vand.u32 4294901760, %v10131_v30 }
  0x1e   : > { %v9424_v31 = vpack.c.bf16 %v867_v28, %v860_v27  ;;  %9453 = vmatprep.subr.bf16.mxu1 %v9883_v34  ;;  %v8359_v19 = vld [vmem:[%s11088_s27] ss:$0 sm:$0xff]  ;;  %s9894_s27 = smov 72  }
  0x1f   : > { %v9427_v37 = vpack.c.bf16 %v881_v36, %v874_v35  ;;  %v1362_v16 = vsub.f32 %v10131_v30, %v1361_v51  ;;  %v10193_v26 = vpack.c.bf16 %v1282_v33, %v1279_v32 }
  0x20   : > { %9425 = vmatpush3.bf16.msra.mxu0 %v9424_v31 }
  0x21   : > { %1788 = vperm.xlu1 %9844, %v1758_v5   ;;  %9426 = vmatprep.subr.bf16.mxu0 %v9883_v34 }
  0x24   : > { %9428 = vmatpush3.bf16.msra.mxu0 %v9427_v37 }
  0x25   : > { %9846 = vset.pattern.permute.xlu1 %v9881_v2  ;;  %9429 = vmatprep.subr.bf16.mxu0 %v9883_v34 }
  0x97   : > { %v1763_v49 = vpop.permute.xlu1 %1762 }
  0x98   : > { %v1769_v57 = vmul.f32 %v8362_v52, %v1763_v49 }
  0x9c   : > { %v1773_v54 = vpop.permute.xlu1 %1772 }
  0x9d   : > { %v1779_v59 = vmul.f32 %v8363_v53, %v1773_v54  ;;  %v10147_v54 = vsub.f32 %v1263_v23, %v1279_v32 }
  0x9f   : > { %v1780_v62 = vadd.f32 %v1779_v59, %v1769_v57 }
  0xa0   : > { %v1789_v2 = vpop.permute.xlu1 %1788 }
  0xa1   : > { %v1802_v63 = vrot.slane %v1780_v62, %v1801_v61  ;;  %v1791_v17 = vmul.f32 %v8363_v53, %v1789_v2  ;;  %v1368_v2 = vand.u32 4294901760, %v10147_v54 }
  0xa3   : > { %v1818_v14 = vrot.slane %v1802_v63, %v1801_v61 }
  0xa5   : > { %v736_v6 = vpop.xlane.xlu0 %735  ;;  %v1840_v27 = vcombine.high %v1818_v14, %v1818_v14 }
  0xa6   : > { %v738_v7 = vmul.f32 0.03125, %v736_v6  ;;  %v1810_v6 = vcombine.high %v1802_v63, %v1802_v63 }
  0xa8   : > { %v10041_v8 = vsub.f32 %v730_v0, %v738_v7  ;;  %v1261_v0 = vld [vmem:[%s11061_s8] sm:$0xff]  ;;  %v1832_v22 = vrot.slane %v1810_v6, %v1801_v61 }
  0xa9   : > { %v1273_v11 = vand.u32 4294901760, %v1261_v0 }
  0xaa   : > { %v740_v9 = vmul.f32 %v10041_v8, %v10041_v8  ;;  %v1842_v37 = vcombine.high %v1832_v22, %v1832_v22 }
  0xab   : > { %v10178_v1 = vpack.c.bf16 %v1276_v12, %v1273_v11 }
  0xac   : > { %v741_v10 = vsel %vm733_vm0, %v740_v9, 0.0  ;;  %v8358_v9 = vld [vmem:[%s11087_s25] ss:$0 sm:$0xff]  ;;  %s9889_s25 = smov 112  }
  0xad   : > { %742 = vadd.xlane.f32.xlu0 %v741_v10  ;;  %v10116_v10 = vsub.s32 0, %v1800_v44 }
  0xaf   : > { %v1847_v29 = vrot.slane %v1818_v14, %v10116_v10  ;;  %v1851_v43 = vrot.slane %v1832_v22, %v10116_v10  ;;  %v1855_v49 = vrot.slane %v1840_v27, %v10116_v10  ;;  %v1859_v58 = vrot.slane %v1842_v37, %v10116_v10  ;;  %v10212_v22 = vld [vmem:[%s11065_s12 + $0x8] sm:$0xff] }
  0xc3   : > { %1783 = vperm.xlu0 %9845, %v1758_v5   ;;  %v1795_v5 = vcombine.high %v1780_v62, %v1780_v62 }
  0xc5   : > { %v1809_v21 = vrot.slane %v1795_v5, %v1801_v61 }
  0xc7   : > { %9848 = vset.pattern.permute.xlu0 %v9882_v4  ;;  %v1811_v36 = vcombine.high %v1809_v21, %v1809_v21  ;;  %v1825_v45 = vrot.slane %v1809_v21, %v1801_v61  ;;  %v10207_v21 = vld [vmem:[%s11065_s12] sm:$0xff] }
  0xc8   : > { %v1949_v37 = vand.u32 4294901760, %v10207_v21 }
  0xc9   : > { %v1839_v57 = vrot.slane %v1811_v36, %v1801_v61  ;;  %v1863_v62 = vrot.slane %v1825_v45, %v10116_v10 }
  0xcb   : > { %v1843_v5 = vcombine.high %v1839_v57, %v1839_v57  ;;  %v1867_v6 = vrot.slane %v1839_v57, %v10116_v10 }
 0x13a   : > { %v743_v55 = vpop.xlane.xlu0 %742 }
 0x13b   : > { %v744_v56 = vmul.f32 0.03125, %v743_v55  ;;  %v10149_v55 = vsub.f32 %v1264_v24, %v1282_v33 }
 0x13d   : > { %v745_v60 = vadd.f32 1e-05, %v744_v56  ;;  %v10154_v56 = vld [vmem:[%s11064_s11] ss:$0 sm:$0xff] }
 0x13f   : > { %9852 = vrsqrt.f32 %v745_v60  ;;  %v1841_v60 = vcombine.high %v1825_v45, %v1825_v45 }
 0x142   : > { %v1784_v3 = vpop.permute.xlu0 %1783 }
 0x143   : > { %v1786_v18 = vmul.f32 %v8362_v52, %v1784_v3  ;;  %v1375_v3 = vand.u32 4294901760, %v10149_v55 }
 0x145   : > { %v10133_v31 = vadd.f32 %v1791_v17, %v1786_v18  ;;  %v1363_v18 = vand.u32 4294901760, %v1362_v16 }
 0x147   : > { %v1884_v52 = vsub.f32 %v1847_v29, %v10133_v31  ;;  %v1885_v59 = vsub.f32 %v1851_v43, %v10133_v31  ;;  %v1888_v12 = vsub.f32 %v1863_v62, %v10133_v31  ;;  %v1889_v27 = vsub.f32 %v1867_v6, %v10133_v31 }
 0x148   : > { %v1952_v43 = vand.u32 4294901760, %v10212_v22 }
 0x149   : > { %v9853_v7 = vpop.eup %9852 }
 0x14a   : > { %v747_v13 = vmul.f32 %v9853_v7, %v10041_v8  ;;  %v10128_v8 = vsub.f32 %v1261_v0, %v1273_v11  ;;  %v1886_v0 = vsub.f32 %v1855_v49, %v10133_v31  ;;  %v1899_v7 = vadd.f32 %v10154_v56, %v1885_v59 }
 0x14c   : > { %v754_v20 = vmul.f32 %v8358_v9, %v747_v13  ;;  %v1354_v50 = vand.u32 4294901760, %v10128_v8  ;;  %v1887_v9 = vsub.f32 %v1859_v58, %v10133_v31  ;;  %v1871_v13 = vrot.slane %v1841_v60, %v10116_v10 }
 0x14d   : > { %v1900_v11 = vadd.f32 %v10154_v56, %v1886_v0  ;;  %v1907_v23 = vmax.f32 %v1899_v7, 0.0  ;;  %v10241_v0 = vsub.f32 %v10207_v21, %v1949_v37 }
 0x14e   : > { %v761_v28 = vadd.f32 %v8359_v19, %v754_v20  ;;  %v1355_v15 = vsub.f32 %v10128_v8, %v1354_v50  ;;  %v1376_v19 = vsub.f32 %v10149_v55, %v1375_v3  ;;  %v1875_v20 = vrot.slane %v1843_v5, %v10116_v10 }
 0x14f   : > { %v1901_v24 = vadd.f32 %v10154_v56, %v1887_v9  ;;  %v1908_v10 = vmax.f32 %v1900_v11, 0.0  ;;  %v1890_v29 = vsub.f32 %v1871_v13, %v10133_v31  ;;  %v1928_v45 = vsel %vm1923_vm2, %v1907_v23, 0 }
 0x150   : > { %v774_v35 = vsel %vm733_vm0, %v761_v28, 0  ;;  %v1356_v17 = vand.u32 4294901760, %v1355_v15  ;;  %v1902_v28 = vadd.f32 %v10154_v56, %v1888_v12  ;;  %v1377_v36 = vand.u32 4294901760, %v1376_v19 }
 0x151   : > { %v10137_v44 = vand.u32 4294901760, %v774_v35  ;;  %v1909_v49 = vmax.f32 %v1901_v24, 0.0  ;;  %v1891_v57 = vsub.f32 %v1875_v20, %v10133_v31  ;;  %v1931_v59 = vsel %vm1923_vm2, %v1908_v10, 0 }
 0x152   : > { %v9460_v32 = vpack.c.bf16 %v1363_v18, %v1356_v17  ;;  %v1910_v60 = vmax.f32 %v1902_v28, 0.0  ;;  %v1904_v62 = vadd.f32 %v10154_v56, %v1890_v29  ;;  %v10246_v31 = vsub.f32 %v10212_v22, %v1952_v43 }
 0x153   : > { %8723 = vmatmul.mubr.f32.vlgmr.msra.gmra.mrb[0].mxu0 %v10137_v44  ;;  %v10145_v53 = vsub.f32 %v774_v35, %v10137_v44  ;;  %v10249_v16 = vand.u32 4294901760, %v1928_v45  ;;  %v1905_v6 = vadd.f32 %v10154_v56, %v1891_v57  ;;  %v9469_v24 = vpack.c.bf16 %v10149_v55, %v10147_v54  ;;  %v8360_v55 = vld [vmem:[%s11060_s7] ss:$0 sm:$0xff] }
 0x154   : > { %9431 = vmatpush3.bf16.msra.mxu0 %v9430_v40  ;;  %8733 = vmatprep.mubr.msk.f32.mxu0 %vm9884_vm1, %v9885_v39  ;;  %v1898_v40 = vadd.f32 %v10154_v56, %v1884_v52  ;;  %v1903_v52 = vadd.f32 %v10154_v56, %v1889_v27  ;;  %v1937_v9 = vsel %vm1923_vm2, %v1910_v60, 0  ;;  %v1912_v13 = vmax.f32 %v1904_v62, 0.0 }
 0x155   : > { %9432 = vmatprep.subr.bf16.mxu0 %v9883_v34  ;;  %v10166_v63 = vand.u32 4294901760, %v10145_v53  ;;  %v2105_v56 = vand.u32 4294901760, %v10246_v31  ;;  %v10271_v11 = vsub.f32 %v1928_v45, %v10249_v16  ;;  %v10279_v18 = vand.u32 4294901760, %v1937_v9 }
 0x156   : > { %v1906_v25 = vmax.f32 %v1898_v40, 0.0  ;;  %v10252_v40 = vand.u32 4294901760, %v1931_v59  ;;  %v1911_v5 = vmax.f32 %v1903_v52, 0.0  ;;  %v1943_v20 = vsel %vm1923_vm2, %v1912_v13, 0 }
 0x157   : > { %v848_v61 = vsub.f32 %v10145_v53, %v10166_v63  ;;  %v2106_v23 = vsub.f32 %v10246_v31, %v2105_v56  ;;  %v2027_v27 = vand.u32 4294901760, %v10271_v11  ;;  %v9497_v13 = vpack.c.bf16 %v10246_v31, %v10241_v0  ;;  %v8361_v31 = vld [vmem:[%s11062_s9] ss:$0 sm:$0xff] }
 0x158   : > { %9434 = vmatpush3.bf16.msra.mxu0 %v9433_v42  ;;  %v1369_v42 = vsub.f32 %v10147_v54, %v1368_v2  ;;  %v1925_v33 = vsel %vm1923_vm2, %v1906_v25, 0  ;;  %v10277_v17 = vsub.f32 %v1931_v59, %v10252_v40  ;;  %v1940_v25 = vsel %vm1923_vm2, %v1911_v5, 0 }
 0x159   : > { %v849_v14 = vand.u32 4294901760, %v848_v61  ;;  %9435 = vmatprep.subr.bf16.mxu0 %v9883_v34  ;;  %v10234_v58 = vand.u32 4294901760, %v1925_v33  ;;  %v1934_v61 = vsel %vm1923_vm2, %v1909_v49, 0  ;;  %v10300_v28 = vand.u32 4294901760, %v1940_v25 }
 0x15a   : > { %v1370_v35 = vand.u32 4294901760, %v1369_v42  ;;  %v10273_v12 = vand.u32 4294901760, %v1934_v61  ;;  %v1913_v42 = vmax.f32 %v1905_v6, 0.0  ;;  %v2037_v29 = vand.u32 4294901760, %v10277_v17 }
 0x15b   : > { %8712 = vmatmul.mubr.f32.vlgmr.msra.gmra.mrb[0].mxu1 %v849_v14  ;;  %8734 = vmatmul.mubr.f32.vlgmr.msra.gmra.mrb[0].mxu0 %v10145_v53  ;;  %v10259_v7 = vsub.f32 %v1925_v33, %v10234_v58  ;;  %v10307_v33 = vand.u32 4294901760, %v1943_v20  ;;  %v2107_v49 = vand.u32 4294901760, %v2106_v23  ;;  %v2028_v21 = vsub.f32 %v10271_v11, %v2027_v27 }
 0x15c   : > { %9455 = vmatpush3.bf16.msra.mxu1 %v10178_v1  ;;  %9437 = vmatpush3.bf16.msra.mxu0 %v10078_v38  ;;  %v9463_v15 = vpack.c.bf16 %v1377_v36, %v1370_v35  ;;  %v10298_v10 = vsub.f32 %v1934_v61, %v10273_v12  ;;  %v1946_v35 = vsel %vm1923_vm2, %v1913_v42, 0  ;;  %v10316_v36 = vpack.c.bf16 %v1952_v43, %v1949_v37 }
 0x15d   : > { %9456 = vmatprep.subr.bf16.mxu1 %v9883_v34  ;;  %9438 = vmatprep.subr.bf16.mxu0 %v9883_v34  ;;  %v2017_v19 = vand.u32 4294901760, %v10259_v7  ;;  %v10330_v37 = vsub.f32 %v1940_v25, %v10300_v28  ;;  %v10332_v43 = vand.u32 4294901760, %v1946_v35  ;;  %v2038_v52 = vsub.f32 %v10277_v17, %v2037_v29 }
 0x15e   : > { %8777 = vmatprep.mubr.msk.f32.mxu1 %vm9884_vm1, %v9885_v39  ;;  %8744 = vmatprep.mubr.msk.f32.mxu0 %vm9884_vm1, %v9885_v39  ;;  %v2047_v22 = vand.u32 4294901760, %v10298_v10  ;;  %v10340_v59 = vsub.f32 %v1943_v20, %v10307_v33  ;;  %v9478_v20 = vpack.c.bf16 %v1361_v51, %v1354_v50 }
 0x15f   : > { %v2067_v61 = vand.u32 4294901760, %v10330_v37  ;;  %v10351_v5 = vsub.f32 %v1946_v35, %v10332_v43  ;;  %v2039_v6 = vand.u32 4294901760, %v2038_v52 }
 0x160   : > { %9458 = vmatpush3.bf16.msra.mxu1 %v10193_v26  ;;  %9440 = vmatpush3.bf16.msra.mxu0 %v10089_v41 }
 0x161   : > { %9459 = vmatprep.subr.bf16.mxu1 %v9883_v34  ;;  %9441 = vmatprep.subr.bf16.mxu0 %v9883_v34  ;;  %v2068_v25 = vsub.f32 %v10330_v37, %v2067_v61  ;;  %v2087_v42 = vand.u32 4294901760, %v10351_v5 }
 0x163   : > { %8778 = vmatmul.mubr.f32.vlgmr.msra.gmra.mrb[2].mxu1 %v849_v14  ;;  %8745 = vmatmul.mubr.f32.vlgmr.msra.gmra.mrb[0].mxu0 %v10166_v63  ;;  %v9466_v14 = vpack.c.bf16 %v10131_v30, %v10128_v8  ;;  %v2088_v35 = vsub.f32 %v10351_v5, %v2087_v42  ;;  %v9481_v8 = vpack.c.bf16 %v1375_v3, %v1368_v2 }
 0x164   : > { %9461 = vmatpush3.bf16.msra.mxu1 %v9460_v32  ;;  %9443 = vmatpush3.bf16.msra.mxu0 %v10097_v47  ;;  %v2098_v47 = vand.u32 4294901760, %v10241_v0  ;;  %v10305_v32 = vsub.f32 %v1937_v9, %v10279_v18  ;;  %v2077_v9 = vand.u32 4294901760, %v10340_v59 }
 0x165   : > { %9462 = vmatprep.subr.bf16.mxu1 %v9883_v34  ;;  %9444 = vmatprep.subr.bf16.mxu0 %v9883_v34  ;;  %v2089_v50 = vand.u32 4294901760, %v2088_v35 }
 0x166   : > { %8788 = vmatprep.mubr.msk.f32.mxu1 %vm9884_vm1, %v9885_v39  ;;  %8755 = vmatprep.mubr.msk.f32.mxu0 %vm9884_vm1, %v9885_v39  ;;  %v2057_v57 = vand.u32 4294901760, %v10305_v32  ;;  %v2078_v23 = vsub.f32 %v10340_v59, %v2077_v9 }
 0x168   : > { %9464 = vmatpush3.bf16.msra.mxu1 %v9463_v15  ;;  %9446 = vmatpush3.bf16.msra.mxu0 %v10099_v48  ;;  %v2099_v48 = vsub.f32 %v10241_v0, %v2098_v47  ;;  %v2048_v15 = vsub.f32 %v10298_v10, %v2047_v22  ;;  %v2079_v30 = vand.u32 4294901760, %v2078_v23 }
 0x169   : > { %9465 = vmatprep.subr.bf16.mxu1 %v9883_v34  ;;  %9447 = vmatprep.subr.bf16.mxu0 %v9883_v34 }
 0x16a   : > { %v2100_v45 = vand.u32 4294901760, %v2099_v48 }
 0x16b   : > { %8789 = vmatmul.mubr.f32.vlgmr.msra.gmra.mrb[2].mxu1 %v10137_v44  ;;  %8756 = vmatmul.mubr.f32.vlgmr.msra.gmra.mrb[0].mxu0 %v10137_v44 }
 0x16c   : > { %9467 = vmatpush3.bf16.msra.mxu1 %v9466_v14  ;;  %9449 = vmatpush3.bf16.msra.mxu0 %v10078_v38  ;;  %v2018_v38 = vsub.f32 %v10259_v7, %v2017_v19  ;;  %v9493_v62 = vpack.c.bf16 %v2107_v49, %v2100_v45  ;;  %v2049_v14 = vand.u32 4294901760, %v2048_v15 }
 0x16d   : > { %9468 = vmatprep.subr.bf16.mxu1 %v9883_v34  ;;  %9450 = vmatprep.subr.bf16.mxu0 %v9883_v34 }
 0x16e   : > { %8799 = vmatprep.mubr.msk.f32.mxu1 %vm9884_vm1, %v9885_v39  ;;  %8766 = vmatprep.mubr.msk.f32.mxu0 %vm9884_vm1, %v9885_v39  ;;  %v2019_v60 = vand.u32 4294901760, %v2018_v38 }
 0x170   : > { %9470 = vmatpush3.bf16.msra.mxu1 %v9469_v24  ;;  %9452 = vmatpush3.bf16.msra.mxu0 %v10089_v41  ;;  %v2029_v41 = vand.u32 4294901760, %v2028_v21  ;;  %v2069_v24 = vand.u32 4294901760, %v2068_v25 }
 0x171   : > { %9471 = vmatprep.subr.bf16.mxu1 %v9883_v34  ;;  %9490 = vmatprep.subr.bf16.mxu0 %v10316_v36 }
 0x173   : > { %8800 = vmatmul.mubr.f32.vlgmr.msra.gmra.mrb[2].mxu1 %v10145_v53  ;;  %8767 = vmatmul.mubr.f32.vlgmr.msra.gmra.mrb[0].mxu0 %v10137_v44  ;;  %v2058_v53 = vsub.f32 %v10305_v32, %v2057_v57 }
 0x174   : > { %9473 = vmatpush3.bf16.msra.mxu1 %v10178_v1  ;;  %9492 = vmatpush3.bf16.msra.mxu0 %v10316_v36 }
 0x175   : > { %9474 = vmatprep.subr.bf16.mxu1 %v9883_v34  ;;  %8839 = vmatprep.mubr.f32.mxu0 %v2019_v60  ;;  %v2059_v48 = vand.u32 4294901760, %v2058_v53 }
 0x176   : > { %8810 = vmatprep.mubr.msk.f32.mxu1 %vm9884_vm1, %v9885_v39  ;;  %9494 = vmatprep.subr.bf16.mxu0 %v9493_v62 }
 0x177   : > { %8840 = vmatmul.mubr.f32.vlgmr.msra.gmra.mrb[2].mxu0 %v2029_v41 }
 0x178   : > { %9476 = vmatpush3.bf16.msra.mxu1 %v10193_v26  ;;  %8842 = vmatprep.mubr.f32.mxu0 %v2039_v6 }
 0x179   : > { %9477 = vmatprep.subr.bf16.mxu1 %v9883_v34  ;;  %9496 = vmatpush3.bf16.msra.mxu0 %v9493_v62 }
 0x17a   : > { %9498 = vmatprep.subr.bf16.mxu0 %v9497_v13 }
 0x17b   : > { %8811 = vmatmul.mubr.f32.vlgmr.msra.gmra.mrb[2].mxu1 %v10166_v63  ;;  %8843 = vmatmul.mubr.f32.gmra.mrb[4].mxu0 %v2049_v14 }
 0x17c   : > { %9479 = vmatpush3.bf16.msra.mxu1 %v9478_v20  ;;  %8845 = vmatprep.mubr.f32.mxu0 %v2059_v48 }
 0x17d   : > { %9480 = vmatprep.subr.bf16.mxu1 %v9883_v34  ;;  %8821 = vmatprep.mubr.msk.f32.mxu1 %vm9884_vm1, %v9885_v39 }
 0x17f   : > { %8846 = vmatmul.mubr.f32.gmra.mrb[6].mxu0 %v2069_v24 }
 0x180   : > { %9482 = vmatpush3.bf16.msra.mxu1 %v9481_v8  ;;  %8848 = vmatprep.mubr.f32.mxu0 %v2079_v30 }
 0x181   : > { %9483 = vmatprep.subr.bf16.mxu1 %v9883_v34 }
 0x183   : > { %8822 = vmatmul.mubr.f32.vlgmr.msra.gmra.mrb[2].mxu1 %v10137_v44  ;;  %8849 = vmatmul.mubr.f32.gmra.mrb[8].mxu0 %v2089_v50 }
 0x184   : > { %9485 = vmatpush3.bf16.msra.mxu1 %v10178_v1  ;;  %8855 = vmatprep.mubr.f32.mxu0 %v10234_v58 }
 0x185   : > { %9486 = vmatprep.subr.bf16.mxu1 %v9883_v34  ;;  %8832 = vmatprep.mubr.msk.f32.mxu1 %vm9884_vm1, %v9885_v39 }
 0x187   : > { %8856 = vmatmul.mubr.f32.vlgmr.msra.gmra.mrb[2].mxu0 %v10249_v16 }
 0x188   : > { %9488 = vmatpush3.bf16.msra.mxu1 %v10193_v26  ;;  %8858 = vmatprep.mubr.f32.mxu0 %v10252_v40 }
 0x189   : > { %9500 = vmatpush3.bf16.msra.mxu0 %v9497_v13  ;;  %8931 = vmatprep.subr.mxu1 %v9885_v39 }
 0x18a   : > { %9502 = vmatprep.subr.bf16.mxu0 %v10316_v36 }
 0x18b   : > { %8833 = vmatmul.mubr.f32.vlgmr.msra.gmra.mrb[2].mxu1 %v10137_v44  ;;  %8859 = vmatmul.mubr.f32.gmra.mrb[4].mxu0 %v10273_v12  ;;  %v9505_v44 = vpack.c.bf16 %v2105_v56, %v2098_v47 }
 0x18c   : > { %8861 = vmatprep.mubr.f32.mxu0 %v10279_v18  ;;  %8933 = vmatprep.mubr.msk.f32.mxu1 %vm9884_vm1, %v9885_v39 }
 0x18f   : > { %8862 = vmatmul.mubr.f32.gmra.mrb[6].mxu0 %v10300_v28 }
 0x190   : > { %8864 = vmatprep.mubr.f32.mxu0 %v10307_v33 }
 0x193   : > { %8865 = vmatmul.mubr.f32.gmra.mrb[8].mxu0 %v10332_v43 }
 0x194   : > { %8871 = vmatprep.mubr.f32.mxu0 %v10259_v7 }
 0x197   : > { %8872 = vmatmul.mubr.f32.vlgmr.msra.gmra.mrb[2].mxu0 %v10271_v11 }
 0x198   : > { %8874 = vmatprep.mubr.f32.mxu0 %v10277_v17  ;;  %9504 = vmatpush3.bf16.msra.mxu0 %v10316_v36 }
 0x199   : > { %9506 = vmatprep.subr.bf16.mxu0 %v9505_v44 }
 0x19b   : > { %8875 = vmatmul.mubr.f32.gmra.mrb[4].mxu0 %v10298_v10 }
 0x19c   : > { %8877 = vmatprep.mubr.f32.mxu0 %v10305_v32 }
 0x19f   : > { %8878 = vmatmul.mubr.f32.gmra.mrb[6].mxu0 %v10330_v37 }
 0x1a0   : > { %8880 = vmatprep.mubr.f32.mxu0 %v10340_v59 }
 0x1a3   : > { %8881 = vmatmul.mubr.f32.gmra.mrb[8].mxu0 %v10351_v5 }
 0x1a4   : > { %8887 = vmatprep.mubr.f32.mxu0 %v2017_v19 }
 0x1a7   : > { %8888 = vmatmul.mubr.f32.vlgmr.msra.gmra.mrb[2].mxu0 %v2027_v27 }
 0x1a8   : > { %8890 = vmatprep.mubr.f32.mxu0 %v2037_v29  ;;  %9508 = vmatpush3.bf16.msra.mxu0 %v9505_v44 }
 0x1a9   : > { %9510 = vmatprep.subr.bf16.mxu0 %v10316_v36 }
 0x1ab   : > { %8891 = vmatmul.mubr.f32.gmra.mrb[4].mxu0 %v2047_v22 }
 0x1ac   : > { %8893 = vmatprep.mubr.f32.mxu0 %v2057_v57 }
 0x1af   : > { %8894 = vmatmul.mubr.f32.gmra.mrb[6].mxu0 %v2067_v61 }
 0x1b0   : > { %8896 = vmatprep.mubr.f32.mxu0 %v2077_v9 }
 0x1b3   : > { %8897 = vmatmul.mubr.f32.gmra.mrb[8].mxu0 %v2087_v42 }
 0x1b4   : > { %8903 = vmatprep.mubr.f32.mxu0 %v10234_v58 }
 0x1b7   : > { %8904 = vmatmul.mubr.f32.vlgmr.msra.gmra.mrb[2].mxu0 %v10249_v16 }
 0x1b8   : > { %8906 = vmatprep.mubr.f32.mxu0 %v10252_v40  ;;  %9512 = vmatpush3.bf16.msra.mxu0 %v10316_v36 }
 0x1b9   : > { %9051 = vmatprep.subr.mxu0 %v9885_v39 }
 0x1bb   : > { %8907 = vmatmul.mubr.f32.gmra.mrb[4].mxu0 %v10273_v12 }
 0x1bc   : > { %8909 = vmatprep.mubr.f32.mxu0 %v10279_v18 }
 0x1bf   : > { %8910 = vmatmul.mubr.f32.gmra.mrb[6].mxu0 %v10300_v28 }
 0x1c0   : > { %8912 = vmatprep.mubr.f32.mxu0 %v10307_v33 }
 0x1c3   : > { %8913 = vmatmul.mubr.f32.gmra.mrb[8].mxu0 %v10332_v43 }
 0x1c4   : > { %8919 = vmatprep.mubr.f32.mxu0 %v10234_v58 }
 0x1c7   : > { %8920 = vmatmul.mubr.f32.vlgmr.msra.gmra.mrb[2].mxu0 %v10249_v16 }
 0x1c8   : > { %8922 = vmatprep.mubr.f32.mxu0 %v10252_v40 }
 0x1cb   : > { %8923 = vmatmul.mubr.f32.gmra.mrb[4].mxu0 %v10273_v12 }
 0x1cc   : > { %8925 = vmatprep.mubr.f32.mxu0 %v10279_v18 }
 0x1cf   : > { %8926 = vmatmul.mubr.f32.gmra.mrb[6].mxu0 %v10300_v28  ;;  %v8365_v28 = vld [vmem:[%s11066_s13] ss:$0 sm:$0xff] }
 0x1d0   : > { %8928 = vmatprep.mubr.f32.mxu0 %v10307_v33 }
 0x1d3   : > { %8929 = vmatmul.mubr.f32.gmra.mrb[8].mxu0 %v10332_v43 }
 0x1d4   : > { %9053 = vmatprep.mubr.msk.f32.mxu0 %vm9884_vm1, %v9885_v39 }
 0x22e   : > { %v851_v51 = vpop.f32.mrb[0].mxu1 }
 0x22f   : > { %v8713_v54 = vpop.f32.mrb[1].mxu1  ;;  %v852_v63 = vadd.f32 %v8360_v55, %v851_v51 }
 0x246   : > { %v1257_v1 = vpop.f32.mrb[0].mxu0 }
 0x247   : > { %v10457_v2 = vadd.f32 %v1257_v1, %v852_v63  ;;  %v8768_v3 = vpop.f32.mrb[1].mxu0 }
 0x249   : > { %v2710_v26 = vsel %vm2708_vm3, %v10457_v2, 0 }
 0x24a   : > { %v2781_v58 = vand.u32 4294901760, %v2710_v26 }
 0x24c   : > { %v2782_v0 = vsub.f32 %v2710_v26, %v2781_v58 }
 0x24e   : > { %v2783_v16 = vand.u32 4294901760, %v2782_v0 }
 0x250   : > { %v2784_v11 = vsub.f32 %v2782_v0, %v2783_v16 }
 0x252   : > { %v2785_v18 = vand.u32 4294901760, %v2784_v11 }
 0x25e   : > { %v1753_v40 = vpop.f32.mrb[2].mxu1 }
 0x25f   : > { %v10464_v7 = vadd.f32 %v8361_v31, %v1753_v40  ;;  %v8834_v47 = vpop.f32.mrb[3].mxu1 }
 0x261   : > { %v2713_v56 = vsel %vm2708_vm3, %v10464_v7, 0 }
 0x262   : > { %v2716_v12 = vand.u32 4294901760, %v2713_v56 }
 0x264   : > { %8932 = vmatpush3.xpose.msra.mxu1 %v2716_v12  ;;  %v2793_v17 = vsub.f32 %v2713_v56, %v2716_v12 }
 0x265   : > { %8936 = vmatprep.subr.mxu1 %v9885_v39 }
 0x266   : > { %v2794_v19 = vand.u32 4294901760, %v2793_v17 }
 0x267   : > { %8934 = vmatmul.mubr.f32.vlgmr.msra.gmra.mrb[4].mxu1 %v2785_v18 }
 0x268   : > { %v2795_v27 = vsub.f32 %v2793_v17, %v2794_v19  ;;  %8938 = vmatprep.mubr.msk.f32.mxu1 %vm9884_vm1, %v9885_v39 }
 0x26a   : > { %v2796_v10 = vand.u32 4294901760, %v2795_v27 }
 0x26c   : > { %8937 = vmatpush3.xpose.msra.mxu1 %v2796_v10 }
 0x26d   : > { %8941 = vmatprep.subr.mxu1 %v9885_v39 }
 0x26f   : > { %8939 = vmatmul.mubr.f32.vlgmr.msra.gmra.mrb[4].mxu1 %v2781_v58 }
 0x270   : > { %8942 = vmatpush3.xpose.msra.mxu1 %v2793_v17  ;;  %8943 = vmatprep.mubr.msk.f32.mxu1 %vm9884_vm1, %v9885_v39 }
 0x271   : > { %8946 = vmatprep.subr.mxu1 %v9885_v39 }
 0x277   : > { %8944 = vmatmul.mubr.f32.vlgmr.msra.gmra.mrb[4].mxu1 %v2782_v0 }
 0x278   : > { %8947 = vmatpush3.xpose.msra.mxu1 %v2716_v12  ;;  %8948 = vmatprep.mubr.msk.f32.mxu1 %vm9884_vm1, %v9885_v39 }
 0x279   : > { %8951 = vmatprep.subr.mxu1 %v9885_v39 }
 0x27f   : > { %8949 = vmatmul.mubr.f32.vlgmr.msra.gmra.mrb[4].mxu1 %v2783_v16 }
 0x280   : > { %8952 = vmatpush3.xpose.msra.mxu1 %v2794_v19  ;;  %8953 = vmatprep.mubr.msk.f32.mxu1 %vm9884_vm1, %v9885_v39 }
 0x281   : > { %8956 = vmatprep.subr.mxu1 %v9885_v39 }
 0x287   : > { %8954 = vmatmul.mubr.f32.vlgmr.msra.gmra.mrb[4].mxu1 %v2781_v58 }
 0x288   : > { %8957 = vmatpush3.xpose.msra.mxu1 %v2716_v12  ;;  %8958 = vmatprep.mubr.msk.f32.mxu1 %vm9884_vm1, %v9885_v39 }
 0x289   : > { %8961 = vmatprep.subr.mxu1 %v9885_v39 }
 0x28f   : > { %8959 = vmatmul.mubr.f32.vlgmr.msra.gmra.mrb[4].mxu1 %v2781_v58  ;;  %v9891_v58 = vmov 2  }
 0x290   : > { %8963 = vmatprep.mubr.msk.f32.mxu1 %vm9884_vm1, %v9885_v39 }
 0x29a   : > { %v8921_v29 = vpop.f32.mrb[2].mxu0 }
 0x29b   : > { %v10489_v32 = vadd.f32 %v8921_v29, %v8365_v28  ;;  %v2662_v33 = vpop.f32.mrb[3].mxu0 }
 0x29c   : > { %v10492_v38 = vadd.f32 %v8365_v28, %v2662_v33 }
 0x29d   : > { %3174 = vperm.xlu1 %9846, %v10489_v32  }
 0x29e   : > { %v8924_v36 = vpop.f32.mrb[4].mxu0 }
 0x29f   : > { %v2674_v45 = vpop.f32.mrb[5].mxu0  ;;  %v10495_v21 = vadd.f32 %v8924_v36, %v8365_v28 }
 0x2a0   : > { %v10498_v43 = vadd.f32 %v8365_v28, %v2674_v45 }
 0x2a1   : > { %3171 = vperm.xlu1 %9846, %v10492_v38  }
 0x2a2   : > { %v8927_v49 = vpop.f32.mrb[6].mxu0 }
 0x2a3   : > { %v2686_v22 = vpop.f32.mrb[7].mxu0  ;;  %v10501_v57 = vadd.f32 %v8927_v49, %v8365_v28 }
 0x2a4   : > { %v10504_v59 = vadd.f32 %v8365_v28, %v2686_v22 }
 0x2a5   : > { %3180 = vperm.xlu1 %9846, %v10495_v21  }
 0x2a6   : > { %v8930_v37 = vpop.f32.mrb[8].mxu0 }
 0x2a7   : > { %v2698_v52 = vpop.f32.mrb[9].mxu0  ;;  %v10510_v62 = vadd.f32 %v8930_v37, %v8365_v28 }
 0x2a8   : > { %v10507_v60 = vadd.f32 %v8365_v28, %v2698_v52 }
 0x2a9   : > { %3177 = vperm.xlu1 %9846, %v10498_v43  }
 0x2ad   : > { %3186 = vperm.xlu1 %9846, %v10501_v57  }
 0x2b1   : > { %3183 = vperm.xlu1 %9846, %v10504_v59  }
 0x2b5   : > { %3189 = vperm.xlu1 %9846, %v10507_v60  }
 0x2b9   : > { %3192 = vperm.xlu1 %9846, %v10510_v62  }
 0x2bd   : > { %9847 = vset.pattern.permute.xlu1 %v9882_v4 }
 0x31c   : > { %v3175_v41 = vpop.permute.xlu1 %3174 }
 0x31d   : > { %v3203_v25 = vrot.slane %v3175_v41, %v10095_v46 }
 0x320   : > { %v3172_v15 = vpop.permute.xlu1 %3171 }
 0x321   : > { %v3199_v9 = vrot.slane %v3172_v15, %v10095_v46 }
 0x323   : > { %v3229_v42 = vsel %vm3228_vm4, %v3203_v25, %v3199_v9 }
 0x324   : > { %v3181_v61 = vpop.permute.xlu1 %3180 }
 0x325   : > { %v3211_v48 = vrot.slane %v3181_v61, %v10095_v46 }
 0x328   : > { %v3178_v5 = vpop.permute.xlu1 %3177 }
 0x329   : > { %v3207_v13 = vrot.slane %v3178_v5, %v10095_v46 }
 0x32b   : > { %v3231_v20 = vsel %vm3230_vm5, %v3207_v13, %v3229_v42 }
 0x32c   : > { %v3187_v6 = vpop.permute.xlu1 %3186  ;;  %v3233_v24 = vsel %vm3232_vm6, %v3211_v48, %v3231_v20 }
 0x32d   : > { %v3219_v30 = vrot.slane %v3187_v6, %v10095_v46 }
 0x330   : > { %v3184_v53 = vpop.permute.xlu1 %3183 }
 0x331   : > { %v3215_v4 = vrot.slane %v3184_v53, %v10095_v46 }
 0x333   : > { %v3235_v35 = vsel %vm3234_vm7, %v3215_v4, %v3233_v24 }
 0x334   : > { %v3190_v14 = vpop.permute.xlu1 %3189  ;;  %v3237_v44 = vsel %vm3236_vm8, %v3219_v30, %v3235_v35 }
 0x335   : > { %v3223_v8 = vrot.slane %v3190_v14, %v10095_v46 }
 0x337   : > { %v3239_v54 = vsel %vm3238_vm9, %v3223_v8, %v3237_v44 }
 0x338   : > { %v3193_v23 = vpop.permute.xlu1 %3192 }
 0x339   : > { %v3227_v50 = vrot.slane %v3193_v23, %v10095_v46 }
 0x33b   : > { %v3241_v1 = vsel %vm3240_vm10, %v3227_v50, %v3239_v54 }
 0x362   : > { %v3157_v51 = vpop.f32.mrb[4].mxu1 }
 0x363   : > { %v3161_v55 = vmul.f32 0.35355338, %v3157_v51  ;;  %v8960_v63 = vpop.f32.mrb[5].mxu1 }
 0x365   : > { %v3243_v3 = vadd.f32 %v3241_v1, %v3161_v55 }
 0x367   : > { %v3244_v26 = vsel %vm2708_vm3, %v3243_v3, -inf }
 0x368   : > { %3245 = vmax.xlane.f32.xlu1 %v3244_v26 }
 0x379   : > { %3255 = vrot.lane.b32.xlu1 %v10464_v7, %s9887_s24 }
 0x37d   : > { %3709 = vrot.lane.b32.xlu1 %v10464_v7, %s9888_s6 }
 0x381   : > { %4690 = vrot.lane.b32.xlu1 %v10457_v2, %s9889_s25 }
 0x385   : > { %5673 = vrot.lane.b32.xlu1 %v10457_v2, %s9890_s26 }
 0x389   : > { %4163 = vperm.xlu1 %9847, %v10492_v38  }
 0x38d   : > { %4169 = vperm.xlu1 %9847, %v10498_v43  }
 0x391   : > { %4172 = vperm.xlu1 %9847, %v10495_v21  }
 0x395   : > { %4178 = vperm.xlu1 %9847, %v10501_v57  }
 0x399   : > { %4184 = vperm.xlu1 %9847, %v10510_v62  }
 0x39d   : > { %9850 = vset.pattern.permute.xlu1 %v9891_v58 }
 0x39e   : > { %5149 = vperm.xlu1 %9850, %v10489_v32  }
 0x3a2   : > { %5152 = vperm.xlu1 %9850, %v10498_v43  }
 0x3a6   : > { %5158 = vperm.xlu1 %9850, %v10504_v59  }
 0x3aa   : > { %5164 = vperm.xlu1 %9850, %v10507_v60  }
 0x3f5   : > { %v3246_v0 = vpop.xlane.xlu1 %3245 }
 0x3f6   : > { %v3247_v31 = vsub.f32 %v3243_v3, %v3246_v0 }
 0x3f8   : > { %v3248_v16 = vmul.f32 1.442695, %v3247_v31 }
 0x3f9   : > { %v3256_v40 = vpop.permute.xlu1 %3255 }
 0x3fa   : > { %9854 = vpow2.f32 %v3248_v16  ;;  %v10543_v47 = vand.u32 4294901760, %v3256_v40 }
 0x3fc   : > { %8962 = vmatpush3.msra.mxu1 %v10543_v47  ;;  %v10574_v49 = vsub.f32 %v3256_v40, %v10543_v47 }
 0x3fd   : > { %8966 = vmatprep.subr.mxu1 %v9885_v39  ;;  %v10566_v12 = vpop.permute.xlu1 %3709 }
 0x3fe   : > { %v3713_v24 = vsel %vm2708_vm3, %v10566_v12, 0 }
 0x3ff   : > { %v10628_v50 = vand.u32 4294901760, %v3713_v24 }
 0x401   : > { %v4691_v17 = vpop.permute.xlu1 %4690  ;;  %v3793_v55 = vsub.f32 %v3713_v24, %v10628_v50 }
 0x402   : > { %v4694_v18 = vsel %vm2708_vm3, %v4691_v17, 0 }
 0x403   : > { %v10569_v19 = vand.u32 4294901760, %v4694_v18  ;;  %v3794_v26 = vand.u32 4294901760, %v3793_v55 }
 0x404   : > { %v9855_v56 = vpop.eup %9854 }
 0x405   : > { %v3250_v11 = vsel %vm2708_vm3, %v9855_v56, 0.0  ;;  %v4765_v10 = vsub.f32 %v4694_v18, %v10569_v19  ;;  %v5674_v9 = vpop.permute.xlu1 %5673  ;;  %v3795_v0 = vsub.f32 %v3793_v55, %v3794_v26 }
 0x406   : > { %3251 = vadd.xlane.f32.xlu0 %v3250_v11  ;;  %v5677_v14 = vsel %vm2708_vm3, %v5674_v9, 0 }
 0x407   : > { %v4766_v29 = vand.u32 4294901760, %v4765_v10  ;;  %v10605_v42 = vand.u32 4294901760, %v5677_v14  ;;  %v3796_v16 = vand.u32 4294901760, %v3795_v0 }
 0x409   : > { %v4767_v33 = vsub.f32 %v4765_v10, %v4766_v29  ;;  %v5748_v4 = vsub.f32 %v5677_v14, %v10605_v42 }
 0x40b   : > { %v4768_v37 = vand.u32 4294901760, %v4767_v33  ;;  %v5749_v35 = vand.u32 4294901760, %v5748_v4 }
 0x40d   : > { %v5750_v44 = vsub.f32 %v5748_v4, %v5749_v35 }
 0x40f   : > { %v5751_v63 = vand.u32 4294901760, %v5750_v44 }
 0x41c   : > { %3707 = vrot.lane.b32.xlu0 %v10457_v2, %s9888_s6  ;;  %v9892_v2 = vmov 3   ;;  %s9897_s6 = smov 16  }
 0x420   : > { %4692 = vrot.lane.b32.xlu0 %v10464_v7, %s9889_s25 }
 0x424   : > { %5675 = vrot.lane.b32.xlu0 %v10464_v7, %s9890_s26 }
 0x428   : > { %4166 = vperm.xlu0 %9848, %v10489_v32  }
 0x42c   : > { %4175 = vperm.xlu0 %9848, %v10504_v59  }
 0x430   : > { %4181 = vperm.xlu0 %9848, %v10507_v60  }
 0x434   : > { %9849 = vset.pattern.permute.xlu0 %v9891_v58 }
 0x435   : > { %5146 = vperm.xlu0 %9849, %v10492_v38  }
 0x439   : > { %5155 = vperm.xlu0 %9849, %v10495_v21  }
 0x43d   : > { %5161 = vperm.xlu0 %9849, %v10501_v57  }
 0x441   : > { %5167 = vperm.xlu0 %9849, %v10510_v62  }
 0x445   : > { %9851 = vset.pattern.permute.xlu0 %v9892_v2 }
 0x446   : > { %6129 = vperm.xlu0 %9851, %v10492_v38  }
 0x44a   : > { %6132 = vperm.xlu0 %9851, %v10489_v32  }
 0x44e   : > { %6135 = vperm.xlu0 %9851, %v10498_v43  }
 0x452   : > { %6138 = vperm.xlu0 %9851, %v10495_v21  }
 0x456   : > { %6141 = vperm.xlu0 %9851, %v10504_v59   ;;  %v3340_v59 = vand.u32 4294901760, %v10574_v49 }
 0x458   : > { %v3341_v61 = vsub.f32 %v10574_v49, %v3340_v59 }
 0x45a   : > { %6144 = vperm.xlu0 %9851, %v10501_v57   ;;  %v3342_v53 = vand.u32 4294901760, %v3341_v61 }
 0x45e   : > { %6147 = vperm.xlu0 %9851, %v10507_v60  }
 0x462   : > { %6150 = vperm.xlu0 %9851, %v10510_v62  }
 0x493   : > { %v3252_v27 = vpop.xlane.xlu0 %3251 }
 0x494   : > { %9856 = vrcp.f32 %v3252_v27 }
 0x497   : > { %v3708_v28 = vpop.permute.xlu0 %3707 }
 0x498   : > { %v3711_v23 = vsel %vm2708_vm3, %v3708_v28, 0 }
 0x499   : > { %v10625_v30 = vand.u32 4294901760, %v3711_v23 }
 0x49b   : > { %v4693_v32 = vpop.permute.xlu0 %4692  ;;  %v3782_v54 = vsub.f32 %v3711_v23, %v10625_v30 }
 0x49c   : > { %v4696_v36 = vsel %vm2708_vm3, %v4693_v32, 0 }
 0x49d   : > { %v4699_v38 = vand.u32 4294901760, %v4696_v36  ;;  %v3783_v3 = vand.u32 4294901760, %v3782_v54 }
 0x49e   : > { %v9857_v45 = vpop.eup %9856 }
 0x49f   : > { %v3254_v21 = vmul.f32 %v9857_v45, %v9855_v56  ;;  %v4776_v22 = vsub.f32 %v4696_v36, %v4699_v38  ;;  %9052 = vmatpush3.xpose.msra.mxu0 %v4699_v38  ;;  %v5676_v13 = vpop.permute.xlu0 %5675  ;;  %v3784_v58 = vsub.f32 %v3782_v54, %v3783_v3 }
 0x4a0   : > { %9056 = vmatprep.subr.mxu0 %v9885_v39  ;;  %v5679_v25 = vsel %vm2708_vm3, %v5676_v13, 0 }
 0x4a1   : > { %v4777_v43 = vand.u32 4294901760, %v4776_v22  ;;  %v3259_v52 = vsel %vm2708_vm3, %v3254_v21, 0  ;;  %v10608_v20 = vand.u32 4294901760, %v5679_v25  ;;  %v3785_v31 = vand.u32 4294901760, %v3784_v58 }
 0x4a2   : > { %9054 = vmatmul.mubr.f32.vlgmr.msra.gmra.mrb[10].mxu0 %v4768_v37  ;;  %v10578_v57 = vand.u32 4294901760, %v3259_v52 }
 0x4a3   : > { %v4778_v60 = vsub.f32 %v4776_v22, %v4777_v43  ;;  %9058 = vmatprep.mubr.msk.f32.mxu0 %vm9884_vm1, %v9885_v39  ;;  %v5759_v48 = vsub.f32 %v5679_v25, %v10608_v20 }
 0x4a4   : > { %v3328_v62 = vsub.f32 %v3259_v52, %v10578_v57 }
 0x4a5   : > { %v4779_v41 = vand.u32 4294901760, %v4778_v60  ;;  %v5760_v8 = vand.u32 4294901760, %v5759_v48 }
 0x4a6   : > { %v3329_v15 = vand.u32 4294901760, %v3328_v62 }
 0x4a7   : > { %9057 = vmatpush3.xpose.msra.mxu0 %v4779_v41  ;;  %v5761_v51 = vsub.f32 %v5759_v48, %v5760_v8  ;;  %v4167_v40 = vpop.permute.xlu0 %4166 }
 0x4a8   : > { %9061 = vmatprep.subr.mxu0 %v9885_v39  ;;  %v3330_v5 = vsub.f32 %v3328_v62, %v3329_v15  ;;  %v4193_v37 = vrot.slane %v4167_v40, %v10095_v46 }
 0x4a9   : > { %v5762_v1 = vand.u32 4294901760, %v5761_v51 }
 0x4aa   : > { %9059 = vmatmul.mubr.f32.vlgmr.msra.gmra.mrb[10].mxu0 %v10569_v19  ;;  %v3331_v6 = vand.u32 4294901760, %v3330_v5 }
 0x4ab   : > { %9062 = vmatpush3.xpose.msra.mxu0 %v4776_v22  ;;  %9063 = vmatprep.mubr.msk.f32.mxu0 %vm9884_vm1, %v9885_v39 }
 0x4ac   : > { %8964 = vmatmul.mubr.f32.vlgmr.msra.gmra.mrb[6].mxu1 %v3331_v6  ;;  %9066 = vmatprep.subr.mxu0 %v9885_v39 }
 0x4ad   : > { %8967 = vmatpush3.msra.mxu1 %v3342_v53  ;;  %8968 = vmatprep.mubr.msk.f32.mxu1 %vm9884_vm1, %v9885_v39 }
 0x4ae   : > { %8971 = vmatprep.subr.mxu1 %v9885_v39 }
 0x4b2   : > { %9064 = vmatmul.mubr.f32.vlgmr.msra.gmra.mrb[10].mxu0 %v4765_v10 }
 0x4b3   : > { %9067 = vmatpush3.xpose.msra.mxu0 %v4699_v38  ;;  %9068 = vmatprep.mubr.msk.f32.mxu0 %vm9884_vm1, %v9885_v39 }
 0x4b4   : > { %8969 = vmatmul.mubr.f32.vlgmr.msra.gmra.mrb[6].mxu1 %v10578_v57  ;;  %9071 = vmatprep.subr.mxu0 %v9885_v39 }
 0x4b5   : > { %8972 = vmatpush3.msra.mxu1 %v10574_v49  ;;  %8973 = vmatprep.mubr.msk.f32.mxu1 %vm9884_vm1, %v9885_v39 }
 0x4b6   : > { %8976 = vmatprep.subr.mxu1 %v9885_v39 }
 0x4ba   : > { %9069 = vmatmul.mubr.f32.vlgmr.msra.gmra.mrb[10].mxu0 %v4766_v29 }
 0x4bb   : > { %9072 = vmatpush3.xpose.msra.mxu0 %v4777_v43  ;;  %9073 = vmatprep.mubr.msk.f32.mxu0 %vm9884_vm1, %v9885_v39 }
 0x4bc   : > { %8974 = vmatmul.mubr.f32.vlgmr.msra.gmra.mrb[6].mxu1 %v3328_v62  ;;  %9076 = vmatprep.subr.mxu0 %v9885_v39 }
 0x4bd   : > { %8977 = vmatpush3.msra.mxu1 %v10543_v47  ;;  %8978 = vmatprep.mubr.msk.f32.mxu1 %vm9884_vm1, %v9885_v39 }
 0x4be   : > { %8981 = vmatprep.subr.mxu1 %v9885_v39 }
 0x4c2   : > { %9074 = vmatmul.mubr.f32.vlgmr.msra.gmra.mrb[10].mxu0 %v10569_v19 }
 0x4c3   : > { %9077 = vmatpush3.xpose.msra.mxu0 %v4699_v38  ;;  %9078 = vmatprep.mubr.msk.f32.mxu0 %vm9884_vm1, %v9885_v39 }
 0x4c4   : > { %8979 = vmatmul.mubr.f32.vlgmr.msra.gmra.mrb[6].mxu1 %v3329_v15  ;;  %9111 = vmatprep.subr.mxu0 %v9885_v39 }
 0x4c5   : > { %8982 = vmatpush3.msra.mxu1 %v3340_v59  ;;  %8983 = vmatprep.mubr.msk.f32.mxu1 %vm9884_vm1, %v9885_v39 }
 0x4c6   : > { %8986 = vmatprep.subr.mxu1 %v9885_v39 }
 0x4ca   : > { %9079 = vmatmul.mubr.f32.vlgmr.msra.gmra.mrb[10].mxu0 %v10569_v19  ;;  %v4164_v19 = vpop.permute.xlu1 %4163 }
 0x4cb   : > { %9112 = vmatpush3.xpose.msra.mxu0 %v10608_v20  ;;  %9113 = vmatprep.mubr.msk.f32.mxu0 %vm9884_vm1, %v9885_v39  ;;  %v4189_v52 = vrot.slane %v4164_v19, %v10095_v46 }
 0x4cc   : > { %8984 = vmatmul.mubr.f32.vlgmr.msra.gmra.mrb[6].mxu1 %v10578_v57  ;;  %9116 = vmatprep.subr.mxu0 %v9885_v39 }
 0x4cd   : > { %8987 = vmatpush3.msra.mxu1 %v10543_v47  ;;  %8988 = vmatprep.mubr.msk.f32.mxu1 %vm9884_vm1, %v9885_v39  ;;  %v4176_v47 = vpop.permute.xlu0 %4175  ;;  %v4218_v59 = vsel %vm3228_vm4, %v4193_v37, %v4189_v52 }
 0x4ce   : > { %9114 = vmatmul.mubr.f32.vlgmr.msra.gmra.mrb[12].mxu0 %v5751_v63  ;;  %8991 = vmatprep.subr.mxu1 %v9885_v39  ;;  %v4170_v10 = vpop.permute.xlu1 %4169  ;;  %v4205_v53 = vrot.slane %v4176_v47, %v10095_v46 }
 0x4cf   : > { %9117 = vmatpush3.xpose.msra.mxu0 %v5762_v1  ;;  %9118 = vmatprep.mubr.msk.f32.mxu0 %vm9884_vm1, %v9885_v39  ;;  %v4197_v60 = vrot.slane %v4170_v10, %v10095_v46 }
 0x4d0   : > { %9121 = vmatprep.subr.mxu0 %v9885_v39 }
 0x4d1   : > { %v4182_v56 = vpop.permute.xlu0 %4181  ;;  %v4219_v41 = vsel %vm3230_vm5, %v4197_v60, %v4218_v59 }
 0x4d2   : > { %v4173_v33 = vpop.permute.xlu1 %4172 }
 0x4d3   : > { %v4201_v61 = vrot.slane %v4173_v33, %v10095_v46 }
 0x4d4   : > { %8989 = vmatmul.mubr.f32.vlgmr.msra.gmra.mrb[6].mxu1 %v10578_v57 }
 0x4d5   : > { %8992 = vmatpush3.xpose.msra.mxu1 %v10628_v50  ;;  %8993 = vmatprep.mubr.msk.f32.mxu1 %vm9884_vm1, %v9885_v39  ;;  %v5147_v11 = vpop.permute.xlu0 %5146  ;;  %v4220_v14 = vsel %vm3232_vm6, %v4201_v61, %v4219_v41 }
 0x4d6   : > { %9119 = vmatmul.mubr.f32.vlgmr.msra.gmra.mrb[12].mxu0 %v10605_v42  ;;  %8996 = vmatprep.subr.mxu1 %v9885_v39  ;;  %v4179_v38 = vpop.permute.xlu1 %4178  ;;  %v5172_v62 = vrot.slane %v5147_v11, %v10095_v46 }
 0x4d7   : > { %9122 = vmatpush3.xpose.msra.mxu0 %v5759_v48  ;;  %9123 = vmatprep.mubr.msk.f32.mxu0 %vm9884_vm1, %v9885_v39  ;;  %v4213_v48 = vrot.slane %v4182_v56, %v10095_v46 }
 0x4d8   : > { %8994 = vmatmul.mubr.f32.vlgmr.msra.gmra.mrb[8].mxu1 %v3785_v31  ;;  %9126 = vmatprep.subr.mxu0 %v9885_v39 }
 0x4d9   : > { %8997 = vmatpush3.xpose.msra.mxu1 %v3796_v16  ;;  %8998 = vmatprep.mubr.msk.f32.mxu1 %vm9884_vm1, %v9885_v39  ;;  %v5156_v2 = vpop.permute.xlu0 %5155 }
 0x4da   : > { %9001 = vmatprep.subr.mxu1 %v9885_v39  ;;  %v4185_v49 = vpop.permute.xlu1 %4184 }
 0x4dd   : > { %v5162_v17 = vpop.permute.xlu0 %5161 }
 0x4de   : > { %9124 = vmatmul.mubr.f32.vlgmr.msra.gmra.mrb[12].mxu0 %v5748_v4  ;;  %v5150_v22 = vpop.permute.xlu1 %5149  ;;  %v4221_v4 = vsel %vm3234_vm7, %v4205_v53, %v4220_v14 }
 0x4df   : > { %9127 = vmatpush3.xpose.msra.mxu0 %v10608_v20  ;;  %9128 = vmatprep.mubr.msk.f32.mxu0 %vm9884_vm1, %v9885_v39  ;;  %v5176_v5 = vrot.slane %v5150_v22, %v10095_v46 }
 0x4e0   : > { %8999 = vmatmul.mubr.f32.vlgmr.msra.gmra.mrb[8].mxu1 %v10625_v30  ;;  %9131 = vmatprep.subr.mxu0 %v9885_v39 }
 0x4e1   : > { %9002 = vmatpush3.xpose.msra.mxu1 %v3793_v55  ;;  %9003 = vmatprep.mubr.msk.f32.mxu1 %vm9884_vm1, %v9885_v39  ;;  %v10691_v27 = vpop.permute.xlu0 %5167  ;;  %v5201_v25 = vsel %vm3228_vm4, %v5176_v5, %v5172_v62  ;;  %v4217_v55 = vrot.slane %v4185_v49, %v10095_v46 }
 0x4e2   : > { %9006 = vmatprep.subr.mxu1 %v9885_v39  ;;  %v5153_v57 = vpop.permute.xlu1 %5152  ;;  %v5200_v58 = vrot.slane %v10691_v27, %v10095_v46 }
 0x4e5   : > { %v6130_v32 = vpop.permute.xlu0 %6129 }
 0x4e6   : > { %9129 = vmatmul.mubr.f32.vlgmr.msra.gmra.mrb[12].mxu0 %v5749_v35  ;;  %v5159_v13 = vpop.permute.xlu1 %5158  ;;  %v4209_v35 = vrot.slane %v4179_v38, %v10095_v46  ;;  %v6155_v0 = vrot.slane %v6130_v32, %v10095_v46 }
 0x4e7   : > { %9132 = vmatpush3.xpose.msra.mxu0 %v5760_v8  ;;  %9133 = vmatprep.mubr.msk.f32.mxu0 %vm9884_vm1, %v9885_v39 }
 0x4e8   : > { %9004 = vmatmul.mubr.f32.vlgmr.msra.gmra.mrb[8].mxu1 %v3782_v54  ;;  %9136 = vmatprep.subr.mxu0 %v9885_v39  ;;  %v4222_v51 = vsel %vm3236_vm8, %v4209_v35, %v4221_v4 }
 0x4e9   : > { %9007 = vmatpush3.xpose.msra.mxu1 %v10628_v50  ;;  %9008 = vmatprep.mubr.msk.f32.mxu1 %vm9884_vm1, %v9885_v39  ;;  %v6133_v36 = vpop.permute.xlu0 %6132  ;;  %v4223_v63 = vsel %vm3238_vm9, %v4213_v48, %v4222_v51 }
 0x4ea   : > { %9011 = vmatprep.subr.mxu1 %v9885_v39  ;;  %v5165_v44 = vpop.permute.xlu1 %5164  ;;  %v6159_v54 = vrot.slane %v6133_v36, %v10095_v46  ;;  %v4224_v10 = vsel %vm3240_vm10, %v4217_v55, %v4223_v63 }
 0x4eb   : > { %v5196_v40 = vrot.slane %v5165_v44, %v10095_v46 }
 0x4ed   : > { %v6136_v45 = vpop.permute.xlu0 %6135 }
 0x4ee   : > { %9134 = vmatmul.mubr.f32.vlgmr.msra.gmra.mrb[12].mxu0 %v10605_v42 }
 0x4ef   : > { %9137 = vmatpush3.xpose.msra.mxu0 %v10608_v20  ;;  %9138 = vmatprep.mubr.msk.f32.mxu0 %vm9884_vm1, %v9885_v39  ;;  %v5180_v20 = vrot.slane %v5153_v57, %v10095_v46 }
 0x4f0   : > { %9009 = vmatmul.mubr.f32.vlgmr.msra.gmra.mrb[8].mxu1 %v3783_v3  ;;  %9513 = vmatprep.subr.bf16.mxu0 %v9883_v34  ;;  %v6163_v3 = vrot.slane %v6136_v45, %v10095_v46 }
 0x4f1   : > { %9012 = vmatpush3.xpose.msra.mxu1 %v3794_v26  ;;  %9013 = vmatprep.mubr.msk.f32.mxu1 %vm9884_vm1, %v9885_v39  ;;  %v6139_v21 = vpop.permute.xlu0 %6138  ;;  %v5202_v23 = vsel %vm3230_vm5, %v5180_v20, %v5201_v25 }
 0x4f2   : > { %9016 = vmatprep.subr.mxu1 %v9885_v39  ;;  %v6167_v31 = vrot.slane %v6139_v21, %v10095_v46 }
 0x4f5   : > { %v6142_v43 = vpop.permute.xlu0 %6141 }
 0x4f6   : > { %9139 = vmatmul.mubr.f32.vlgmr.msra.gmra.mrb[12].mxu0 %v10605_v42  ;;  %v5184_v42 = vrot.slane %v5156_v2, %v10095_v46  ;;  %v6171_v47 = vrot.slane %v6142_v43, %v10095_v46 }
 0x4f7   : > { %9179 = vmatprep.mubr.msk.f32.mxu0 %vm9884_vm1, %v9885_v39 }
 0x4f8   : > { %9014 = vmatmul.mubr.f32.vlgmr.msra.gmra.mrb[8].mxu1 %v10625_v30  ;;  %v5203_v8 = vsel %vm3232_vm6, %v5184_v42, %v5202_v23 }
 0x4f9   : > { %9017 = vmatpush3.xpose.msra.mxu1 %v10628_v50  ;;  %9018 = vmatprep.mubr.msk.f32.mxu1 %vm9884_vm1, %v9885_v39  ;;  %v6145_v15 = vpop.permute.xlu0 %6144  ;;  %v5188_v50 = vrot.slane %v5159_v13, %v10095_v46 }
 0x4fa   : > { %9021 = vmatprep.subr.mxu1 %v9885_v39  ;;  %v6175_v19 = vrot.slane %v6145_v15, %v10095_v46 }
 0x4fb   : > { %v5204_v1 = vsel %vm3234_vm7, %v5188_v50, %v5203_v8 }
 0x4fd   : > { %v6148_v24 = vpop.permute.xlu0 %6147 }
 0x500   : > { %9019 = vmatmul.mubr.f32.vlgmr.msra.gmra.mrb[8].mxu1 %v10625_v30  ;;  %v5192_v30 = vrot.slane %v5162_v17, %v10095_v46 }
 0x501   : > { %9023 = vmatprep.mubr.msk.f32.mxu1 %vm9884_vm1, %v9885_v39  ;;  %v6151_v56 = vpop.permute.xlu0 %6150 }
 0x502   : > { %v5205_v26 = vsel %vm3236_vm8, %v5192_v30, %v5204_v1  ;;  %v6183_v38 = vrot.slane %v6151_v56, %v10095_v46 }
 0x503   : > { %v5206_v33 = vsel %vm3238_vm9, %v5196_v40, %v5205_v26 }
 0x59d   : > { %v5140_v12 = vpop.f32.mrb[10].mxu0 }
 0x59e   : > { %v9080_v18 = vpop.f32.mrb[11].mxu0  ;;  %v5144_v11 = vmul.f32 0.35355338, %v5140_v12  ;;  %v5207_v12 = vsel %vm3240_vm10, %v5200_v58, %v5206_v33 }
 0x59f   : > { %v6184_v18 = vsel %vm3228_vm4, %v6159_v54, %v6155_v0 }
 0x5a0   : > { %v6185_v27 = vsel %vm3230_vm5, %v6163_v3, %v6184_v18  ;;  %v5209_v22 = vadd.f32 %v5207_v12, %v5144_v11 }
 0x5a1   : > { %v6186_v36 = vsel %vm3232_vm6, %v6167_v31, %v6185_v27 }
 0x5a2   : > { %v6187_v45 = vsel %vm3234_vm7, %v6171_v47, %v6186_v36  ;;  %v5210_v57 = vsel %vm2708_vm3, %v5209_v22, -inf }
 0x5a3   : > { %v6188_v37 = vsel %vm3236_vm8, %v6175_v19, %v6187_v45 }
 0x5a7   : > { %v10693_v28 = vpop.f32.mrb[6].mxu1 }
 0x5a8   : > { %v8990_v29 = vpop.f32.mrb[7].mxu1 }
 0x5a9   : > { %v6179_v29 = vrot.slane %v6148_v24, %v10095_v46 }
 0x5ab   : > { %v6189_v43 = vsel %vm3238_vm9, %v6179_v29, %v6188_v37 }
 0x5ac   : > { %v6190_v52 = vsel %vm3240_vm10, %v6183_v38, %v6189_v43 }
 0x5c9   : > { %v6123_v6 = vpop.f32.mrb[12].mxu0 }
 0x5ca   : > { %v9140_v9 = vpop.f32.mrb[13].mxu0  ;;  %v6127_v49 = vmul.f32 0.35355338, %v6123_v6 }
 0x5cc   : > { %v6192_v59 = vadd.f32 %v6190_v52, %v6127_v49 }
 0x5ce   : > { %v6193_v46 = vsel %vm2708_vm3, %v6192_v59, -inf }
 0x5d3   : > { %v4157_v16 = vpop.f32.mrb[8].mxu1 }
 0x5d4   : > { %v4161_v2 = vmul.f32 0.35355338, %v4157_v16  ;;  %v9020_v17 = vpop.f32.mrb[9].mxu1 }
 0x5d6   : > { %v4226_v32 = vadd.f32 %v4224_v10, %v4161_v2 }
 0x5d8   : > { %v4227_v21 = vsel %vm2708_vm3, %v4226_v32, -inf }
 0x5d9   : > { %4228 = vmax.xlane.f32.xlu1 %v4227_v21 }
 0x5dd   : > { %5211 = vmax.xlane.f32.xlu1 %v5210_v57 }
 0x5e1   : > { %6194 = vmax.xlane.f32.xlu1 %v6193_v46 }
 0x5f2   : > { %4238 = vrot.lane.b32.xlu1 %v10464_v7, %s9893_s2 }
 0x666   : > { %v4229_v60 = vpop.xlane.xlu1 %4228 }
 0x667   : > { %v4230_v62 = vsub.f32 %v4226_v32, %v4229_v60 }
 0x669   : > { %v4231_v41 = vmul.f32 1.442695, %v4230_v62  ;;  %v6672_v62 = vld [vmem:[%s11067_s14] sm:$0xff] }
 0x66a   : > { %v5212_v15 = vpop.xlane.xlu1 %5211 }
 0x66b   : > { %9858 = vpow2.f32 %v4231_v41  ;;  %v5213_v61 = vsub.f32 %v5209_v22, %v5212_v15  ;;  %v6673_v41 = vld [vmem:[%s11067_s14 + $0x8] sm:$0xff]  ;;  %v6680_v15 = vand.u32 4294901760, %v6672_v62 }
 0x66d   : > { %v5214_v5 = vmul.f32 1.442695, %v5213_v61  ;;  %v6683_v61 = vand.u32 4294901760, %v6673_v41 }
 0x66e   : > { %v6195_v6 = vpop.xlane.xlu1 %6194 }
 0x66f   : > { %9860 = vpow2.f32 %v5214_v5  ;;  %v6196_v20 = vsub.f32 %v6192_v59, %v6195_v6  ;;  %v10817_v5 = vsub.f32 %v6672_v62, %v6680_v15  ;;  %v10819_v6 = vsub.f32 %v6673_v41, %v6683_v61 }
 0x671   : > { %v6197_v4 = vmul.f32 1.442695, %v6196_v20 }
 0x672   : > { %v4239_v53 = vpop.permute.xlu1 %4238 }
 0x673   : > { %v4245_v9 = vand.u32 4294901760, %v4239_v53  ;;  %9862 = vpow2.f32 %v6197_v4 }
 0x675   : > { %v9859_v13 = vpop.eup %9858  ;;  %9022 = vmatpush3.msra.mxu1 %v4245_v9  ;;  %v4322_v8 = vsub.f32 %v4239_v53, %v4245_v9  ;;  %v6761_v53 = vand.u32 4294901760, %v10817_v5 }
 0x676   : > { %v4233_v14 = vsel %vm2708_vm3, %v9859_v13, 0.0  ;;  %9026 = vmatprep.subr.mxu1 %v9885_v39 }
 0x677   : > { %4234 = vadd.xlane.f32.xlu0 %v4233_v14  ;;  %v4323_v51 = vand.u32 4294901760, %v4322_v8 }
 0x679   : > { %v9861_v25 = vpop.eup %9860  ;;  %v4324_v55 = vsub.f32 %v4322_v8, %v4323_v51 }
 0x67a   : > { %v5216_v42 = vsel %vm2708_vm3, %v9861_v25, 0.0 }
 0x67b   : > { %5217 = vadd.xlane.f32.xlu1 %v5216_v42  ;;  %v4325_v3 = vand.u32 4294901760, %v4324_v55 }
 0x67d   : > { %v10750_v48 = vpop.eup %9862 }
 0x67e   : > { %v6199_v23 = vsel %vm2708_vm3, %v10750_v48, 0.0 }
 0x68c   : > { %6204 = vrot.lane.b32.xlu1 %v10464_v7, %s9894_s27 }
 0x68d   : > { %5221 = vrot.lane.b32.xlu0 %v10464_v7, %s9895_s28  ;;  %s9898_s28 = smov 24  }
 0x6ac   : > { %6200 = vadd.xlane.f32.xlu0 %v6199_v23  ;;  %v6674_v23 = vld [vmem:[%s11067_s14 + $0x10] sm:$0xff] }
 0x704   : > { %v4235_v24 = vpop.xlane.xlu0 %4234 }
 0x705   : > { %9864 = vrcp.f32 %v4235_v24  ;;  %v6675_v24 = vld [vmem:[%s11067_s14 + $0x18] sm:$0xff] }
 0x708   : > { %v5218_v26 = vpop.xlane.xlu1 %5217  ;;  %v5222_v16 = vpop.permute.xlu0 %5221 }
 0x709   : > { %9866 = vrcp.f32 %v5218_v26  ;;  %v5228_v47 = vand.u32 4294901760, %v5222_v16 }
 0x70b   : > { %v5305_v11 = vsub.f32 %v5222_v16, %v5228_v47 }
 0x70c   : > { %v6205_v38 = vpop.permute.xlu1 %6204 }
 0x70d   : > { %v5306_v17 = vand.u32 4294901760, %v5305_v11  ;;  %v6211_v45 = vand.u32 4294901760, %v6205_v38 }
 0x70f   : > { %v9865_v35 = vpop.eup %9864  ;;  %v5307_v19 = vsub.f32 %v5305_v11, %v5306_v17  ;;  %v6288_v21 = vsub.f32 %v6205_v38, %v6211_v45 }
 0x710   : > { %v4237_v30 = vmul.f32 %v9865_v35, %v9859_v13  ;;  %v6762_v13 = vsub.f32 %v10817_v5, %v6761_v53  ;;  %v6686_v35 = vand.u32 4294901760, %v6674_v23 }
 0x711   : > { %v5308_v27 = vand.u32 4294901760, %v5307_v19  ;;  %v6289_v37 = vand.u32 4294901760, %v6288_v21 }
 0x712   : > { %v4242_v50 = vsel %vm2708_vm3, %v4237_v30, 0  ;;  %v6774_v30 = vsub.f32 %v6674_v23, %v6686_v35  ;;  %v7204_v23 = vld [vmem:[%s11071_s18 + $0x10] sm:$0xff] }
 0x713   : > { %v4310_v44 = vand.u32 4294901760, %v4242_v50  ;;  %v9867_v58 = vpop.eup %9866  ;;  %v6290_v52 = vsub.f32 %v6288_v21, %v6289_v37 }
 0x714   : > { %v5220_v0 = vmul.f32 %v9867_v58, %v9861_v25  ;;  %v6763_v25 = vand.u32 4294901760, %v6762_v13  ;;  %v9526_v58 = vpack.c.bf16 %v10819_v6, %v10817_v5  ;;  %v9872_v5 = vld [vmem:[%s10028_s23] sm:$0xff] }
 0x715   : > { %v4311_v54 = vsub.f32 %v4242_v50, %v4310_v44  ;;  %v6291_v59 = vand.u32 4294901760, %v6290_v52 }
 0x716   : > { %v5225_v31 = vsel %vm2708_vm3, %v5220_v0, 0 }
 0x717   : > { %v4312_v7 = vand.u32 4294901760, %v4311_v54  ;;  %v5293_v40 = vand.u32 4294901760, %v5225_v31 }
 0x719   : > { %v4313_v63 = vsub.f32 %v4311_v54, %v4312_v7  ;;  %v5294_v56 = vsub.f32 %v5225_v31, %v5293_v40 }
 0x71b   : > { %v4314_v1 = vand.u32 4294901760, %v4313_v63  ;;  %v5295_v2 = vand.u32 4294901760, %v5294_v56 }
 0x71d   : > { %9024 = vmatmul.mubr.f32.vlgmr.msra.gmra.mrb[10].mxu1 %v4314_v1  ;;  %v5296_v18 = vsub.f32 %v5294_v56, %v5295_v2 }
 0x71e   : > { %9027 = vmatpush3.msra.mxu1 %v4325_v3  ;;  %9028 = vmatprep.mubr.msk.f32.mxu1 %vm9884_vm1, %v9885_v39  ;;  %v9514_v3 = vpack.c.bf16 %v6683_v61, %v6680_v15  ;;  %v8366_v61 = vld [vmem:[%s11068_s15] ss:$0 sm:$0xff] }
 0x71f   : > { %9031 = vmatprep.subr.mxu1 %v9885_v39  ;;  %v5297_v10 = vand.u32 4294901760, %v5296_v18 }
 0x720   : > { %9515 = vmatpush3.bf16.msra.mxu0 %v9514_v3 }
 0x721   : > { %9516 = vmatprep.subr.bf16.mxu0 %v9883_v34 }
 0x725   : > { %9029 = vmatmul.mubr.f32.vlgmr.msra.gmra.mrb[10].mxu1 %v4310_v44 }
 0x726   : > { %9032 = vmatpush3.msra.mxu1 %v4322_v8  ;;  %9033 = vmatprep.mubr.msk.f32.mxu1 %vm9884_vm1, %v9885_v39  ;;  %v6689_v8 = vand.u32 4294901760, %v6675_v24 }
 0x727   : > { %9036 = vmatprep.subr.mxu1 %v9885_v39 }
 0x728   : > { %v6781_v50 = vsub.f32 %v6675_v24, %v6689_v8  ;;  %v9517_v26 = vpack.c.bf16 %v6689_v8, %v6686_v35  ;;  %v7205_v8 = vld [vmem:[%s11071_s18 + $0x18] sm:$0xff] }
 0x72a   : > { %9518 = vmatpush3.bf16.msra.mxu0 %v9517_v26  ;;  %v9529_v16 = vpack.c.bf16 %v6781_v50, %v6774_v30 }
 0x72b   : > { %9525 = vmatprep.subr.bf16.mxu0 %v9883_v34 }
 0x72d   : > { %9034 = vmatmul.mubr.f32.vlgmr.msra.gmra.mrb[10].mxu1 %v4311_v54 }
 0x72e   : > { %9037 = vmatpush3.msra.mxu1 %v4245_v9  ;;  %9038 = vmatprep.mubr.msk.f32.mxu1 %vm9884_vm1, %v9885_v39 }
 0x72f   : > { %9041 = vmatprep.subr.mxu1 %v9885_v39 }
 0x735   : > { %9039 = vmatmul.mubr.f32.vlgmr.msra.gmra.mrb[10].mxu1 %v4312_v7 }
 0x736   : > { %9042 = vmatpush3.msra.mxu1 %v4323_v51  ;;  %9043 = vmatprep.mubr.msk.f32.mxu1 %vm9884_vm1, %v9885_v39  ;;  %v6782_v51 = vand.u32 4294901760, %v6781_v50 }
 0x737   : > { %9046 = vmatprep.subr.mxu1 %v9885_v39 }
 0x738   : > { %v6783_v7 = vsub.f32 %v6781_v50, %v6782_v51  ;;  %v7226_v50 = vand.u32 4294901760, %v7205_v8 }
 0x739   : > { %v6201_v29 = vpop.xlane.xlu0 %6200 }
 0x73a   : > { %9868 = vrcp.f32 %v6201_v29  ;;  %v6784_v63 = vand.u32 4294901760, %v6783_v7 }
 0x73d   : > { %9044 = vmatmul.mubr.f32.vlgmr.msra.gmra.mrb[10].mxu1 %v4310_v44 }
 0x73e   : > { %9047 = vmatpush3.msra.mxu1 %v4245_v9  ;;  %9048 = vmatprep.mubr.msk.f32.mxu1 %vm9884_vm1, %v9885_v39  ;;  %v6768_v9 = vand.u32 4294901760, %v10819_v6 }
 0x73f   : > { %9081 = vmatprep.subr.mxu1 %v9885_v39 }
 0x740   : > { %v6769_v14 = vsub.f32 %v10819_v6, %v6768_v9 }
 0x742   : > { %v6770_v42 = vand.u32 4294901760, %v6769_v14 }
 0x744   : > { %v9869_v32 = vpop.eup %9868  ;;  %v9520_v20 = vpack.c.bf16 %v6770_v42, %v6763_v25 }
 0x745   : > { %9049 = vmatmul.mubr.f32.vlgmr.msra.gmra.mrb[10].mxu1 %v4310_v44  ;;  %v6203_v33 = vmul.f32 %v9869_v32, %v10750_v48  ;;  %v6775_v44 = vand.u32 4294901760, %v6774_v30 }
 0x746   : > { %9082 = vmatpush3.msra.mxu1 %v5228_v47  ;;  %9083 = vmatprep.mubr.msk.f32.mxu1 %vm9884_vm1, %v9885_v39 }
 0x747   : > { %9086 = vmatprep.subr.mxu1 %v9885_v39  ;;  %v6208_v36 = vsel %vm2708_vm3, %v6203_v33, 0  ;;  %v6776_v54 = vsub.f32 %v6774_v30, %v6775_v44  ;;  %v7223_v30 = vand.u32 4294901760, %v7204_v23 }
 0x748   : > { %v6276_v12 = vand.u32 4294901760, %v6208_v36 }
 0x749   : > { %9084 = vmatmul.mubr.f32.vlgmr.msra.gmra.mrb[12].mxu1 %v5297_v10  ;;  %v6777_v55 = vand.u32 4294901760, %v6776_v54  ;;  %v7311_v7 = vsub.f32 %v7204_v23, %v7223_v30 }
 0x74a   : > { %9087 = vmatpush3.msra.mxu1 %v5308_v27  ;;  %9088 = vmatprep.mubr.msk.f32.mxu1 %vm9884_vm1, %v9885_v39  ;;  %v6277_v49 = vsub.f32 %v6208_v36, %v6276_v12 }
 0x74b   : > { %9091 = vmatprep.subr.mxu1 %v9885_v39  ;;  %v9523_v1 = vpack.c.bf16 %v6784_v63, %v6777_v55  ;;  %v7318_v55 = vsub.f32 %v7205_v8, %v7226_v50  ;;  %v10886_v63 = vpack.c.bf16 %v7226_v50, %v7223_v30 }
 0x74c   : > { %v6278_v22 = vand.u32 4294901760, %v6277_v49 }
 0x74e   : > { %v6279_v43 = vsub.f32 %v6277_v49, %v6278_v22 }
 0x750   : > { %v6280_v57 = vand.u32 4294901760, %v6279_v43 }
 0x751   : > { %9089 = vmatmul.mubr.f32.vlgmr.msra.gmra.mrb[12].mxu1 %v5293_v40 }
 0x752   : > { %9092 = vmatpush3.msra.mxu1 %v5305_v11  ;;  %9093 = vmatprep.mubr.msk.f32.mxu1 %vm9884_vm1, %v9885_v39 }
 0x753   : > { %9096 = vmatprep.subr.mxu1 %v9885_v39 }
 0x759   : > { %9094 = vmatmul.mubr.f32.vlgmr.msra.gmra.mrb[12].mxu1 %v5294_v56 }
 0x75a   : > { %9097 = vmatpush3.msra.mxu1 %v5228_v47  ;;  %9098 = vmatprep.mubr.msk.f32.mxu1 %vm9884_vm1, %v9885_v39 }
 0x75b   : > { %9101 = vmatprep.subr.mxu1 %v9885_v39 }
 0x761   : > { %9099 = vmatmul.mubr.f32.vlgmr.msra.gmra.mrb[12].mxu1 %v5295_v2 }
 0x762   : > { %9102 = vmatpush3.msra.mxu1 %v5306_v17  ;;  %9103 = vmatprep.mubr.msk.f32.mxu1 %vm9884_vm1, %v9885_v39 }
 0x763   : > { %9106 = vmatprep.subr.mxu1 %v9885_v39 }
 0x769   : > { %9104 = vmatmul.mubr.f32.vlgmr.msra.gmra.mrb[12].mxu1 %v5293_v40 }
 0x76a   : > { %9107 = vmatpush3.msra.mxu1 %v5228_v47  ;;  %9108 = vmatprep.mubr.msk.f32.mxu1 %vm9884_vm1, %v9885_v39  ;;  %v9541_v47 = vpack.c.bf16 %v6782_v51, %v6775_v44 }
 0x76b   : > { %9141 = vmatprep.subr.mxu1 %v9885_v39 }
 0x771   : > { %9109 = vmatmul.mubr.f32.vlgmr.msra.gmra.mrb[12].mxu1 %v5293_v40  ;;  %v9538_v40 = vpack.c.bf16 %v6768_v9, %v6761_v53 }
 0x772   : > { %9142 = vmatpush3.msra.mxu1 %v6211_v45  ;;  %9143 = vmatprep.mubr.msk.f32.mxu1 %vm9884_vm1, %v9885_v39 }
 0x773   : > { %9146 = vmatprep.subr.mxu1 %v9885_v39 }
 0x775   : > { %9144 = vmatmul.mubr.f32.vlgmr.msra.gmra.mrb[14].mxu1 %v6280_v57 }
 0x776   : > { %9147 = vmatpush3.msra.mxu1 %v6291_v59  ;;  %9148 = vmatprep.mubr.msk.f32.mxu1 %vm9884_vm1, %v9885_v39 }
 0x777   : > { %9151 = vmatprep.subr.mxu1 %v9885_v39 }
 0x77d   : > { %9149 = vmatmul.mubr.f32.vlgmr.msra.gmra.mrb[14].mxu1 %v6276_v12 }
 0x77e   : > { %9152 = vmatpush3.msra.mxu1 %v6288_v21  ;;  %9153 = vmatprep.mubr.msk.f32.mxu1 %vm9884_vm1, %v9885_v39 }
 0x77f   : > { %9156 = vmatprep.subr.mxu1 %v9885_v39 }
 0x785   : > { %9154 = vmatmul.mubr.f32.vlgmr.msra.gmra.mrb[14].mxu1 %v6277_v49 }
 0x786   : > { %9157 = vmatpush3.msra.mxu1 %v6211_v45  ;;  %9158 = vmatprep.mubr.msk.f32.mxu1 %vm9884_vm1, %v9885_v39 }
 0x787   : > { %9161 = vmatprep.subr.mxu1 %v9885_v39 }
 0x78d   : > { %9159 = vmatmul.mubr.f32.vlgmr.msra.gmra.mrb[14].mxu1 %v6278_v22 }
 0x78e   : > { %9162 = vmatpush3.msra.mxu1 %v6289_v37  ;;  %9163 = vmatprep.mubr.msk.f32.mxu1 %vm9884_vm1, %v9885_v39 }
 0x78f   : > { %9166 = vmatprep.subr.mxu1 %v9885_v39 }
 0x795   : > { %9164 = vmatmul.mubr.f32.vlgmr.msra.gmra.mrb[14].mxu1 %v6276_v12 }
 0x796   : > { %9167 = vmatpush3.msra.mxu1 %v6211_v45  ;;  %9168 = vmatprep.mubr.msk.f32.mxu1 %vm9884_vm1, %v9885_v39 }
 0x797   : > { %9519 = vmatprep.subr.bf16.mxu1 %v9883_v34 }
 0x79d   : > { %9169 = vmatmul.mubr.f32.vlgmr.msra.gmra.mrb[14].mxu1 %v6276_v12 }
 0x79e   : > { %9190 = vmatprep.mubr.msk.f32.mxu1 %vm9884_vm1, %v9885_v39  ;;  %9521 = vmatpush3.bf16.msra.mxu1 %v9520_v20 }
 0x79f   : > { %9522 = vmatprep.subr.bf16.mxu1 %v9883_v34 }
 0x7a2   : > { %9524 = vmatpush3.bf16.msra.mxu1 %v9523_v1 }
 0x7a3   : > { %9531 = vmatprep.subr.bf16.mxu1 %v9883_v34 }
 0x818   : > { %v4686_v46 = vpop.f32.mrb[10].mxu1 }
 0x819   : > { %6657 = vrot.lane.b32.xlu1 %v4686_v46, %s9896_s30  ;;  %v9050_v60 = vpop.f32.mrb[11].mxu1  ;;  %s729_s30 = scalar_lea.vmem %s11075_s22, %s10022_s29 }
 0x844   : > { %v5669_v4 = vpop.f32.mrb[12].mxu1 }
 0x845   : > { %6661 = vrot.lane.b32.xlu1 %v5669_v4, %s9897_s6  ;;  %v9110_v48 = vpop.f32.mrb[13].mxu1  ;;  %v7202_v4 = vld [vmem:[%s11071_s18] sm:$0xff] }
 0x846   : > { %v7203_v48 = vld [vmem:[%s11071_s18 + $0x8] sm:$0xff]  ;;  %v7217_v24 = vand.u32 4294901760, %v7202_v4 }
 0x847   : > { %v7220_v35 = vand.u32 4294901760, %v7203_v48 }
 0x848   : > { %v7297_v51 = vsub.f32 %v7202_v4, %v7217_v24 }
 0x849   : > { %v10883_v44 = vpack.c.bf16 %v7220_v35, %v7217_v24  ;;  %v7304_v54 = vsub.f32 %v7203_v48, %v7220_v35  ;;  %v7708_v24 = vld [vmem:[%s11073_s20 + $0x30] sm:$0xff]  ;;  %v7709_v35 = vld [vmem:[%s11073_s20 + $0x38] sm:$0xff] }
 0x84a   : > { %v7298_v1 = vand.u32 4294901760, %v7297_v51  ;;  %v7740_v8 = vand.u32 4294901760, %v7708_v24  ;;  %v7743_v30 = vand.u32 4294901760, %v7709_v35 }
 0x84c   : > { %v10970_v50 = vpack.c.bf16 %v7743_v30, %v7740_v8 }
 0x870   : > { %v6652_v0 = vpop.f32.mrb[14].mxu1 }
 0x871   : > { %6665 = vrot.lane.b32.xlu1 %v6652_v0, %s9898_s28  ;;  %v9170_v31 = vpop.f32.mrb[15].mxu1 }
 0x88b   : > { %v6658_v56 = vpop.permute.xlu1 %6657 }
 0x88c   : > { %v6668_v2 = vsel %vm2708_vm3, %v10693_v28, %v6658_v56 }
 0x8b7   : > { %v6662_v11 = vpop.permute.xlu1 %6661 }
 0x8b8   : > { %v6669_v17 = vsel %vm1923_vm2, %v6668_v2, %v6662_v11 }
 0x8e3   : > { %v6666_v18 = vpop.permute.xlu1 %6665 }
 0x8e4   : > { %v6671_v19 = vsel %vm6670_vm11, %v6669_v17, %v6666_v18 }
 0x8e5   : > { %v6677_v10 = vsel %vm733_vm0, %v6671_v19, 0  ;;  %v9562_v19 = vpack.c.bf16 %v7304_v54, %v7297_v51 }
 0x8e6   : > { %v6748_v27 = vand.u32 4294901760, %v6677_v10 }
 0x8e8   : > { %v6749_v29 = vsub.f32 %v6677_v10, %v6748_v27  ;;  %9191 = vmatmul.mubr.f32.vlgmr.msra.gmra.mrb[16].mxu1 %v6748_v27  ;;  %v9565_v10 = vpack.c.bf16 %v7318_v55, %v7311_v7 }
 0x8e9   : > { %9533 = vmatpush3.bf16.msra.mxu1 %v9514_v3  ;;  %9212 = vmatprep.mubr.msk.f32.mxu1 %vm9884_vm1, %v9885_v39 }
 0x8ea   : > { %9534 = vmatprep.subr.bf16.mxu1 %v9883_v34  ;;  %v6750_v32 = vand.u32 4294901760, %v6749_v29 }
 0x8ec   : > { %v6751_v33 = vsub.f32 %v6749_v29, %v6750_v32 }
 0x8ed   : > { %9536 = vmatpush3.bf16.msra.mxu1 %v9517_v26 }
 0x8ee   : > { %9543 = vmatprep.subr.bf16.mxu1 %v9883_v34  ;;  %v6752_v28 = vand.u32 4294901760, %v6751_v33  ;;  %v7703_v33 = vld [vmem:[%s11073_s20 + $0x8] sm:$0xff] }
 0x8f0   : > { %9213 = vmatmul.mubr.f32.vlgmr.msra.gmra.mrb[18].mxu1 %v6750_v32  ;;  %9180 = vmatmul.mubr.f32.vlgmr.msra.gmra.mrb[14].mxu0 %v6752_v28  ;;  %v7702_v32 = vld [vmem:[%s11073_s20] sm:$0xff] }
 0x8f1   : > { %9527 = vmatpush3.bf16.msra.mxu0 %v9526_v58  ;;  %9545 = vmatpush3.bf16.msra.mxu1 %v9514_v3  ;;  %v7305_v3 = vand.u32 4294901760, %v7304_v54  ;;  %v7722_v28 = vand.u32 4294901760, %v7702_v32 }
 0x8f2   : > { %9528 = vmatprep.subr.bf16.mxu0 %v9883_v34  ;;  %9546 = vmatprep.subr.bf16.mxu1 %v9883_v34 }
 0x8f3   : > { %9201 = vmatprep.mubr.msk.f32.mxu0 %vm9884_vm1, %v9885_v39  ;;  %9234 = vmatprep.mubr.msk.f32.mxu1 %vm9884_vm1, %v9885_v39  ;;  %v7306_v58 = vsub.f32 %v7304_v54, %v7305_v3 }
 0x8f5   : > { %9530 = vmatpush3.bf16.msra.mxu0 %v9529_v16  ;;  %9548 = vmatpush3.bf16.msra.mxu1 %v9517_v26  ;;  %v7299_v26 = vsub.f32 %v7297_v51, %v7298_v1  ;;  %v7307_v31 = vand.u32 4294901760, %v7306_v58  ;;  %v7312_v16 = vand.u32 4294901760, %v7311_v7 }
 0x8f6   : > { %9537 = vmatprep.subr.bf16.mxu0 %v9883_v34  ;;  %9585 = vmatprep.subr.bf16.mxu1 %v9883_v34 }
 0x8f7   : > { %v7300_v0 = vand.u32 4294901760, %v7299_v26  ;;  %v7313_v56 = vsub.f32 %v7311_v7, %v7312_v16 }
 0x8f8   : > { %9202 = vmatmul.mubr.f32.vlgmr.msra.gmra.mrb[16].mxu0 %v6749_v29  ;;  %9235 = vmatmul.mubr.f32.vlgmr.msra.gmra.mrb[20].mxu1 %v6748_v27 }
 0x8f9   : > { %9539 = vmatpush3.bf16.msra.mxu0 %v9538_v40  ;;  %9223 = vmatprep.mubr.msk.f32.mxu0 %vm9884_vm1, %v9885_v39  ;;  %v7319_v40 = vand.u32 4294901760, %v7318_v55  ;;  %v7314_v2 = vand.u32 4294901760, %v7313_v56 }
 0x8fa   : > { %9540 = vmatprep.subr.bf16.mxu0 %v9883_v34  ;;  %9319 = vmatprep.mubr.msk.f32.mxu1 %vm9884_vm1, %v9885_v39 }
 0x8fb   : > { %v7320_v11 = vsub.f32 %v7318_v55, %v7319_v40  ;;  %v9577_v29 = vpack.c.bf16 %v7319_v40, %v7312_v16  ;;  %v10981_v55 = vsub.f32 %v7708_v24, %v7740_v8 }
 0x8fd   : > { %9542 = vmatpush3.bf16.msra.mxu0 %v9541_v47  ;;  %v9556_v47 = vpack.c.bf16 %v7307_v31, %v7300_v0  ;;  %v7321_v17 = vand.u32 4294901760, %v7320_v11 }
 0x8fe   : > { %9549 = vmatprep.subr.bf16.mxu0 %v9883_v34 }
 0x8ff   : > { %v9559_v18 = vpack.c.bf16 %v7321_v17, %v7314_v2 }
 0x900   : > { %9224 = vmatmul.mubr.f32.vlgmr.msra.gmra.mrb[18].mxu0 %v6748_v27  ;;  %v9574_v27 = vpack.c.bf16 %v7305_v3, %v7298_v1 }
 0x901   : > { %9245 = vmatprep.mubr.msk.f32.mxu0 %vm9884_vm1, %v9885_v39  ;;  %9551 = vmatpush3.bf16.msra.mxu0 %v10883_v44 }
 0x902   : > { %9552 = vmatprep.subr.bf16.mxu0 %v9883_v34 }
 0x905   : > { %9554 = vmatpush3.bf16.msra.mxu0 %v10886_v63 }
 0x906   : > { %9555 = vmatprep.subr.bf16.mxu0 %v9883_v34 }
 0x9bb   : > { %v6845_v36 = vpop.f32.mrb[16].mxu1 }
 0x9bc   : > { %v9192_v38 = vpop.f32.mrb[17].mxu1 }
 0x9c3   : > { %v7002_v12 = vpop.f32.mrb[18].mxu1  ;;  %v6754_v45 = vpop.f32.mrb[14].mxu0 }
 0x9c4   : > { %v6846_v49 = vadd.f32 %v6845_v36, %v6754_v45  ;;  %v9214_v21 = vpop.f32.mrb[19].mxu1  ;;  %v9181_v22 = vpop.f32.mrb[15].mxu0  ;;  %v7725_v36 = vand.u32 4294901760, %v7703_v33 }
 0x9c6   : > { %v10897_v38 = vpack.c.bf16 %v7725_v36, %v7722_v28  ;;  %v10901_v45 = vsub.f32 %v7703_v33, %v7725_v36 }
 0x9c8   : > { %9587 = vmatpush3.bf16.msra.mxu1 %v10897_v38  ;;  %v7814_v3 = vand.u32 4294901760, %v10901_v45 }
 0x9c9   : > { %9588 = vmatprep.subr.bf16.mxu1 %v9883_v34 }
 0x9ca   : > { %v7815_v58 = vsub.f32 %v10901_v45, %v7814_v3 }
 0x9cb   : > { %v6925_v37 = vpop.f32.mrb[16].mxu0  ;;  %v7160_v43 = vpop.f32.mrb[20].mxu1 }
 0x9cc   : > { %v6926_v52 = vadd.f32 %v6925_v37, %v6846_v49  ;;  %v9203_v57 = vpop.f32.mrb[17].mxu0  ;;  %v9236_v59 = vpop.f32.mrb[21].mxu1  ;;  %v7816_v31 = vand.u32 4294901760, %v7815_v58 }
 0x9cd   : > { %v8368_v57 = vld [vmem:[%s11070_s17] ss:$0 sm:$0xff] }
 0x9ce   : > { %v7003_v46 = vadd.f32 %v7002_v12, %v6926_v52  ;;  %v10899_v12 = vsub.f32 %v7702_v32, %v7722_v28  ;;  %v7849_v28 = vand.u32 4294901760, %v10981_v55 }
 0x9d0   : > { %v7807_v1 = vand.u32 4294901760, %v10899_v12 }
 0x9d2   : > { %v7808_v26 = vsub.f32 %v10899_v12, %v7807_v1 }
 0x9d3   : > { %v7085_v60 = vpop.f32.mrb[18].mxu0 }
 0x9d4   : > { %v7086_v62 = vadd.f32 %v7085_v60, %v7003_v46  ;;  %v9225_v41 = vpop.f32.mrb[19].mxu0  ;;  %v7809_v0 = vand.u32 4294901760, %v7808_v26 }
 0x9d6   : > { %v7161_v15 = vadd.f32 %v7160_v43, %v7086_v62  ;;  %v8367_v43 = vld [vmem:[%s11069_s16] ss:$0 sm:$0xff] }
 0x9d8   : > { %v7164_v6 = vadd.f32 %v9872_v5, %v7161_v15 }
 0x9da   : > { %v10865_v53 = vadd.f32 %v8366_v61, %v7164_v6  ;;  %v7704_v6 = vld [vmem:[%s11073_s20 + $0x10] sm:$0xff] }
 0x9dc   : > { %v7175_v9 = vsel %vm733_vm0, %v10865_v53, 0.0 }
 0x9dd   : > { %7176 = vadd.xlane.f32.xlu0 %v7175_v9  ;;  %v7705_v9 = vld [vmem:[%s11073_s20 + $0x18] sm:$0xff] }
 0xa6a   : > { %v7177_v13 = vpop.xlane.xlu0 %7176 }
 0xa6b   : > { %v7178_v14 = vmul.f32 0.03125, %v7177_v13  ;;  %v7728_v13 = vand.u32 4294901760, %v7704_v6 }
 0xa6d   : > { %v7179_v25 = vsub.f32 %v10865_v53, %v7178_v14  ;;  %v7731_v14 = vand.u32 4294901760, %v7705_v9 }
 0xa6f   : > { %v7180_v42 = vmul.f32 %v7179_v25, %v7179_v25  ;;  %v10974_v51 = vsub.f32 %v7705_v9, %v7731_v14 }
 0xa71   : > { %v7181_v20 = vsel %vm733_vm0, %v7180_v42, 0.0  ;;  %v7706_v42 = vld [vmem:[%s11073_s20 + $0x20] sm:$0xff]  ;;  %v7828_v40 = vand.u32 4294901760, %v10974_v51 }
 0xa72   : > { %7182 = vadd.xlane.f32.xlu1 %v7181_v20  ;;  %v7707_v20 = vld [vmem:[%s11073_s20 + $0x28] sm:$0xff]  ;;  %v7734_v4 = vand.u32 4294901760, %v7706_v42 }
 0xa73   : > { %v7737_v48 = vand.u32 4294901760, %v7707_v20  ;;  %v7829_v11 = vsub.f32 %v10974_v51, %v7828_v40 }
 0xa74   : > { %v10976_v54 = vsub.f32 %v7706_v42, %v7734_v4 }
 0xa75   : > { %v10958_v23 = vpack.c.bf16 %v7737_v48, %v7734_v4  ;;  %v10978_v7 = vsub.f32 %v7707_v20, %v7737_v48  ;;  %v7830_v17 = vand.u32 4294901760, %v7829_v11 }
 0xaff   : > { %v7183_v49 = vpop.xlane.xlu1 %7182 }
 0xb00   : > { %v7184_v21 = vmul.f32 0.03125, %v7183_v49 }
 0xb02   : > { %v7185_v22 = vadd.f32 1e-05, %v7184_v21  ;;  %v7850_v21 = vsub.f32 %v10981_v55, %v7849_v28 }
 0xb04   : > { %9870 = vrsqrt.f32 %v7185_v22 }
 0xb0e   : > { %v9871_v37 = vpop.eup %9870 }
 0xb0f   : > { %v7187_v52 = vmul.f32 %v9871_v37, %v7179_v25  ;;  %v10946_v25 = vpack.c.bf16 %v7731_v14, %v7728_v13  ;;  %v7851_v37 = vand.u32 4294901760, %v7850_v21 }
 0xb11   : > { %v7194_v59 = vmul.f32 %v8367_v43, %v7187_v52  ;;  %9590 = vmatpush3.bf16.msra.mxu1 %v10946_v25 }
 0xb12   : > { %9591 = vmatprep.subr.bf16.mxu1 %v9883_v34 }
 0xb13   : > { %v7201_v46 = vadd.f32 %v8368_v57, %v7194_v59  ;;  %v9610_v57 = vpack.c.bf16 %v10901_v45, %v10899_v12 }
 0xb15   : > { %v7214_v60 = vsel %vm733_vm0, %v7201_v46, 0  ;;  %9593 = vmatpush3.bf16.msra.mxu1 %v10958_v23  ;;  %v9616_v46 = vpack.c.bf16 %v10978_v7, %v10976_v54 }
 0xb16   : > { %v7285_v62 = vand.u32 4294901760, %v7214_v60  ;;  %9594 = vmatprep.subr.bf16.mxu1 %v9883_v34 }
 0xb18   : > { %v7286_v41 = vsub.f32 %v7214_v60, %v7285_v62 }
 0xb19   : > { %9596 = vmatpush3.bf16.msra.mxu1 %v10970_v50 }
 0xb1a   : > { %v7287_v15 = vand.u32 4294901760, %v7286_v41  ;;  %9597 = vmatprep.subr.bf16.mxu1 %v9883_v34 }
 0xb1c   : > { %v7288_v61 = vsub.f32 %v7286_v41, %v7287_v15 }
 0xb1e   : > { %v7289_v5 = vand.u32 4294901760, %v7288_v61 }
 0xb20   : > { %9246 = vmatmul.mubr.f32.vlgmr.msra.gmra.mrb[20].mxu0 %v7289_v5  ;;  %v8369_v5 = vld [vmem:[%s11072_s19] ss:$0 sm:$0xff] }
 0xb21   : > { %9557 = vmatpush3.bf16.msra.mxu0 %v9556_v47  ;;  %9256 = vmatprep.mubr.msk.f32.mxu0 %vm9884_vm1, %v9885_v39  ;;  %v9598_v47 = vpack.c.bf16 %v7816_v31, %v7809_v0 }
 0xb22   : > { %9558 = vmatprep.subr.bf16.mxu0 %v9883_v34 }
 0xb25   : > { %9560 = vmatpush3.bf16.msra.mxu0 %v9559_v18  ;;  %v7835_v18 = vand.u32 4294901760, %v10976_v54 }
 0xb26   : > { %9561 = vmatprep.subr.bf16.mxu0 %v9883_v34 }
 0xb28   : > { %9257 = vmatmul.mubr.f32.vlgmr.msra.gmra.mrb[20].mxu0 %v7285_v62 }
 0xb29   : > { %9563 = vmatpush3.bf16.msra.mxu0 %v9562_v19  ;;  %9267 = vmatprep.mubr.msk.f32.mxu0 %vm9884_vm1, %v9885_v39  ;;  %v7842_v19 = vand.u32 4294901760, %v10978_v7 }
 0xb2a   : > { %9564 = vmatprep.subr.bf16.mxu0 %v9883_v34 }
 0xb2d   : > { %9566 = vmatpush3.bf16.msra.mxu0 %v9565_v10 }
 0xb2e   : > { %9567 = vmatprep.subr.bf16.mxu0 %v9883_v34 }
 0xb30   : > { %9268 = vmatmul.mubr.f32.vlgmr.msra.gmra.mrb[20].mxu0 %v7286_v41 }
 0xb31   : > { %9569 = vmatpush3.bf16.msra.mxu0 %v10883_v44  ;;  %9278 = vmatprep.mubr.msk.f32.mxu0 %vm9884_vm1, %v9885_v39 }
 0xb32   : > { %9570 = vmatprep.subr.bf16.mxu0 %v9883_v34 }
 0xb35   : > { %9572 = vmatpush3.bf16.msra.mxu0 %v10886_v63 }
 0xb36   : > { %9573 = vmatprep.subr.bf16.mxu0 %v9883_v34 }
 0xb38   : > { %9279 = vmatmul.mubr.f32.vlgmr.msra.gmra.mrb[20].mxu0 %v7287_v15  ;;  %v9640_v15 = vpack.c.bf16 %v7842_v19, %v7835_v18 }
 0xb39   : > { %9575 = vmatpush3.bf16.msra.mxu0 %v9574_v27  ;;  %9289 = vmatprep.mubr.msk.f32.mxu0 %vm9884_vm1, %v9885_v39  ;;  %v7836_v27 = vsub.f32 %v10976_v54, %v7835_v18 }
 0xb3a   : > { %9576 = vmatprep.subr.bf16.mxu0 %v9883_v34 }
 0xb3b   : > { %v7837_v32 = vand.u32 4294901760, %v7836_v27 }
 0xb3d   : > { %9578 = vmatpush3.bf16.msra.mxu0 %v9577_v29  ;;  %v7843_v29 = vsub.f32 %v10978_v7, %v7842_v19 }
 0xb3e   : > { %9579 = vmatprep.subr.bf16.mxu0 %v9883_v34 }
 0xb3f   : > { %v7844_v33 = vand.u32 4294901760, %v7843_v29 }
 0xb40   : > { %9290 = vmatmul.mubr.f32.vlgmr.msra.gmra.mrb[20].mxu0 %v7285_v62 }
 0xb41   : > { %9581 = vmatpush3.bf16.msra.mxu0 %v10883_v44  ;;  %9300 = vmatprep.mubr.msk.f32.mxu0 %vm9884_vm1, %v9885_v39  ;;  %v10972_v44 = vsub.f32 %v7704_v6, %v7728_v13  ;;  %v9604_v49 = vpack.c.bf16 %v7844_v33, %v7837_v32 }
 0xb42   : > { %9582 = vmatprep.subr.bf16.mxu0 %v9883_v34 }
 0xb43   : > { %v7821_v16 = vand.u32 4294901760, %v10972_v44  ;;  %v9613_v59 = vpack.c.bf16 %v10974_v51, %v10972_v44 }
 0xb45   : > { %9584 = vmatpush3.bf16.msra.mxu0 %v10886_v63  ;;  %v10983_v63 = vsub.f32 %v7709_v35, %v7743_v30  ;;  %v7822_v56 = vsub.f32 %v10972_v44, %v7821_v16  ;;  %v9637_v41 = vpack.c.bf16 %v7828_v40, %v7821_v16  ;;  %v8370_v35 = vld [vmem:[%s11074_s21] ss:$0 sm:$0xff] }
 0xb46   : > { %9621 = vmatprep.subr.bf16.mxu0 %v9883_v34 }
 0xb47   : > { %v7823_v2 = vand.u32 4294901760, %v7822_v56  ;;  %v7856_v36 = vand.u32 4294901760, %v10983_v63  ;;  %v9619_v60 = vpack.c.bf16 %v10983_v63, %v10981_v55 }
 0xb48   : > { %9301 = vmatmul.mubr.f32.vlgmr.msra.gmra.mrb[20].mxu0 %v7285_v62  ;;  %v9634_v62 = vpack.c.bf16 %v7814_v3, %v7807_v1 }
 0xb49   : > { %9623 = vmatpush3.bf16.msra.mxu0 %v10897_v38  ;;  %9376 = vmatprep.mubr.msk.f32.mxu0 %vm9884_vm1, %v9885_v39  ;;  %v9601_v10 = vpack.c.bf16 %v7830_v17, %v7823_v2  ;;  %v7857_v22 = vsub.f32 %v10983_v63, %v7856_v36  ;;  %v9643_v61 = vpack.c.bf16 %v7856_v36, %v7849_v28 }
 0xb4a   : > { %9624 = vmatprep.subr.bf16.mxu0 %v9883_v34 }
 0xb4b   : > { %v7858_v43 = vand.u32 4294901760, %v7857_v22 }
 0xb4d   : > { %9626 = vmatpush3.bf16.msra.mxu0 %v10946_v25  ;;  %v9607_v52 = vpack.c.bf16 %v7858_v43, %v7851_v37 }
 0xb4e   : > { %9627 = vmatprep.subr.bf16.mxu0 %v9883_v34 }
 0xb51   : > { %9629 = vmatpush3.bf16.msra.mxu0 %v10958_v23 }
 0xb52   : > { %9630 = vmatprep.subr.bf16.mxu0 %v9883_v34 }
 0xb55   : > { %9632 = vmatpush3.bf16.msra.mxu0 %v10970_v50 }
 0xb56   : > { %9645 = vmatprep.subr.bf16.mxu0 %v9883_v34 }
 0xc1b   : > { %v7697_v6 = vpop.f32.mrb[20].mxu0 }
 0xc1c   : > { %v9668_v9 = vadd.f32 %v8369_v5, %v7697_v6  ;;  %v9302_v12 = vpop.f32.mrb[21].mxu0 }
 0xc1e   : > { %v7701_v45 = vmax.f32 %v9668_v9, 0.0 }
 0xc20   : > { %v7719_v13 = vsel %vm7717_vm12, %v7701_v45, 0 }
 0xc21   : > { %v7794_v14 = vand.u32 4294901760, %v7719_v13 }
 0xc23   : > { %v7795_v42 = vsub.f32 %v7719_v13, %v7794_v14 }
 0xc25   : > { %v7796_v20 = vand.u32 4294901760, %v7795_v42 }
 0xc27   : > { %9377 = vmatmul.mubr.f32.vlgmr.msra.gmra.mrb[22].mxu0 %v7796_v20  ;;  %v7797_v4 = vsub.f32 %v7795_v42, %v7796_v20 }
 0xc28   : > { %9647 = vmatpush3.bf16.msra.mxu0 %v10897_v38  ;;  %9414 = vmatprep.mubr.msk.f32.mxu0 %vm9884_vm1, %v9885_v39 }
 0xc29   : > { %9648 = vmatprep.subr.bf16.mxu0 %v9883_v34  ;;  %v7798_v48 = vand.u32 4294901760, %v7797_v4 }
 0xc2b   : > { %9320 = vmatmul.mubr.f32.vlgmr.msra.gmra.mrb[22].mxu1 %v7798_v48 }
 0xc2c   : > { %9599 = vmatpush3.bf16.msra.mxu1 %v9598_v47  ;;  %9650 = vmatpush3.bf16.msra.mxu0 %v10946_v25 }
 0xc2d   : > { %9600 = vmatprep.subr.bf16.mxu1 %v9883_v34  ;;  %9651 = vmatprep.subr.bf16.mxu0 %v9883_v34 }
 0xc2e   : > { %9338 = vmatprep.mubr.msk.f32.mxu1 %vm9884_vm1, %v9885_v39 }
 0xc30   : > { %9602 = vmatpush3.bf16.msra.mxu1 %v9601_v10  ;;  %9653 = vmatpush3.bf16.msra.mxu0 %v10958_v23 }
 0xc31   : > { %9603 = vmatprep.subr.bf16.mxu1 %v9883_v34  ;;  %9654 = vmatprep.subr.bf16.mxu0 %v9883_v34 }
 0xc34   : > { %9605 = vmatpush3.bf16.msra.mxu1 %v9604_v49  ;;  %9656 = vmatpush3.bf16.msra.mxu0 %v10970_v50 }
 0xc35   : > { %9606 = vmatprep.subr.bf16.mxu1 %v9883_v34 }
 0xc37   : > { %9415 = vmatmul.mubr.f32.vlgmr.msra.gmra.mrb[24].mxu0 %v7794_v14 }
 0xc38   : > { %9608 = vmatpush3.bf16.msra.mxu1 %v9607_v52 }
 0xc39   : > { %9609 = vmatprep.subr.bf16.mxu1 %v9883_v34 }
 0xc3b   : > { %9339 = vmatmul.mubr.f32.vlgmr.msra.gmra.mrb[24].mxu1 %v7794_v14 }
 0xc3c   : > { %9611 = vmatpush3.bf16.msra.mxu1 %v9610_v57  ;;  %9357 = vmatprep.mubr.msk.f32.mxu1 %vm9884_vm1, %v9885_v39 }
 0xc3d   : > { %9612 = vmatprep.subr.bf16.mxu1 %v9883_v34 }
 0xc40   : > { %9614 = vmatpush3.bf16.msra.mxu1 %v9613_v59 }
 0xc41   : > { %9615 = vmatprep.subr.bf16.mxu1 %v9883_v34 }
 0xc44   : > { %9617 = vmatpush3.bf16.msra.mxu1 %v9616_v46 }
 0xc45   : > { %9618 = vmatprep.subr.bf16.mxu1 %v9883_v34 }
 0xc48   : > { %9620 = vmatpush3.bf16.msra.mxu1 %v9619_v60 }
 0xc49   : > { %9633 = vmatprep.subr.bf16.mxu1 %v9883_v34 }
 0xc4b   : > { %9358 = vmatmul.mubr.f32.vlgmr.msra.gmra.mrb[26].mxu1 %v7795_v42 }
 0xc4c   : > { %9635 = vmatpush3.bf16.msra.mxu1 %v9634_v62  ;;  %9395 = vmatprep.mubr.msk.f32.mxu1 %vm9884_vm1, %v9885_v39 }
 0xc4d   : > { %9636 = vmatprep.subr.bf16.mxu1 %v9883_v34 }
 0xc50   : > { %9638 = vmatpush3.bf16.msra.mxu1 %v9637_v41 }
 0xc51   : > { %9639 = vmatprep.subr.bf16.mxu1 %v9883_v34 }
 0xc54   : > { %9641 = vmatpush3.bf16.msra.mxu1 %v9640_v15 }
 0xc55   : > { %9642 = vmatprep.subr.bf16.mxu1 %v9883_v34 }
 0xc58   : > { %9644 = vmatpush3.bf16.msra.mxu1 %v9643_v61 }
 0xc5b   : > { %9396 = vmatmul.mubr.f32.vlgmr.msra.gmra.mrb[28].mxu1 %v7794_v14 }
 0xcfa   : > { %v8080_v38 = vpop.f32.mrb[22].mxu0 }
 0xcfb   : > { %v9378_v25 = vpop.f32.mrb[23].mxu0 }
 0xcfe   : > { %v7800_v23 = vpop.f32.mrb[22].mxu1 }
 0xcff   : > { %v9321_v24 = vpop.f32.mrb[23].mxu1  ;;  %v7801_v30 = vadd.f32 %v8370_v35, %v7800_v23 }
 0xd0a   : > { %v8254_v39 = vpop.f32.mrb[24].mxu0 }
 0xd0b   : > { %v9416_v8 = vpop.f32.mrb[25].mxu0 }
 0xd0e   : > { %v7911_v50 = vpop.f32.mrb[24].mxu1 }
 0xd0f   : > { %v7912_v44 = vadd.f32 %v7911_v50, %v7801_v30  ;;  %v9340_v51 = vpop.f32.mrb[25].mxu1 }
 0xd1e   : > { %v7999_v54 = vpop.f32.mrb[26].mxu1 }
 0xd1f   : > { %v8000_v7 = vadd.f32 %v7999_v54, %v7912_v44  ;;  %v9359_v34 = vpop.f32.mrb[27].mxu1 }
 0xd21   : > { %v8081_v55 = vadd.f32 %v8080_v38, %v8000_v7 }
 0xd2e   : > { %v8175_v63 = vpop.f32.mrb[28].mxu1 }
 0xd2f   : > { %v8176_v1 = vadd.f32 %v8175_v63, %v8081_v55  ;;  %v9397_v3 = vpop.f32.mrb[29].mxu1 }
 0xd31   : > { %v8255_v26 = vadd.f32 %v8254_v39, %v8176_v1 }
 0xd33   : > { %v8258_v58 = vadd.f32 %v8255_v26, %v10865_v53 }
 0xd35   : > { %8259 = vst.msk [vmem:[%s729_s30] sm:$0xff] %vm733_vm0, %v8258_v58 }
 0xd36 PF: > { %s32_s3 = sadd.s32 1, %s9879_s3  }
 0xd37   : > { %p29_p4 = scmp.ge.s32.totalorder %s32_s3, 4  }
 0xd39   :  { %31 = sbr.rel (!%p29_p4) target bundleno = 7 (0x7), region = 147 }

// kernel: tetnp_encoder_forward_pallas.7
= control target key start
LH: loop header
LB: loop body
LE: loop exit
PB: predicated region body
PF: predicated region fallthrough
CT: control target
= control target key end

     0   :  { %s11081_s0 = inlined_call_operand.vmem [shape: f32[2,8,32], index: 0, kind: input, shape index: {}]   ;;  %s11082_s1 = inlined_call_operand.vmem [shape: f32[2,8,32], index: 1, kind: input, shape index: {}]   ;;  %s11083_s2 = inlined_call_operand.vmem [shape: f32[2,8,2], index: 2, kind: input, shape index: {}]   ;;  %s11084_s3 = inlined_call_operand.vmem [shape: f32[2,8,2], index: 3, kind: input, shape index: {}]   ;;  %s11085_s4 = inlined_call_operand.vmem [shape: f32[1,32], index: 4, kind: input, shape index: {}]   ;;  %s11086_s5 = inlined_call_operand.vmem [shape: f32[1,32], index: 5, kind: input, shape index: {}]   ;;  %s11087_s6 = inlined_call_operand.vmem [shape: f32[32,32], index: 6, kind: input, shape index: {}]   ;;  %s11088_s7 = inlined_call_operand.vmem [shape: f32[1,32], index: 7, kind: input, shape index: {}]   ;;  %s11089_s8 = inlined_call_operand.vmem [shape: f32[32,64], index: 8, kind: input, shape index: {}]   ;;  %s11090_s9 = inlined_call_operand.vmem [shape: f32[1,64], index: 9, kind: input, shape index: {}]   ;;  %s11091_s10 = inlined_call_operand.vmem [shape: f32[2,16], index: 10, kind: input, shape index: {}]   ;;  %s11092_s11 = inlined_call_operand.vmem [shape: f32[1,16], index: 11, kind: input, shape index: {}]   ;;  %s11093_s12 = inlined_call_operand.vmem [shape: f32[16,4], index: 12, kind: input, shape index: {}]   ;;  %s11094_s13 = inlined_call_operand.vmem [shape: f32[1,4], index: 13, kind: input, shape index: {}]   ;;  %s11095_s14 = inlined_call_operand.vmem [shape: f32[32,32], index: 14, kind: input, shape index: {}]   ;;  %s11096_s15 = inlined_call_operand.vmem [shape: f32[1,32], index: 15, kind: input, shape index: {}]   ;;  %s11097_s16 = inlined_call_operand.vmem [shape: f32[1,32], index: 16, kind: input, shape index: {}]   ;;  %s11098_s17 = inlined_call_operand.vmem [shape: f32[1,32], index: 17, kind: input, shape index: {}]   ;;  %s11099_s18 = inlined_call_operand.vmem [shape: f32[32,64], index: 18, kind: input, shape index: {}]   ;;  %s11100_s19 = inlined_call_operand.vmem [shape: f32[1,64], index: 19, kind: input, shape index: {}]   ;;  %s11101_s20 = inlined_call_operand.vmem [shape: f32[64,32], index: 20, kind: input, shape index: {}]   ;;  %s11102_s21 = inlined_call_operand.vmem [shape: f32[1,32], index: 21, kind: input, shape index: {}]   ;;  %s11103_s22 = inlined_call_operand.vmem [shape: f32[2,8,32], index: 22, kind: output, shape index: {}]  }
   0x1   :  { %11105 = sst [smem:[#allocation2_spill]] %s11081_s0 }
   0x2   :  { %11106 = sst [smem:[#allocation3_spill]] %s11082_s1 }
   0x3   :  { %11107 = sst [smem:[#allocation4_spill]] %s11083_s2 }
   0x4   :  { %11108 = sst [smem:[#allocation5_spill]] %s11084_s3  ;;  %s10019_s3 = smov 0  }
   0x5   :  { %11109 = sst [smem:[#allocation6_spill]] %s11085_s4 }
   0x6   :  { %11110 = sst [smem:[#allocation7_spill]] %s11086_s5 }
   0x7   :  { %11111 = sst [smem:[#allocation8_spill]] %s11087_s6 }
   0x8 LB: > { %s8353_s28 = sadd.s32 4294967295, %s9884_s3   ;;  %p8357_p0 = scmp.ge.s32.totalorder %s9884_s3, 1  ;;  %s9884_s3 = sphi %s10019_s3, %s32_s3  }
   0x9   : > { %p638_p1 = scmp.lt.s32.totalorder %s9884_s3, 3 }
   0xb   : > { %p639_p2 = pnand %p8357_p0, %p638_p1 }
   0xc   : > { %p710_p3 = scmp.lt.s32.totalorder (!%p639_p2), %s8353_s28, 1  ;;  %vm733_vm0 = vcmask (!%p639_p2), 261120   ;;  %s11112_s0 = sld [smem:[#allocation2_spill]] (!%p639_p2)  ;;  %v9886_v2 = vmov (!%p639_p2), 0   ;;  %v9887_v4 = vmov (!%p639_p2), 1   ;;  %v9888_v34 = vmov (!%p639_p2), 0.0|0.0  }
   0xd   : > { %642 = sbr.rel (%p639_p2) target bundleno = 3383 (0xd37), region = 108  ;;  %s11113_s24 = sld [smem:[#allocation4_spill]] (!%p639_p2)  ;;  %9848 = vset.pattern.permute.xlu1 (!%p639_p2), %v9886_v2  ;;  %9850 = vset.pattern.permute.xlu0 (!%p639_p2), %v9886_v2  ;;  %vm9889_vm1 = vmmov (!%p639_p2), 0   ;;  %v9890_v38 = vmov (!%p639_p2), 0.0   ;;  %v1803_v43 = vlaneseq (!%p639_p2)  ;;  %v9891_v50 = vmov (!%p639_p2), 1966171168  }
   0xe   : > { %s11114_s2 = sld [smem:[#allocation5_spill]] (!%p639_p2)  ;;  %s11115_s4 = sld [smem:[#allocation8_spill]] (!%p639_p2)  ;;  %9428 = vmatprep.subr.bf16.mxu0 (!%p639_p2), %v9888_v34  ;;  %9422 = vmatprep.subr.bf16.mxu1 (!%p639_p2), %v9888_v34  ;;  %v1801_v51 = vunpack.c.l.s4 (!%p639_p2), %v9891_v50  ;;  %v8367_v52 = vld [vmem:[%s11091_s10] ss:$0 sm:$0xff] (!%p639_p2)  ;;  %v8368_v53 = vld [vmem:[%s11091_s10 + $0x1] ss:$0 sm:$0xff] (!%p639_p2) }
   0xf   : > { %8727 = vmatprep.mubr.msk.f32.mxu0 (!%p639_p2), %vm9889_vm1, %v9890_v38  ;;  %8716 = vmatprep.mubr.msk.f32.mxu1 (!%p639_p2), %vm9889_vm1, %v9890_v38  ;;  %v1804_v44 = vshrl.u32 (!%p639_p2), %v1803_v43, 7  ;;  %v3199_v45 = vand.u32 (!%p639_p2), 127, %v1803_v43  ;;  %s11116_s1 = sld [smem:[#allocation3_spill]] (!%p639_p2)  ;;  %vm1927_vm2 = vcmask (!%p639_p2), 130048   ;;  %vm2712_vm3 = vcmask (!%p639_p2), 64512   ;;  %s9895_s30 = smov (!%p639_p2), 104  }
  0x10   : > { %v1802_v58 = vunpack.c.0.s8 (!%p639_p2), %v1801_v51  ;;  %vm3232_vm4 = vcmask (!%p639_p2), 1041409   ;;  %vm3234_vm5 = vcmask (!%p639_p2), 1042434   ;;  %vm3236_vm6 = vcmask (!%p639_p2), 1043459  }
  0x11   : > { %v10100_v46 = vsub.s32 (!%p639_p2), %v3199_v45, %v1804_v44  ;;  %vm3238_vm7 = vcmask (!%p639_p2), 1044484   ;;  %vm3240_vm8 = vcmask (!%p639_p2), 1045509   ;;  %vm3242_vm9 = vcmask (!%p639_p2), 1046534  }
  0x12   : > { %v1805_v61 = vsub.s32 (!%p639_p2), %v1802_v58, %v1804_v44  ;;  %vm3244_vm10 = vcmask (!%p639_p2), 1047559   ;;  %vm6674_vm11 = vcmask (!%p639_p2), 195584   ;;  %vm7721_vm12 = vcmask (!%p639_p2), 523264  }
  0x14   : > { %s11120_s28 = smov (!%p710_p3, %s8353_s28), 1  ;;  %v763_v11 = vld [vmem:[%s11115_s4] sm:$0xff]  ;;  %v764_v12 = vld [vmem:[%s11115_s4 + $0x8] sm:$0xff]  ;;  %v765_v17 = vld [vmem:[%s11115_s4 + $0x10] sm:$0xff] }
  0x15   : > { %s10027_s29 = sshll.u32 %s11120_s28, 3  ;;  %v778_v13 = vand.u32 4294901760, %v763_v11  ;;  %v781_v14 = vand.u32 4294901760, %v764_v12  ;;  %v766_v18 = vld [vmem:[%s11115_s4 + $0x18] sm:$0xff]  ;;  %v784_v21 = vand.u32 4294901760, %v765_v17  ;;  %s11117_s28 = sld [smem:[#allocation6_spill]] }
  0x16   : > { %s10033_s23 = scalar_lea.vmem %s11112_s0, %s10027_s29  ;;  %s721_s6 = scalar_lea.vmem %s11113_s24, %s10027_s29  ;;  %v787_v22 = vand.u32 4294901760, %v766_v18 }
  0x17   : > { %v730_v0 = vld [vmem:[%s10033_s23] sm:$0xff]  ;;  %s725_s27 = scalar_lea.vmem %s11114_s2, %s10027_s29  ;;  %v10057_v15 = vsub.f32 %v763_v11, %v778_v13  ;;  %v10059_v16 = vsub.f32 %v764_v12, %v781_v14  ;;  %v10071_v25 = vsub.f32 %v765_v17, %v784_v21  ;;  %v10082_v35 = vpack.c.bf16 %v781_v14, %v778_v13  ;;  %s717_s5 = scalar_lea.vmem %s11116_s1, %s10027_s29 }
  0x18   : > { %v734_v1 = vsel %vm733_vm0, %v730_v0, 0.0  ;;  %v1761_v3 = vld [vmem:[%s721_s6] sm:$0xff]  ;;  %v10073_v26 = vsub.f32 %v766_v18, %v787_v22  ;;  %v10094_v41 = vpack.c.bf16 %v787_v22, %v784_v21  ;;  %v10129_v11 = vsub.s32 0, %v1804_v44  ;;  %s11118_s1 = sld [smem:[#allocation7_spill]]  ;;  %s9892_s2 = smov 96  }
  0x19   : > { %735 = vadd.xlane.f32.xlu0 %v734_v1  ;;  %1766 = vperm.xlu1 %9848, %v1761_v3   ;;  %v1762_v5 = vld [vmem:[%s725_s27] sm:$0xff]  ;;  %v859_v19 = vand.u32 4294901760, %v10057_v15  ;;  %v866_v20 = vand.u32 4294901760, %v10059_v16  ;;  %v873_v29 = vand.u32 4294901760, %v10071_v25  ;;  %v9435_v40 = vpack.c.bf16 %v10059_v16, %v10057_v15  ;;  %v10124_v1 = vld [vmem:[%s11089_s8 + $0x8] sm:$0xff]  ;;  %s9893_s27 = smov 120  }
  0x1a   : > { %v880_v30 = vand.u32 4294901760, %v10073_v26  ;;  %9424 = vmatpush3.bf16.msra.mxu1 %v10082_v35  ;;  %v9438_v42 = vpack.c.bf16 %v10073_v26, %v10071_v25  ;;  %v1280_v13 = vand.u32 4294901760, %v10124_v1  ;;  %s9898_s0 = smov 88   ;;  %s9901_s24 = smov 8  }
  0x1b   : > { %v860_v23 = vsub.f32 %v10057_v15, %v859_v19  ;;  %v867_v24 = vsub.f32 %v10059_v16, %v866_v20  ;;  %v874_v32 = vsub.f32 %v10071_v25, %v873_v29  ;;  %9425 = vmatprep.subr.bf16.mxu1 %v9888_v34  ;;  %v10102_v47 = vpack.c.bf16 %v866_v20, %v859_v19 }
  0x1c   : > { %v881_v33 = vsub.f32 %v10073_v26, %v880_v30  ;;  %v10104_v48 = vpack.c.bf16 %v880_v30, %v873_v29 }
  0x1d   : > { %9849 = vset.pattern.permute.xlu1 %v9887_v4  ;;  %v861_v27 = vand.u32 4294901760, %v860_v23  ;;  %v868_v28 = vand.u32 4294901760, %v867_v24  ;;  %v875_v36 = vand.u32 4294901760, %v874_v32 }
  0x1e   : > { %1776 = vperm.xlu1 %9849, %v1761_v3   ;;  %v882_v37 = vand.u32 4294901760, %v881_v33  ;;  %9427 = vmatpush3.bf16.msra.mxu1 %v10094_v41  ;;  %v8364_v21 = vld [vmem:[%s11118_s1] ss:$0 sm:$0xff]  ;;  %v10151_v33 = vsub.f32 %v10124_v1, %v1280_v13  ;;  %s9899_s1 = smov 72  }
  0x1f   : > { %v9429_v31 = vpack.c.bf16 %v868_v28, %v861_v27  ;;  %9458 = vmatprep.subr.bf16.mxu1 %v9888_v34  ;;  %v1264_v27 = vld [vmem:[%s11089_s8 + $0x10] sm:$0xff]  ;;  %v1265_v28 = vld [vmem:[%s11089_s8 + $0x18] sm:$0xff] }
  0x20   : > { %v9432_v39 = vpack.c.bf16 %v882_v37, %v875_v36  ;;  %v1283_v37 = vand.u32 4294901760, %v1264_v27 }
  0x21   : > { %9430 = vmatpush3.bf16.msra.mxu0 %v9429_v31 }
  0x22   : > { %1792 = vperm.xlu1 %9849, %v1762_v5   ;;  %9431 = vmatprep.subr.bf16.mxu0 %v9888_v34  ;;  %v10170_v58 = vsub.f32 %v1264_v27, %v1283_v37 }
  0x25   : > { %9433 = vmatpush3.bf16.msra.mxu0 %v9432_v39  ;;  %v1286_v39 = vand.u32 4294901760, %v1265_v28 }
  0x26   : > { %9851 = vset.pattern.permute.xlu1 %v9886_v2  ;;  %9434 = vmatprep.subr.bf16.mxu0 %v9888_v34  ;;  %v762_v2 = vld [vmem:[%s717_s5] sm:$0xff]  ;;  %s9900_s5 = smov 80  }
  0x27   : > { %v1274_v14 = vsel %vm733_vm0, %v762_v2, 0 }
  0x28   : > { %v10147_v30 = vand.u32 4294901760, %v1274_v14 }
  0x98   : > { %v1767_v49 = vpop.permute.xlu1 %1766 }
  0x99   : > { %v1773_v57 = vmul.f32 %v8367_v52, %v1767_v49 }
  0x9d   : > { %v1777_v54 = vpop.permute.xlu1 %1776 }
  0x9e   : > { %v1783_v59 = vmul.f32 %v8368_v53, %v1777_v54 }
  0xa0   : > { %v1784_v62 = vadd.f32 %v1783_v59, %v1773_v57  ;;  %v10172_v59 = vsub.f32 %v1265_v28, %v1286_v39 }
  0xa1   : > { %v1793_v3 = vpop.permute.xlu1 %1792 }
  0xa2   : > { %v1806_v63 = vrot.slane %v1784_v62, %v1805_v61  ;;  %v1795_v19 = vmul.f32 %v8368_v53, %v1793_v3  ;;  %v10161_v53 = vsub.f32 %v1274_v14, %v10147_v30 }
  0xa4   : > { %v1822_v18 = vrot.slane %v1806_v63, %v1805_v61  ;;  %v1347_v15 = vand.u32 4294901760, %v10161_v53 }
  0xa6   : > { %v736_v6 = vpop.xlane.xlu0 %735  ;;  %v1844_v29 = vcombine.high %v1822_v18, %v1822_v18  ;;  %v1851_v32 = vrot.slane %v1822_v18, %v10129_v11  ;;  %v1348_v25 = vsub.f32 %v10161_v53, %v1347_v15 }
  0xa7   : > { %v738_v7 = vmul.f32 0.03125, %v736_v6  ;;  %v1799_v6 = vcombine.high %v1784_v62, %v1784_v62 }
  0xa9   : > { %v10046_v8 = vsub.f32 %v730_v0, %v738_v7  ;;  %v10119_v0 = vld [vmem:[%s11089_s8] sm:$0xff]  ;;  %v1814_v7 = vcombine.high %v1806_v63, %v1806_v63  ;;  %v1813_v23 = vrot.slane %v1799_v6, %v1805_v61 }
  0xaa   : > { %v1277_v12 = vand.u32 4294901760, %v10119_v0 }
  0xab   : > { %v740_v9 = vmul.f32 %v10046_v8, %v10046_v8  ;;  %v1836_v24 = vrot.slane %v1814_v7, %v1805_v61  ;;  %v1815_v44 = vcombine.high %v1813_v23, %v1813_v23  ;;  %v1829_v51 = vrot.slane %v1813_v23, %v1805_v61 }
  0xac   : > { %v10201_v7 = vpack.c.bf16 %v1280_v13, %v1277_v12  ;;  %v10219_v23 = vpack.c.bf16 %v1286_v39, %v1283_v37 }
  0xad   : > { %v741_v10 = vsel %vm733_vm0, %v740_v9, 0.0  ;;  %v1846_v45 = vcombine.high %v1836_v24, %v1836_v24  ;;  %v1855_v49 = vrot.slane %v1836_v24, %v10129_v11  ;;  %v1843_v62 = vrot.slane %v1815_v44, %v1805_v61 }
  0xae   : > { %742 = vadd.xlane.f32.xlu0 %v741_v10  ;;  %v8363_v10 = vld [vmem:[%s11117_s28] ss:$0 sm:$0xff]  ;;  %v1845_v1 = vcombine.high %v1829_v51, %v1829_v51  ;;  %v1867_v2 = vrot.slane %v1829_v51, %v10129_v11  ;;  %s9894_s28 = smov 112  }
  0xaf   : > { %v1863_v63 = vrot.slane %v1846_v45, %v10129_v11  ;;  %v1847_v14 = vcombine.high %v1843_v62, %v1843_v62  ;;  %v1349_v45 = vand.u32 4294901760, %v1348_v25 }
  0xb1   : > { %v1879_v28 = vrot.slane %v1847_v14, %v10129_v11 }
  0xc4   : > { %1787 = vperm.xlu0 %9850, %v1762_v5  }
  0xc8   : > { %9853 = vset.pattern.permute.xlu0 %v9887_v4 }
 0x13b   : > { %v743_v55 = vpop.xlane.xlu0 %742 }
 0x13c   : > { %v744_v56 = vmul.f32 0.03125, %v743_v55  ;;  %v1365_v55 = vand.u32 4294901760, %v10151_v33 }
 0x13e   : > { %v745_v60 = vadd.f32 1e-05, %v744_v56 }
 0x140   : > { %9857 = vrsqrt.f32 %v745_v60  ;;  %v10177_v60 = vld [vmem:[%s11092_s11] ss:$0 sm:$0xff] }
 0x143   : > { %v1788_v5 = vpop.permute.xlu0 %1787 }
 0x144   : > { %v1790_v20 = vmul.f32 %v8367_v52, %v1788_v5  ;;  %v1859_v52 = vrot.slane %v1844_v29, %v10129_v11  ;;  %v10233_v29 = vld [vmem:[%s11093_s12] sm:$0xff] }
 0x146   : > { %v10153_v36 = vadd.f32 %v1795_v19, %v1790_v20  ;;  %v1875_v20 = vrot.slane %v1845_v1, %v10129_v11 }
 0x148   : > { %v1888_v56 = vsub.f32 %v1851_v32, %v10153_v36  ;;  %v1890_v5 = vsub.f32 %v1859_v52, %v10153_v36  ;;  %v1891_v19 = vsub.f32 %v1863_v63, %v10153_v36  ;;  %v1892_v13 = vsub.f32 %v1867_v2, %v10153_v36 }
 0x149   : > { %v1894_v44 = vsub.f32 %v1875_v20, %v10153_v36 }
 0x14a   : > { %v9858_v9 = vpop.eup %9857  ;;  %v1902_v61 = vadd.f32 %v10177_v60, %v1888_v56  ;;  %v1905_v37 = vadd.f32 %v10177_v60, %v1891_v19 }
 0x14b   : > { %v747_v17 = vmul.f32 %v9858_v9, %v10046_v8  ;;  %v10145_v8 = vsub.f32 %v10119_v0, %v1277_v12  ;;  %v1889_v0 = vsub.f32 %v1855_v49, %v10153_v36  ;;  %v1372_v9 = vand.u32 4294901760, %v10170_v58 }
 0x14c   : > { %v1904_v12 = vadd.f32 %v10177_v60, %v1890_v5  ;;  %v1913_v1 = vmax.f32 %v1905_v37, 0.0  ;;  %v1895_v5 = vsub.f32 %v1879_v28, %v10153_v36 }
 0x14d   : > { %v754_v22 = vmul.f32 %v8363_v10, %v747_v17  ;;  %v1358_v54 = vand.u32 4294901760, %v10145_v8  ;;  %v1379_v10 = vand.u32 4294901760, %v10172_v59  ;;  %v1871_v17 = vrot.slane %v1843_v62, %v10129_v11 }
 0x14e   : > { %v1903_v18 = vadd.f32 %v10177_v60, %v1889_v0  ;;  %v1373_v24 = vsub.f32 %v10170_v58, %v1372_v9  ;;  %v1912_v11 = vmax.f32 %v1904_v12, 0.0  ;;  %v1953_v62 = vand.u32 4294901760, %v10233_v29 }
 0x14f   : > { %v761_v31 = vadd.f32 %v8364_v21, %v754_v22  ;;  %v1359_v16 = vsub.f32 %v10145_v8, %v1358_v54  ;;  %v1910_v22 = vmax.f32 %v1902_v61, 0.0  ;;  %v1380_v27 = vsub.f32 %v10172_v59, %v1379_v10 }
 0x150   : > { %v1911_v32 = vmax.f32 %v1903_v18, 0.0  ;;  %v1893_v39 = vsub.f32 %v1871_v17, %v10153_v36  ;;  %v1374_v52 = vand.u32 4294901760, %v1373_v24  ;;  %v10267_v14 = vsub.f32 %v10233_v29, %v1953_v62 }
 0x151   : > { %v775_v43 = vsel %vm733_vm0, %v761_v31, 0  ;;  %v1360_v26 = vand.u32 4294901760, %v1359_v16  ;;  %v10238_v31 = vld [vmem:[%s11093_s12 + $0x8] sm:$0xff]  ;;  %v1929_v51 = vsel %vm1927_vm2, %v1910_v22, 0  ;;  %v1381_v56 = vand.u32 4294901760, %v1380_v27 }
 0x152   : > { %v10157_v50 = vand.u32 4294901760, %v775_v43  ;;  %v1956_v63 = vand.u32 4294901760, %v10238_v31  ;;  %v1932_v0 = vsel %vm1927_vm2, %v1911_v32, 0  ;;  %v1907_v2 = vadd.f32 %v10177_v60, %v1893_v39 }
 0x153   : > { %v10260_v16 = vand.u32 4294901760, %v1929_v51  ;;  %v9468_v17 = vpack.c.bf16 %v1381_v56, %v1374_v52  ;;  %v10276_v18 = vand.u32 4294901760, %v1932_v0  ;;  %v1938_v20 = vsel %vm1927_vm2, %v1913_v1, 0 }
 0x154   : > { %8728 = vmatmul.mubr.f32.vlgmr.msra.gmra.mrb[0].mxu0 %v10157_v50  ;;  %v10168_v57 = vsub.f32 %v775_v43, %v10157_v50  ;;  %v1906_v43 = vadd.f32 %v10177_v60, %v1892_v13  ;;  %v10272_v36 = vsub.f32 %v10238_v31, %v1956_v63  ;;  %v1909_v12 = vadd.f32 %v10177_v60, %v1895_v5 }
 0x155   : > { %9436 = vmatpush3.bf16.msra.mxu0 %v9435_v40  ;;  %8738 = vmatprep.mubr.msk.f32.mxu0 %vm9889_vm1, %v9890_v38  ;;  %v1366_v40 = vsub.f32 %v10151_v33, %v1365_v55  ;;  %v9471_v25 = vpack.c.bf16 %v10151_v33, %v10145_v8  ;;  %v9486_v8 = vpack.c.bf16 %v1379_v10, %v1372_v9 }
 0x156   : > { %9437 = vmatprep.subr.bf16.mxu0 %v9888_v34  ;;  %v848_v3 = vand.u32 4294901760, %v10168_v57  ;;  %v1914_v61 = vmax.f32 %v1906_v43, 0.0  ;;  %v1917_v28 = vmax.f32 %v1909_v12, 0.0 }
 0x158   : > { %v849_v6 = vsub.f32 %v10168_v57, %v848_v3  ;;  %v1950_v56 = vsel %vm1927_vm2, %v1917_v28, 0 }
 0x159   : > { %9439 = vmatpush3.bf16.msra.mxu0 %v9438_v42  ;;  %v1367_v42 = vand.u32 4294901760, %v1366_v40  ;;  %v1935_v40 = vsel %vm1927_vm2, %v1912_v11, 0  ;;  %v9474_v11 = vpack.c.bf16 %v10172_v59, %v10170_v58  ;;  %v8365_v58 = vld [vmem:[%s11088_s7] ss:$0 sm:$0xff] }
 0x15a   : > { %v850_v21 = vand.u32 4294901760, %v849_v6  ;;  %9440 = vmatprep.subr.bf16.mxu0 %v9888_v34  ;;  %v1908_v6 = vadd.f32 %v10177_v60, %v1894_v44  ;;  %v10279_v19 = vand.u32 4294901760, %v1935_v40  ;;  %v2109_v60 = vand.u32 4294901760, %v10272_v36 }
 0x15b   : > { %v9465_v49 = vpack.c.bf16 %v1367_v42, %v1360_v26  ;;  %v10298_v26 = vsub.f32 %v1932_v0, %v10276_v18  ;;  %v10300_v42 = vand.u32 4294901760, %v1938_v20  ;;  %v10343_v0 = vpack.c.bf16 %v1956_v63, %v1953_v62 }
 0x15c   : > { %8717 = vmatmul.mubr.f32.vlgmr.msra.gmra.mrb[0].mxu1 %v850_v21  ;;  %8739 = vmatmul.mubr.f32.vlgmr.msra.gmra.mrb[0].mxu0 %v10168_v57  ;;  %v1915_v21 = vmax.f32 %v1907_v2, 0.0  ;;  %v10286_v57 = vsub.f32 %v1929_v51, %v10260_v16  ;;  %v1916_v13 = vmax.f32 %v1908_v6, 0.0  ;;  %v10304_v22 = vsub.f32 %v1935_v40, %v10279_v19 }
 0x15d   : > { %9460 = vmatpush3.bf16.msra.mxu1 %v10201_v7  ;;  %9442 = vmatpush3.bf16.msra.mxu0 %v10082_v35  ;;  %v2110_v39 = vsub.f32 %v10272_v36, %v2109_v60  ;;  %v2031_v43 = vand.u32 4294901760, %v10298_v26  ;;  %v10325_v44 = vsub.f32 %v1938_v20, %v10300_v42  ;;  %v10359_v63 = vand.u32 4294901760, %v1950_v56 }
 0x15e   : > { %9461 = vmatprep.subr.bf16.mxu1 %v9888_v34  ;;  %9443 = vmatprep.subr.bf16.mxu0 %v9888_v34  ;;  %v1944_v27 = vsel %vm1927_vm2, %v1915_v21, 0  ;;  %v2021_v32 = vand.u32 4294901760, %v10286_v57  ;;  %v1947_v37 = vsel %vm1927_vm2, %v1916_v13, 0 }
 0x15f   : > { %8782 = vmatprep.mubr.msk.f32.mxu1 %vm9889_vm1, %v9890_v38  ;;  %8749 = vmatprep.mubr.msk.f32.mxu0 %vm9889_vm1, %v9890_v38  ;;  %v10334_v52 = vand.u32 4294901760, %v1947_v37  ;;  %v2111_v2 = vand.u32 4294901760, %v2110_v39  ;;  %v2032_v29 = vsub.f32 %v10298_v26, %v2031_v43  ;;  %v2051_v31 = vand.u32 4294901760, %v10325_v44 }
 0x160   : > { %v10378_v12 = vsub.f32 %v1950_v56, %v10359_v63 }
 0x161   : > { %9463 = vmatpush3.bf16.msra.mxu1 %v10219_v23  ;;  %9445 = vmatpush3.bf16.msra.mxu0 %v10094_v41  ;;  %v2052_v20 = vsub.f32 %v10325_v44, %v2051_v31 }
 0x162   : > { %9464 = vmatprep.subr.bf16.mxu1 %v9888_v34  ;;  %9446 = vmatprep.subr.bf16.mxu0 %v9888_v34 }
 0x164   : > { %8783 = vmatmul.mubr.f32.vlgmr.msra.gmra.mrb[2].mxu1 %v1349_v45  ;;  %8750 = vmatmul.mubr.f32.vlgmr.msra.gmra.mrb[0].mxu0 %v848_v3  ;;  %v1941_v3 = vsel %vm1927_vm2, %v1914_v61, 0  ;;  %v10327_v45 = vand.u32 4294901760, %v1944_v27  ;;  %v10367_v61 = vsub.f32 %v1947_v37, %v10334_v52  ;;  %v2091_v37 = vand.u32 4294901760, %v10378_v12 }
 0x165   : > { %9466 = vmatpush3.bf16.msra.mxu1 %v9465_v49  ;;  %9448 = vmatpush3.bf16.msra.mxu0 %v10102_v47  ;;  %v2102_v47 = vand.u32 4294901760, %v10267_v14  ;;  %v10306_v24 = vand.u32 4294901760, %v1941_v3  ;;  %v2041_v49 = vand.u32 4294901760, %v10304_v22 }
 0x166   : > { %9467 = vmatprep.subr.bf16.mxu1 %v9888_v34  ;;  %9449 = vmatprep.subr.bf16.mxu0 %v9888_v34  ;;  %v10357_v62 = vsub.f32 %v1944_v27, %v10327_v45  ;;  %v2053_v27 = vand.u32 4294901760, %v2052_v20 }
 0x167   : > { %8793 = vmatprep.mubr.msk.f32.mxu1 %vm9889_vm1, %v9890_v38  ;;  %8760 = vmatprep.mubr.msk.f32.mxu0 %vm9889_vm1, %v9890_v38  ;;  %v10332_v51 = vsub.f32 %v1941_v3, %v10306_v24  ;;  %v2042_v5 = vsub.f32 %v10304_v22, %v2041_v49 }
 0x168   : > { %v2071_v21 = vand.u32 4294901760, %v10357_v62 }
 0x169   : > { %9469 = vmatpush3.bf16.msra.mxu1 %v9468_v17  ;;  %9451 = vmatpush3.bf16.msra.mxu0 %v10104_v48  ;;  %v2103_v48 = vsub.f32 %v10267_v14, %v2102_v47  ;;  %v2061_v40 = vand.u32 4294901760, %v10332_v51  ;;  %v2043_v3 = vand.u32 4294901760, %v2042_v5 }
 0x16a   : > { %9470 = vmatprep.subr.bf16.mxu1 %v9888_v34  ;;  %9452 = vmatprep.subr.bf16.mxu0 %v9888_v34  ;;  %v2072_v28 = vsub.f32 %v10357_v62, %v2071_v21 }
 0x16b   : > { %v2104_v1 = vand.u32 4294901760, %v2103_v48  ;;  %v2062_v13 = vsub.f32 %v10332_v51, %v2061_v40  ;;  %v9483_v48 = vpack.c.bf16 %v1365_v55, %v1358_v54 }
 0x16c   : > { %8794 = vmatmul.mubr.f32.vlgmr.msra.gmra.mrb[2].mxu1 %v10147_v30  ;;  %8761 = vmatmul.mubr.f32.vlgmr.msra.gmra.mrb[0].mxu0 %v10157_v50  ;;  %v2073_v56 = vand.u32 4294901760, %v2072_v28 }
 0x16d   : > { %9472 = vmatpush3.bf16.msra.mxu1 %v9471_v25  ;;  %9454 = vmatpush3.bf16.msra.mxu0 %v10082_v35  ;;  %v2022_v35 = vsub.f32 %v10286_v57, %v2021_v32  ;;  %v9498_v17 = vpack.c.bf16 %v2111_v2, %v2104_v1  ;;  %v9502_v25 = vpack.c.bf16 %v10272_v36, %v10267_v14  ;;  %v2063_v39 = vand.u32 4294901760, %v2062_v13  ;;  %v8366_v14 = vld [vmem:[%s11090_s9] ss:$0 sm:$0xff] }
 0x16e   : > { %9473 = vmatprep.subr.bf16.mxu1 %v9888_v34  ;;  %9455 = vmatprep.subr.bf16.mxu0 %v9888_v34 }
 0x16f   : > { %8804 = vmatprep.mubr.msk.f32.mxu1 %vm9889_vm1, %v9890_v38  ;;  %8771 = vmatprep.mubr.msk.f32.mxu0 %vm9889_vm1, %v9890_v38  ;;  %v2023_v6 = vand.u32 4294901760, %v2022_v35  ;;  %v2092_v35 = vsub.f32 %v10378_v12, %v2091_v37 }
 0x171   : > { %9475 = vmatpush3.bf16.msra.mxu1 %v9474_v11  ;;  %9457 = vmatpush3.bf16.msra.mxu0 %v10094_v41  ;;  %v2033_v41 = vand.u32 4294901760, %v2032_v29 }
 0x172   : > { %9476 = vmatprep.subr.bf16.mxu1 %v9888_v34  ;;  %9495 = vmatprep.subr.bf16.mxu0 %v10343_v0 }
 0x174   : > { %8805 = vmatmul.mubr.f32.vlgmr.msra.gmra.mrb[2].mxu1 %v10161_v53  ;;  %8772 = vmatmul.mubr.f32.vlgmr.msra.gmra.mrb[0].mxu0 %v10157_v50  ;;  %v2081_v50 = vand.u32 4294901760, %v10367_v61  ;;  %v2093_v53 = vand.u32 4294901760, %v2092_v35 }
 0x175   : > { %9478 = vmatpush3.bf16.msra.mxu1 %v10201_v7  ;;  %9497 = vmatpush3.bf16.msra.mxu0 %v10343_v0 }
 0x176   : > { %9479 = vmatprep.subr.bf16.mxu1 %v9888_v34  ;;  %8844 = vmatprep.mubr.f32.mxu0 %v2023_v6  ;;  %v2082_v11 = vsub.f32 %v10367_v61, %v2081_v50 }
 0x177   : > { %8815 = vmatprep.mubr.msk.f32.mxu1 %vm9889_vm1, %v9890_v38  ;;  %9499 = vmatprep.subr.bf16.mxu0 %v9498_v17 }
 0x178   : > { %8845 = vmatmul.mubr.f32.vlgmr.msra.gmra.mrb[2].mxu0 %v2033_v41  ;;  %v2083_v33 = vand.u32 4294901760, %v2082_v11 }
 0x179   : > { %9481 = vmatpush3.bf16.msra.mxu1 %v10219_v23  ;;  %8847 = vmatprep.mubr.f32.mxu0 %v2043_v3 }
 0x17a   : > { %9482 = vmatprep.subr.bf16.mxu1 %v9888_v34  ;;  %9501 = vmatpush3.bf16.msra.mxu0 %v9498_v17 }
 0x17b   : > { %9503 = vmatprep.subr.bf16.mxu0 %v9502_v25 }
 0x17c   : > { %8816 = vmatmul.mubr.f32.vlgmr.msra.gmra.mrb[2].mxu1 %v1347_v15  ;;  %8848 = vmatmul.mubr.f32.gmra.mrb[4].mxu0 %v2053_v27 }
 0x17d   : > { %9484 = vmatpush3.bf16.msra.mxu1 %v9483_v48  ;;  %8850 = vmatprep.mubr.f32.mxu0 %v2063_v39 }
 0x17e   : > { %9485 = vmatprep.subr.bf16.mxu1 %v9888_v34  ;;  %8826 = vmatprep.mubr.msk.f32.mxu1 %vm9889_vm1, %v9890_v38 }
 0x180   : > { %8851 = vmatmul.mubr.f32.gmra.mrb[6].mxu0 %v2073_v56 }
 0x181   : > { %9487 = vmatpush3.bf16.msra.mxu1 %v9486_v8  ;;  %8853 = vmatprep.mubr.f32.mxu0 %v2083_v33 }
 0x182   : > { %9488 = vmatprep.subr.bf16.mxu1 %v9888_v34 }
 0x184   : > { %8827 = vmatmul.mubr.f32.vlgmr.msra.gmra.mrb[2].mxu1 %v10147_v30  ;;  %8854 = vmatmul.mubr.f32.gmra.mrb[8].mxu0 %v2093_v53 }
 0x185   : > { %9490 = vmatpush3.bf16.msra.mxu1 %v10201_v7  ;;  %8860 = vmatprep.mubr.f32.mxu0 %v10260_v16 }
 0x186   : > { %9491 = vmatprep.subr.bf16.mxu1 %v9888_v34  ;;  %8837 = vmatprep.mubr.msk.f32.mxu1 %vm9889_vm1, %v9890_v38 }
 0x188   : > { %8861 = vmatmul.mubr.f32.vlgmr.msra.gmra.mrb[2].mxu0 %v10276_v18 }
 0x189   : > { %9493 = vmatpush3.bf16.msra.mxu1 %v10219_v23  ;;  %8863 = vmatprep.mubr.f32.mxu0 %v10279_v19 }
 0x18a   : > { %9505 = vmatpush3.bf16.msra.mxu0 %v9502_v25  ;;  %8936 = vmatprep.subr.mxu1 %v9890_v38 }
 0x18b   : > { %9507 = vmatprep.subr.bf16.mxu0 %v10343_v0 }
 0x18c   : > { %8838 = vmatmul.mubr.f32.vlgmr.msra.gmra.mrb[2].mxu1 %v10147_v30  ;;  %8864 = vmatmul.mubr.f32.gmra.mrb[4].mxu0 %v10300_v42  ;;  %v9510_v30 = vpack.c.bf16 %v2109_v60, %v2102_v47 }
 0x18d   : > { %8866 = vmatprep.mubr.f32.mxu0 %v10306_v24  ;;  %8938 = vmatprep.mubr.msk.f32.mxu1 %vm9889_vm1, %v9890_v38 }
 0x190   : > { %8867 = vmatmul.mubr.f32.gmra.mrb[6].mxu0 %v10327_v45 }
 0x191   : > { %8869 = vmatprep.mubr.f32.mxu0 %v10334_v52 }
 0x194   : > { %8870 = vmatmul.mubr.f32.gmra.mrb[8].mxu0 %v10359_v63 }
 0x195   : > { %8876 = vmatprep.mubr.f32.mxu0 %v10286_v57 }
 0x198   : > { %8877 = vmatmul.mubr.f32.vlgmr.msra.gmra.mrb[2].mxu0 %v10298_v26 }
 0x199   : > { %8879 = vmatprep.mubr.f32.mxu0 %v10304_v22  ;;  %9509 = vmatpush3.bf16.msra.mxu0 %v10343_v0 }
 0x19a   : > { %9511 = vmatprep.subr.bf16.mxu0 %v9510_v30 }
 0x19c   : > { %8880 = vmatmul.mubr.f32.gmra.mrb[4].mxu0 %v10325_v44  ;;  %v8370_v44 = vld [vmem:[%s11094_s13] ss:$0 sm:$0xff] }
 0x19d   : > { %8882 = vmatprep.mubr.f32.mxu0 %v10332_v51 }
 0x1a0   : > { %8883 = vmatmul.mubr.f32.gmra.mrb[6].mxu0 %v10357_v62 }
 0x1a1   : > { %8885 = vmatprep.mubr.f32.mxu0 %v10367_v61 }
 0x1a4   : > { %8886 = vmatmul.mubr.f32.gmra.mrb[8].mxu0 %v10378_v12 }
 0x1a5   : > { %8892 = vmatprep.mubr.f32.mxu0 %v2021_v32 }
 0x1a8   : > { %8893 = vmatmul.mubr.f32.vlgmr.msra.gmra.mrb[2].mxu0 %v2031_v43 }
 0x1a9   : > { %8895 = vmatprep.mubr.f32.mxu0 %v2041_v49  ;;  %9513 = vmatpush3.bf16.msra.mxu0 %v9510_v30 }
 0x1aa   : > { %9515 = vmatprep.subr.bf16.mxu0 %v10343_v0 }
 0x1ac   : > { %8896 = vmatmul.mubr.f32.gmra.mrb[4].mxu0 %v2051_v31 }
 0x1ad   : > { %8898 = vmatprep.mubr.f32.mxu0 %v2061_v40 }
 0x1b0   : > { %8899 = vmatmul.mubr.f32.gmra.mrb[6].mxu0 %v2071_v21 }
 0x1b1   : > { %8901 = vmatprep.mubr.f32.mxu0 %v2081_v50 }
 0x1b4   : > { %8902 = vmatmul.mubr.f32.gmra.mrb[8].mxu0 %v2091_v37 }
 0x1b5   : > { %8908 = vmatprep.mubr.f32.mxu0 %v10260_v16 }
 0x1b8   : > { %8909 = vmatmul.mubr.f32.vlgmr.msra.gmra.mrb[2].mxu0 %v10276_v18 }
 0x1b9   : > { %8911 = vmatprep.mubr.f32.mxu0 %v10279_v19  ;;  %9517 = vmatpush3.bf16.msra.mxu0 %v10343_v0 }
 0x1ba   : > { %9056 = vmatprep.subr.mxu0 %v9890_v38 }
 0x1bc   : > { %8912 = vmatmul.mubr.f32.gmra.mrb[4].mxu0 %v10300_v42 }
 0x1bd   : > { %8914 = vmatprep.mubr.f32.mxu0 %v10306_v24 }
 0x1c0   : > { %8915 = vmatmul.mubr.f32.gmra.mrb[6].mxu0 %v10327_v45 }
 0x1c1   : > { %8917 = vmatprep.mubr.f32.mxu0 %v10334_v52 }
 0x1c4   : > { %8918 = vmatmul.mubr.f32.gmra.mrb[8].mxu0 %v10359_v63 }
 0x1c5   : > { %8924 = vmatprep.mubr.f32.mxu0 %v10260_v16 }
 0x1c8   : > { %8925 = vmatmul.mubr.f32.vlgmr.msra.gmra.mrb[2].mxu0 %v10276_v18 }
 0x1c9   : > { %8927 = vmatprep.mubr.f32.mxu0 %v10279_v19 }
 0x1cc   : > { %8928 = vmatmul.mubr.f32.gmra.mrb[4].mxu0 %v10300_v42 }
 0x1cd   : > { %8930 = vmatprep.mubr.f32.mxu0 %v10306_v24 }
 0x1d0   : > { %8931 = vmatmul.mubr.f32.gmra.mrb[6].mxu0 %v10327_v45 }
 0x1d1   : > { %8933 = vmatprep.mubr.f32.mxu0 %v10334_v52 }
 0x1d4   : > { %8934 = vmatmul.mubr.f32.gmra.mrb[8].mxu0 %v10359_v63 }
 0x1d5   : > { %9058 = vmatprep.mubr.msk.f32.mxu0 %vm9889_vm1, %v9890_v38 }
 0x22f   : > { %v852_v54 = vpop.f32.mrb[0].mxu1 }
 0x230   : > { %v8718_v55 = vpop.f32.mrb[1].mxu1  ;;  %v853_v59 = vadd.f32 %v8365_v58, %v852_v54 }
 0x247   : > { %v1258_v15 = vpop.f32.mrb[0].mxu0 }
 0x248   : > { %v10485_v7 = vadd.f32 %v1258_v15, %v853_v59  ;;  %v8773_v9 = vpop.f32.mrb[1].mxu0 }
 0x24a   : > { %v2714_v10 = vsel %vm2712_vm3, %v10485_v7, 0 }
 0x24b   : > { %v2785_v23 = vand.u32 4294901760, %v2714_v10 }
 0x24d   : > { %v2786_v16 = vsub.f32 %v2714_v10, %v2785_v23 }
 0x24f   : > { %v2787_v36 = vand.u32 4294901760, %v2786_v16 }
 0x251   : > { %v2788_v60 = vsub.f32 %v2786_v16, %v2787_v36 }
 0x253   : > { %v2789_v22 = vand.u32 4294901760, %v2788_v60 }
 0x25f   : > { %v1757_v18 = vpop.f32.mrb[2].mxu1 }
 0x260   : > { %v10492_v19 = vadd.f32 %v8366_v14, %v1757_v18  ;;  %v8839_v57 = vpop.f32.mrb[3].mxu1 }
 0x262   : > { %v2717_v47 = vsel %vm2712_vm3, %v10492_v19, 0 }
 0x263   : > { %v2720_v26 = vand.u32 4294901760, %v2717_v47 }
 0x265   : > { %8937 = vmatpush3.xpose.msra.mxu1 %v2720_v26  ;;  %v2797_v42 = vsub.f32 %v2717_v47, %v2720_v26 }
 0x266   : > { %8941 = vmatprep.subr.mxu1 %v9890_v38 }
 0x267   : > { %v2798_v24 = vand.u32 4294901760, %v2797_v42 }
 0x268   : > { %8939 = vmatmul.mubr.f32.vlgmr.msra.gmra.mrb[4].mxu1 %v2789_v22 }
 0x269   : > { %v2799_v32 = vsub.f32 %v2797_v42, %v2798_v24  ;;  %8943 = vmatprep.mubr.msk.f32.mxu1 %vm9889_vm1, %v9890_v38 }
 0x26b   : > { %v2800_v43 = vand.u32 4294901760, %v2799_v32 }
 0x26d   : > { %8942 = vmatpush3.xpose.msra.mxu1 %v2800_v43 }
 0x26e   : > { %8946 = vmatprep.subr.mxu1 %v9890_v38 }
 0x270   : > { %8944 = vmatmul.mubr.f32.vlgmr.msra.gmra.mrb[4].mxu1 %v2785_v23 }
 0x271   : > { %8947 = vmatpush3.xpose.msra.mxu1 %v2797_v42  ;;  %8948 = vmatprep.mubr.msk.f32.mxu1 %vm9889_vm1, %v9890_v38 }
 0x272   : > { %8951 = vmatprep.subr.mxu1 %v9890_v38 }
 0x278   : > { %8949 = vmatmul.mubr.f32.vlgmr.msra.gmra.mrb[4].mxu1 %v2786_v16 }
 0x279   : > { %8952 = vmatpush3.xpose.msra.mxu1 %v2720_v26  ;;  %8953 = vmatprep.mubr.msk.f32.mxu1 %vm9889_vm1, %v9890_v38 }
 0x27a   : > { %8956 = vmatprep.subr.mxu1 %v9890_v38 }
 0x280   : > { %8954 = vmatmul.mubr.f32.vlgmr.msra.gmra.mrb[4].mxu1 %v2787_v36 }
 0x281   : > { %8957 = vmatpush3.xpose.msra.mxu1 %v2798_v24  ;;  %8958 = vmatprep.mubr.msk.f32.mxu1 %vm9889_vm1, %v9890_v38 }
 0x282   : > { %8961 = vmatprep.subr.mxu1 %v9890_v38 }
 0x288   : > { %8959 = vmatmul.mubr.f32.vlgmr.msra.gmra.mrb[4].mxu1 %v2785_v23 }
 0x289   : > { %8962 = vmatpush3.xpose.msra.mxu1 %v2720_v26  ;;  %8963 = vmatprep.mubr.msk.f32.mxu1 %vm9889_vm1, %v9890_v38 }
 0x28a   : > { %8966 = vmatprep.subr.mxu1 %v9890_v38 }
 0x290   : > { %8964 = vmatmul.mubr.f32.vlgmr.msra.gmra.mrb[4].mxu1 %v2785_v23  ;;  %v9896_v23 = vmov 2  }
 0x291   : > { %8968 = vmatprep.mubr.msk.f32.mxu1 %vm9889_vm1, %v9890_v38 }
 0x29b   : > { %v8926_v45 = vpop.f32.mrb[2].mxu0 }
 0x29c   : > { %v10517_v49 = vadd.f32 %v8926_v45, %v8370_v44  ;;  %v2666_v51 = vpop.f32.mrb[3].mxu0 }
 0x29d   : > { %v10520_v0 = vadd.f32 %v8370_v44, %v2666_v51 }
 0x29e   : > { %3178 = vperm.xlu1 %9851, %v10517_v49  }
 0x29f   : > { %v8929_v52 = vpop.f32.mrb[4].mxu0 }
 0x2a0   : > { %v2678_v1 = vpop.f32.mrb[5].mxu0  ;;  %v10523_v29 = vadd.f32 %v8929_v52, %v8370_v44 }
 0x2a1   : > { %v10526_v63 = vadd.f32 %v8370_v44, %v2678_v1 }
 0x2a2   : > { %3175 = vperm.xlu1 %9851, %v10520_v0  }
 0x2a3   : > { %v8932_v2 = vpop.f32.mrb[6].mxu0 }
 0x2a4   : > { %v2690_v31 = vpop.f32.mrb[7].mxu0  ;;  %v10529_v40 = vadd.f32 %v8932_v2, %v8370_v44 }
 0x2a5   : > { %v10532_v61 = vadd.f32 %v8370_v44, %v2690_v31 }
 0x2a6   : > { %3184 = vperm.xlu1 %9851, %v10523_v29  }
 0x2a7   : > { %v8935_v62 = vpop.f32.mrb[8].mxu0 }
 0x2a8   : > { %v2702_v5 = vpop.f32.mrb[9].mxu0  ;;  %v10538_v17 = vadd.f32 %v8935_v62, %v8370_v44 }
 0x2a9   : > { %v10535_v6 = vadd.f32 %v8370_v44, %v2702_v5 }
 0x2aa   : > { %3181 = vperm.xlu1 %9851, %v10526_v63  }
 0x2ae   : > { %3190 = vperm.xlu1 %9851, %v10529_v40  }
 0x2b2   : > { %3187 = vperm.xlu1 %9851, %v10532_v61  }
 0x2b6   : > { %3193 = vperm.xlu1 %9851, %v10535_v6  }
 0x2ba   : > { %3196 = vperm.xlu1 %9851, %v10538_v17  }
 0x2be   : > { %9852 = vset.pattern.permute.xlu1 %v9887_v4 }
 0x31d   : > { %v3179_v41 = vpop.permute.xlu1 %3178 }
 0x31e   : > { %v3207_v28 = vrot.slane %v3179_v41, %v10100_v46 }
 0x321   : > { %v3176_v20 = vpop.permute.xlu1 %3175 }
 0x322   : > { %v3203_v50 = vrot.slane %v3176_v20, %v10100_v46 }
 0x324   : > { %v3233_v37 = vsel %vm3232_vm4, %v3207_v28, %v3203_v50 }
 0x325   : > { %v3185_v21 = vpop.permute.xlu1 %3184 }
 0x326   : > { %v3215_v39 = vrot.slane %v3185_v21, %v10100_v46 }
 0x329   : > { %v3182_v12 = vpop.permute.xlu1 %3181 }
 0x32a   : > { %v3211_v25 = vrot.slane %v3182_v12, %v10100_v46 }
 0x32c   : > { %v3235_v48 = vsel %vm3234_vm5, %v3211_v25, %v3233_v37 }
 0x32d   : > { %v3191_v3 = vpop.permute.xlu1 %3190  ;;  %v3237_v56 = vsel %vm3236_vm6, %v3215_v39, %v3235_v48 }
 0x32e   : > { %v3223_v33 = vrot.slane %v3191_v3, %v10100_v46 }
 0x331   : > { %v3188_v13 = vpop.permute.xlu1 %3187 }
 0x332   : > { %v3219_v4 = vrot.slane %v3188_v13, %v10100_v46 }
 0x334   : > { %v3239_v35 = vsel %vm3238_vm7, %v3219_v4, %v3237_v56 }
 0x335   : > { %v3194_v27 = vpop.permute.xlu1 %3193  ;;  %v3241_v30 = vsel %vm3240_vm8, %v3223_v33, %v3239_v35 }
 0x336   : > { %v3227_v8 = vrot.slane %v3194_v27, %v10100_v46 }
 0x338   : > { %v3243_v55 = vsel %vm3242_vm9, %v3227_v8, %v3241_v30 }
 0x339   : > { %v3197_v11 = vpop.permute.xlu1 %3196 }
 0x33a   : > { %v3231_v53 = vrot.slane %v3197_v11, %v10100_v46 }
 0x33c   : > { %v3245_v15 = vsel %vm3244_vm10, %v3231_v53, %v3243_v55 }
 0x363   : > { %v3161_v54 = vpop.f32.mrb[4].mxu1 }
 0x364   : > { %v3165_v58 = vmul.f32 0.35355338, %v3161_v54  ;;  %v8965_v59 = vpop.f32.mrb[5].mxu1 }
 0x366   : > { %v3247_v9 = vadd.f32 %v3245_v15, %v3165_v58 }
 0x368   : > { %v3248_v10 = vsel %vm2712_vm3, %v3247_v9, -inf }
 0x369   : > { %3249 = vmax.xlane.f32.xlu1 %v3248_v10 }
 0x37a   : > { %3259 = vrot.lane.b32.xlu1 %v10492_v19, %s9892_s2 }
 0x37e   : > { %3713 = vrot.lane.b32.xlu1 %v10492_v19, %s9893_s27 }
 0x382   : > { %4694 = vrot.lane.b32.xlu1 %v10485_v7, %s9894_s28 }
 0x386   : > { %5677 = vrot.lane.b32.xlu1 %v10485_v7, %s9895_s30 }
 0x38a   : > { %4167 = vperm.xlu1 %9852, %v10520_v0  }
 0x38e   : > { %4173 = vperm.xlu1 %9852, %v10526_v63  }
 0x392   : > { %4176 = vperm.xlu1 %9852, %v10523_v29  }
 0x396   : > { %4182 = vperm.xlu1 %9852, %v10529_v40  }
 0x39a   : > { %4188 = vperm.xlu1 %9852, %v10538_v17  }
 0x39e   : > { %9855 = vset.pattern.permute.xlu1 %v9896_v23 }
 0x39f   : > { %5153 = vperm.xlu1 %9855, %v10517_v49  }
 0x3a3   : > { %5156 = vperm.xlu1 %9855, %v10526_v63  }
 0x3a7   : > { %5162 = vperm.xlu1 %9855, %v10532_v61  }
 0x3ab   : > { %5168 = vperm.xlu1 %9855, %v10535_v6  }
 0x3f6   : > { %v3250_v16 = vpop.xlane.xlu1 %3249 }
 0x3f7   : > { %v3251_v14 = vsub.f32 %v3247_v9, %v3250_v16 }
 0x3f9   : > { %v3252_v36 = vmul.f32 1.442695, %v3251_v14 }
 0x3fa   : > { %v3260_v18 = vpop.permute.xlu1 %3259 }
 0x3fb   : > { %9859 = vpow2.f32 %v3252_v36  ;;  %v10571_v57 = vand.u32 4294901760, %v3260_v18 }
 0x3fd   : > { %8967 = vmatpush3.msra.mxu1 %v10571_v57  ;;  %v10602_v2 = vsub.f32 %v3260_v18, %v10571_v57 }
 0x3fe   : > { %8971 = vmatprep.subr.mxu1 %v9890_v38  ;;  %v10594_v26 = vpop.permute.xlu1 %3713 }
 0x3ff   : > { %v3717_v56 = vsel %vm2712_vm3, %v10594_v26, 0 }
 0x400   : > { %v10656_v53 = vand.u32 4294901760, %v3717_v56 }
 0x402   : > { %v4695_v42 = vpop.permute.xlu1 %4694  ;;  %v3797_v58 = vsub.f32 %v3717_v56, %v10656_v53 }
 0x403   : > { %v4698_v22 = vsel %vm2712_vm3, %v4695_v42, 0 }
 0x404   : > { %v10597_v24 = vand.u32 4294901760, %v4698_v22  ;;  %v3798_v10 = vand.u32 4294901760, %v3797_v58 }
 0x405   : > { %v9860_v47 = vpop.eup %9859 }
 0x406   : > { %v3254_v60 = vsel %vm2712_vm3, %v9860_v47, 0.0  ;;  %v4769_v43 = vsub.f32 %v4698_v22, %v10597_v24  ;;  %v5678_v50 = vpop.permute.xlu1 %5677  ;;  %v3799_v16 = vsub.f32 %v3797_v58, %v3798_v10 }
 0x407   : > { %3255 = vadd.xlane.f32.xlu0 %v3254_v60  ;;  %v5681_v27 = vsel %vm2712_vm3, %v5678_v50, 0 }
 0x408   : > { %v4770_v45 = vand.u32 4294901760, %v4769_v43  ;;  %v10633_v37 = vand.u32 4294901760, %v5681_v27  ;;  %v3800_v36 = vand.u32 4294901760, %v3799_v16 }
 0x40a   : > { %v4771_v51 = vsub.f32 %v4769_v43, %v4770_v45  ;;  %v5752_v4 = vsub.f32 %v5681_v27, %v10633_v37 }
 0x40c   : > { %v4772_v62 = vand.u32 4294901760, %v4771_v51  ;;  %v5753_v35 = vand.u32 4294901760, %v5752_v4 }
 0x40e   : > { %v5754_v30 = vsub.f32 %v5752_v4, %v5753_v35 }
 0x410   : > { %v5755_v59 = vand.u32 4294901760, %v5754_v30 }
 0x41d   : > { %3711 = vrot.lane.b32.xlu0 %v10485_v7, %s9893_s27  ;;  %v9897_v7 = vmov 3   ;;  %s9902_s27 = smov 16  }
 0x421   : > { %4696 = vrot.lane.b32.xlu0 %v10492_v19, %s9894_s28 }
 0x425   : > { %5679 = vrot.lane.b32.xlu0 %v10492_v19, %s9895_s30 }
 0x429   : > { %4170 = vperm.xlu0 %9853, %v10517_v49  }
 0x42d   : > { %4179 = vperm.xlu0 %9853, %v10532_v61  }
 0x431   : > { %4185 = vperm.xlu0 %9853, %v10535_v6  }
 0x435   : > { %9854 = vset.pattern.permute.xlu0 %v9896_v23 }
 0x436   : > { %5150 = vperm.xlu0 %9854, %v10520_v0  }
 0x43a   : > { %5159 = vperm.xlu0 %9854, %v10523_v29  }
 0x43e   : > { %5165 = vperm.xlu0 %9854, %v10529_v40  }
 0x442   : > { %5171 = vperm.xlu0 %9854, %v10538_v17  }
 0x446   : > { %9856 = vset.pattern.permute.xlu0 %v9897_v7 }
 0x447   : > { %6133 = vperm.xlu0 %9856, %v10520_v0  }
 0x44b   : > { %6136 = vperm.xlu0 %9856, %v10517_v49  }
 0x44f   : > { %6139 = vperm.xlu0 %9856, %v10526_v63  }
 0x453   : > { %6142 = vperm.xlu0 %9856, %v10523_v29  }
 0x457   : > { %6145 = vperm.xlu0 %9856, %v10532_v61   ;;  %v3344_v61 = vand.u32 4294901760, %v10602_v2 }
 0x459   : > { %v3345_v21 = vsub.f32 %v10602_v2, %v3344_v61 }
 0x45b   : > { %6148 = vperm.xlu0 %9856, %v10529_v40   ;;  %v3346_v13 = vand.u32 4294901760, %v3345_v21 }
 0x45f   : > { %6151 = vperm.xlu0 %9856, %v10535_v6  }
 0x463   : > { %6154 = vperm.xlu0 %9856, %v10538_v17  }
 0x494   : > { %v3256_v32 = vpop.xlane.xlu0 %3255 }
 0x495   : > { %9861 = vrcp.f32 %v3256_v32 }
 0x498   : > { %v3712_v44 = vpop.permute.xlu0 %3711 }
 0x499   : > { %v3715_v11 = vsel %vm2712_vm3, %v3712_v44, 0 }
 0x49a   : > { %v10653_v33 = vand.u32 4294901760, %v3715_v11 }
 0x49c   : > { %v4697_v49 = vpop.permute.xlu0 %4696  ;;  %v3786_v55 = vsub.f32 %v3715_v11, %v10653_v33 }
 0x49d   : > { %v4700_v52 = vsel %vm2712_vm3, %v4697_v49, 0 }
 0x49e   : > { %v4703_v0 = vand.u32 4294901760, %v4700_v52  ;;  %v3787_v9 = vand.u32 4294901760, %v3786_v55 }
 0x49f   : > { %v9862_v1 = vpop.eup %9861 }
 0x4a0   : > { %v3258_v29 = vmul.f32 %v9862_v1, %v9860_v47  ;;  %v4780_v31 = vsub.f32 %v4700_v52, %v4703_v0  ;;  %9057 = vmatpush3.xpose.msra.mxu0 %v4703_v0  ;;  %v5680_v25 = vpop.permute.xlu0 %5679  ;;  %v3788_v23 = vsub.f32 %v3786_v55, %v3787_v9 }
 0x4a1   : > { %9061 = vmatprep.subr.mxu0 %v9890_v38  ;;  %v5683_v28 = vsel %vm2712_vm3, %v5680_v25, 0 }
 0x4a2   : > { %v4781_v63 = vand.u32 4294901760, %v4780_v31  ;;  %v3263_v5 = vsel %vm2712_vm3, %v3258_v29, 0  ;;  %v10636_v48 = vand.u32 4294901760, %v5683_v28  ;;  %v3789_v14 = vand.u32 4294901760, %v3788_v23 }
 0x4a3   : > { %9059 = vmatmul.mubr.f32.vlgmr.msra.gmra.mrb[10].mxu0 %v4772_v62  ;;  %v10606_v40 = vand.u32 4294901760, %v3263_v5 }
 0x4a4   : > { %v4782_v6 = vsub.f32 %v4780_v31, %v4781_v63  ;;  %9063 = vmatprep.mubr.msk.f32.mxu0 %vm9889_vm1, %v9890_v38  ;;  %v5763_v39 = vsub.f32 %v5683_v28, %v10636_v48 }
 0x4a5   : > { %v3332_v17 = vsub.f32 %v3263_v5, %v10606_v40 }
 0x4a6   : > { %v4783_v41 = vand.u32 4294901760, %v4782_v6  ;;  %v5764_v8 = vand.u32 4294901760, %v5763_v39 }
 0x4a7   : > { %v3333_v20 = vand.u32 4294901760, %v3332_v17 }
 0x4a8   : > { %9062 = vmatpush3.xpose.msra.mxu0 %v4783_v41  ;;  %v5765_v54 = vsub.f32 %v5763_v39, %v5764_v8  ;;  %v4171_v18 = vpop.permute.xlu0 %4170 }
 0x4a9   : > { %9066 = vmatprep.subr.mxu0 %v9890_v38  ;;  %v3334_v12 = vsub.f32 %v3332_v17, %v3333_v20  ;;  %v4197_v62 = vrot.slane %v4171_v18, %v10100_v46 }
 0x4aa   : > { %v5766_v15 = vand.u32 4294901760, %v5765_v54 }
 0x4ab   : > { %9064 = vmatmul.mubr.f32.vlgmr.msra.gmra.mrb[10].mxu0 %v10597_v24  ;;  %v3335_v3 = vand.u32 4294901760, %v3334_v12 }
 0x4ac   : > { %9067 = vmatpush3.xpose.msra.mxu0 %v4780_v31  ;;  %9068 = vmatprep.mubr.msk.f32.mxu0 %vm9889_vm1, %v9890_v38 }
 0x4ad   : > { %8969 = vmatmul.mubr.f32.vlgmr.msra.gmra.mrb[6].mxu1 %v3335_v3  ;;  %9071 = vmatprep.subr.mxu0 %v9890_v38 }
 0x4ae   : > { %8972 = vmatpush3.msra.mxu1 %v3346_v13  ;;  %8973 = vmatprep.mubr.msk.f32.mxu1 %vm9889_vm1, %v9890_v38 }
 0x4af   : > { %8976 = vmatprep.subr.mxu1 %v9890_v38 }
 0x4b3   : > { %9069 = vmatmul.mubr.f32.vlgmr.msra.gmra.mrb[10].mxu0 %v4769_v43 }
 0x4b4   : > { %9072 = vmatpush3.xpose.msra.mxu0 %v4703_v0  ;;  %9073 = vmatprep.mubr.msk.f32.mxu0 %vm9889_vm1, %v9890_v38 }
 0x4b5   : > { %8974 = vmatmul.mubr.f32.vlgmr.msra.gmra.mrb[6].mxu1 %v10606_v40  ;;  %9076 = vmatprep.subr.mxu0 %v9890_v38 }
 0x4b6   : > { %8977 = vmatpush3.msra.mxu1 %v10602_v2  ;;  %8978 = vmatprep.mubr.msk.f32.mxu1 %vm9889_vm1, %v9890_v38 }
 0x4b7   : > { %8981 = vmatprep.subr.mxu1 %v9890_v38 }
 0x4bb   : > { %9074 = vmatmul.mubr.f32.vlgmr.msra.gmra.mrb[10].mxu0 %v4770_v45 }
 0x4bc   : > { %9077 = vmatpush3.xpose.msra.mxu0 %v4781_v63  ;;  %9078 = vmatprep.mubr.msk.f32.mxu0 %vm9889_vm1, %v9890_v38 }
 0x4bd   : > { %8979 = vmatmul.mubr.f32.vlgmr.msra.gmra.mrb[6].mxu1 %v3332_v17  ;;  %9081 = vmatprep.subr.mxu0 %v9890_v38 }
 0x4be   : > { %8982 = vmatpush3.msra.mxu1 %v10571_v57  ;;  %8983 = vmatprep.mubr.msk.f32.mxu1 %vm9889_vm1, %v9890_v38 }
 0x4bf   : > { %8986 = vmatprep.subr.mxu1 %v9890_v38 }
 0x4c3   : > { %9079 = vmatmul.mubr.f32.vlgmr.msra.gmra.mrb[10].mxu0 %v10597_v24 }
 0x4c4   : > { %9082 = vmatpush3.xpose.msra.mxu0 %v4703_v0  ;;  %9083 = vmatprep.mubr.msk.f32.mxu0 %vm9889_vm1, %v9890_v38 }
 0x4c5   : > { %8984 = vmatmul.mubr.f32.vlgmr.msra.gmra.mrb[6].mxu1 %v3333_v20  ;;  %9116 = vmatprep.subr.mxu0 %v9890_v38 }
 0x4c6   : > { %8987 = vmatpush3.msra.mxu1 %v3344_v61  ;;  %8988 = vmatprep.mubr.msk.f32.mxu1 %vm9889_vm1, %v9890_v38 }
 0x4c7   : > { %8991 = vmatprep.subr.mxu1 %v9890_v38 }
 0x4cb   : > { %9084 = vmatmul.mubr.f32.vlgmr.msra.gmra.mrb[10].mxu0 %v10597_v24  ;;  %v4168_v24 = vpop.permute.xlu1 %4167 }
 0x4cc   : > { %9117 = vmatpush3.xpose.msra.mxu0 %v10636_v48  ;;  %9118 = vmatprep.mubr.msk.f32.mxu0 %vm9889_vm1, %v9890_v38  ;;  %v4193_v5 = vrot.slane %v4168_v24, %v10100_v46 }
 0x4cd   : > { %8989 = vmatmul.mubr.f32.vlgmr.msra.gmra.mrb[6].mxu1 %v10606_v40  ;;  %9121 = vmatprep.subr.mxu0 %v9890_v38 }
 0x4ce   : > { %8992 = vmatpush3.msra.mxu1 %v10571_v57  ;;  %8993 = vmatprep.mubr.msk.f32.mxu1 %vm9889_vm1, %v9890_v38  ;;  %v4180_v57 = vpop.permute.xlu0 %4179  ;;  %v4222_v61 = vsel %vm3232_vm4, %v4197_v62, %v4193_v5 }
 0x4cf   : > { %9119 = vmatmul.mubr.f32.vlgmr.msra.gmra.mrb[12].mxu0 %v5755_v59  ;;  %8996 = vmatprep.subr.mxu1 %v9890_v38  ;;  %v4174_v43 = vpop.permute.xlu1 %4173  ;;  %v4209_v13 = vrot.slane %v4180_v57, %v10100_v46 }
 0x4d0   : > { %9122 = vmatpush3.xpose.msra.mxu0 %v5766_v15  ;;  %9123 = vmatprep.mubr.msk.f32.mxu0 %vm9889_vm1, %v9890_v38  ;;  %v4201_v6 = vrot.slane %v4174_v43, %v10100_v46 }
 0x4d1   : > { %9126 = vmatprep.subr.mxu0 %v9890_v38 }
 0x4d2   : > { %v4186_v47 = vpop.permute.xlu0 %4185  ;;  %v4223_v41 = vsel %vm3234_vm5, %v4201_v6, %v4222_v61 }
 0x4d3   : > { %v4177_v51 = vpop.permute.xlu1 %4176 }
 0x4d4   : > { %v4205_v21 = vrot.slane %v4177_v51, %v10100_v46 }
 0x4d5   : > { %8994 = vmatmul.mubr.f32.vlgmr.msra.gmra.mrb[6].mxu1 %v10606_v40 }
 0x4d6   : > { %8997 = vmatpush3.xpose.msra.mxu1 %v10656_v53  ;;  %8998 = vmatprep.mubr.msk.f32.mxu1 %vm9889_vm1, %v9890_v38  ;;  %v5151_v60 = vpop.permute.xlu0 %5150  ;;  %v4224_v27 = vsel %vm3236_vm6, %v4205_v21, %v4223_v41 }
 0x4d7   : > { %9124 = vmatmul.mubr.f32.vlgmr.msra.gmra.mrb[12].mxu0 %v10633_v37  ;;  %9001 = vmatprep.subr.mxu1 %v9890_v38  ;;  %v4183_v0 = vpop.permute.xlu1 %4182  ;;  %v5176_v17 = vrot.slane %v5151_v60, %v10100_v46 }
 0x4d8   : > { %9127 = vmatpush3.xpose.msra.mxu0 %v5763_v39  ;;  %9128 = vmatprep.mubr.msk.f32.mxu0 %vm9889_vm1, %v9890_v38  ;;  %v4217_v39 = vrot.slane %v4186_v47, %v10100_v46 }
 0x4d9   : > { %8999 = vmatmul.mubr.f32.vlgmr.msra.gmra.mrb[8].mxu1 %v3789_v14  ;;  %9131 = vmatprep.subr.mxu0 %v9890_v38 }
 0x4da   : > { %9002 = vmatpush3.xpose.msra.mxu1 %v3800_v36  ;;  %9003 = vmatprep.mubr.msk.f32.mxu1 %vm9889_vm1, %v9890_v38  ;;  %v5160_v7 = vpop.permute.xlu0 %5159 }
 0x4db   : > { %9006 = vmatprep.subr.mxu1 %v9890_v38  ;;  %v4189_v2 = vpop.permute.xlu1 %4188 }
 0x4de   : > { %v5166_v42 = vpop.permute.xlu0 %5165 }
 0x4df   : > { %9129 = vmatmul.mubr.f32.vlgmr.msra.gmra.mrb[12].mxu0 %v5752_v4  ;;  %v5154_v31 = vpop.permute.xlu1 %5153  ;;  %v4225_v4 = vsel %vm3238_vm7, %v4209_v13, %v4224_v27 }
 0x4e0   : > { %9132 = vmatpush3.xpose.msra.mxu0 %v10636_v48  ;;  %9133 = vmatprep.mubr.msk.f32.mxu0 %vm9889_vm1, %v9890_v38  ;;  %v5180_v12 = vrot.slane %v5154_v31, %v10100_v46 }
 0x4e1   : > { %9004 = vmatmul.mubr.f32.vlgmr.msra.gmra.mrb[8].mxu1 %v10653_v33  ;;  %9136 = vmatprep.subr.mxu0 %v9890_v38 }
 0x4e2   : > { %9007 = vmatpush3.xpose.msra.mxu1 %v3797_v58  ;;  %9008 = vmatprep.mubr.msk.f32.mxu1 %vm9889_vm1, %v9890_v38  ;;  %v10719_v32 = vpop.permute.xlu0 %5171  ;;  %v5205_v28 = vsel %vm3232_vm4, %v5180_v12, %v5176_v17  ;;  %v4221_v58 = vrot.slane %v4189_v2, %v10100_v46 }
 0x4e3   : > { %9011 = vmatprep.subr.mxu1 %v9890_v38  ;;  %v5157_v40 = vpop.permute.xlu1 %5156  ;;  %v5204_v23 = vrot.slane %v10719_v32, %v10100_v46 }
 0x4e6   : > { %v6134_v49 = vpop.permute.xlu0 %6133 }
 0x4e7   : > { %9134 = vmatmul.mubr.f32.vlgmr.msra.gmra.mrb[12].mxu0 %v5753_v35  ;;  %v5163_v25 = vpop.permute.xlu1 %5162  ;;  %v4213_v35 = vrot.slane %v4183_v0, %v10100_v46  ;;  %v6159_v16 = vrot.slane %v6134_v49, %v10100_v46 }
 0x4e8   : > { %9137 = vmatpush3.xpose.msra.mxu0 %v5764_v8  ;;  %9138 = vmatprep.mubr.msk.f32.mxu0 %vm9889_vm1, %v9890_v38 }
 0x4e9   : > { %9009 = vmatmul.mubr.f32.vlgmr.msra.gmra.mrb[8].mxu1 %v3786_v55  ;;  %9141 = vmatprep.subr.mxu0 %v9890_v38  ;;  %v4226_v54 = vsel %vm3240_vm8, %v4213_v35, %v4225_v4 }
 0x4ea   : > { %9012 = vmatpush3.xpose.msra.mxu1 %v10656_v53  ;;  %9013 = vmatprep.mubr.msk.f32.mxu1 %vm9889_vm1, %v9890_v38  ;;  %v6137_v52 = vpop.permute.xlu0 %6136  ;;  %v4227_v59 = vsel %vm3242_vm9, %v4217_v39, %v4226_v54 }
 0x4eb   : > { %9016 = vmatprep.subr.mxu1 %v9890_v38  ;;  %v5169_v30 = vpop.permute.xlu1 %5168  ;;  %v6163_v55 = vrot.slane %v6137_v52, %v10100_v46  ;;  %v4228_v43 = vsel %vm3244_vm10, %v4221_v58, %v4227_v59 }
 0x4ec   : > { %v5200_v18 = vrot.slane %v5169_v30, %v10100_v46 }
 0x4ee   : > { %v6140_v1 = vpop.permute.xlu0 %6139 }
 0x4ef   : > { %9139 = vmatmul.mubr.f32.vlgmr.msra.gmra.mrb[12].mxu0 %v10633_v37 }
 0x4f0   : > { %9142 = vmatpush3.xpose.msra.mxu0 %v10636_v48  ;;  %9143 = vmatprep.mubr.msk.f32.mxu0 %vm9889_vm1, %v9890_v38  ;;  %v5184_v48 = vrot.slane %v5157_v40, %v10100_v46 }
 0x4f1   : > { %9014 = vmatmul.mubr.f32.vlgmr.msra.gmra.mrb[8].mxu1 %v3787_v9  ;;  %9518 = vmatprep.subr.bf16.mxu0 %v9888_v34  ;;  %v6167_v9 = vrot.slane %v6140_v1, %v10100_v46 }
 0x4f2   : > { %9017 = vmatpush3.xpose.msra.mxu1 %v3798_v10  ;;  %9018 = vmatprep.mubr.msk.f32.mxu1 %vm9889_vm1, %v9890_v38  ;;  %v6143_v29 = vpop.permute.xlu0 %6142  ;;  %v5206_v11 = vsel %vm3234_vm5, %v5184_v48, %v5205_v28 }
 0x4f3   : > { %9021 = vmatprep.subr.mxu1 %v9890_v38  ;;  %v6171_v14 = vrot.slane %v6143_v29, %v10100_v46 }
 0x4f6   : > { %v6146_v63 = vpop.permute.xlu0 %6145 }
 0x4f7   : > { %9144 = vmatmul.mubr.f32.vlgmr.msra.gmra.mrb[12].mxu0 %v10633_v37  ;;  %v5188_v37 = vrot.slane %v5160_v7, %v10100_v46  ;;  %v6175_v57 = vrot.slane %v6146_v63, %v10100_v46 }
 0x4f8   : > { %9184 = vmatprep.mubr.msk.f32.mxu0 %vm9889_vm1, %v9890_v38 }
 0x4f9   : > { %9019 = vmatmul.mubr.f32.vlgmr.msra.gmra.mrb[8].mxu1 %v10653_v33  ;;  %v5207_v8 = vsel %vm3236_vm6, %v5188_v37, %v5206_v11 }
 0x4fa   : > { %9022 = vmatpush3.xpose.msra.mxu1 %v10656_v53  ;;  %9023 = vmatprep.mubr.msk.f32.mxu1 %vm9889_vm1, %v9890_v38  ;;  %v6149_v20 = vpop.permute.xlu0 %6148  ;;  %v5192_v53 = vrot.slane %v5163_v25, %v10100_v46 }
 0x4fb   : > { %9026 = vmatprep.subr.mxu1 %v9890_v38  ;;  %v6179_v24 = vrot.slane %v6149_v20, %v10100_v46 }
 0x4fc   : > { %v5208_v15 = vsel %vm3238_vm7, %v5192_v53, %v5207_v8 }
 0x4fe   : > { %v6152_v56 = vpop.permute.xlu0 %6151 }
 0x501   : > { %9024 = vmatmul.mubr.f32.vlgmr.msra.gmra.mrb[8].mxu1 %v10653_v33  ;;  %v5196_v33 = vrot.slane %v5166_v42, %v10100_v46 }
 0x502   : > { %9028 = vmatprep.mubr.msk.f32.mxu1 %vm9889_vm1, %v9890_v38  ;;  %v6155_v47 = vpop.permute.xlu0 %6154 }
 0x503   : > { %v5209_v10 = vsel %vm3240_vm8, %v5196_v33, %v5208_v15  ;;  %v6187_v0 = vrot.slane %v6155_v47, %v10100_v46 }
 0x504   : > { %v5210_v51 = vsel %vm3242_vm9, %v5200_v18, %v5209_v10 }
 0x59e   : > { %v5144_v26 = vpop.f32.mrb[10].mxu0 }
 0x59f   : > { %v9085_v22 = vpop.f32.mrb[11].mxu0  ;;  %v5148_v60 = vmul.f32 0.35355338, %v5144_v26  ;;  %v5211_v26 = vsel %vm3244_vm10, %v5204_v23, %v5210_v51 }
 0x5a0   : > { %v6188_v22 = vsel %vm3232_vm4, %v6163_v55, %v6159_v16 }
 0x5a1   : > { %v6189_v32 = vsel %vm3234_vm5, %v6167_v9, %v6188_v22  ;;  %v5213_v31 = vadd.f32 %v5211_v26, %v5148_v60 }
 0x5a2   : > { %v6190_v52 = vsel %vm3236_vm6, %v6171_v14, %v6189_v32 }
 0x5a3   : > { %v6191_v1 = vsel %vm3238_vm7, %v6175_v57, %v6190_v52  ;;  %v5214_v40 = vsel %vm2712_vm3, %v5213_v31, -inf }
 0x5a4   : > { %v6192_v62 = vsel %vm3240_vm8, %v6179_v24, %v6191_v1 }
 0x5a8   : > { %v10721_v44 = vpop.f32.mrb[6].mxu1 }
 0x5a9   : > { %v8995_v45 = vpop.f32.mrb[7].mxu1 }
 0x5aa   : > { %v6183_v45 = vrot.slane %v6152_v56, %v10100_v46 }
 0x5ac   : > { %v6193_v63 = vsel %vm3242_vm9, %v6183_v45, %v6192_v62 }
 0x5ad   : > { %v6194_v5 = vsel %vm3244_vm10, %v6187_v0, %v6193_v63 }
 0x5ca   : > { %v6127_v3 = vpop.f32.mrb[12].mxu0 }
 0x5cb   : > { %v9145_v50 = vpop.f32.mrb[13].mxu0  ;;  %v6131_v2 = vmul.f32 0.35355338, %v6127_v3 }
 0x5cd   : > { %v6196_v61 = vadd.f32 %v6194_v5, %v6131_v2 }
 0x5cf   : > { %v6197_v46 = vsel %vm2712_vm3, %v6196_v61, -inf }
 0x5d4   : > { %v4161_v36 = vpop.f32.mrb[8].mxu1 }
 0x5d5   : > { %v4165_v7 = vmul.f32 0.35355338, %v4161_v36  ;;  %v9025_v42 = vpop.f32.mrb[9].mxu1 }
 0x5d7   : > { %v4230_v49 = vadd.f32 %v4228_v43, %v4165_v7 }
 0x5d9   : > { %v4231_v29 = vsel %vm2712_vm3, %v4230_v49, -inf }
 0x5da   : > { %4232 = vmax.xlane.f32.xlu1 %v4231_v29 }
 0x5de   : > { %5215 = vmax.xlane.f32.xlu1 %v5214_v40 }
 0x5e2   : > { %6198 = vmax.xlane.f32.xlu1 %v6197_v46 }
 0x5f3   : > { %4242 = vrot.lane.b32.xlu1 %v10492_v19, %s9898_s0 }
 0x667   : > { %v4233_v6 = vpop.xlane.xlu1 %4232 }
 0x668   : > { %v4234_v17 = vsub.f32 %v4230_v49, %v4233_v6 }
 0x66a   : > { %v4235_v41 = vmul.f32 1.442695, %v4234_v17  ;;  %v6676_v17 = vld [vmem:[%s11095_s14] sm:$0xff] }
 0x66b   : > { %v5216_v20 = vpop.xlane.xlu1 %5215 }
 0x66c   : > { %9863 = vpow2.f32 %v4235_v41  ;;  %v5217_v21 = vsub.f32 %v5213_v31, %v5216_v20  ;;  %v6677_v41 = vld [vmem:[%s11095_s14 + $0x8] sm:$0xff]  ;;  %v6684_v20 = vand.u32 4294901760, %v6676_v17 }
 0x66e   : > { %v5218_v12 = vmul.f32 1.442695, %v5217_v21  ;;  %v6687_v21 = vand.u32 4294901760, %v6677_v41 }
 0x66f   : > { %v6199_v3 = vpop.xlane.xlu1 %6198 }
 0x670   : > { %9865 = vpow2.f32 %v5218_v12  ;;  %v6200_v48 = vsub.f32 %v6196_v61, %v6199_v3  ;;  %v10845_v12 = vsub.f32 %v6676_v17, %v6684_v20  ;;  %v10847_v3 = vsub.f32 %v6677_v41, %v6687_v21 }
 0x672   : > { %v6201_v4 = vmul.f32 1.442695, %v6200_v48 }
 0x673   : > { %v4243_v13 = vpop.permute.xlu1 %4242 }
 0x674   : > { %v4249_v50 = vand.u32 4294901760, %v4243_v13  ;;  %9867 = vpow2.f32 %v6201_v4 }
 0x676   : > { %v9864_v25 = vpop.eup %9863  ;;  %9027 = vmatpush3.msra.mxu1 %v4249_v50  ;;  %v4326_v8 = vsub.f32 %v4243_v13, %v4249_v50  ;;  %v6765_v13 = vand.u32 4294901760, %v10845_v12 }
 0x677   : > { %v4237_v27 = vsel %vm2712_vm3, %v9864_v25, 0.0  ;;  %9031 = vmatprep.subr.mxu1 %v9890_v38 }
 0x678   : > { %4238 = vadd.xlane.f32.xlu0 %v4237_v27  ;;  %v4327_v54 = vand.u32 4294901760, %v4326_v8 }
 0x67a   : > { %v9866_v28 = vpop.eup %9865  ;;  %v4328_v58 = vsub.f32 %v4326_v8, %v4327_v54 }
 0x67b   : > { %v5220_v37 = vsel %vm2712_vm3, %v9866_v28, 0.0 }
 0x67c   : > { %5221 = vadd.xlane.f32.xlu1 %v5220_v37  ;;  %v4329_v9 = vand.u32 4294901760, %v4328_v58 }
 0x67e   : > { %v10778_v39 = vpop.eup %9867 }
 0x67f   : > { %v6203_v11 = vsel %vm2712_vm3, %v10778_v39, 0.0 }
 0x68d   : > { %6208 = vrot.lane.b32.xlu1 %v10492_v19, %s9899_s1 }
 0x68e   : > { %5225 = vrot.lane.b32.xlu0 %v10492_v19, %s9900_s5  ;;  %s9903_s5 = smov 24  }
 0x6ad   : > { %6204 = vadd.xlane.f32.xlu0 %v6203_v11  ;;  %v6678_v11 = vld [vmem:[%s11095_s14 + $0x10] sm:$0xff] }
 0x705   : > { %v4239_v56 = vpop.xlane.xlu0 %4238 }
 0x706   : > { %9869 = vrcp.f32 %v4239_v56  ;;  %v6679_v56 = vld [vmem:[%s11095_s14 + $0x18] sm:$0xff] }
 0x709   : > { %v5222_v10 = vpop.xlane.xlu1 %5221  ;;  %v5226_v36 = vpop.permute.xlu0 %5225 }
 0x70a   : > { %9871 = vrcp.f32 %v5222_v10  ;;  %v5232_v57 = vand.u32 4294901760, %v5226_v36 }
 0x70c   : > { %v5309_v60 = vsub.f32 %v5226_v36, %v5232_v57 }
 0x70d   : > { %v6209_v0 = vpop.permute.xlu1 %6208 }
 0x70e   : > { %v5310_v42 = vand.u32 4294901760, %v5309_v60  ;;  %v6215_v1 = vand.u32 4294901760, %v6209_v0 }
 0x710   : > { %v9870_v35 = vpop.eup %9869  ;;  %v5311_v24 = vsub.f32 %v5309_v60, %v5310_v42  ;;  %v6292_v29 = vsub.f32 %v6209_v0, %v6215_v1 }
 0x711   : > { %v4241_v33 = vmul.f32 %v9870_v35, %v9864_v25  ;;  %v6766_v25 = vsub.f32 %v10845_v12, %v6765_v13  ;;  %v6690_v35 = vand.u32 4294901760, %v6678_v11 }
 0x712   : > { %v5312_v32 = vand.u32 4294901760, %v5311_v24  ;;  %v6293_v62 = vand.u32 4294901760, %v6292_v29 }
 0x713   : > { %v4246_v53 = vsel %vm2712_vm3, %v4241_v33, 0  ;;  %v6778_v33 = vsub.f32 %v6678_v11, %v6690_v35  ;;  %v7208_v11 = vld [vmem:[%s11099_s18 + $0x10] sm:$0xff] }
 0x714   : > { %v4314_v30 = vand.u32 4294901760, %v4246_v53  ;;  %v9872_v23 = vpop.eup %9871  ;;  %v6294_v5 = vsub.f32 %v6292_v29, %v6293_v62 }
 0x715   : > { %v5224_v16 = vmul.f32 %v9872_v23, %v9866_v28  ;;  %v6767_v28 = vand.u32 4294901760, %v6766_v25  ;;  %v9531_v23 = vpack.c.bf16 %v10847_v3, %v10845_v12  ;;  %v9877_v12 = vld [vmem:[%s10033_s23] sm:$0xff] }
 0x716   : > { %v4315_v55 = vsub.f32 %v4246_v53, %v4314_v30  ;;  %v6295_v61 = vand.u32 4294901760, %v6294_v5 }
 0x717   : > { %v5229_v14 = vsel %vm2712_vm3, %v5224_v16, 0 }
 0x718   : > { %v4316_v19 = vand.u32 4294901760, %v4315_v55  ;;  %v5297_v18 = vand.u32 4294901760, %v5229_v14 }
 0x71a   : > { %v4317_v59 = vsub.f32 %v4315_v55, %v4316_v19  ;;  %v5298_v47 = vsub.f32 %v5229_v14, %v5297_v18 }
 0x71c   : > { %v4318_v15 = vand.u32 4294901760, %v4317_v59  ;;  %v5299_v7 = vand.u32 4294901760, %v5298_v47 }
 0x71e   : > { %9029 = vmatmul.mubr.f32.vlgmr.msra.gmra.mrb[10].mxu1 %v4318_v15  ;;  %v5300_v22 = vsub.f32 %v5298_v47, %v5299_v7 }
 0x71f   : > { %9032 = vmatpush3.msra.mxu1 %v4329_v9  ;;  %9033 = vmatprep.mubr.msk.f32.mxu1 %vm9889_vm1, %v9890_v38  ;;  %v9519_v9 = vpack.c.bf16 %v6687_v21, %v6684_v20  ;;  %v8371_v21 = vld [vmem:[%s11096_s15] ss:$0 sm:$0xff] }
 0x720   : > { %9036 = vmatprep.subr.mxu1 %v9890_v38  ;;  %v5301_v43 = vand.u32 4294901760, %v5300_v22 }
 0x721   : > { %9520 = vmatpush3.bf16.msra.mxu0 %v9519_v9 }
 0x722   : > { %9521 = vmatprep.subr.bf16.mxu0 %v9888_v34 }
 0x726   : > { %9034 = vmatmul.mubr.f32.vlgmr.msra.gmra.mrb[10].mxu1 %v4314_v30 }
 0x727   : > { %9037 = vmatpush3.msra.mxu1 %v4326_v8  ;;  %9038 = vmatprep.mubr.msk.f32.mxu1 %vm9889_vm1, %v9890_v38  ;;  %v6693_v8 = vand.u32 4294901760, %v6679_v56 }
 0x728   : > { %9041 = vmatprep.subr.mxu1 %v9890_v38 }
 0x729   : > { %v6785_v53 = vsub.f32 %v6679_v56, %v6693_v8  ;;  %v9522_v10 = vpack.c.bf16 %v6693_v8, %v6690_v35  ;;  %v7209_v8 = vld [vmem:[%s11099_s18 + $0x18] sm:$0xff] }
 0x72b   : > { %9523 = vmatpush3.bf16.msra.mxu0 %v9522_v10  ;;  %v9534_v36 = vpack.c.bf16 %v6785_v53, %v6778_v33 }
 0x72c   : > { %9530 = vmatprep.subr.bf16.mxu0 %v9888_v34 }
 0x72e   : > { %9039 = vmatmul.mubr.f32.vlgmr.msra.gmra.mrb[10].mxu1 %v4315_v55 }
 0x72f   : > { %9042 = vmatpush3.msra.mxu1 %v4249_v50  ;;  %9043 = vmatprep.mubr.msk.f32.mxu1 %vm9889_vm1, %v9890_v38 }
 0x730   : > { %9046 = vmatprep.subr.mxu1 %v9890_v38 }
 0x736   : > { %9044 = vmatmul.mubr.f32.vlgmr.msra.gmra.mrb[10].mxu1 %v4316_v19 }
 0x737   : > { %9047 = vmatpush3.msra.mxu1 %v4327_v54  ;;  %9048 = vmatprep.mubr.msk.f32.mxu1 %vm9889_vm1, %v9890_v38  ;;  %v6786_v54 = vand.u32 4294901760, %v6785_v53 }
 0x738   : > { %9051 = vmatprep.subr.mxu1 %v9890_v38 }
 0x739   : > { %v6787_v19 = vsub.f32 %v6785_v53, %v6786_v54  ;;  %v7230_v53 = vand.u32 4294901760, %v7209_v8 }
 0x73a   : > { %v6205_v45 = vpop.xlane.xlu0 %6204 }
 0x73b   : > { %9873 = vrcp.f32 %v6205_v45  ;;  %v6788_v59 = vand.u32 4294901760, %v6787_v19 }
 0x73e   : > { %9049 = vmatmul.mubr.f32.vlgmr.msra.gmra.mrb[10].mxu1 %v4314_v30 }
 0x73f   : > { %9052 = vmatpush3.msra.mxu1 %v4249_v50  ;;  %9053 = vmatprep.mubr.msk.f32.mxu1 %vm9889_vm1, %v9890_v38  ;;  %v6772_v50 = vand.u32 4294901760, %v10847_v3 }
 0x740   : > { %9086 = vmatprep.subr.mxu1 %v9890_v38 }
 0x741   : > { %v6773_v27 = vsub.f32 %v10847_v3, %v6772_v50 }
 0x743   : > { %v6774_v37 = vand.u32 4294901760, %v6773_v27 }
 0x745   : > { %v9874_v49 = vpop.eup %9873  ;;  %v9525_v48 = vpack.c.bf16 %v6774_v37, %v6767_v28 }
 0x746   : > { %9054 = vmatmul.mubr.f32.vlgmr.msra.gmra.mrb[10].mxu1 %v4314_v30  ;;  %v6207_v51 = vmul.f32 %v9874_v49, %v10778_v39  ;;  %v6779_v30 = vand.u32 4294901760, %v6778_v33 }
 0x747   : > { %9087 = vmatpush3.msra.mxu1 %v5232_v57  ;;  %9088 = vmatprep.mubr.msk.f32.mxu1 %vm9889_vm1, %v9890_v38 }
 0x748   : > { %9091 = vmatprep.subr.mxu1 %v9890_v38  ;;  %v6212_v52 = vsel %vm2712_vm3, %v6207_v51, 0  ;;  %v6780_v55 = vsub.f32 %v6778_v33, %v6779_v30  ;;  %v7227_v33 = vand.u32 4294901760, %v7208_v11 }
 0x749   : > { %v6280_v26 = vand.u32 4294901760, %v6212_v52 }
 0x74a   : > { %9089 = vmatmul.mubr.f32.vlgmr.msra.gmra.mrb[12].mxu1 %v5301_v43  ;;  %v6781_v58 = vand.u32 4294901760, %v6780_v55  ;;  %v7315_v19 = vsub.f32 %v7208_v11, %v7227_v33 }
 0x74b   : > { %9092 = vmatpush3.msra.mxu1 %v5312_v32  ;;  %9093 = vmatprep.mubr.msk.f32.mxu1 %vm9889_vm1, %v9890_v38  ;;  %v6281_v2 = vsub.f32 %v6212_v52, %v6280_v26 }
 0x74c   : > { %9096 = vmatprep.subr.mxu1 %v9890_v38  ;;  %v9528_v15 = vpack.c.bf16 %v6788_v59, %v6781_v58  ;;  %v7322_v58 = vsub.f32 %v7209_v8, %v7230_v53  ;;  %v10914_v59 = vpack.c.bf16 %v7230_v53, %v7227_v33 }
 0x74d   : > { %v6282_v31 = vand.u32 4294901760, %v6281_v2 }
 0x74f   : > { %v6283_v63 = vsub.f32 %v6281_v2, %v6282_v31 }
 0x751   : > { %v6284_v40 = vand.u32 4294901760, %v6283_v63 }
 0x752   : > { %9094 = vmatmul.mubr.f32.vlgmr.msra.gmra.mrb[12].mxu1 %v5297_v18 }
 0x753   : > { %9097 = vmatpush3.msra.mxu1 %v5309_v60  ;;  %9098 = vmatprep.mubr.msk.f32.mxu1 %vm9889_vm1, %v9890_v38 }
 0x754   : > { %9101 = vmatprep.subr.mxu1 %v9890_v38 }
 0x75a   : > { %9099 = vmatmul.mubr.f32.vlgmr.msra.gmra.mrb[12].mxu1 %v5298_v47 }
 0x75b   : > { %9102 = vmatpush3.msra.mxu1 %v5232_v57  ;;  %9103 = vmatprep.mubr.msk.f32.mxu1 %vm9889_vm1, %v9890_v38 }
 0x75c   : > { %9106 = vmatprep.subr.mxu1 %v9890_v38 }
 0x762   : > { %9104 = vmatmul.mubr.f32.vlgmr.msra.gmra.mrb[12].mxu1 %v5299_v7 }
 0x763   : > { %9107 = vmatpush3.msra.mxu1 %v5310_v42  ;;  %9108 = vmatprep.mubr.msk.f32.mxu1 %vm9889_vm1, %v9890_v38 }
 0x764   : > { %9111 = vmatprep.subr.mxu1 %v9890_v38 }
 0x76a   : > { %9109 = vmatmul.mubr.f32.vlgmr.msra.gmra.mrb[12].mxu1 %v5297_v18 }
 0x76b   : > { %9112 = vmatpush3.msra.mxu1 %v5232_v57  ;;  %9113 = vmatprep.mubr.msk.f32.mxu1 %vm9889_vm1, %v9890_v38  ;;  %v9546_v57 = vpack.c.bf16 %v6786_v54, %v6779_v30 }
 0x76c   : > { %9146 = vmatprep.subr.mxu1 %v9890_v38 }
 0x772   : > { %9114 = vmatmul.mubr.f32.vlgmr.msra.gmra.mrb[12].mxu1 %v5297_v18  ;;  %v9543_v18 = vpack.c.bf16 %v6772_v50, %v6765_v13 }
 0x773   : > { %9147 = vmatpush3.msra.mxu1 %v6215_v1  ;;  %9148 = vmatprep.mubr.msk.f32.mxu1 %vm9889_vm1, %v9890_v38 }
 0x774   : > { %9151 = vmatprep.subr.mxu1 %v9890_v38 }
 0x776   : > { %9149 = vmatmul.mubr.f32.vlgmr.msra.gmra.mrb[14].mxu1 %v6284_v40 }
 0x777   : > { %9152 = vmatpush3.msra.mxu1 %v6295_v61  ;;  %9153 = vmatprep.mubr.msk.f32.mxu1 %vm9889_vm1, %v9890_v38 }
 0x778   : > { %9156 = vmatprep.subr.mxu1 %v9890_v38 }
 0x77e   : > { %9154 = vmatmul.mubr.f32.vlgmr.msra.gmra.mrb[14].mxu1 %v6280_v26 }
 0x77f   : > { %9157 = vmatpush3.msra.mxu1 %v6292_v29  ;;  %9158 = vmatprep.mubr.msk.f32.mxu1 %vm9889_vm1, %v9890_v38 }
 0x780   : > { %9161 = vmatprep.subr.mxu1 %v9890_v38 }
 0x786   : > { %9159 = vmatmul.mubr.f32.vlgmr.msra.gmra.mrb[14].mxu1 %v6281_v2 }
 0x787   : > { %9162 = vmatpush3.msra.mxu1 %v6215_v1  ;;  %9163 = vmatprep.mubr.msk.f32.mxu1 %vm9889_vm1, %v9890_v38 }
 0x788   : > { %9166 = vmatprep.subr.mxu1 %v9890_v38 }
 0x78e   : > { %9164 = vmatmul.mubr.f32.vlgmr.msra.gmra.mrb[14].mxu1 %v6282_v31 }
 0x78f   : > { %9167 = vmatpush3.msra.mxu1 %v6293_v62  ;;  %9168 = vmatprep.mubr.msk.f32.mxu1 %vm9889_vm1, %v9890_v38 }
 0x790   : > { %9171 = vmatprep.subr.mxu1 %v9890_v38 }
 0x796   : > { %9169 = vmatmul.mubr.f32.vlgmr.msra.gmra.mrb[14].mxu1 %v6280_v26 }
 0x797   : > { %9172 = vmatpush3.msra.mxu1 %v6215_v1  ;;  %9173 = vmatprep.mubr.msk.f32.mxu1 %vm9889_vm1, %v9890_v38 }
 0x798   : > { %9524 = vmatprep.subr.bf16.mxu1 %v9888_v34 }
 0x79e   : > { %9174 = vmatmul.mubr.f32.vlgmr.msra.gmra.mrb[14].mxu1 %v6280_v26 }
 0x79f   : > { %9195 = vmatprep.mubr.msk.f32.mxu1 %vm9889_vm1, %v9890_v38  ;;  %9526 = vmatpush3.bf16.msra.mxu1 %v9525_v48 }
 0x7a0   : > { %9527 = vmatprep.subr.bf16.mxu1 %v9888_v34 }
 0x7a3   : > { %9529 = vmatpush3.bf16.msra.mxu1 %v9528_v15 }
 0x7a4   : > { %9536 = vmatprep.subr.bf16.mxu1 %v9888_v34 }
 0x819   : > { %v4690_v46 = vpop.f32.mrb[10].mxu1 }
 0x81a   : > { %6661 = vrot.lane.b32.xlu1 %v4690_v46, %s9901_s24  ;;  %v9055_v6 = vpop.f32.mrb[11].mxu1  ;;  %s729_s24 = scalar_lea.vmem %s11103_s22, %s10027_s29 }
 0x845   : > { %v5673_v4 = vpop.f32.mrb[12].mxu1 }
 0x846   : > { %6665 = vrot.lane.b32.xlu1 %v5673_v4, %s9902_s27  ;;  %v9115_v39 = vpop.f32.mrb[13].mxu1  ;;  %v7206_v4 = vld [vmem:[%s11099_s18] sm:$0xff] }
 0x847   : > { %v7207_v39 = vld [vmem:[%s11099_s18 + $0x8] sm:$0xff]  ;;  %v7221_v56 = vand.u32 4294901760, %v7206_v4 }
 0x848   : > { %v7224_v35 = vand.u32 4294901760, %v7207_v39 }
 0x849   : > { %v7301_v54 = vsub.f32 %v7206_v4, %v7221_v56 }
 0x84a   : > { %v10911_v30 = vpack.c.bf16 %v7224_v35, %v7221_v56  ;;  %v7308_v55 = vsub.f32 %v7207_v39, %v7224_v35  ;;  %v7712_v56 = vld [vmem:[%s11101_s20 + $0x30] sm:$0xff]  ;;  %v7713_v35 = vld [vmem:[%s11101_s20 + $0x38] sm:$0xff] }
 0x84b   : > { %v7302_v15 = vand.u32 4294901760, %v7301_v54  ;;  %v7744_v8 = vand.u32 4294901760, %v7712_v56  ;;  %v7747_v33 = vand.u32 4294901760, %v7713_v35 }
 0x84d   : > { %v10998_v53 = vpack.c.bf16 %v7747_v33, %v7744_v8 }
 0x871   : > { %v6656_v16 = vpop.f32.mrb[14].mxu1 }
 0x872   : > { %6669 = vrot.lane.b32.xlu1 %v6656_v16, %s9903_s5  ;;  %v9175_v14 = vpop.f32.mrb[15].mxu1 }
 0x88c   : > { %v6662_v47 = vpop.permute.xlu1 %6661 }
 0x88d   : > { %v6672_v7 = vsel %vm2712_vm3, %v10721_v44, %v6662_v47 }
 0x8b8   : > { %v6666_v60 = vpop.permute.xlu1 %6665 }
 0x8b9   : > { %v6673_v42 = vsel %vm1927_vm2, %v6672_v7, %v6666_v60 }
 0x8e4   : > { %v6670_v22 = vpop.permute.xlu1 %6669 }
 0x8e5   : > { %v6675_v24 = vsel %vm6674_vm11, %v6673_v42, %v6670_v22 }
 0x8e6   : > { %v6681_v43 = vsel %vm733_vm0, %v6675_v24, 0  ;;  %v9567_v24 = vpack.c.bf16 %v7308_v55, %v7301_v54 }
 0x8e7   : > { %v6752_v32 = vand.u32 4294901760, %v6681_v43 }
 0x8e9   : > { %v6753_v45 = vsub.f32 %v6681_v43, %v6752_v32  ;;  %9196 = vmatmul.mubr.f32.vlgmr.msra.gmra.mrb[16].mxu1 %v6752_v32  ;;  %v9570_v43 = vpack.c.bf16 %v7322_v58, %v7315_v19 }
 0x8ea   : > { %9538 = vmatpush3.bf16.msra.mxu1 %v9519_v9  ;;  %9217 = vmatprep.mubr.msk.f32.mxu1 %vm9889_vm1, %v9890_v38 }
 0x8eb   : > { %9539 = vmatprep.subr.bf16.mxu1 %v9888_v34  ;;  %v6754_v49 = vand.u32 4294901760, %v6753_v45 }
 0x8ed   : > { %v6755_v51 = vsub.f32 %v6753_v45, %v6754_v49 }
 0x8ee   : > { %9541 = vmatpush3.bf16.msra.mxu1 %v9522_v10 }
 0x8ef   : > { %9548 = vmatprep.subr.bf16.mxu1 %v9888_v34  ;;  %v6756_v44 = vand.u32 4294901760, %v6755_v51  ;;  %v7707_v51 = vld [vmem:[%s11101_s20 + $0x8] sm:$0xff] }
 0x8f1   : > { %9218 = vmatmul.mubr.f32.vlgmr.msra.gmra.mrb[18].mxu1 %v6754_v49  ;;  %9185 = vmatmul.mubr.f32.vlgmr.msra.gmra.mrb[14].mxu0 %v6756_v44  ;;  %v7706_v49 = vld [vmem:[%s11101_s20] sm:$0xff] }
 0x8f2   : > { %9532 = vmatpush3.bf16.msra.mxu0 %v9531_v23  ;;  %9550 = vmatpush3.bf16.msra.mxu1 %v9519_v9  ;;  %v7309_v9 = vand.u32 4294901760, %v7308_v55  ;;  %v7726_v44 = vand.u32 4294901760, %v7706_v49 }
 0x8f3   : > { %9533 = vmatprep.subr.bf16.mxu0 %v9888_v34  ;;  %9551 = vmatprep.subr.bf16.mxu1 %v9888_v34 }
 0x8f4   : > { %9206 = vmatprep.mubr.msk.f32.mxu0 %vm9889_vm1, %v9890_v38  ;;  %9239 = vmatprep.mubr.msk.f32.mxu1 %vm9889_vm1, %v9890_v38  ;;  %v7310_v23 = vsub.f32 %v7308_v55, %v7309_v9 }
 0x8f6   : > { %9535 = vmatpush3.bf16.msra.mxu0 %v9534_v36  ;;  %9553 = vmatpush3.bf16.msra.mxu1 %v9522_v10  ;;  %v7303_v10 = vsub.f32 %v7301_v54, %v7302_v15  ;;  %v7311_v14 = vand.u32 4294901760, %v7310_v23  ;;  %v7316_v36 = vand.u32 4294901760, %v7315_v19 }
 0x8f7   : > { %9542 = vmatprep.subr.bf16.mxu0 %v9888_v34  ;;  %9590 = vmatprep.subr.bf16.mxu1 %v9888_v34 }
 0x8f8   : > { %v7304_v16 = vand.u32 4294901760, %v7303_v10  ;;  %v7317_v47 = vsub.f32 %v7315_v19, %v7316_v36 }
 0x8f9   : > { %9207 = vmatmul.mubr.f32.vlgmr.msra.gmra.mrb[16].mxu0 %v6753_v45  ;;  %9240 = vmatmul.mubr.f32.vlgmr.msra.gmra.mrb[20].mxu1 %v6752_v32 }
 0x8fa   : > { %9544 = vmatpush3.bf16.msra.mxu0 %v9543_v18  ;;  %9228 = vmatprep.mubr.msk.f32.mxu0 %vm9889_vm1, %v9890_v38  ;;  %v7323_v18 = vand.u32 4294901760, %v7322_v58  ;;  %v7318_v7 = vand.u32 4294901760, %v7317_v47 }
 0x8fb   : > { %9545 = vmatprep.subr.bf16.mxu0 %v9888_v34  ;;  %9324 = vmatprep.mubr.msk.f32.mxu1 %vm9889_vm1, %v9890_v38 }
 0x8fc   : > { %v7324_v60 = vsub.f32 %v7322_v58, %v7323_v18  ;;  %v9582_v45 = vpack.c.bf16 %v7323_v18, %v7316_v36  ;;  %v11009_v58 = vsub.f32 %v7712_v56, %v7744_v8 }
 0x8fe   : > { %9547 = vmatpush3.bf16.msra.mxu0 %v9546_v57  ;;  %v9561_v57 = vpack.c.bf16 %v7311_v14, %v7304_v16  ;;  %v7325_v42 = vand.u32 4294901760, %v7324_v60 }
 0x8ff   : > { %9554 = vmatprep.subr.bf16.mxu0 %v9888_v34 }
 0x900   : > { %v9564_v22 = vpack.c.bf16 %v7325_v42, %v7318_v7 }
 0x901   : > { %9229 = vmatmul.mubr.f32.vlgmr.msra.gmra.mrb[18].mxu0 %v6752_v32  ;;  %v9579_v32 = vpack.c.bf16 %v7309_v9, %v7302_v15 }
 0x902   : > { %9250 = vmatprep.mubr.msk.f32.mxu0 %vm9889_vm1, %v9890_v38  ;;  %9556 = vmatpush3.bf16.msra.mxu0 %v10911_v30 }
 0x903   : > { %9557 = vmatprep.subr.bf16.mxu0 %v9888_v34 }
 0x906   : > { %9559 = vmatpush3.bf16.msra.mxu0 %v10914_v59 }
 0x907   : > { %9560 = vmatprep.subr.bf16.mxu0 %v9888_v34 }
 0x9bc   : > { %v6849_v52 = vpop.f32.mrb[16].mxu1 }
 0x9bd   : > { %v9197_v0 = vpop.f32.mrb[17].mxu1 }
 0x9c4   : > { %v7006_v26 = vpop.f32.mrb[18].mxu1  ;;  %v6758_v1 = vpop.f32.mrb[14].mxu0 }
 0x9c5   : > { %v6850_v2 = vadd.f32 %v6849_v52, %v6758_v1  ;;  %v9219_v29 = vpop.f32.mrb[19].mxu1  ;;  %v9186_v31 = vpop.f32.mrb[15].mxu0  ;;  %v7729_v52 = vand.u32 4294901760, %v7707_v51 }
 0x9c7   : > { %v10925_v0 = vpack.c.bf16 %v7729_v52, %v7726_v44  ;;  %v10929_v1 = vsub.f32 %v7707_v51, %v7729_v52 }
 0x9c9   : > { %9592 = vmatpush3.bf16.msra.mxu1 %v10925_v0  ;;  %v7818_v9 = vand.u32 4294901760, %v10929_v1 }
 0x9ca   : > { %9593 = vmatprep.subr.bf16.mxu1 %v9888_v34 }
 0x9cb   : > { %v7819_v23 = vsub.f32 %v10929_v1, %v7818_v9 }
 0x9cc   : > { %v6929_v62 = vpop.f32.mrb[16].mxu0  ;;  %v7164_v63 = vpop.f32.mrb[20].mxu1 }
 0x9cd   : > { %v6930_v5 = vadd.f32 %v6929_v62, %v6850_v2  ;;  %v9208_v40 = vpop.f32.mrb[17].mxu0  ;;  %v9241_v61 = vpop.f32.mrb[21].mxu1  ;;  %v7820_v14 = vand.u32 4294901760, %v7819_v23 }
 0x9ce   : > { %v8373_v40 = vld [vmem:[%s11098_s17] ss:$0 sm:$0xff] }
 0x9cf   : > { %v7007_v46 = vadd.f32 %v7006_v26, %v6930_v5  ;;  %v10927_v26 = vsub.f32 %v7706_v49, %v7726_v44  ;;  %v7853_v44 = vand.u32 4294901760, %v11009_v58 }
 0x9d1   : > { %v7811_v15 = vand.u32 4294901760, %v10927_v26 }
 0x9d3   : > { %v7812_v10 = vsub.f32 %v10927_v26, %v7811_v15 }
 0x9d4   : > { %v7089_v6 = vpop.f32.mrb[18].mxu0 }
 0x9d5   : > { %v7090_v17 = vadd.f32 %v7089_v6, %v7007_v46  ;;  %v9230_v41 = vpop.f32.mrb[19].mxu0  ;;  %v7813_v16 = vand.u32 4294901760, %v7812_v10 }
 0x9d7   : > { %v7165_v20 = vadd.f32 %v7164_v63, %v7090_v17  ;;  %v8372_v63 = vld [vmem:[%s11097_s16] ss:$0 sm:$0xff] }
 0x9d9   : > { %v7168_v3 = vadd.f32 %v9877_v12, %v7165_v20 }
 0x9db   : > { %v10893_v13 = vadd.f32 %v8371_v21, %v7168_v3  ;;  %v7708_v3 = vld [vmem:[%s11101_s20 + $0x10] sm:$0xff] }
 0x9dd   : > { %v7179_v50 = vsel %vm733_vm0, %v10893_v13, 0.0 }
 0x9de   : > { %7180 = vadd.xlane.f32.xlu0 %v7179_v50  ;;  %v7709_v50 = vld [vmem:[%s11101_s20 + $0x18] sm:$0xff] }
 0xa6b   : > { %v7181_v25 = vpop.xlane.xlu0 %7180 }
 0xa6c   : > { %v7182_v27 = vmul.f32 0.03125, %v7181_v25  ;;  %v7732_v25 = vand.u32 4294901760, %v7708_v3 }
 0xa6e   : > { %v7183_v28 = vsub.f32 %v10893_v13, %v7182_v27  ;;  %v7735_v27 = vand.u32 4294901760, %v7709_v50 }
 0xa70   : > { %v7184_v37 = vmul.f32 %v7183_v28, %v7183_v28  ;;  %v11002_v54 = vsub.f32 %v7709_v50, %v7735_v27 }
 0xa72   : > { %v7185_v48 = vsel %vm733_vm0, %v7184_v37, 0.0  ;;  %v7710_v37 = vld [vmem:[%s11101_s20 + $0x20] sm:$0xff]  ;;  %v7832_v18 = vand.u32 4294901760, %v11002_v54 }
 0xa73   : > { %7186 = vadd.xlane.f32.xlu1 %v7185_v48  ;;  %v7711_v48 = vld [vmem:[%s11101_s20 + $0x28] sm:$0xff]  ;;  %v7738_v4 = vand.u32 4294901760, %v7710_v37 }
 0xa74   : > { %v7741_v39 = vand.u32 4294901760, %v7711_v48  ;;  %v7833_v60 = vsub.f32 %v11002_v54, %v7832_v18 }
 0xa75   : > { %v11004_v55 = vsub.f32 %v7710_v37, %v7738_v4 }
 0xa76   : > { %v10986_v11 = vpack.c.bf16 %v7741_v39, %v7738_v4  ;;  %v11006_v19 = vsub.f32 %v7711_v48, %v7741_v39  ;;  %v7834_v42 = vand.u32 4294901760, %v7833_v60 }
 0xb00   : > { %v7187_v2 = vpop.xlane.xlu1 %7186 }
 0xb01   : > { %v7188_v29 = vmul.f32 0.03125, %v7187_v2 }
 0xb03   : > { %v7189_v31 = vadd.f32 1e-05, %v7188_v29  ;;  %v7854_v29 = vsub.f32 %v11009_v58, %v7853_v44 }
 0xb05   : > { %9875 = vrsqrt.f32 %v7189_v31 }
 0xb0f   : > { %v9876_v62 = vpop.eup %9875 }
 0xb10   : > { %v7191_v5 = vmul.f32 %v9876_v62, %v7183_v28  ;;  %v10974_v28 = vpack.c.bf16 %v7735_v27, %v7732_v25  ;;  %v7855_v62 = vand.u32 4294901760, %v7854_v29 }
 0xb12   : > { %v7198_v61 = vmul.f32 %v8372_v63, %v7191_v5  ;;  %9595 = vmatpush3.bf16.msra.mxu1 %v10974_v28 }
 0xb13   : > { %9596 = vmatprep.subr.bf16.mxu1 %v9888_v34 }
 0xb14   : > { %v7205_v46 = vadd.f32 %v8373_v40, %v7198_v61  ;;  %v9615_v40 = vpack.c.bf16 %v10929_v1, %v10927_v26 }
 0xb16   : > { %v7218_v6 = vsel %vm733_vm0, %v7205_v46, 0  ;;  %9598 = vmatpush3.bf16.msra.mxu1 %v10986_v11  ;;  %v9621_v46 = vpack.c.bf16 %v11006_v19, %v11004_v55 }
 0xb17   : > { %v7289_v17 = vand.u32 4294901760, %v7218_v6  ;;  %9599 = vmatprep.subr.bf16.mxu1 %v9888_v34 }
 0xb19   : > { %v7290_v41 = vsub.f32 %v7218_v6, %v7289_v17 }
 0xb1a   : > { %9601 = vmatpush3.bf16.msra.mxu1 %v10998_v53 }
 0xb1b   : > { %v7291_v20 = vand.u32 4294901760, %v7290_v41  ;;  %9602 = vmatprep.subr.bf16.mxu1 %v9888_v34 }
 0xb1d   : > { %v7292_v21 = vsub.f32 %v7290_v41, %v7291_v20 }
 0xb1f   : > { %v7293_v12 = vand.u32 4294901760, %v7292_v21 }
 0xb21   : > { %9251 = vmatmul.mubr.f32.vlgmr.msra.gmra.mrb[20].mxu0 %v7293_v12  ;;  %v8374_v12 = vld [vmem:[%s11100_s19] ss:$0 sm:$0xff] }
 0xb22   : > { %9562 = vmatpush3.bf16.msra.mxu0 %v9561_v57  ;;  %9261 = vmatprep.mubr.msk.f32.mxu0 %vm9889_vm1, %v9890_v38  ;;  %v9603_v57 = vpack.c.bf16 %v7820_v14, %v7813_v16 }
 0xb23   : > { %9563 = vmatprep.subr.bf16.mxu0 %v9888_v34 }
 0xb26   : > { %9565 = vmatpush3.bf16.msra.mxu0 %v9564_v22  ;;  %v7839_v22 = vand.u32 4294901760, %v11004_v55 }
 0xb27   : > { %9566 = vmatprep.subr.bf16.mxu0 %v9888_v34 }
 0xb29   : > { %9262 = vmatmul.mubr.f32.vlgmr.msra.gmra.mrb[20].mxu0 %v7289_v17 }
 0xb2a   : > { %9568 = vmatpush3.bf16.msra.mxu0 %v9567_v24  ;;  %9272 = vmatprep.mubr.msk.f32.mxu0 %vm9889_vm1, %v9890_v38  ;;  %v7846_v24 = vand.u32 4294901760, %v11006_v19 }
 0xb2b   : > { %9569 = vmatprep.subr.bf16.mxu0 %v9888_v34 }
 0xb2e   : > { %9571 = vmatpush3.bf16.msra.mxu0 %v9570_v43 }
 0xb2f   : > { %9572 = vmatprep.subr.bf16.mxu0 %v9888_v34 }
 0xb31   : > { %9273 = vmatmul.mubr.f32.vlgmr.msra.gmra.mrb[20].mxu0 %v7290_v41 }
 0xb32   : > { %9574 = vmatpush3.bf16.msra.mxu0 %v10911_v30  ;;  %9283 = vmatprep.mubr.msk.f32.mxu0 %vm9889_vm1, %v9890_v38 }
 0xb33   : > { %9575 = vmatprep.subr.bf16.mxu0 %v9888_v34 }
 0xb36   : > { %9577 = vmatpush3.bf16.msra.mxu0 %v10914_v59 }
 0xb37   : > { %9578 = vmatprep.subr.bf16.mxu0 %v9888_v34 }
 0xb39   : > { %9284 = vmatmul.mubr.f32.vlgmr.msra.gmra.mrb[20].mxu0 %v7291_v20  ;;  %v9645_v20 = vpack.c.bf16 %v7846_v24, %v7839_v22 }
 0xb3a   : > { %9580 = vmatpush3.bf16.msra.mxu0 %v9579_v32  ;;  %9294 = vmatprep.mubr.msk.f32.mxu0 %vm9889_vm1, %v9890_v38  ;;  %v7840_v32 = vsub.f32 %v11004_v55, %v7839_v22 }
 0xb3b   : > { %9581 = vmatprep.subr.bf16.mxu0 %v9888_v34 }
 0xb3c   : > { %v7841_v49 = vand.u32 4294901760, %v7840_v32 }
 0xb3e   : > { %9583 = vmatpush3.bf16.msra.mxu0 %v9582_v45  ;;  %v7847_v45 = vsub.f32 %v11006_v19, %v7846_v24 }
 0xb3f   : > { %9584 = vmatprep.subr.bf16.mxu0 %v9888_v34 }
 0xb40   : > { %v7848_v51 = vand.u32 4294901760, %v7847_v45 }
 0xb41   : > { %9295 = vmatmul.mubr.f32.vlgmr.msra.gmra.mrb[20].mxu0 %v7289_v17 }
 0xb42   : > { %9586 = vmatpush3.bf16.msra.mxu0 %v10911_v30  ;;  %9305 = vmatprep.mubr.msk.f32.mxu0 %vm9889_vm1, %v9890_v38  ;;  %v11000_v30 = vsub.f32 %v7708_v3, %v7732_v25  ;;  %v9609_v2 = vpack.c.bf16 %v7848_v51, %v7841_v49 }
 0xb43   : > { %9587 = vmatprep.subr.bf16.mxu0 %v9888_v34 }
 0xb44   : > { %v7825_v36 = vand.u32 4294901760, %v11000_v30  ;;  %v9618_v61 = vpack.c.bf16 %v11002_v54, %v11000_v30 }
 0xb46   : > { %9589 = vmatpush3.bf16.msra.mxu0 %v10914_v59  ;;  %v11011_v59 = vsub.f32 %v7713_v35, %v7747_v33  ;;  %v7826_v47 = vsub.f32 %v11000_v30, %v7825_v36  ;;  %v9642_v41 = vpack.c.bf16 %v7832_v18, %v7825_v36  ;;  %v8375_v35 = vld [vmem:[%s11102_s21] ss:$0 sm:$0xff] }
 0xb47   : > { %9626 = vmatprep.subr.bf16.mxu0 %v9888_v34 }
 0xb48   : > { %v7827_v7 = vand.u32 4294901760, %v7826_v47  ;;  %v7860_v52 = vand.u32 4294901760, %v11011_v59  ;;  %v9624_v6 = vpack.c.bf16 %v11011_v59, %v11009_v58 }
 0xb49   : > { %9306 = vmatmul.mubr.f32.vlgmr.msra.gmra.mrb[20].mxu0 %v7289_v17  ;;  %v9639_v17 = vpack.c.bf16 %v7818_v9, %v7811_v15 }
 0xb4a   : > { %9628 = vmatpush3.bf16.msra.mxu0 %v10925_v0  ;;  %9381 = vmatprep.mubr.msk.f32.mxu0 %vm9889_vm1, %v9890_v38  ;;  %v9606_v43 = vpack.c.bf16 %v7834_v42, %v7827_v7  ;;  %v7861_v31 = vsub.f32 %v11011_v59, %v7860_v52  ;;  %v9648_v21 = vpack.c.bf16 %v7860_v52, %v7853_v44 }
 0xb4b   : > { %9629 = vmatprep.subr.bf16.mxu0 %v9888_v34 }
 0xb4c   : > { %v7862_v63 = vand.u32 4294901760, %v7861_v31 }
 0xb4e   : > { %9631 = vmatpush3.bf16.msra.mxu0 %v10974_v28  ;;  %v9612_v5 = vpack.c.bf16 %v7862_v63, %v7855_v62 }
 0xb4f   : > { %9632 = vmatprep.subr.bf16.mxu0 %v9888_v34 }
 0xb52   : > { %9634 = vmatpush3.bf16.msra.mxu0 %v10986_v11 }
 0xb53   : > { %9635 = vmatprep.subr.bf16.mxu0 %v9888_v34 }
 0xb56   : > { %9637 = vmatpush3.bf16.msra.mxu0 %v10998_v53 }
 0xb57   : > { %9650 = vmatprep.subr.bf16.mxu0 %v9888_v34 }
 0xc1c   : > { %v7701_v3 = vpop.f32.mrb[20].mxu0 }
 0xc1d   : > { %v9673_v50 = vadd.f32 %v8374_v12, %v7701_v3  ;;  %v9307_v26 = vpop.f32.mrb[21].mxu0 }
 0xc1f   : > { %v7705_v1 = vmax.f32 %v9673_v50, 0.0 }
 0xc21   : > { %v7723_v25 = vsel %vm7721_vm12, %v7705_v1, 0 }
 0xc22   : > { %v7798_v27 = vand.u32 4294901760, %v7723_v25 }
 0xc24   : > { %v7799_v37 = vsub.f32 %v7723_v25, %v7798_v27 }
 0xc26   : > { %v7800_v48 = vand.u32 4294901760, %v7799_v37 }
 0xc28   : > { %9382 = vmatmul.mubr.f32.vlgmr.msra.gmra.mrb[22].mxu0 %v7800_v48  ;;  %v7801_v4 = vsub.f32 %v7799_v37, %v7800_v48 }
 0xc29   : > { %9652 = vmatpush3.bf16.msra.mxu0 %v10925_v0  ;;  %9419 = vmatprep.mubr.msk.f32.mxu0 %vm9889_vm1, %v9890_v38 }
 0xc2a   : > { %9653 = vmatprep.subr.bf16.mxu0 %v9888_v34  ;;  %v7802_v39 = vand.u32 4294901760, %v7801_v4 }
 0xc2c   : > { %9325 = vmatmul.mubr.f32.vlgmr.msra.gmra.mrb[22].mxu1 %v7802_v39 }
 0xc2d   : > { %9604 = vmatpush3.bf16.msra.mxu1 %v9603_v57  ;;  %9655 = vmatpush3.bf16.msra.mxu0 %v10974_v28 }
 0xc2e   : > { %9605 = vmatprep.subr.bf16.mxu1 %v9888_v34  ;;  %9656 = vmatprep.subr.bf16.mxu0 %v9888_v34 }
 0xc2f   : > { %9343 = vmatprep.mubr.msk.f32.mxu1 %vm9889_vm1, %v9890_v38 }
 0xc31   : > { %9607 = vmatpush3.bf16.msra.mxu1 %v9606_v43  ;;  %9658 = vmatpush3.bf16.msra.mxu0 %v10986_v11 }
 0xc32   : > { %9608 = vmatprep.subr.bf16.mxu1 %v9888_v34  ;;  %9659 = vmatprep.subr.bf16.mxu0 %v9888_v34 }
 0xc35   : > { %9610 = vmatpush3.bf16.msra.mxu1 %v9609_v2  ;;  %9661 = vmatpush3.bf16.msra.mxu0 %v10998_v53 }
 0xc36   : > { %9611 = vmatprep.subr.bf16.mxu1 %v9888_v34 }
 0xc38   : > { %9420 = vmatmul.mubr.f32.vlgmr.msra.gmra.mrb[24].mxu0 %v7798_v27 }
 0xc39   : > { %9613 = vmatpush3.bf16.msra.mxu1 %v9612_v5 }
 0xc3a   : > { %9614 = vmatprep.subr.bf16.mxu1 %v9888_v34 }
 0xc3c   : > { %9344 = vmatmul.mubr.f32.vlgmr.msra.gmra.mrb[24].mxu1 %v7798_v27 }
 0xc3d   : > { %9616 = vmatpush3.bf16.msra.mxu1 %v9615_v40  ;;  %9362 = vmatprep.mubr.msk.f32.mxu1 %vm9889_vm1, %v9890_v38 }
 0xc3e   : > { %9617 = vmatprep.subr.bf16.mxu1 %v9888_v34 }
 0xc41   : > { %9619 = vmatpush3.bf16.msra.mxu1 %v9618_v61 }
 0xc42   : > { %9620 = vmatprep.subr.bf16.mxu1 %v9888_v34 }
 0xc45   : > { %9622 = vmatpush3.bf16.msra.mxu1 %v9621_v46 }
 0xc46   : > { %9623 = vmatprep.subr.bf16.mxu1 %v9888_v34 }
 0xc49   : > { %9625 = vmatpush3.bf16.msra.mxu1 %v9624_v6 }
 0xc4a   : > { %9638 = vmatprep.subr.bf16.mxu1 %v9888_v34 }
 0xc4c   : > { %9363 = vmatmul.mubr.f32.vlgmr.msra.gmra.mrb[26].mxu1 %v7799_v37 }
 0xc4d   : > { %9640 = vmatpush3.bf16.msra.mxu1 %v9639_v17  ;;  %9400 = vmatprep.mubr.msk.f32.mxu1 %vm9889_vm1, %v9890_v38 }
 0xc4e   : > { %9641 = vmatprep.subr.bf16.mxu1 %v9888_v34 }
 0xc51   : > { %9643 = vmatpush3.bf16.msra.mxu1 %v9642_v41 }
 0xc52   : > { %9644 = vmatprep.subr.bf16.mxu1 %v9888_v34 }
 0xc55   : > { %9646 = vmatpush3.bf16.msra.mxu1 %v9645_v20 }
 0xc56   : > { %9647 = vmatprep.subr.bf16.mxu1 %v9888_v34 }
 0xc59   : > { %9649 = vmatpush3.bf16.msra.mxu1 %v9648_v21 }
 0xc5c   : > { %9401 = vmatmul.mubr.f32.vlgmr.msra.gmra.mrb[28].mxu1 %v7798_v27 }
 0xcfb   : > { %v8084_v0 = vpop.f32.mrb[22].mxu0 }
 0xcfc   : > { %v9383_v28 = vpop.f32.mrb[23].mxu0 }
 0xcff   : > { %v7804_v11 = vpop.f32.mrb[22].mxu1 }
 0xd00   : > { %v9326_v56 = vpop.f32.mrb[23].mxu1  ;;  %v7805_v33 = vadd.f32 %v8375_v35, %v7804_v11 }
 0xd0b   : > { %v8258_v38 = vpop.f32.mrb[24].mxu0 }
 0xd0c   : > { %v9421_v8 = vpop.f32.mrb[25].mxu0 }
 0xd0f   : > { %v7915_v53 = vpop.f32.mrb[24].mxu1 }
 0xd10   : > { %v7916_v30 = vadd.f32 %v7915_v53, %v7805_v33  ;;  %v9345_v54 = vpop.f32.mrb[25].mxu1 }
 0xd1f   : > { %v8003_v55 = vpop.f32.mrb[26].mxu1 }
 0xd20   : > { %v8004_v19 = vadd.f32 %v8003_v55, %v7916_v30  ;;  %v9364_v34 = vpop.f32.mrb[27].mxu1 }
 0xd22   : > { %v8085_v58 = vadd.f32 %v8084_v0, %v8004_v19 }
 0xd2f   : > { %v8179_v59 = vpop.f32.mrb[28].mxu1 }
 0xd30   : > { %v8180_v15 = vadd.f32 %v8179_v59, %v8085_v58  ;;  %v9402_v9 = vpop.f32.mrb[29].mxu1 }
 0xd32   : > { %v8259_v10 = vadd.f32 %v8258_v38, %v8180_v15 }
 0xd34   : > { %v8262_v23 = vadd.f32 %v8259_v10, %v10893_v13 }
 0xd36   : > { %8263 = vst.msk [vmem:[%s729_s24] sm:$0xff] %vm733_vm0, %v8262_v23 }
 0xd37 PF: > { %s32_s3 = sadd.s32 1, %s9884_s3  }
 0xd38   : > { %p29_p4 = scmp.ge.s32.totalorder %s32_s3, 4  }
 0xd3a   :  { %31 = sbr.rel (!%p29_p4) target bundleno = 8 (0x8), region = 147 }

</bundles_post_ra>
